<compile_context>
chip_gen: v6e
topology: v6e:2x2x1
jax: 0.10.0
libtpu: 0.0.40
codegen_flags: <defaults>
</compile_context>

<pallas_src>
import functools
import math

import jax
import jax.numpy as jnp
from jax.experimental import pallas as pl
from jax.experimental.pallas import tpu as pltpu


def _layernorm_bf16(x_f32, eps):
    mean = jnp.mean(x_f32, axis=-1, keepdims=True)
    var = jnp.mean(jnp.square(x_f32 - mean), axis=-1, keepdims=True)
    return ((x_f32 - mean) * jax.lax.rsqrt(var + eps)).astype(jnp.bfloat16)


def _attn_kernel(x_ref, wqkv_ref, bqkv_ref, wo_ref, bo_ref, o_ref, *scratch,
                 eps: float, heads_per_block: int, batch_block: int,
                 seq_len: int, head_dim: int, num_groups: int):
    hb, Bt, N, Dh = heads_per_block, batch_block, seq_len, head_dim
    HD = hb * Dh
    E = x_ref.shape[-1]
    rows = Bt * N
    multi_group = num_groups > 1

    # --- LayerNorm statistics (affine + softmax scale already folded into wqkv/bqkv) ---
    if multi_group:
        acc_ref, xn_ref = scratch
        g = pl.program_id(1)

        @pl.when(g == 0)
        def _init():
            acc_ref[...] = jnp.zeros_like(acc_ref)
            xn_ref[...] = _layernorm_bf16(
                x_ref[...].reshape(rows, E).astype(jnp.float32), eps)

        xn = xn_ref[...]                                              # (rows, E) bf16 (cached)
    else:
        xn = _layernorm_bf16(x_ref[...].reshape(rows, E).astype(jnp.float32), eps)

    # --- fused QKV projection for the whole head group (bf16 MXU, f32 accumulation) ---
    qkv = jnp.dot(xn, wqkv_ref[0], preferred_element_type=jnp.float32) + bqkv_ref[0]
    q_blk = qkv[:, :HD]                                               # (rows, hb*Dh) f32
    k_blk = qkv[:, HD:2 * HD].astype(jnp.bfloat16)
    v_blk = qkv[:, 2 * HD:].astype(jnp.bfloat16)

    # --- per-(batch-row, head) scaled dot-product attention (unrolled at trace time) ---
    per_batch = []
    for bi in range(Bt):
        r = slice(bi * N, (bi + 1) * N)
        head_outs = []
        for h in range(hb):
            c = slice(h * Dh, (h + 1) * Dh)
            q = q_blk[r, c].astype(jnp.bfloat16)                      # (N, Dh)
            k = k_blk[r, c]
            v = v_blk[r, c]
            dots = jax.lax.dot_general(                               # scale folded into W_q
                q, k, dimension_numbers=(((1,), (1,)), ((), ())),
                preferred_element_type=jnp.float32)                   # (N, N)
            m = jnp.max(dots, axis=-1, keepdims=True)
            p = jnp.exp(dots - m)
            l = jnp.sum(p, axis=-1, keepdims=True)
            pv = jnp.dot(p.astype(jnp.bfloat16), v,
                         preferred_element_type=jnp.float32)          # (N, Dh)
            # deferred softmax normalization (dropout p=0 -> identity)
            head_outs.append(pv * pl.reciprocal(l, approx=True))
        per_batch.append(jnp.concatenate(head_outs, axis=-1))         # (N, hb*Dh)
    out_grp = jnp.concatenate(per_batch, axis=0).astype(jnp.bfloat16)  # (rows, hb*Dh)

    # --- fused output projection for this head group (contraction depth hb*Dh) ---
    proj = jnp.dot(out_grp, wo_ref[0], preferred_element_type=jnp.float32)   # (rows, E)

    if multi_group:
        acc_ref[...] += proj

        @pl.when(g == pl.num_programs(1) - 1)
        def _finalize():
            o_ref[...] = (acc_ref[...] + bo_ref[...]).reshape(o_ref.shape).astype(o_ref.dtype)
    else:
        o_ref[...] = (proj + bo_ref[...]).reshape(o_ref.shape).astype(o_ref.dtype)


def attention_pallas(x, gamma, beta, w_qkv, w_out, b_out, *, heads, head_dim,
                     eps=1e-5, heads_per_block=None, batch_block=None):
    """x: (B, N, E).  w_qkv: (E, 3*heads*head_dim).  w_out: (heads*head_dim, E)."""
    B, N, E = x.shape
    H, Dh = heads, head_dim
    inner = H * Dh
    assert w_qkv.shape == (E, 3 * inner)
    assert w_out.shape == (inner, E)

    # -- batch-row packing: make the row-parallel matmuls see >= 128 rows when N is small --
    if batch_block is None:
        batch_block = 1
        for d in range(1, B + 1):
            if B % d == 0 and d * N <= max(256, N):
                batch_block = d
    Bt = batch_block
    assert B % Bt == 0
    rows = Bt * N

    # -- head-group size under a VMEM budget (default: all heads at once if they fit) --
    if heads_per_block is None:
        try:
            vmem_bytes = int(pltpu.get_tpu_info().vmem_capacity_bytes)
        except Exception:  # conservative fallback (v7x has 64 MiB per TensorCore)
            vmem_bytes = 64 << 20
        budget = vmem_bytes // 2
        fixed = 4 * rows * E * 4 + 2 * rows * E * 6 + 3 * N * N * 4   # x/out blocks, scratch, live scores
        heads_per_block = 1
        for d in range(1, H + 1):
            if H % d:
                continue
            wbytes = 2 * 2 * (E * 3 * d * Dh + d * Dh * E)            # bf16 weights, double-buffered
            qkvbytes = rows * 3 * d * Dh * 4 + rows * d * Dh * 4      # qkv + concat PV intermediates
            if fixed + wbytes + qkvbytes <= budget:
                heads_per_block = d
    hb = heads_per_block
    assert H % hb == 0
    G = H // hb

    # -- fold LayerNorm affine and the softmax scale into the QKV projection --
    #    (LN(x)*gamma + beta) @ W  ==  LN(x) @ (gamma[:,None]*W) + beta @ W
    scale = float(Dh) ** -0.5
    w_qkv_f = gamma[:, None] * w_qkv                                  # (E, 3*inner)
    b_qkv_f = beta @ w_qkv                                            # (3*inner,)
    wq, wk, wv = jnp.split(w_qkv_f, 3, axis=-1)                       # each (E, inner)
    bq, bk, bv = jnp.split(b_qkv_f, 3)
    wq = wq * scale                                                   # fold softmax scale into Q
    bq = bq * scale

    # -- lane-dense per-group layouts: [Q heads | K heads | V heads] within each group --
    w_qkv_g = jnp.concatenate(
        [w.reshape(E, G, hb * Dh) for w in (wq, wk, wv)], axis=-1)    # (E, G, 3*hb*Dh)
    w_qkv_g = jnp.transpose(w_qkv_g, (1, 0, 2)).astype(jnp.bfloat16)  # (G, E, 3*hb*Dh)
    b_qkv_g = jnp.concatenate(
        [b.reshape(G, hb * Dh) for b in (bq, bk, bv)], axis=-1)       # (G, 3*hb*Dh)
    b_qkv_g = b_qkv_g.reshape(G, 1, 3 * hb * Dh).astype(jnp.float32)
    w_out_g = w_out.reshape(G, hb * Dh, E).astype(jnp.bfloat16)       # (G, hb*Dh, E)
    b_out2 = b_out.reshape(1, E).astype(jnp.float32)

    kernel = functools.partial(
        _attn_kernel, eps=eps, heads_per_block=hb, batch_block=Bt,
        seq_len=N, head_dim=Dh, num_groups=G)

    flops = 2 * B * N * (E * 3 * inner + 2 * N * inner + inner * E)
    cost = pl.CostEstimate(
        flops=int(flops),
        transcendentals=int(B * H * N * N),
        bytes_accessed=int(2 * x.size * x.dtype.itemsize
                           + 2 * (w_qkv_g.size + w_out_g.size)
                           + 4 * (b_qkv_g.size + b_out2.size)),
    )

    scratch_shapes = []
    if G > 1:
        scratch_shapes = [pltpu.VMEM((rows, E), jnp.float32),          # out-proj accumulator
                          pltpu.VMEM((rows, E), jnp.bfloat16)]         # cached LayerNorm output

    out = pl.pallas_call(
        kernel,
        out_shape=jax.ShapeDtypeStruct((B, N, E), x.dtype),
        grid_spec=pltpu.PrefetchScalarGridSpec(
            num_scalar_prefetch=0,
            grid=(B // Bt, G),
            in_specs=[
                pl.BlockSpec((Bt, N, E), lambda b, g: (b, 0, 0)),              # x (batch block)
                pl.BlockSpec((1, E, 3 * hb * Dh), lambda b, g: (g, 0, 0)),     # fused QKV weights
                pl.BlockSpec((1, 1, 3 * hb * Dh), lambda b, g: (g, 0, 0)),     # folded LN/scale bias
                pl.BlockSpec((1, hb * Dh, E), lambda b, g: (g, 0, 0)),         # out-proj weights
                pl.BlockSpec((1, E), lambda b, g: (0, 0)),                     # out-proj bias
            ],
            out_specs=pl.BlockSpec((Bt, N, E), lambda b, g: (b, 0, 0)),
            scratch_shapes=scratch_shapes,
        ),
        compiler_params=pltpu.CompilerParams(
            dimension_semantics=("parallel", "arbitrary"),
        ),
        cost_estimate=cost,
    )(x, w_qkv_g, b_qkv_g, w_out_g, b_out2)
    return out


def init_params(key, embed_dim, heads, head_dim):
    """Synthetic params matching the PyTorch module's shapes (project_out=True path)."""
    inner = heads * head_dim
    k1, k2, k3, k4, k5 = jax.random.split(key, 5)
    gamma = 1.0 + 0.1 * jax.random.normal(k1, (embed_dim,), jnp.float32)
    beta = 0.1 * jax.random.normal(k2, (embed_dim,), jnp.float32)
    lim_qkv = 1.0 / math.sqrt(embed_dim)
    w_qkv = jax.random.uniform(k3, (embed_dim, 3 * inner), jnp.float32, -lim_qkv, lim_qkv)
    lim_o = 1.0 / math.sqrt(inner)
    w_out = jax.random.uniform(k4, (inner, embed_dim), jnp.float32, -lim_o, lim_o)
    b_out = jax.random.uniform(k5, (embed_dim,), jnp.float32, -lim_o, lim_o)
    return gamma, beta, w_qkv, w_out, b_out


def attention_ref(x, gamma, beta, w_qkv, w_out, b_out, *, heads, head_dim, eps=1e-5):
    """Pure-JAX f32 reference matching the PyTorch forward."""
    B, N, E = x.shape
    inner = heads * head_dim
    mean = jnp.mean(x, axis=-1, keepdims=True)
    var = jnp.mean((x - mean) ** 2, axis=-1, keepdims=True)
    xn = (x - mean) / jnp.sqrt(var + eps) * gamma + beta
    qkv = xn @ w_qkv
    q, k, v = jnp.split(qkv, 3, axis=-1)
    to_heads = lambda t: t.reshape(B, N, heads, head_dim).transpose(0, 2, 1, 3)
    q, k, v = map(to_heads, (q, k, v))
    dots = jnp.einsum('bhnd,bhmd->bhnm', q, k) * (head_dim ** -0.5)
    attn = jax.nn.softmax(dots, axis=-1)
    out = jnp.einsum('bhnm,bhmd->bhnd', attn, v)
    out = out.transpose(0, 2, 1, 3).reshape(B, N, inner)
    return out @ w_out + b_out


if __name__ == "__main__":
    B, N, E = 2, 64, 128            # batch, seq, embed_dim
    H, Dh = 8, 64                   # module defaults: heads=8, head_dim=64

    key = jax.random.PRNGKey(0)
    kx, kp = jax.random.split(key)
    x = jax.random.normal(kx, (B, N, E), jnp.float32)
    gamma, beta, w_qkv, w_out, b_out = init_params(kp, E, H, Dh)

    ref = attention_ref(x, gamma, beta, w_qkv, w_out, b_out, heads=H, head_dim=Dh)

    # Default path: all heads in one group (G=1), two batch rows packed per block.
    out = attention_pallas(x, gamma, beta, w_qkv, w_out, b_out, heads=H, head_dim=Dh)
    out = jax.block_until_ready(out)
    assert out.shape == (B, N, E)
    # bf16 MXU operands + approx reciprocal -> loosened tolerance vs the exact f32 reference.
    assert jnp.allclose(out, ref, atol=2e-2, rtol=2e-2), (
        f"mismatch vs reference (G=1): max abs err {jnp.max(jnp.abs(out - ref))}")

    # Multi-group path: exercises the accumulator init/finalize + cached-LayerNorm scratch.
    out2 = attention_pallas(x, gamma, beta, w_qkv, w_out, b_out, heads=H, head_dim=Dh,
                            heads_per_block=2, batch_block=1)
    out2 = jax.block_until_ready(out2)
    assert jnp.allclose(out2, ref, atol=2e-2, rtol=2e-2), (
        f"mismatch vs reference (G=4): max abs err {jnp.max(jnp.abs(out2 - ref))}")

    print("KERNEL_OK")
</pallas_src>

<mosaic_0001>
module attributes {stable_mosaic.version = 11 : i64} {
  func.func @_attn_kernel(%arg0: i32, %arg1: i32, %arg2: memref<2x64x128xf32, #tpu.memory_space<vmem>>, %arg3: memref<1x128x1536xbf16, #tpu.memory_space<vmem>>, %arg4: memref<1x1x1536xf32, #tpu.memory_space<vmem>>, %arg5: memref<1x512x128xbf16, #tpu.memory_space<vmem>>, %arg6: memref<1x128xf32, #tpu.memory_space<vmem>>, %arg7: memref<2x64x128xf32, #tpu.memory_space<vmem>>) attributes {dimension_semantics = [#tpu.dimension_semantics<parallel>, #tpu.dimension_semantics<arbitrary>], iteration_bounds = array<i64: 1, 1>, scalar_prefetch = 0 : i64, scratch_operands = 0 : i64, tpu.core_type = #tpu.core_type<tc>, window_params = [{transform_indices = @transform_0, window_bounds = array<i64: 2, 64, 128>}, {transform_indices = @transform_1, window_bounds = array<i64: 1, 128, 1536>}, {transform_indices = @transform_2, window_bounds = array<i64: 1, 1, 1536>}, {transform_indices = @transform_3, window_bounds = array<i64: 1, 512, 128>}, {pipeline_mode = #tpu.pipeline_mode<synchronous>, transform_indices = @transform_4, window_bounds = array<i64: 1, 128>}, {transform_indices = @transform_5, window_bounds = array<i64: 2, 64, 128>}]} {
    %c0 = arith.constant 0 : index
    %c0_0 = arith.constant 0 : index
    %c0_1 = arith.constant 0 : index
    %0 = vector.load %arg2[%c0, %c0_0, %c0_1] : memref<2x64x128xf32, #tpu.memory_space<vmem>>, vector<2x64x128xf32>
    %1 = vector.shape_cast %0 : vector<2x64x128xf32> to vector<128x128xf32>
    %cst = arith.constant dense<0.000000e+00> : vector<128xf32>
    %2 = vector.multi_reduction <add>, %1, %cst [1] : vector<128x128xf32> to vector<128xf32>
    %3 = vector.shape_cast %2 : vector<128xf32> to vector<128x1xf32>
    %cst_2 = arith.constant 1.280000e+02 : f32
    %4 = vector.broadcast %cst_2 : f32 to vector<128x1xf32>
    %5 = arith.divf %3, %4 : vector<128x1xf32>
    %6 = vector.broadcast %5 : vector<128x1xf32> to vector<128x128xf32>
    %7 = arith.subf %1, %6 : vector<128x128xf32>
    %8 = arith.mulf %7, %7 : vector<128x128xf32>
    %cst_3 = arith.constant dense<0.000000e+00> : vector<128xf32>
    %9 = vector.multi_reduction <add>, %8, %cst_3 [1] : vector<128x128xf32> to vector<128xf32>
    %10 = vector.shape_cast %9 : vector<128xf32> to vector<128x1xf32>
    %cst_4 = arith.constant 1.280000e+02 : f32
    %11 = vector.broadcast %cst_4 : f32 to vector<128x1xf32>
    %12 = arith.divf %10, %11 : vector<128x1xf32>
    %13 = vector.broadcast %5 : vector<128x1xf32> to vector<128x128xf32>
    %14 = arith.subf %1, %13 : vector<128x128xf32>
    %cst_5 = arith.constant 9.99999974E-6 : f32
    %15 = vector.broadcast %cst_5 : f32 to vector<128x1xf32>
    %16 = arith.addf %12, %15 : vector<128x1xf32>
    %17 = math.rsqrt %16 : vector<128x1xf32>
    %18 = vector.broadcast %17 : vector<128x1xf32> to vector<128x128xf32>
    %19 = arith.mulf %14, %18 : vector<128x128xf32>
    %20 = arith.truncf %19 : vector<128x128xf32> to vector<128x128xbf16>
    %c0_6 = arith.constant 0 : index
    %c0_7 = arith.constant 0 : index
    %c0_8 = arith.constant 0 : index
    %21 = vector.load %arg3[%c0_6, %c0_7, %c0_8] : memref<1x128x1536xbf16, #tpu.memory_space<vmem>>, vector<1x128x1536xbf16>
    %22 = vector.shape_cast %21 : vector<1x128x1536xbf16> to vector<128x1536xbf16>
    %cst_9 = arith.constant dense<0.000000e+00> : vector<128x1536xf32>
    %23 = tpu.matmul %20, %22, %cst_9 {dimension_numbers = #tpu.dot_dimension_numbers<[1], [0], [0], [1], [0, 0, 1, 1], [], []>} : vector<128x128xbf16>, vector<128x1536xbf16>, vector<128x1536xf32> -> vector<128x1536xf32>
    %c0_10 = arith.constant 0 : index
    %c0_11 = arith.constant 0 : index
    %c0_12 = arith.constant 0 : index
    %24 = vector.load %arg4[%c0_10, %c0_11, %c0_12] : memref<1x1x1536xf32, #tpu.memory_space<vmem>>, vector<1x1x1536xf32>
    %25 = vector.shape_cast %24 : vector<1x1x1536xf32> to vector<1x1536xf32>
    %26 = vector.broadcast %25 : vector<1x1536xf32> to vector<128x1536xf32>
    %27 = arith.addf %23, %26 : vector<128x1536xf32>
    %28 = vector.extract_strided_slice %27 {offsets = [0, 0], sizes = [128, 512], strides = [1, 1]} : vector<128x1536xf32> to vector<128x512xf32>
    %29 = vector.extract_strided_slice %27 {offsets = [0, 512], sizes = [128, 512], strides = [1, 1]} : vector<128x1536xf32> to vector<128x512xf32>
    %30 = arith.truncf %29 : vector<128x512xf32> to vector<128x512xbf16>
    %31 = vector.extract_strided_slice %27 {offsets = [0, 1024], sizes = [128, 512], strides = [1, 1]} : vector<128x1536xf32> to vector<128x512xf32>
    %32 = arith.truncf %31 : vector<128x512xf32> to vector<128x512xbf16>
    %33 = vector.extract_strided_slice %28 {offsets = [0, 0], sizes = [64, 64], strides = [1, 1]} : vector<128x512xf32> to vector<64x64xf32>
    %34 = arith.truncf %33 : vector<64x64xf32> to vector<64x64xbf16>
    %35 = vector.extract_strided_slice %30 {offsets = [0, 0], sizes = [64, 64], strides = [1, 1]} : vector<128x512xbf16> to vector<64x64xbf16>
    %36 = vector.extract_strided_slice %32 {offsets = [0, 0], sizes = [64, 64], strides = [1, 1]} : vector<128x512xbf16> to vector<64x64xbf16>
    %cst_13 = arith.constant dense<0.000000e+00> : vector<64x64xf32>
    %37 = tpu.matmul %34, %35, %cst_13 {dimension_numbers = #tpu.dot_dimension_numbers<[1], [1], [0], [0], [0, 0, 1, 0], [], []>} : vector<64x64xbf16>, vector<64x64xbf16>, vector<64x64xf32> -> vector<64x64xf32>
    %cst_14 = arith.constant dense<0xFF800000> : vector<64xf32>
    %38 = vector.multi_reduction <maximumf>, %37, %cst_14 [1] : vector<64x64xf32> to vector<64xf32>
    %39 = vector.shape_cast %38 : vector<64xf32> to vector<64x1xf32>
    %40 = vector.broadcast %39 : vector<64x1xf32> to vector<64x64xf32>
    %41 = arith.subf %37, %40 : vector<64x64xf32>
    %42 = math.exp %41 : vector<64x64xf32>
    %cst_15 = arith.constant dense<0.000000e+00> : vector<64xf32>
    %43 = vector.multi_reduction <add>, %42, %cst_15 [1] : vector<64x64xf32> to vector<64xf32>
    %44 = vector.shape_cast %43 : vector<64xf32> to vector<64x1xf32>
    %45 = arith.truncf %42 : vector<64x64xf32> to vector<64x64xbf16>
    %cst_16 = arith.constant dense<0.000000e+00> : vector<64x64xf32>
    %46 = tpu.matmul %45, %36, %cst_16 {dimension_numbers = #tpu.dot_dimension_numbers<[1], [0], [0], [1], [0, 0, 1, 1], [], []>} : vector<64x64xbf16>, vector<64x64xbf16>, vector<64x64xf32> -> vector<64x64xf32>
    %47 = tpu.reciprocal %44 {approx = true} : vector<64x1xf32> -> vector<64x1xf32>
    %48 = vector.broadcast %47 : vector<64x1xf32> to vector<64x64xf32>
    %49 = arith.mulf %46, %48 : vector<64x64xf32>
    %50 = vector.extract_strided_slice %28 {offsets = [0, 64], sizes = [64, 64], strides = [1, 1]} : vector<128x512xf32> to vector<64x64xf32>
    %51 = arith.truncf %50 : vector<64x64xf32> to vector<64x64xbf16>
    %52 = vector.extract_strided_slice %30 {offsets = [0, 64], sizes = [64, 64], strides = [1, 1]} : vector<128x512xbf16> to vector<64x64xbf16>
    %53 = vector.extract_strided_slice %32 {offsets = [0, 64], sizes = [64, 64], strides = [1, 1]} : vector<128x512xbf16> to vector<64x64xbf16>
    %cst_17 = arith.constant dense<0.000000e+00> : vector<64x64xf32>
    %54 = tpu.matmul %51, %52, %cst_17 {dimension_numbers = #tpu.dot_dimension_numbers<[1], [1], [0], [0], [0, 0, 1, 0], [], []>} : vector<64x64xbf16>, vector<64x64xbf16>, vector<64x64xf32> -> vector<64x64xf32>
    %cst_18 = arith.constant dense<0xFF800000> : vector<64xf32>
    %55 = vector.multi_reduction <maximumf>, %54, %cst_18 [1] : vector<64x64xf32> to vector<64xf32>
    %56 = vector.shape_cast %55 : vector<64xf32> to vector<64x1xf32>
    %57 = vector.broadcast %56 : vector<64x1xf32> to vector<64x64xf32>
    %58 = arith.subf %54, %57 : vector<64x64xf32>
    %59 = math.exp %58 : vector<64x64xf32>
    %cst_19 = arith.constant dense<0.000000e+00> : vector<64xf32>
    %60 = vector.multi_reduction <add>, %59, %cst_19 [1] : vector<64x64xf32> to vector<64xf32>
    %61 = vector.shape_cast %60 : vector<64xf32> to vector<64x1xf32>
    %62 = arith.truncf %59 : vector<64x64xf32> to vector<64x64xbf16>
    %cst_20 = arith.constant dense<0.000000e+00> : vector<64x64xf32>
    %63 = tpu.matmul %62, %53, %cst_20 {dimension_numbers = #tpu.dot_dimension_numbers<[1], [0], [0], [1], [0, 0, 1, 1], [], []>} : vector<64x64xbf16>, vector<64x64xbf16>, vector<64x64xf32> -> vector<64x64xf32>
    %64 = tpu.reciprocal %61 {approx = true} : vector<64x1xf32> -> vector<64x1xf32>
    %65 = vector.broadcast %64 : vector<64x1xf32> to vector<64x64xf32>
    %66 = arith.mulf %63, %65 : vector<64x64xf32>
    %67 = vector.extract_strided_slice %28 {offsets = [0, 128], sizes = [64, 64], strides = [1, 1]} : vector<128x512xf32> to vector<64x64xf32>
    %68 = arith.truncf %67 : vector<64x64xf32> to vector<64x64xbf16>
    %69 = vector.extract_strided_slice %30 {offsets = [0, 128], sizes = [64, 64], strides = [1, 1]} : vector<128x512xbf16> to vector<64x64xbf16>
    %70 = vector.extract_strided_slice %32 {offsets = [0, 128], sizes = [64, 64], strides = [1, 1]} : vector<128x512xbf16> to vector<64x64xbf16>
    %cst_21 = arith.constant dense<0.000000e+00> : vector<64x64xf32>
    %71 = tpu.matmul %68, %69, %cst_21 {dimension_numbers = #tpu.dot_dimension_numbers<[1], [1], [0], [0], [0, 0, 1, 0], [], []>} : vector<64x64xbf16>, vector<64x64xbf16>, vector<64x64xf32> -> vector<64x64xf32>
    %cst_22 = arith.constant dense<0xFF800000> : vector<64xf32>
    %72 = vector.multi_reduction <maximumf>, %71, %cst_22 [1] : vector<64x64xf32> to vector<64xf32>
    %73 = vector.shape_cast %72 : vector<64xf32> to vector<64x1xf32>
    %74 = vector.broadcast %73 : vector<64x1xf32> to vector<64x64xf32>
    %75 = arith.subf %71, %74 : vector<64x64xf32>
    %76 = math.exp %75 : vector<64x64xf32>
    %cst_23 = arith.constant dense<0.000000e+00> : vector<64xf32>
    %77 = vector.multi_reduction <add>, %76, %cst_23 [1] : vector<64x64xf32> to vector<64xf32>
    %78 = vector.shape_cast %77 : vector<64xf32> to vector<64x1xf32>
    %79 = arith.truncf %76 : vector<64x64xf32> to vector<64x64xbf16>
    %cst_24 = arith.constant dense<0.000000e+00> : vector<64x64xf32>
    %80 = tpu.matmul %79, %70, %cst_24 {dimension_numbers = #tpu.dot_dimension_numbers<[1], [0], [0], [1], [0, 0, 1, 1], [], []>} : vector<64x64xbf16>, vector<64x64xbf16>, vector<64x64xf32> -> vector<64x64xf32>
    %81 = tpu.reciprocal %78 {approx = true} : vector<64x1xf32> -> vector<64x1xf32>
    %82 = vector.broadcast %81 : vector<64x1xf32> to vector<64x64xf32>
    %83 = arith.mulf %80, %82 : vector<64x64xf32>
    %84 = vector.extract_strided_slice %28 {offsets = [0, 192], sizes = [64, 64], strides = [1, 1]} : vector<128x512xf32> to vector<64x64xf32>
    %85 = arith.truncf %84 : vector<64x64xf32> to vector<64x64xbf16>
    %86 = vector.extract_strided_slice %30 {offsets = [0, 192], sizes = [64, 64], strides = [1, 1]} : vector<128x512xbf16> to vector<64x64xbf16>
    %87 = vector.extract_strided_slice %32 {offsets = [0, 192], sizes = [64, 64], strides = [1, 1]} : vector<128x512xbf16> to vector<64x64xbf16>
    %cst_25 = arith.constant dense<0.000000e+00> : vector<64x64xf32>
    %88 = tpu.matmul %85, %86, %cst_25 {dimension_numbers = #tpu.dot_dimension_numbers<[1], [1], [0], [0], [0, 0, 1, 0], [], []>} : vector<64x64xbf16>, vector<64x64xbf16>, vector<64x64xf32> -> vector<64x64xf32>
    %cst_26 = arith.constant dense<0xFF800000> : vector<64xf32>
    %89 = vector.multi_reduction <maximumf>, %88, %cst_26 [1] : vector<64x64xf32> to vector<64xf32>
    %90 = vector.shape_cast %89 : vector<64xf32> to vector<64x1xf32>
    %91 = vector.broadcast %90 : vector<64x1xf32> to vector<64x64xf32>
    %92 = arith.subf %88, %91 : vector<64x64xf32>
    %93 = math.exp %92 : vector<64x64xf32>
    %cst_27 = arith.constant dense<0.000000e+00> : vector<64xf32>
    %94 = vector.multi_reduction <add>, %93, %cst_27 [1] : vector<64x64xf32> to vector<64xf32>
    %95 = vector.shape_cast %94 : vector<64xf32> to vector<64x1xf32>
    %96 = arith.truncf %93 : vector<64x64xf32> to vector<64x64xbf16>
    %cst_28 = arith.constant dense<0.000000e+00> : vector<64x64xf32>
    %97 = tpu.matmul %96, %87, %cst_28 {dimension_numbers = #tpu.dot_dimension_numbers<[1], [0], [0], [1], [0, 0, 1, 1], [], []>} : vector<64x64xbf16>, vector<64x64xbf16>, vector<64x64xf32> -> vector<64x64xf32>
    %98 = tpu.reciprocal %95 {approx = true} : vector<64x1xf32> -> vector<64x1xf32>
    %99 = vector.broadcast %98 : vector<64x1xf32> to vector<64x64xf32>
    %100 = arith.mulf %97, %99 : vector<64x64xf32>
    %101 = vector.extract_strided_slice %28 {offsets = [0, 256], sizes = [64, 64], strides = [1, 1]} : vector<128x512xf32> to vector<64x64xf32>
    %102 = arith.truncf %101 : vector<64x64xf32> to vector<64x64xbf16>
    %103 = vector.extract_strided_slice %30 {offsets = [0, 256], sizes = [64, 64], strides = [1, 1]} : vector<128x512xbf16> to vector<64x64xbf16>
    %104 = vector.extract_strided_slice %32 {offsets = [0, 256], sizes = [64, 64], strides = [1, 1]} : vector<128x512xbf16> to vector<64x64xbf16>
    %cst_29 = arith.constant dense<0.000000e+00> : vector<64x64xf32>
    %105 = tpu.matmul %102, %103, %cst_29 {dimension_numbers = #tpu.dot_dimension_numbers<[1], [1], [0], [0], [0, 0, 1, 0], [], []>} : vector<64x64xbf16>, vector<64x64xbf16>, vector<64x64xf32> -> vector<64x64xf32>
    %cst_30 = arith.constant dense<0xFF800000> : vector<64xf32>
    %106 = vector.multi_reduction <maximumf>, %105, %cst_30 [1] : vector<64x64xf32> to vector<64xf32>
    %107 = vector.shape_cast %106 : vector<64xf32> to vector<64x1xf32>
    %108 = vector.broadcast %107 : vector<64x1xf32> to vector<64x64xf32>
    %109 = arith.subf %105, %108 : vector<64x64xf32>
    %110 = math.exp %109 : vector<64x64xf32>
    %cst_31 = arith.constant dense<0.000000e+00> : vector<64xf32>
    %111 = vector.multi_reduction <add>, %110, %cst_31 [1] : vector<64x64xf32> to vector<64xf32>
    %112 = vector.shape_cast %111 : vector<64xf32> to vector<64x1xf32>
    %113 = arith.truncf %110 : vector<64x64xf32> to vector<64x64xbf16>
    %cst_32 = arith.constant dense<0.000000e+00> : vector<64x64xf32>
    %114 = tpu.matmul %113, %104, %cst_32 {dimension_numbers = #tpu.dot_dimension_numbers<[1], [0], [0], [1], [0, 0, 1, 1], [], []>} : vector<64x64xbf16>, vector<64x64xbf16>, vector<64x64xf32> -> vector<64x64xf32>
    %115 = tpu.reciprocal %112 {approx = true} : vector<64x1xf32> -> vector<64x1xf32>
    %116 = vector.broadcast %115 : vector<64x1xf32> to vector<64x64xf32>
    %117 = arith.mulf %114, %116 : vector<64x64xf32>
    %118 = vector.extract_strided_slice %28 {offsets = [0, 320], sizes = [64, 64], strides = [1, 1]} : vector<128x512xf32> to vector<64x64xf32>
    %119 = arith.truncf %118 : vector<64x64xf32> to vector<64x64xbf16>
    %120 = vector.extract_strided_slice %30 {offsets = [0, 320], sizes = [64, 64], strides = [1, 1]} : vector<128x512xbf16> to vector<64x64xbf16>
    %121 = vector.extract_strided_slice %32 {offsets = [0, 320], sizes = [64, 64], strides = [1, 1]} : vector<128x512xbf16> to vector<64x64xbf16>
    %cst_33 = arith.constant dense<0.000000e+00> : vector<64x64xf32>
    %122 = tpu.matmul %119, %120, %cst_33 {dimension_numbers = #tpu.dot_dimension_numbers<[1], [1], [0], [0], [0, 0, 1, 0], [], []>} : vector<64x64xbf16>, vector<64x64xbf16>, vector<64x64xf32> -> vector<64x64xf32>
    %cst_34 = arith.constant dense<0xFF800000> : vector<64xf32>
    %123 = vector.multi_reduction <maximumf>, %122, %cst_34 [1] : vector<64x64xf32> to vector<64xf32>
    %124 = vector.shape_cast %123 : vector<64xf32> to vector<64x1xf32>
    %125 = vector.broadcast %124 : vector<64x1xf32> to vector<64x64xf32>
    %126 = arith.subf %122, %125 : vector<64x64xf32>
    %127 = math.exp %126 : vector<64x64xf32>
    %cst_35 = arith.constant dense<0.000000e+00> : vector<64xf32>
    %128 = vector.multi_reduction <add>, %127, %cst_35 [1] : vector<64x64xf32> to vector<64xf32>
    %129 = vector.shape_cast %128 : vector<64xf32> to vector<64x1xf32>
    %130 = arith.truncf %127 : vector<64x64xf32> to vector<64x64xbf16>
    %cst_36 = arith.constant dense<0.000000e+00> : vector<64x64xf32>
    %131 = tpu.matmul %130, %121, %cst_36 {dimension_numbers = #tpu.dot_dimension_numbers<[1], [0], [0], [1], [0, 0, 1, 1], [], []>} : vector<64x64xbf16>, vector<64x64xbf16>, vector<64x64xf32> -> vector<64x64xf32>
    %132 = tpu.reciprocal %129 {approx = true} : vector<64x1xf32> -> vector<64x1xf32>
    %133 = vector.broadcast %132 : vector<64x1xf32> to vector<64x64xf32>
    %134 = arith.mulf %131, %133 : vector<64x64xf32>
    %135 = vector.extract_strided_slice %28 {offsets = [0, 384], sizes = [64, 64], strides = [1, 1]} : vector<128x512xf32> to vector<64x64xf32>
    %136 = arith.truncf %135 : vector<64x64xf32> to vector<64x64xbf16>
    %137 = vector.extract_strided_slice %30 {offsets = [0, 384], sizes = [64, 64], strides = [1, 1]} : vector<128x512xbf16> to vector<64x64xbf16>
    %138 = vector.extract_strided_slice %32 {offsets = [0, 384], sizes = [64, 64], strides = [1, 1]} : vector<128x512xbf16> to vector<64x64xbf16>
    %cst_37 = arith.constant dense<0.000000e+00> : vector<64x64xf32>
    %139 = tpu.matmul %136, %137, %cst_37 {dimension_numbers = #tpu.dot_dimension_numbers<[1], [1], [0], [0], [0, 0, 1, 0], [], []>} : vector<64x64xbf16>, vector<64x64xbf16>, vector<64x64xf32> -> vector<64x64xf32>
    %cst_38 = arith.constant dense<0xFF800000> : vector<64xf32>
    %140 = vector.multi_reduction <maximumf>, %139, %cst_38 [1] : vector<64x64xf32> to vector<64xf32>
    %141 = vector.shape_cast %140 : vector<64xf32> to vector<64x1xf32>
    %142 = vector.broadcast %141 : vector<64x1xf32> to vector<64x64xf32>
    %143 = arith.subf %139, %142 : vector<64x64xf32>
    %144 = math.exp %143 : vector<64x64xf32>
    %cst_39 = arith.constant dense<0.000000e+00> : vector<64xf32>
    %145 = vector.multi_reduction <add>, %144, %cst_39 [1] : vector<64x64xf32> to vector<64xf32>
    %146 = vector.shape_cast %145 : vector<64xf32> to vector<64x1xf32>
    %147 = arith.truncf %144 : vector<64x64xf32> to vector<64x64xbf16>
    %cst_40 = arith.constant dense<0.000000e+00> : vector<64x64xf32>
    %148 = tpu.matmul %147, %138, %cst_40 {dimension_numbers = #tpu.dot_dimension_numbers<[1], [0], [0], [1], [0, 0, 1, 1], [], []>} : vector<64x64xbf16>, vector<64x64xbf16>, vector<64x64xf32> -> vector<64x64xf32>
    %149 = tpu.reciprocal %146 {approx = true} : vector<64x1xf32> -> vector<64x1xf32>
    %150 = vector.broadcast %149 : vector<64x1xf32> to vector<64x64xf32>
    %151 = arith.mulf %148, %150 : vector<64x64xf32>
    %152 = vector.extract_strided_slice %28 {offsets = [0, 448], sizes = [64, 64], strides = [1, 1]} : vector<128x512xf32> to vector<64x64xf32>
    %153 = arith.truncf %152 : vector<64x64xf32> to vector<64x64xbf16>
    %154 = vector.extract_strided_slice %30 {offsets = [0, 448], sizes = [64, 64], strides = [1, 1]} : vector<128x512xbf16> to vector<64x64xbf16>
    %155 = vector.extract_strided_slice %32 {offsets = [0, 448], sizes = [64, 64], strides = [1, 1]} : vector<128x512xbf16> to vector<64x64xbf16>
    %cst_41 = arith.constant dense<0.000000e+00> : vector<64x64xf32>
    %156 = tpu.matmul %153, %154, %cst_41 {dimension_numbers = #tpu.dot_dimension_numbers<[1], [1], [0], [0], [0, 0, 1, 0], [], []>} : vector<64x64xbf16>, vector<64x64xbf16>, vector<64x64xf32> -> vector<64x64xf32>
    %cst_42 = arith.constant dense<0xFF800000> : vector<64xf32>
    %157 = vector.multi_reduction <maximumf>, %156, %cst_42 [1] : vector<64x64xf32> to vector<64xf32>
    %158 = vector.shape_cast %157 : vector<64xf32> to vector<64x1xf32>
    %159 = vector.broadcast %158 : vector<64x1xf32> to vector<64x64xf32>
    %160 = arith.subf %156, %159 : vector<64x64xf32>
    %161 = math.exp %160 : vector<64x64xf32>
    %cst_43 = arith.constant dense<0.000000e+00> : vector<64xf32>
    %162 = vector.multi_reduction <add>, %161, %cst_43 [1] : vector<64x64xf32> to vector<64xf32>
    %163 = vector.shape_cast %162 : vector<64xf32> to vector<64x1xf32>
    %164 = arith.truncf %161 : vector<64x64xf32> to vector<64x64xbf16>
    %cst_44 = arith.constant dense<0.000000e+00> : vector<64x64xf32>
    %165 = tpu.matmul %164, %155, %cst_44 {dimension_numbers = #tpu.dot_dimension_numbers<[1], [0], [0], [1], [0, 0, 1, 1], [], []>} : vector<64x64xbf16>, vector<64x64xbf16>, vector<64x64xf32> -> vector<64x64xf32>
    %166 = tpu.reciprocal %163 {approx = true} : vector<64x1xf32> -> vector<64x1xf32>
    %167 = vector.broadcast %166 : vector<64x1xf32> to vector<64x64xf32>
    %168 = arith.mulf %165, %167 : vector<64x64xf32>
    %169 = tpu.concatenate %49, %66, %83, %100, %117, %134, %151, %168 in 1 : vector<64x64xf32>, vector<64x64xf32>, vector<64x64xf32>, vector<64x64xf32>, vector<64x64xf32>, vector<64x64xf32>, vector<64x64xf32>, vector<64x64xf32> -> vector<64x512xf32>
    %170 = vector.extract_strided_slice %28 {offsets = [64, 0], sizes = [64, 64], strides = [1, 1]} : vector<128x512xf32> to vector<64x64xf32>
    %171 = arith.truncf %170 : vector<64x64xf32> to vector<64x64xbf16>
    %172 = vector.extract_strided_slice %30 {offsets = [64, 0], sizes = [64, 64], strides = [1, 1]} : vector<128x512xbf16> to vector<64x64xbf16>
    %173 = vector.extract_strided_slice %32 {offsets = [64, 0], sizes = [64, 64], strides = [1, 1]} : vector<128x512xbf16> to vector<64x64xbf16>
    %cst_45 = arith.constant dense<0.000000e+00> : vector<64x64xf32>
    %174 = tpu.matmul %171, %172, %cst_45 {dimension_numbers = #tpu.dot_dimension_numbers<[1], [1], [0], [0], [0, 0, 1, 0], [], []>} : vector<64x64xbf16>, vector<64x64xbf16>, vector<64x64xf32> -> vector<64x64xf32>
    %cst_46 = arith.constant dense<0xFF800000> : vector<64xf32>
    %175 = vector.multi_reduction <maximumf>, %174, %cst_46 [1] : vector<64x64xf32> to vector<64xf32>
    %176 = vector.shape_cast %175 : vector<64xf32> to vector<64x1xf32>
    %177 = vector.broadcast %176 : vector<64x1xf32> to vector<64x64xf32>
    %178 = arith.subf %174, %177 : vector<64x64xf32>
    %179 = math.exp %178 : vector<64x64xf32>
    %cst_47 = arith.constant dense<0.000000e+00> : vector<64xf32>
    %180 = vector.multi_reduction <add>, %179, %cst_47 [1] : vector<64x64xf32> to vector<64xf32>
    %181 = vector.shape_cast %180 : vector<64xf32> to vector<64x1xf32>
    %182 = arith.truncf %179 : vector<64x64xf32> to vector<64x64xbf16>
    %cst_48 = arith.constant dense<0.000000e+00> : vector<64x64xf32>
    %183 = tpu.matmul %182, %173, %cst_48 {dimension_numbers = #tpu.dot_dimension_numbers<[1], [0], [0], [1], [0, 0, 1, 1], [], []>} : vector<64x64xbf16>, vector<64x64xbf16>, vector<64x64xf32> -> vector<64x64xf32>
    %184 = tpu.reciprocal %181 {approx = true} : vector<64x1xf32> -> vector<64x1xf32>
    %185 = vector.broadcast %184 : vector<64x1xf32> to vector<64x64xf32>
    %186 = arith.mulf %183, %185 : vector<64x64xf32>
    %187 = vector.extract_strided_slice %28 {offsets = [64, 64], sizes = [64, 64], strides = [1, 1]} : vector<128x512xf32> to vector<64x64xf32>
    %188 = arith.truncf %187 : vector<64x64xf32> to vector<64x64xbf16>
    %189 = vector.extract_strided_slice %30 {offsets = [64, 64], sizes = [64, 64], strides = [1, 1]} : vector<128x512xbf16> to vector<64x64xbf16>
    %190 = vector.extract_strided_slice %32 {offsets = [64, 64], sizes = [64, 64], strides = [1, 1]} : vector<128x512xbf16> to vector<64x64xbf16>
    %cst_49 = arith.constant dense<0.000000e+00> : vector<64x64xf32>
    %191 = tpu.matmul %188, %189, %cst_49 {dimension_numbers = #tpu.dot_dimension_numbers<[1], [1], [0], [0], [0, 0, 1, 0], [], []>} : vector<64x64xbf16>, vector<64x64xbf16>, vector<64x64xf32> -> vector<64x64xf32>
    %cst_50 = arith.constant dense<0xFF800000> : vector<64xf32>
    %192 = vector.multi_reduction <maximumf>, %191, %cst_50 [1] : vector<64x64xf32> to vector<64xf32>
    %193 = vector.shape_cast %192 : vector<64xf32> to vector<64x1xf32>
    %194 = vector.broadcast %193 : vector<64x1xf32> to vector<64x64xf32>
    %195 = arith.subf %191, %194 : vector<64x64xf32>
    %196 = math.exp %195 : vector<64x64xf32>
    %cst_51 = arith.constant dense<0.000000e+00> : vector<64xf32>
    %197 = vector.multi_reduction <add>, %196, %cst_51 [1] : vector<64x64xf32> to vector<64xf32>
    %198 = vector.shape_cast %197 : vector<64xf32> to vector<64x1xf32>
    %199 = arith.truncf %196 : vector<64x64xf32> to vector<64x64xbf16>
    %cst_52 = arith.constant dense<0.000000e+00> : vector<64x64xf32>
    %200 = tpu.matmul %199, %190, %cst_52 {dimension_numbers = #tpu.dot_dimension_numbers<[1], [0], [0], [1], [0, 0, 1, 1], [], []>} : vector<64x64xbf16>, vector<64x64xbf16>, vector<64x64xf32> -> vector<64x64xf32>
    %201 = tpu.reciprocal %198 {approx = true} : vector<64x1xf32> -> vector<64x1xf32>
    %202 = vector.broadcast %201 : vector<64x1xf32> to vector<64x64xf32>
    %203 = arith.mulf %200, %202 : vector<64x64xf32>
    %204 = vector.extract_strided_slice %28 {offsets = [64, 128], sizes = [64, 64], strides = [1, 1]} : vector<128x512xf32> to vector<64x64xf32>
    %205 = arith.truncf %204 : vector<64x64xf32> to vector<64x64xbf16>
    %206 = vector.extract_strided_slice %30 {offsets = [64, 128], sizes = [64, 64], strides = [1, 1]} : vector<128x512xbf16> to vector<64x64xbf16>
    %207 = vector.extract_strided_slice %32 {offsets = [64, 128], sizes = [64, 64], strides = [1, 1]} : vector<128x512xbf16> to vector<64x64xbf16>
    %cst_53 = arith.constant dense<0.000000e+00> : vector<64x64xf32>
    %208 = tpu.matmul %205, %206, %cst_53 {dimension_numbers = #tpu.dot_dimension_numbers<[1], [1], [0], [0], [0, 0, 1, 0], [], []>} : vector<64x64xbf16>, vector<64x64xbf16>, vector<64x64xf32> -> vector<64x64xf32>
    %cst_54 = arith.constant dense<0xFF800000> : vector<64xf32>
    %209 = vector.multi_reduction <maximumf>, %208, %cst_54 [1] : vector<64x64xf32> to vector<64xf32>
    %210 = vector.shape_cast %209 : vector<64xf32> to vector<64x1xf32>
    %211 = vector.broadcast %210 : vector<64x1xf32> to vector<64x64xf32>
    %212 = arith.subf %208, %211 : vector<64x64xf32>
    %213 = math.exp %212 : vector<64x64xf32>
    %cst_55 = arith.constant dense<0.000000e+00> : vector<64xf32>
    %214 = vector.multi_reduction <add>, %213, %cst_55 [1] : vector<64x64xf32> to vector<64xf32>
    %215 = vector.shape_cast %214 : vector<64xf32> to vector<64x1xf32>
    %216 = arith.truncf %213 : vector<64x64xf32> to vector<64x64xbf16>
    %cst_56 = arith.constant dense<0.000000e+00> : vector<64x64xf32>
    %217 = tpu.matmul %216, %207, %cst_56 {dimension_numbers = #tpu.dot_dimension_numbers<[1], [0], [0], [1], [0, 0, 1, 1], [], []>} : vector<64x64xbf16>, vector<64x64xbf16>, vector<64x64xf32> -> vector<64x64xf32>
    %218 = tpu.reciprocal %215 {approx = true} : vector<64x1xf32> -> vector<64x1xf32>
    %219 = vector.broadcast %218 : vector<64x1xf32> to vector<64x64xf32>
    %220 = arith.mulf %217, %219 : vector<64x64xf32>
    %221 = vector.extract_strided_slice %28 {offsets = [64, 192], sizes = [64, 64], strides = [1, 1]} : vector<128x512xf32> to vector<64x64xf32>
    %222 = arith.truncf %221 : vector<64x64xf32> to vector<64x64xbf16>
    %223 = vector.extract_strided_slice %30 {offsets = [64, 192], sizes = [64, 64], strides = [1, 1]} : vector<128x512xbf16> to vector<64x64xbf16>
    %224 = vector.extract_strided_slice %32 {offsets = [64, 192], sizes = [64, 64], strides = [1, 1]} : vector<128x512xbf16> to vector<64x64xbf16>
    %cst_57 = arith.constant dense<0.000000e+00> : vector<64x64xf32>
    %225 = tpu.matmul %222, %223, %cst_57 {dimension_numbers = #tpu.dot_dimension_numbers<[1], [1], [0], [0], [0, 0, 1, 0], [], []>} : vector<64x64xbf16>, vector<64x64xbf16>, vector<64x64xf32> -> vector<64x64xf32>
    %cst_58 = arith.constant dense<0xFF800000> : vector<64xf32>
    %226 = vector.multi_reduction <maximumf>, %225, %cst_58 [1] : vector<64x64xf32> to vector<64xf32>
    %227 = vector.shape_cast %226 : vector<64xf32> to vector<64x1xf32>
    %228 = vector.broadcast %227 : vector<64x1xf32> to vector<64x64xf32>
    %229 = arith.subf %225, %228 : vector<64x64xf32>
    %230 = math.exp %229 : vector<64x64xf32>
    %cst_59 = arith.constant dense<0.000000e+00> : vector<64xf32>
    %231 = vector.multi_reduction <add>, %230, %cst_59 [1] : vector<64x64xf32> to vector<64xf32>
    %232 = vector.shape_cast %231 : vector<64xf32> to vector<64x1xf32>
    %233 = arith.truncf %230 : vector<64x64xf32> to vector<64x64xbf16>
    %cst_60 = arith.constant dense<0.000000e+00> : vector<64x64xf32>
    %234 = tpu.matmul %233, %224, %cst_60 {dimension_numbers = #tpu.dot_dimension_numbers<[1], [0], [0], [1], [0, 0, 1, 1], [], []>} : vector<64x64xbf16>, vector<64x64xbf16>, vector<64x64xf32> -> vector<64x64xf32>
    %235 = tpu.reciprocal %232 {approx = true} : vector<64x1xf32> -> vector<64x1xf32>
    %236 = vector.broadcast %235 : vector<64x1xf32> to vector<64x64xf32>
    %237 = arith.mulf %234, %236 : vector<64x64xf32>
    %238 = vector.extract_strided_slice %28 {offsets = [64, 256], sizes = [64, 64], strides = [1, 1]} : vector<128x512xf32> to vector<64x64xf32>
    %239 = arith.truncf %238 : vector<64x64xf32> to vector<64x64xbf16>
    %240 = vector.extract_strided_slice %30 {offsets = [64, 256], sizes = [64, 64], strides = [1, 1]} : vector<128x512xbf16> to vector<64x64xbf16>
    %241 = vector.extract_strided_slice %32 {offsets = [64, 256], sizes = [64, 64], strides = [1, 1]} : vector<128x512xbf16> to vector<64x64xbf16>
    %cst_61 = arith.constant dense<0.000000e+00> : vector<64x64xf32>
    %242 = tpu.matmul %239, %240, %cst_61 {dimension_numbers = #tpu.dot_dimension_numbers<[1], [1], [0], [0], [0, 0, 1, 0], [], []>} : vector<64x64xbf16>, vector<64x64xbf16>, vector<64x64xf32> -> vector<64x64xf32>
    %cst_62 = arith.constant dense<0xFF800000> : vector<64xf32>
    %243 = vector.multi_reduction <maximumf>, %242, %cst_62 [1] : vector<64x64xf32> to vector<64xf32>
    %244 = vector.shape_cast %243 : vector<64xf32> to vector<64x1xf32>
    %245 = vector.broadcast %244 : vector<64x1xf32> to vector<64x64xf32>
    %246 = arith.subf %242, %245 : vector<64x64xf32>
    %247 = math.exp %246 : vector<64x64xf32>
    %cst_63 = arith.constant dense<0.000000e+00> : vector<64xf32>
    %248 = vector.multi_reduction <add>, %247, %cst_63 [1] : vector<64x64xf32> to vector<64xf32>
    %249 = vector.shape_cast %248 : vector<64xf32> to vector<64x1xf32>
    %250 = arith.truncf %247 : vector<64x64xf32> to vector<64x64xbf16>
    %cst_64 = arith.constant dense<0.000000e+00> : vector<64x64xf32>
    %251 = tpu.matmul %250, %241, %cst_64 {dimension_numbers = #tpu.dot_dimension_numbers<[1], [0], [0], [1], [0, 0, 1, 1], [], []>} : vector<64x64xbf16>, vector<64x64xbf16>, vector<64x64xf32> -> vector<64x64xf32>
    %252 = tpu.reciprocal %249 {approx = true} : vector<64x1xf32> -> vector<64x1xf32>
    %253 = vector.broadcast %252 : vector<64x1xf32> to vector<64x64xf32>
    %254 = arith.mulf %251, %253 : vector<64x64xf32>
    %255 = vector.extract_strided_slice %28 {offsets = [64, 320], sizes = [64, 64], strides = [1, 1]} : vector<128x512xf32> to vector<64x64xf32>
    %256 = arith.truncf %255 : vector<64x64xf32> to vector<64x64xbf16>
    %257 = vector.extract_strided_slice %30 {offsets = [64, 320], sizes = [64, 64], strides = [1, 1]} : vector<128x512xbf16> to vector<64x64xbf16>
    %258 = vector.extract_strided_slice %32 {offsets = [64, 320], sizes = [64, 64], strides = [1, 1]} : vector<128x512xbf16> to vector<64x64xbf16>
    %cst_65 = arith.constant dense<0.000000e+00> : vector<64x64xf32>
    %259 = tpu.matmul %256, %257, %cst_65 {dimension_numbers = #tpu.dot_dimension_numbers<[1], [1], [0], [0], [0, 0, 1, 0], [], []>} : vector<64x64xbf16>, vector<64x64xbf16>, vector<64x64xf32> -> vector<64x64xf32>
    %cst_66 = arith.constant dense<0xFF800000> : vector<64xf32>
    %260 = vector.multi_reduction <maximumf>, %259, %cst_66 [1] : vector<64x64xf32> to vector<64xf32>
    %261 = vector.shape_cast %260 : vector<64xf32> to vector<64x1xf32>
    %262 = vector.broadcast %261 : vector<64x1xf32> to vector<64x64xf32>
    %263 = arith.subf %259, %262 : vector<64x64xf32>
    %264 = math.exp %263 : vector<64x64xf32>
    %cst_67 = arith.constant dense<0.000000e+00> : vector<64xf32>
    %265 = vector.multi_reduction <add>, %264, %cst_67 [1] : vector<64x64xf32> to vector<64xf32>
    %266 = vector.shape_cast %265 : vector<64xf32> to vector<64x1xf32>
    %267 = arith.truncf %264 : vector<64x64xf32> to vector<64x64xbf16>
    %cst_68 = arith.constant dense<0.000000e+00> : vector<64x64xf32>
    %268 = tpu.matmul %267, %258, %cst_68 {dimension_numbers = #tpu.dot_dimension_numbers<[1], [0], [0], [1], [0, 0, 1, 1], [], []>} : vector<64x64xbf16>, vector<64x64xbf16>, vector<64x64xf32> -> vector<64x64xf32>
    %269 = tpu.reciprocal %266 {approx = true} : vector<64x1xf32> -> vector<64x1xf32>
    %270 = vector.broadcast %269 : vector<64x1xf32> to vector<64x64xf32>
    %271 = arith.mulf %268, %270 : vector<64x64xf32>
    %272 = vector.extract_strided_slice %28 {offsets = [64, 384], sizes = [64, 64], strides = [1, 1]} : vector<128x512xf32> to vector<64x64xf32>
    %273 = arith.truncf %272 : vector<64x64xf32> to vector<64x64xbf16>
    %274 = vector.extract_strided_slice %30 {offsets = [64, 384], sizes = [64, 64], strides = [1, 1]} : vector<128x512xbf16> to vector<64x64xbf16>
    %275 = vector.extract_strided_slice %32 {offsets = [64, 384], sizes = [64, 64], strides = [1, 1]} : vector<128x512xbf16> to vector<64x64xbf16>
    %cst_69 = arith.constant dense<0.000000e+00> : vector<64x64xf32>
    %276 = tpu.matmul %273, %274, %cst_69 {dimension_numbers = #tpu.dot_dimension_numbers<[1], [1], [0], [0], [0, 0, 1, 0], [], []>} : vector<64x64xbf16>, vector<64x64xbf16>, vector<64x64xf32> -> vector<64x64xf32>
    %cst_70 = arith.constant dense<0xFF800000> : vector<64xf32>
    %277 = vector.multi_reduction <maximumf>, %276, %cst_70 [1] : vector<64x64xf32> to vector<64xf32>
    %278 = vector.shape_cast %277 : vector<64xf32> to vector<64x1xf32>
    %279 = vector.broadcast %278 : vector<64x1xf32> to vector<64x64xf32>
    %280 = arith.subf %276, %279 : vector<64x64xf32>
    %281 = math.exp %280 : vector<64x64xf32>
    %cst_71 = arith.constant dense<0.000000e+00> : vector<64xf32>
    %282 = vector.multi_reduction <add>, %281, %cst_71 [1] : vector<64x64xf32> to vector<64xf32>
    %283 = vector.shape_cast %282 : vector<64xf32> to vector<64x1xf32>
    %284 = arith.truncf %281 : vector<64x64xf32> to vector<64x64xbf16>
    %cst_72 = arith.constant dense<0.000000e+00> : vector<64x64xf32>
    %285 = tpu.matmul %284, %275, %cst_72 {dimension_numbers = #tpu.dot_dimension_numbers<[1], [0], [0], [1], [0, 0, 1, 1], [], []>} : vector<64x64xbf16>, vector<64x64xbf16>, vector<64x64xf32> -> vector<64x64xf32>
    %286 = tpu.reciprocal %283 {approx = true} : vector<64x1xf32> -> vector<64x1xf32>
    %287 = vector.broadcast %286 : vector<64x1xf32> to vector<64x64xf32>
    %288 = arith.mulf %285, %287 : vector<64x64xf32>
    %289 = vector.extract_strided_slice %28 {offsets = [64, 448], sizes = [64, 64], strides = [1, 1]} : vector<128x512xf32> to vector<64x64xf32>
    %290 = arith.truncf %289 : vector<64x64xf32> to vector<64x64xbf16>
    %291 = vector.extract_strided_slice %30 {offsets = [64, 448], sizes = [64, 64], strides = [1, 1]} : vector<128x512xbf16> to vector<64x64xbf16>
    %292 = vector.extract_strided_slice %32 {offsets = [64, 448], sizes = [64, 64], strides = [1, 1]} : vector<128x512xbf16> to vector<64x64xbf16>
    %cst_73 = arith.constant dense<0.000000e+00> : vector<64x64xf32>
    %293 = tpu.matmul %290, %291, %cst_73 {dimension_numbers = #tpu.dot_dimension_numbers<[1], [1], [0], [0], [0, 0, 1, 0], [], []>} : vector<64x64xbf16>, vector<64x64xbf16>, vector<64x64xf32> -> vector<64x64xf32>
    %cst_74 = arith.constant dense<0xFF800000> : vector<64xf32>
    %294 = vector.multi_reduction <maximumf>, %293, %cst_74 [1] : vector<64x64xf32> to vector<64xf32>
    %295 = vector.shape_cast %294 : vector<64xf32> to vector<64x1xf32>
    %296 = vector.broadcast %295 : vector<64x1xf32> to vector<64x64xf32>
    %297 = arith.subf %293, %296 : vector<64x64xf32>
    %298 = math.exp %297 : vector<64x64xf32>
    %cst_75 = arith.constant dense<0.000000e+00> : vector<64xf32>
    %299 = vector.multi_reduction <add>, %298, %cst_75 [1] : vector<64x64xf32> to vector<64xf32>
    %300 = vector.shape_cast %299 : vector<64xf32> to vector<64x1xf32>
    %301 = arith.truncf %298 : vector<64x64xf32> to vector<64x64xbf16>
    %cst_76 = arith.constant dense<0.000000e+00> : vector<64x64xf32>
    %302 = tpu.matmul %301, %292, %cst_76 {dimension_numbers = #tpu.dot_dimension_numbers<[1], [0], [0], [1], [0, 0, 1, 1], [], []>} : vector<64x64xbf16>, vector<64x64xbf16>, vector<64x64xf32> -> vector<64x64xf32>
    %303 = tpu.reciprocal %300 {approx = true} : vector<64x1xf32> -> vector<64x1xf32>
    %304 = vector.broadcast %303 : vector<64x1xf32> to vector<64x64xf32>
    %305 = arith.mulf %302, %304 : vector<64x64xf32>
    %306 = tpu.concatenate %186, %203, %220, %237, %254, %271, %288, %305 in 1 : vector<64x64xf32>, vector<64x64xf32>, vector<64x64xf32>, vector<64x64xf32>, vector<64x64xf32>, vector<64x64xf32>, vector<64x64xf32>, vector<64x64xf32> -> vector<64x512xf32>
    %307 = tpu.concatenate %169, %306 in 0 : vector<64x512xf32>, vector<64x512xf32> -> vector<128x512xf32>
    %308 = arith.truncf %307 : vector<128x512xf32> to vector<128x512xbf16>
    %c0_77 = arith.constant 0 : index
    %c0_78 = arith.constant 0 : index
    %c0_79 = arith.constant 0 : index
    %309 = vector.load %arg5[%c0_77, %c0_78, %c0_79] : memref<1x512x128xbf16, #tpu.memory_space<vmem>>, vector<1x512x128xbf16>
    %310 = vector.shape_cast %309 : vector<1x512x128xbf16> to vector<512x128xbf16>
    %cst_80 = arith.constant dense<0.000000e+00> : vector<128x128xf32>
    %311 = tpu.matmul %308, %310, %cst_80 {dimension_numbers = #tpu.dot_dimension_numbers<[1], [0], [0], [1], [0, 0, 1, 1], [], []>} : vector<128x512xbf16>, vector<512x128xbf16>, vector<128x128xf32> -> vector<128x128xf32>
    %c0_81 = arith.constant 0 : index
    %c0_82 = arith.constant 0 : index
    %312 = vector.load %arg6[%c0_81, %c0_82] : memref<1x128xf32, #tpu.memory_space<vmem>>, vector<1x128xf32>
    %313 = vector.broadcast %312 : vector<1x128xf32> to vector<128x128xf32>
    %314 = arith.addf %311, %313 : vector<128x128xf32>
    %315 = vector.shape_cast %314 : vector<128x128xf32> to vector<2x64x128xf32>
    %c0_83 = arith.constant 0 : index
    %c0_84 = arith.constant 0 : index
    %c0_85 = arith.constant 0 : index
    %316 = vector.load %arg7[%c0_83, %c0_84, %c0_85] : memref<2x64x128xf32, #tpu.memory_space<vmem>>, vector<2x64x128xf32>
    tpu.vector_store %arg7[%c0_83, %c0_84, %c0_85], %315 {strides = array<i32>} : memref<2x64x128xf32, #tpu.memory_space<vmem>>, vector<2x64x128xf32>,
    return
  }
  func.func @transform_0(%arg0: i32, %arg1: i32) -> (i32, i32, i32) {
    %c0_i32 = arith.constant 0 : i32
    %c0_i32_0 = arith.constant 0 : i32
    %c0_i32_1 = arith.constant 0 : i32
    return %arg0, %c0_i32, %c0_i32_0 : i32, i32, i32
  }
  func.func @transform_1(%arg0: i32, %arg1: i32) -> (i32, i32, i32) {
    %c0_i32 = arith.constant 0 : i32
    %c0_i32_0 = arith.constant 0 : i32
    %c0_i32_1 = arith.constant 0 : i32
    return %arg1, %c0_i32, %c0_i32_0 : i32, i32, i32
  }
  func.func @transform_2(%arg0: i32, %arg1: i32) -> (i32, i32, i32) {
    %c0_i32 = arith.constant 0 : i32
    %c0_i32_0 = arith.constant 0 : i32
    %c0_i32_1 = arith.constant 0 : i32
    return %arg1, %c0_i32, %c0_i32_0 : i32, i32, i32
  }
  func.func @transform_3(%arg0: i32, %arg1: i32) -> (i32, i32, i32) {
    %c0_i32 = arith.constant 0 : i32
    %c0_i32_0 = arith.constant 0 : i32
    %c0_i32_1 = arith.constant 0 : i32
    return %arg1, %c0_i32, %c0_i32_0 : i32, i32, i32
  }
  func.func @transform_4(%arg0: i32, %arg1: i32) -> (i32, i32) {
    %c0_i32 = arith.constant 0 : i32
    %c0_i32_0 = arith.constant 0 : i32
    %c0_i32_1 = arith.constant 0 : i32
    return %c0_i32, %c0_i32_0 : i32, i32
  }
  func.func @transform_5(%arg0: i32, %arg1: i32) -> (i32, i32, i32) {
    %c0_i32 = arith.constant 0 : i32
    %c0_i32_0 = arith.constant 0 : i32
    %c0_i32_1 = arith.constant 0 : i32
    return %arg0, %c0_i32, %c0_i32_0 : i32, i32, i32
  }
}

</mosaic_0001>

<bundles_post_ra>
// kernel: tpu_custom_call.1
= control target key start
LH: loop header
LB: loop body
LE: loop exit
PB: predicated region body
PF: predicated region fallthrough
CT: control target
= control target key end

     0   :  { %10 = vsyncpa [#allocation3], 0  ;;  %s12502_s0 = inlined_call_operand.hbm [shape: f32[2,64,128], index: 0, kind: input, shape index: {}]   ;;  %s12503_s1 = inlined_call_operand.hbm [shape: bf16[1,128,1536], index: 1, kind: input, shape index: {}]   ;;  %s12504_s2 = inlined_call_operand.hbm [shape: f32[1,1,1536], index: 2, kind: input, shape index: {}]   ;;  %s12505_s3 = inlined_call_operand.hbm [shape: bf16[1,512,128], index: 3, kind: input, shape index: {}]   ;;  %s12506_s4 = inlined_call_operand.vmem [shape: f32[1,128], index: 4, kind: input, shape index: {}]   ;;  %s12507_s5 = inlined_call_operand.hbm [shape: f32[2,64,128], index: 5, kind: output, shape index: {}]  }
   0x1   :  { %11 = vsyncpa [#allocation6], 0 }
   0x2   :  { %12 = vsyncpa [#allocation9], 0 }
   0x3   :  { %13 = vsyncpa [#allocation4], 0  ;;  %s9216_s18 = smov [#allocation5]  }
   0x4   :  { %s31_s19 = sshll.u32 %s9216_s18, 4  ;;  %s32_s19 = int_to_ptr.vmem [resolvable:$true] %s31_s19 }
   0x5   :  { %s9116_s20 = scalar_lea.vmem %s32_s19, 12288  ;;  %p9121_p1 = scmp.lt.s32.totalorder %s32_s19, %s32_s19 }
   0x6   :  { %p9117_p0 = scmp.ne.s32.totalorder %s32_s19, %s9116_s20  ;;  %p9122_p2 = scmp.lt.s32.totalorder %s9116_s20, %s9116_s20 }
   0x8   :  { %p9123_p3 = por %p9122_p2, %p9121_p1 }
   0xa   :  { %p9124_p4 = pnand %p9123_p3, %p9117_p0 }
   0xc   :  { %9127 = shalt.err (!%p9124_p4)
}
   0xd   :  { %s9217_s21 = smov 768   ;;  %s9218_s22 = smov 48  }
   0xe   :  { %37 = dma.hbm_to_vmem [thread:$0]  %s12503_s1, 12288, %s32_s19, [#allocation6], %s9217_s21, %s9217_s21, %s9218_s22  }
   0xf   :  { %s9219_s25 = smov [#allocation2]  }
  0x10   :  { %s19_s26 = sshll.u32 %s9219_s25, 4  ;;  %s20_s26 = int_to_ptr.vmem [resolvable:$true] %s19_s26 }
  0x11   :  { %s9136_s27 = scalar_lea.vmem %s20_s26, 2048  ;;  %p9141_p6 = scmp.lt.s32.totalorder %s20_s26, %s20_s26 }
  0x12   :  { %p9137_p5 = scmp.ne.s32.totalorder %s20_s26, %s9136_s27  ;;  %p9142_p7 = scmp.lt.s32.totalorder %s9136_s27, %s9136_s27 }
  0x14   :  { %p9143_p8 = por %p9142_p7, %p9141_p6 }
  0x16   :  { %p9144_p9 = pnand %p9143_p8, %p9137_p5 }
  0x18   :  { %9147 = shalt.err (!%p9144_p9)
}
  0x19   :  { %s9220_s28 = smov 128   ;;  %s9221_s29 = smov 8  }
  0x1a   :  { %25 = dma.hbm_to_vmem [thread:$0]  %s12502_s0, 2048, %s20_s26, [#allocation3], %s9220_s28, %s9220_s28, %s9221_s29  }
  0x1b   :  { %s9222_s1 = smov [#allocation7]   ;;  %s9223_s8 = smov [#allocation8]  }
  0x1c   :  { %s44_s7 = sshll.u32 %s9222_s1, 4  ;;  %s53_s9 = sshll.u32 %s9223_s8, 4  ;;  %s45_s7 = int_to_ptr.vmem [resolvable:$true] %s44_s7  ;;  %s54_s9 = int_to_ptr.vmem [resolvable:$true] %s53_s9 }
  0x1d   :  { %s9156_s10 = scalar_lea.vmem %s45_s7, 192  ;;  %p9161_p11 = scmp.lt.s32.totalorder %s45_s7, %s45_s7 }
  0x1e   :  { %p9157_p10 = scmp.ne.s32.totalorder %s45_s7, %s9156_s10  ;;  %p9162_p12 = scmp.lt.s32.totalorder %s9156_s10, %s9156_s10 }
  0x20   :  { %p9163_p13 = por %p9162_p12, %p9161_p11 }
  0x22   :  { %p9164_p0 = pnand %p9163_p13, %p9157_p10 }
  0x24   :  { %9167 = shalt.err (!%p9164_p0)
}
  0x25   :  { %47 = dma.hbm_to_vmem [thread:$0]  %s12504_s2, 192, %s45_s7, [#allocation6]  }
  0x26   :  { %s9176_s13 = scalar_lea.vmem %s54_s9, 4096  ;;  %p9181_p2 = scmp.lt.s32.totalorder %s54_s9, %s54_s9 }
  0x27   :  { %p9177_p1 = scmp.ne.s32.totalorder %s54_s9, %s9176_s13  ;;  %p9182_p3 = scmp.lt.s32.totalorder %s9176_s13, %s9176_s13 }
  0x29   :  { %p9183_p4 = por %p9182_p3, %p9181_p2 }
  0x2b   :  { %p9184_p5 = pnand %p9183_p4, %p9177_p1 }
  0x2d   :  { %9187 = shalt.err (!%p9184_p5)
}
  0x2e   :  { %s9224_s0 = smov 64   ;;  %s9225_s14 = smov 4  }
  0x2f   :  { %59 = dma.hbm_to_vmem [thread:$0]  %s12505_s3, 4096, %s54_s9, [#allocation9], %s9224_s0, %s9224_s0, %s9225_s14  }
  0x30   :  { %9208 = dma.done.wait [#allocation3], 2048  }
  0x31   :  { %9209 = vsyncadd [#allocation3], 4294965248 }
  0x32   :  { %9210 = dma.done.wait [#allocation6], 12480  }
  0x33   :  { %9211 = vsyncadd [#allocation6], 4294954816 }
  0x34   :  { %9212 = dma.done.wait [#allocation9], 4096  }
  0x35   :  { %9213 = vsyncadd [#allocation9], 4294963200  ;;  %v75_v0 = vld [vmem:[#allocation2] sm:$0xff]  ;;  %v77_v1 = vld [vmem:[#allocation2 + $0x10] sm:$0xff]  ;;  %vm1662_vm0 = vcmask 523264  }
  0x36   :  { %91 = vadd.xlane.f32.xlu0 %v75_v0  ;;  %95 = vadd.xlane.f32.xlu1 %v77_v1  ;;  %v76_v2 = vld [vmem:[#allocation2 + $0x8] sm:$0xff]  ;;  %v78_v3 = vld [vmem:[#allocation2 + $0x18] sm:$0xff]  ;;  %v9275_v4 = vld [vmem:[#allocation2 + $0x20] sm:$0xff] }
  0x37   :  { %v9277_v5 = vld [vmem:[#allocation2 + $0x28] sm:$0xff]  ;;  %v9279_v6 = vld [vmem:[#allocation2 + $0x30] sm:$0xff]  ;;  %v9281_v7 = vld [vmem:[#allocation2 + $0x38] sm:$0xff] }
  0x38   :  { %v9285_v8 = vld [vmem:[#allocation2 + $0x40] sm:$0xff]  ;;  %v9287_v9 = vld [vmem:[#allocation2 + $0x48] sm:$0xff]  ;;  %v9291_v10 = vld [vmem:[#allocation2 + $0x50] sm:$0xff] }
  0x39   :  { %v9293_v11 = vld [vmem:[#allocation2 + $0x58] sm:$0xff]  ;;  %v9297_v12 = vld [vmem:[#allocation2 + $0x60] sm:$0xff]  ;;  %v9299_v13 = vld [vmem:[#allocation2 + $0x68] sm:$0xff] }
  0x3a   :  { %93 = vadd.xlane.f32.xlu0 %v76_v2  ;;  %97 = vadd.xlane.f32.xlu1 %v78_v3  ;;  %v9303_v14 = vld [vmem:[#allocation2 + $0x70] sm:$0xff]  ;;  %v9305_v15 = vld [vmem:[#allocation2 + $0x78] sm:$0xff] }
  0x3b   :  { %v8388_v16 = vld [vmem:[#allocation5 + $0x2a4] ss:$48 sps:$4 sm:$0xff]   ;;  %v8390_v17 = vld [vmem:[#allocation5 + $0x2a0] ss:$48 sps:$4 sm:$0xff]   ;;  %v8391_v18 = vld [vmem:[#allocation5 + $0x2ac] ss:$48 sps:$4 sm:$0xff]  }
  0x3c   :  { %v8393_v19 = vld [vmem:[#allocation5 + $0x2a8] ss:$48 sps:$4 sm:$0xff]   ;;  %v8394_v20 = vld [vmem:[#allocation5 + $0x244] ss:$48 sps:$4 sm:$0xff]   ;;  %v8396_v21 = vld [vmem:[#allocation5 + $0x240] ss:$48 sps:$4 sm:$0xff]   ;;  %916 = vmatprep.subr.bf16.mxu0 %v8388_v16  ;;  %1029 = vmatprep.subr.bf16.mxu1 %v8391_v18 }
  0x3d   :  { %v8397_v22 = vld [vmem:[#allocation5 + $0x24c] ss:$48 sps:$4 sm:$0xff]   ;;  %v8399_v23 = vld [vmem:[#allocation5 + $0x248] ss:$48 sps:$4 sm:$0xff]   ;;  %917 = vmatpush1.bf16.msra.mxu0 %v8390_v17  ;;  %1030 = vmatpush1.bf16.msra.mxu1 %v8393_v19  ;;  %v8400_v59 = vld [vmem:[#allocation5 + $0x1e4] ss:$48 sps:$4 sm:$0xff]  }
  0x3e   :  { %99 = vadd.xlane.f32.xlu0 %v9275_v4  ;;  %101 = vadd.xlane.f32.xlu1 %v9277_v5  ;;  %v8403_v60 = vld [vmem:[#allocation5 + $0x1ec] ss:$48 sps:$4 sm:$0xff]   ;;  %v8402_v61 = vld [vmem:[#allocation5 + $0x1e0] ss:$48 sps:$4 sm:$0xff]   ;;  %v8405_v62 = vld [vmem:[#allocation5 + $0x1e8] ss:$48 sps:$4 sm:$0xff]  }
  0x3f   :  { %918 = vmatprep.subr.bf16.mxu0 %v8394_v20  ;;  %1031 = vmatprep.subr.bf16.mxu1 %v8397_v22  ;;  %v8409_v16 = vld [vmem:[#allocation5 + $0x18c] ss:$48 sps:$4 sm:$0xff]   ;;  %v8408_v18 = vld [vmem:[#allocation5 + $0x180] ss:$48 sps:$4 sm:$0xff]   ;;  %v8411_v19 = vld [vmem:[#allocation5 + $0x188] ss:$48 sps:$4 sm:$0xff]  }
  0x41   :  { %919 = vmatpush1.bf16.msra.mxu0 %v8396_v21  ;;  %1032 = vmatpush1.bf16.msra.mxu1 %v8399_v23 }
  0x42   :  { %103 = vadd.xlane.f32.xlu0 %v9279_v6  ;;  %105 = vadd.xlane.f32.xlu1 %v9281_v7 }
  0x43   :  { %920 = vmatprep.subr.bf16.mxu0 %v8400_v59  ;;  %1033 = vmatprep.subr.bf16.mxu1 %v8403_v60 }
  0x45   :  { %921 = vmatpush1.bf16.msra.mxu0 %v8402_v61  ;;  %1034 = vmatpush1.bf16.msra.mxu1 %v8405_v62 }
  0x46   :  { %107 = vadd.xlane.f32.xlu0 %v9285_v8  ;;  %109 = vadd.xlane.f32.xlu1 %v9287_v9 }
  0x47   :  { %1035 = vmatprep.subr.bf16.mxu1 %v8409_v16 }
  0x49   :  { %1036 = vmatpush1.bf16.msra.mxu1 %v8411_v19 }
  0x4a   :  { %111 = vadd.xlane.f32.xlu0 %v9291_v10  ;;  %113 = vadd.xlane.f32.xlu1 %v9293_v11 }
  0x4e   :  { %115 = vadd.xlane.f32.xlu0 %v9297_v12  ;;  %117 = vadd.xlane.f32.xlu1 %v9299_v13 }
  0x52   :  { %119 = vadd.xlane.f32.xlu0 %v9303_v14  ;;  %121 = vadd.xlane.f32.xlu1 %v9305_v15 }
  0xbf   :  { %v92_v24 = vpop.xlane.xlu0 %91  ;;  %v96_v25 = vpop.xlane.xlu1 %95 }
  0xc0   :  { %v124_v26 = vmul.f32 0.0078125, %v92_v24  ;;  %v126_v27 = vmul.f32 0.0078125, %v96_v25  ;;  %v8412_v25 = vld [vmem:[#allocation5 + $0x124] ss:$48 sps:$4 sm:$0xff]  }
  0xc2   :  { %v9311_v28 = vsub.f32 %v75_v0, %v124_v26  ;;  %v9313_v29 = vsub.f32 %v77_v1, %v126_v27  ;;  %v8415_v26 = vld [vmem:[#allocation5 + $0x12c] ss:$48 sps:$4 sm:$0xff]  }
  0xc3   :  { %v94_v30 = vpop.xlane.xlu0 %93  ;;  %v98_v31 = vpop.xlane.xlu1 %97  ;;  %1037 = vmatprep.subr.bf16.mxu1 %v8415_v26 }
  0xc4   :  { %v125_v32 = vmul.f32 0.0078125, %v94_v30  ;;  %v156_v33 = vmul.f32 %v9311_v28, %v9311_v28  ;;  %v127_v34 = vmul.f32 0.0078125, %v98_v31  ;;  %v158_v35 = vmul.f32 %v9313_v29, %v9313_v29  ;;  %v8414_v30 = vld [vmem:[#allocation5 + $0x120] ss:$48 sps:$4 sm:$0xff]   ;;  %v8417_v31 = vld [vmem:[#allocation5 + $0x128] ss:$48 sps:$4 sm:$0xff]  }
  0xc5   :  { %1038 = vmatpush1.bf16.msra.mxu1 %v8417_v31 }
  0xc6   :  { %172 = vadd.xlane.f32.xlu0 %v156_v33  ;;  %v9319_v36 = vsub.f32 %v76_v2, %v125_v32  ;;  %v9321_v37 = vsub.f32 %v78_v3, %v127_v34 }
  0xc7   :  { %v100_v38 = vpop.xlane.xlu0 %99  ;;  %v102_v39 = vpop.xlane.xlu1 %101 }
  0xc8   :  { %v128_v40 = vmul.f32 0.0078125, %v100_v38  ;;  %v157_v41 = vmul.f32 %v9319_v36, %v9319_v36  ;;  %v129_v42 = vmul.f32 0.0078125, %v102_v39  ;;  %v159_v43 = vmul.f32 %v9321_v37, %v9321_v37  ;;  %v8418_v39 = vld [vmem:[#allocation5 + $0xc4] ss:$48 sps:$4 sm:$0xff]  }
  0xca   :  { %176 = vadd.xlane.f32.xlu0 %v158_v35  ;;  %174 = vadd.xlane.f32.xlu1 %v157_v41  ;;  %v9328_v44 = vsub.f32 %v9275_v4, %v128_v40  ;;  %v9331_v45 = vsub.f32 %v9277_v5, %v129_v42  ;;  %v8421_v40 = vld [vmem:[#allocation5 + $0xcc] ss:$48 sps:$4 sm:$0xff]   ;;  %v8420_v42 = vld [vmem:[#allocation5 + $0xc0] ss:$48 sps:$4 sm:$0xff]  }
  0xcb   :  { %v104_v46 = vpop.xlane.xlu0 %103  ;;  %v106_v47 = vpop.xlane.xlu1 %105  ;;  %1039 = vmatprep.subr.bf16.mxu1 %v8421_v40 }
  0xcc   :  { %v130_v48 = vmul.f32 0.0078125, %v104_v46  ;;  %v160_v49 = vmul.f32 %v9328_v44, %v9328_v44  ;;  %v131_v50 = vmul.f32 0.0078125, %v106_v47  ;;  %v161_v51 = vmul.f32 %v9331_v45, %v9331_v45  ;;  %v8424_v47 = vld [vmem:[#allocation5 + $0x64] ss:$48 sps:$4 sm:$0xff]  }
  0xce   :  { %178 = vadd.xlane.f32.xlu1 %v159_v43  ;;  %180 = vadd.xlane.f32.xlu0 %v160_v49  ;;  %v9338_v52 = vsub.f32 %v9279_v6, %v130_v48  ;;  %v9341_v53 = vsub.f32 %v9281_v7, %v131_v50  ;;  %v8406_v7 = vld [vmem:[#allocation5 + $0x184] ss:$48 sps:$4 sm:$0xff]   ;;  %v8423_v43 = vld [vmem:[#allocation5 + $0xc8] ss:$48 sps:$4 sm:$0xff]   ;;  %v8427_v48 = vld [vmem:[#allocation5 + $0x6c] ss:$48 sps:$4 sm:$0xff]  }
  0xcf   :  { %v108_v54 = vpop.xlane.xlu0 %107  ;;  %v110_v55 = vpop.xlane.xlu1 %109  ;;  %922 = vmatprep.subr.bf16.mxu0 %v8406_v7  ;;  %1040 = vmatpush1.bf16.msra.mxu1 %v8423_v43  ;;  %v8426_v49 = vld [vmem:[#allocation5 + $0x60] ss:$48 sps:$4 sm:$0xff]   ;;  %v8429_v50 = vld [vmem:[#allocation5 + $0x68] ss:$48 sps:$4 sm:$0xff]   ;;  %v8456_v43 = vld [vmem:[#allocation5 + $0x25c] ss:$48 sps:$4 sm:$0xff]  }
  0xd0   :  { %v132_v56 = vmul.f32 0.0078125, %v108_v54  ;;  %v162_v57 = vmul.f32 %v9338_v52, %v9338_v52  ;;  %v133_v58 = vmul.f32 0.0078125, %v110_v55  ;;  %v163_v63 = vmul.f32 %v9341_v53, %v9341_v53  ;;  %923 = vmatpush1.bf16.msra.mxu0 %v8408_v18  ;;  %1041 = vmatprep.subr.bf16.mxu1 %v8427_v48  ;;  %v8432_v54 = vld [vmem:[#allocation5] ss:$48 sps:$4 sm:$0xff]   ;;  %v8435_v55 = vld [vmem:[#allocation5 + $0x8] ss:$48 sps:$4 sm:$0xff]  }
  0xd1   :  { %924 = vmatprep.subr.bf16.mxu0 %v8412_v25 }
  0xd2   :  { %182 = vadd.xlane.f32.xlu1 %v161_v51  ;;  %184 = vadd.xlane.f32.xlu0 %v162_v57  ;;  %v9348_v0 = vsub.f32 %v9285_v8, %v132_v56  ;;  %v9351_v1 = vsub.f32 %v9287_v9, %v133_v58  ;;  %v8433_v51 = vld [vmem:[#allocation5 + $0xc] ss:$48 sps:$4 sm:$0xff]   ;;  %v9226_v56 = vmov 0   ;;  %v8438_v57 = vld [vmem:[#allocation5 + $0x2b4] ss:$48 sps:$4 sm:$0xff]  }
  0xd3   :  { %v112_v2 = vpop.xlane.xlu0 %111  ;;  %v114_v3 = vpop.xlane.xlu1 %113  ;;  %1042 = vmatpush1.bf16.msra.mxu1 %v8429_v50  ;;  %948 = vmatprep.mubr.bf16.mxu0 %v9226_v56  ;;  %v8453_v58 = vld [vmem:[#allocation5 + $0x2bc] ss:$48 sps:$4 sm:$0xff]  }
  0xd4   :  { %v134_v4 = vmul.f32 0.0078125, %v112_v2  ;;  %v164_v5 = vmul.f32 %v9348_v0, %v9348_v0  ;;  %v135_v6 = vmul.f32 0.0078125, %v114_v3  ;;  %v165_v8 = vmul.f32 %v9351_v1, %v9351_v1  ;;  %925 = vmatpush1.bf16.msra.mxu0 %v8414_v30  ;;  %1043 = vmatprep.subr.bf16.mxu1 %v8433_v51 }
  0xd5   :  { %926 = vmatprep.subr.bf16.mxu0 %v8418_v39  ;;  %1061 = vmatprep.mubr.bf16.mxu1 %v9226_v56 }
  0xd6   :  { %186 = vadd.xlane.f32.xlu1 %v163_v63  ;;  %188 = vadd.xlane.f32.xlu0 %v164_v5  ;;  %v9358_v9 = vsub.f32 %v9291_v10, %v134_v4  ;;  %v9361_v17 = vsub.f32 %v9293_v11, %v135_v6 }
  0xd7   :  { %v116_v20 = vpop.xlane.xlu0 %115  ;;  %v118_v21 = vpop.xlane.xlu1 %117  ;;  %1044 = vmatpush1.bf16.msra.mxu1 %v8435_v55  ;;  %v8442_v55 = vld [vmem:[#allocation5 + $0x1f0] ss:$48 sps:$4 sm:$0xff]  }
  0xd8   :  { %v136_v22 = vmul.f32 0.0078125, %v116_v20  ;;  %v166_v23 = vmul.f32 %v9358_v9, %v9358_v9  ;;  %v137_v24 = vmul.f32 0.0078125, %v118_v21  ;;  %v167_v10 = vmul.f32 %v9361_v17, %v9361_v17  ;;  %927 = vmatpush1.bf16.msra.mxu0 %v8420_v42  ;;  %1255 = vmatprep.subr.bf16.mxu1 %v8453_v58 }
  0xd9   :  { %928 = vmatprep.subr.bf16.mxu0 %v8424_v47 }
  0xda   :  { %190 = vadd.xlane.f32.xlu1 %v165_v8  ;;  %192 = vadd.xlane.f32.xlu0 %v166_v23  ;;  %v9368_v11 = vsub.f32 %v9297_v12, %v136_v22  ;;  %v9371_v27 = vsub.f32 %v9299_v13, %v137_v24 }
  0xdb   :  { %v120_v32 = vpop.xlane.xlu0 %119  ;;  %v122_v33 = vpop.xlane.xlu1 %121 }
  0xdc   :  { %v138_v34 = vmul.f32 0.0078125, %v120_v32  ;;  %v168_v35 = vmul.f32 %v9368_v11, %v9368_v11  ;;  %v139_v38 = vmul.f32 0.0078125, %v122_v33  ;;  %v169_v12 = vmul.f32 %v9371_v27, %v9371_v27  ;;  %929 = vmatpush1.bf16.msra.mxu0 %v8426_v49  ;;  %v8436_v33 = vld [vmem:[#allocation5 + $0x2b0] ss:$48 sps:$4 sm:$0xff]   ;;  %v8454_v49 = vld [vmem:[#allocation5 + $0x258] ss:$48 sps:$4 sm:$0xff]  }
  0xde   :  { %194 = vadd.xlane.f32.xlu1 %v167_v10  ;;  %196 = vadd.xlane.f32.xlu0 %v168_v35  ;;  %v9378_v13 = vsub.f32 %v9303_v14, %v138_v34  ;;  %v9381_v41 = vsub.f32 %v9305_v15, %v139_v38  ;;  %v8430_v15 = vld [vmem:[#allocation5 + $0x4] ss:$48 sps:$4 sm:$0xff]  }
  0xdf   :  { %930 = vmatprep.subr.bf16.mxu0 %v8430_v15  ;;  %v8441_v38 = vld [vmem:[#allocation5 + $0x254] ss:$48 sps:$4 sm:$0xff]  }
  0xe0   :  { %v170_v46 = vmul.f32 %v9378_v13, %v9378_v13  ;;  %v171_v14 = vmul.f32 %v9381_v41, %v9381_v41  ;;  %931 = vmatpush1.bf16.msra.mxu0 %v8432_v54 }
  0xe1   :  { %1142 = vmatprep.subr.bf16.mxu0 %v8438_v57 }
  0xe2   :  { %198 = vadd.xlane.f32.xlu1 %v169_v12  ;;  %200 = vadd.xlane.f32.xlu0 %v170_v46  ;;  %v8451_v12 = vld [vmem:[#allocation5 + $0x2b8] ss:$48 sps:$4 sm:$0xff]  }
  0xe6   :  { %202 = vadd.xlane.f32.xlu1 %v171_v14  ;;  %v8444_v14 = vld [vmem:[#allocation5 + $0x1f4] ss:$48 sps:$4 sm:$0xff]  }
 0x14f   :  { %v173_v59 = vpop.xlane.xlu0 %172 }
 0x150   :  { %v204_v60 = vmul.f32 0.0078125, %v173_v59  ;;  %v8447_v59 = vld [vmem:[#allocation5 + $0x194] ss:$48 sps:$4 sm:$0xff]  }
 0x152   :  { %v220_v61 = vadd.f32 1e-05, %v204_v60  ;;  %v8460_v60 = vld [vmem:[#allocation5 + $0x1f8] ss:$48 sps:$4 sm:$0xff]  }
 0x153   :  { %v175_v62 = vpop.xlane.xlu1 %174  ;;  %v177_v63 = vpop.xlane.xlu0 %176 }
 0x154   :  { %v205_v2 = vmul.f32 0.0078125, %v175_v62  ;;  %8564 = vrsqrt.f32 %v220_v61  ;;  %v206_v4 = vmul.f32 0.0078125, %v177_v63 }
 0x156   :  { %v221_v3 = vadd.f32 1e-05, %v205_v2  ;;  %v222_v7 = vadd.f32 1e-05, %v206_v4  ;;  %v8445_v4 = vld [vmem:[#allocation5 + $0x190] ss:$48 sps:$4 sm:$0xff]  }
 0x157   :  { %v179_v5 = vpop.xlane.xlu1 %178  ;;  %v181_v8 = vpop.xlane.xlu0 %180 }
 0x158   :  { %8566 = vrsqrt.f32 %v221_v3  ;;  %v207_v6 = vmul.f32 0.0078125, %v179_v5  ;;  %v208_v20 = vmul.f32 0.0078125, %v181_v8  ;;  %v8450_v5 = vld [vmem:[#allocation5 + $0x134] ss:$48 sps:$4 sm:$0xff]  }
 0x15a   :  { %v223_v16 = vadd.f32 1e-05, %v207_v6  ;;  %v224_v23 = vadd.f32 1e-05, %v208_v20  ;;  %v8463_v6 = vld [vmem:[#allocation5 + $0x198] ss:$48 sps:$4 sm:$0xff]  }
 0x15b   :  { %v183_v18 = vpop.xlane.xlu1 %182  ;;  %v185_v25 = vpop.xlane.xlu0 %184 }
 0x15c   :  { %8568 = vrsqrt.f32 %v223_v16  ;;  %v209_v19 = vmul.f32 0.0078125, %v183_v18  ;;  %v210_v32 = vmul.f32 0.0078125, %v185_v25 }
 0x15d   :  { %8570 = vrsqrt.f32 %v222_v7 }
 0x15e   :  { %v225_v21 = vadd.f32 1e-05, %v209_v19  ;;  %v226_v42 = vadd.f32 1e-05, %v210_v32  ;;  %v8448_v19 = vld [vmem:[#allocation5 + $0x130] ss:$48 sps:$4 sm:$0xff]  }
 0x15f   :  { %v187_v22 = vpop.xlane.xlu1 %186  ;;  %v8468_v32 = vld [vmem:[#allocation5 + $0x74] ss:$48 sps:$4 sm:$0xff]  }
 0x160   :  { %8572 = vrsqrt.f32 %v225_v21  ;;  %v211_v26 = vmul.f32 0.0078125, %v187_v22  ;;  %v8459_v22 = vld [vmem:[#allocation5 + $0xd4] ss:$48 sps:$4 sm:$0xff]  }
 0x161   :  { %v8565_v24 = vpop.eup %8564  ;;  %8574 = vrsqrt.f32 %v224_v23  ;;  %v8469_v23 = vld [vmem:[#allocation5 + $0x138] ss:$48 sps:$4 sm:$0xff]  }
 0x162   :  { %v252_v30 = vmul.f32 %v8565_v24, %v9311_v28  ;;  %v227_v34 = vadd.f32 1e-05, %v211_v26  ;;  %v189_v28 = vpop.xlane.xlu0 %188 }
 0x163   :  { %v191_v40 = vpop.xlane.xlu1 %190  ;;  %v212_v15 = vmul.f32 0.0078125, %v189_v28  ;;  %v8478_v28 = vld [vmem:[#allocation5 + $0x78] ss:$48 sps:$4 sm:$0xff]  }
 0x164   :  { %8576 = vrsqrt.f32 %v227_v34  ;;  %v213_v48 = vmul.f32 0.0078125, %v191_v40 }
 0x165   :  { %v8567_v10 = vpop.eup %8566  ;;  %8578 = vrsqrt.f32 %v226_v42  ;;  %v228_v61 = vadd.f32 1e-05, %v212_v15  ;;  %v8481_v15 = vld [vmem:[#allocation5 + $0x18] ss:$48 sps:$4 sm:$0xff]  }
 0x166   :  { %v253_v31 = vmul.f32 %v8567_v10, %v9319_v36  ;;  %v8439_v36 = vld [vmem:[#allocation5 + $0x250] ss:$48 sps:$4 sm:$0xff]   ;;  %v229_v51 = vadd.f32 1e-05, %v213_v48  ;;  %v193_v63 = vpop.xlane.xlu0 %192 }
 0x167   :  { %v195_v58 = vpop.xlane.xlu1 %194  ;;  %v214_v16 = vmul.f32 0.0078125, %v193_v63 }
 0x168   :  { %v9391_v35 = vpack.c.bf16 %v253_v31, %v252_v30  ;;  %8580 = vrsqrt.f32 %v229_v51  ;;  %v215_v3 = vmul.f32 0.0078125, %v195_v58  ;;  %v8457_v31 = vld [vmem:[#allocation5 + $0xd0] ss:$48 sps:$4 sm:$0xff]   ;;  %v8486_v51 = vld [vmem:[#allocation5 + $0x2c4] ss:$48 sps:$4 sm:$0xff]  }
 0x169   :  { %v8569_v39 = vpop.eup %8568  ;;  %8582 = vrsqrt.f32 %v228_v61  ;;  %v230_v24 = vadd.f32 1e-05, %v214_v16 }
 0x16a   :  { %949 = vmatmul.mubr.bf16.vlgmr.msra.gmra.mxu0 %v9391_v35  ;;  %1062 = vmatmul.mubr.bf16.vlgmr.msra.gmra.mxu1 %v9391_v35  ;;  %v8571_v46 = vpop.eup %8570  ;;  %v255_v47 = vmul.f32 %v8569_v39, %v9321_v37  ;;  %v8462_v37 = vld [vmem:[#allocation5 + $0x1fc] ss:$48 sps:$4 sm:$0xff]   ;;  %v231_v8 = vadd.f32 1e-05, %v215_v3  ;;  %v197_v26 = vpop.xlane.xlu0 %196 }
 0x16b   :  { %1143 = vmatpush1.bf16.msra.mxu0 %v8436_v33  ;;  %958 = vmatprep.mubr.bf16.mxu0 %v9226_v56  ;;  %v254_v50 = vmul.f32 %v8571_v46, %v9313_v29  ;;  %v8465_v29 = vld [vmem:[#allocation5 + $0x19c] ss:$48 sps:$4 sm:$0xff]   ;;  %v199_v21 = vpop.xlane.xlu1 %198  ;;  %v8472_v33 = vld [vmem:[#allocation5 + $0xd8] ss:$48 sps:$4 sm:$0xff]   ;;  %v8477_v46 = vld [vmem:[#allocation5 + $0x14] ss:$48 sps:$4 sm:$0xff]  }
 0x16c   :  { %1071 = vmatprep.mubr.bf16.mxu1 %v9226_v56  ;;  %1144 = vmatprep.subr.bf16.mxu0 %v8441_v38  ;;  %8584 = vrsqrt.f32 %v231_v8  ;;  %v217_v30 = vmul.f32 0.0078125, %v199_v21  ;;  %v216_v38 = vmul.f32 0.0078125, %v197_v26  ;;  %v8492_v8 = vld [vmem:[#allocation5 + $0x264] ss:$48 sps:$4 sm:$0xff]   ;;  %v8496_v21 = vld [vmem:[#allocation5 + $0x200] ss:$48 sps:$4 sm:$0xff]  }
 0x16d   :  { %1256 = vmatpush1.bf16.msra.mxu1 %v8451_v12  ;;  %v9399_v54 = vpack.c.bf16 %v255_v47, %v254_v50  ;;  %v8573_v57 = vpop.eup %8572  ;;  %8586 = vrsqrt.f32 %v230_v24  ;;  %v8466_v12 = vld [vmem:[#allocation5 + $0x70] ss:$48 sps:$4 sm:$0xff]   ;;  %v8507_v24 = vld [vmem:[#allocation5 + $0x1ac] ss:$48 sps:$4 sm:$0xff]   ;;  %v8510_v26 = vld [vmem:[#allocation5 + $0x144] ss:$48 sps:$4 sm:$0xff]  }
 0x16e   :  { %1257 = vmatprep.subr.bf16.mxu1 %v8456_v43  ;;  %v8575_v62 = vpop.eup %8574  ;;  %v257_v2 = vmul.f32 %v8573_v57, %v9331_v45  ;;  %v8471_v45 = vld [vmem:[#allocation5 + $0x13c] ss:$48 sps:$4 sm:$0xff]   ;;  %v233_v39 = vadd.f32 1e-05, %v217_v30  ;;  %v201_v48 = vpop.xlane.xlu0 %200  ;;  %v8475_v50 = vld [vmem:[#allocation5 + $0x10] ss:$48 sps:$4 sm:$0xff]  }
 0x16f   :  { %1145 = vmatpush1.bf16.msra.mxu0 %v8439_v36  ;;  %v256_v7 = vmul.f32 %v8575_v62, %v9328_v44  ;;  %v8474_v44 = vld [vmem:[#allocation5 + $0xdc] ss:$48 sps:$4 sm:$0xff]   ;;  %v203_v43 = vpop.xlane.xlu1 %202  ;;  %v232_v36 = vadd.f32 1e-05, %v216_v38  ;;  %v8508_v30 = vld [vmem:[#allocation5 + $0x140] ss:$48 sps:$4 sm:$0xff]  }
 0x170   :  { %1146 = vmatprep.subr.bf16.mxu0 %v8444_v14  ;;  %8588 = vrsqrt.f32 %v233_v39  ;;  %v8517_v38 = vld [vmem:[#allocation5 + $0xe8] ss:$48 sps:$4 sm:$0xff]   ;;  %v8522_v39 = vld [vmem:[#allocation5 + $0x84] ss:$48 sps:$4 sm:$0xff]  }
 0x171   :  { %1258 = vmatpush1.bf16.msra.mxu1 %v8454_v49  ;;  %v9407_v18 = vpack.c.bf16 %v257_v2, %v256_v7  ;;  %v8577_v20 = vpop.eup %8576  ;;  %v219_v49 = vmul.f32 0.0078125, %v203_v43  ;;  %8590 = vrsqrt.f32 %v232_v36  ;;  %v8528_v43 = vld [vmem:[#allocation5 + $0x24] ss:$48 sps:$4 sm:$0xff]   ;;  %v8529_v36 = vld [vmem:[#allocation5 + $0x28] ss:$48 sps:$4 sm:$0xff]  }
 0x172   :  { %959 = vmatmul.mubr.bf16.gmra.mxu0 %v9399_v54  ;;  %1072 = vmatmul.mubr.bf16.gmra.mxu1 %v9399_v54  ;;  %v8579_v25 = vpop.eup %8578  ;;  %v259_v10 = vmul.f32 %v8577_v20, %v9341_v53  ;;  %v8480_v53 = vld [vmem:[#allocation5 + $0x7c] ss:$48 sps:$4 sm:$0xff]  }
 0x173   :  { %968 = vmatprep.mubr.bf16.mxu0 %v9226_v56  ;;  %1081 = vmatprep.mubr.bf16.mxu1 %v9226_v56  ;;  %v258_v34 = vmul.f32 %v8579_v25, %v9338_v52  ;;  %v8483_v52 = vld [vmem:[#allocation5 + $0x1c] ss:$48 sps:$4 sm:$0xff]   ;;  %v235_v57 = vadd.f32 1e-05, %v219_v49  ;;  %v8505_v25 = vld [vmem:[#allocation5 + $0x1a8] ss:$48 sps:$4 sm:$0xff]  }
 0x174   :  { %1147 = vmatpush1.bf16.msra.mxu0 %v8442_v55  ;;  %1259 = vmatprep.subr.bf16.mxu1 %v8462_v37  ;;  %v218_v37 = vmul.f32 0.0078125, %v201_v48  ;;  %v8501_v20 = vld [vmem:[#allocation5 + $0x20c] ss:$48 sps:$4 sm:$0xff]  }
 0x175   :  { %1148 = vmatprep.subr.bf16.mxu0 %v8447_v59  ;;  %1260 = vmatpush1.bf16.msra.mxu1 %v8460_v60  ;;  %v9415_v40 = vpack.c.bf16 %v259_v10, %v258_v34  ;;  %v8581_v42 = vpop.eup %8580  ;;  %v8489_v59 = vld [vmem:[#allocation5 + $0x2cc] ss:$48 sps:$4 sm:$0xff]   ;;  %8592 = vrsqrt.f32 %v235_v57  ;;  %v8514_v34 = vld [vmem:[#allocation5 + $0xe0] ss:$48 sps:$4 sm:$0xff]  }
 0x176   :  { %1261 = vmatprep.subr.bf16.mxu1 %v8465_v29  ;;  %v8583_v47 = vpop.eup %8582  ;;  %v261_v14 = vmul.f32 %v8581_v42, %v9351_v1  ;;  %v234_v60 = vadd.f32 1e-05, %v218_v37  ;;  %v8513_v10 = vld [vmem:[#allocation5 + $0x14c] ss:$48 sps:$4 sm:$0xff]   ;;  %v8523_v42 = vld [vmem:[#allocation5 + $0x88] ss:$48 sps:$4 sm:$0xff]  }
 0x177   :  { %v260_v55 = vmul.f32 %v8583_v47, %v9348_v0 }
 0x178   :  { %1149 = vmatpush1.bf16.msra.mxu0 %v8445_v4  ;;  %8594 = vrsqrt.f32 %v234_v60 }
 0x179   :  { %1150 = vmatprep.subr.bf16.mxu0 %v8450_v5  ;;  %1262 = vmatpush1.bf16.msra.mxu1 %v8463_v6  ;;  %v9423_v58 = vpack.c.bf16 %v261_v14, %v260_v55  ;;  %v8585_v1 = vpop.eup %8584 }
 0x17a   :  { %969 = vmatmul.mubr.bf16.gmra.mxu0 %v9407_v18  ;;  %1082 = vmatmul.mubr.bf16.gmra.mxu1 %v9407_v18  ;;  %v8587_v61 = vpop.eup %8586  ;;  %v263_v0 = vmul.f32 %v8585_v1, %v9361_v17 }
 0x17b   :  { %978 = vmatprep.mubr.bf16.mxu0 %v9226_v56  ;;  %1091 = vmatprep.mubr.bf16.mxu1 %v9226_v56  ;;  %v262_v29 = vmul.f32 %v8587_v61, %v9358_v9 }
 0x17c   :  { %1151 = vmatpush1.bf16.msra.mxu0 %v8448_v19  ;;  %1263 = vmatprep.subr.bf16.mxu1 %v8471_v45  ;;  %v8495_v19 = vld [vmem:[#allocation5 + $0x26c] ss:$48 sps:$4 sm:$0xff]   ;;  %v8498_v45 = vld [vmem:[#allocation5 + $0x204] ss:$48 sps:$4 sm:$0xff]  }
 0x17d   :  { %1152 = vmatprep.subr.bf16.mxu0 %v8459_v22  ;;  %1264 = vmatpush1.bf16.msra.mxu1 %v8469_v23  ;;  %v9431_v62 = vpack.c.bf16 %v263_v0, %v262_v29  ;;  %v8589_v63 = vpop.eup %8588  ;;  %v8499_v22 = vld [vmem:[#allocation5 + $0x208] ss:$48 sps:$4 sm:$0xff]   ;;  %v8504_v23 = vld [vmem:[#allocation5 + $0x1a4] ss:$48 sps:$4 sm:$0xff]  }
 0x17e   :  { %1265 = vmatprep.subr.bf16.mxu1 %v8474_v44  ;;  %v8591_v2 = vpop.eup %8590  ;;  %v265_v3 = vmul.f32 %v8589_v63, %v9371_v27  ;;  %v8487_v27 = vld [vmem:[#allocation5 + $0x2c8] ss:$48 sps:$4 sm:$0xff]   ;;  %v8502_v44 = vld [vmem:[#allocation5 + $0x1a0] ss:$48 sps:$4 sm:$0xff]  }
 0x17f   :  { %v264_v17 = vmul.f32 %v8591_v2, %v9368_v11  ;;  %v8484_v11 = vld [vmem:[#allocation5 + $0x2c0] ss:$48 sps:$4 sm:$0xff]  }
 0x180   :  { %1153 = vmatpush1.bf16.msra.mxu0 %v8457_v31  ;;  %v8511_v31 = vld [vmem:[#allocation5 + $0x148] ss:$48 sps:$4 sm:$0xff]  }
 0x181   :  { %1154 = vmatprep.subr.bf16.mxu0 %v8468_v32  ;;  %1266 = vmatpush1.bf16.msra.mxu1 %v8472_v33  ;;  %v9439_v4 = vpack.c.bf16 %v265_v3, %v264_v17  ;;  %v8516_v32 = vld [vmem:[#allocation5 + $0xe4] ss:$48 sps:$4 sm:$0xff]   ;;  %v8519_v33 = vld [vmem:[#allocation5 + $0xec] ss:$48 sps:$4 sm:$0xff]  }
 0x182   :  { %979 = vmatmul.mubr.bf16.gmra.mxu0 %v9415_v40  ;;  %1092 = vmatmul.mubr.bf16.gmra.mxu1 %v9415_v40  ;;  %v8593_v9 = vpop.eup %8592 }
 0x183   :  { %988 = vmatprep.mubr.bf16.mxu0 %v9226_v56  ;;  %1101 = vmatprep.mubr.bf16.mxu1 %v9226_v56  ;;  %v267_v6 = vmul.f32 %v8593_v9, %v9381_v41  ;;  %v8493_v41 = vld [vmem:[#allocation5 + $0x268] ss:$48 sps:$4 sm:$0xff]  }
 0x184   :  { %1155 = vmatpush1.bf16.msra.mxu0 %v8466_v12  ;;  %1267 = vmatprep.subr.bf16.mxu1 %v8480_v53  ;;  %v8525_v12 = vld [vmem:[#allocation5 + $0x8c] ss:$48 sps:$4 sm:$0xff]   ;;  %v8520_v53 = vld [vmem:[#allocation5 + $0x80] ss:$48 sps:$4 sm:$0xff]  }
 0x185   :  { %1156 = vmatprep.subr.bf16.mxu0 %v8477_v46  ;;  %1268 = vmatpush1.bf16.msra.mxu1 %v8478_v28  ;;  %v8595_v5 = vpop.eup %8594  ;;  %v8531_v46 = vld [vmem:[#allocation5 + $0x2c] ss:$48 sps:$4 sm:$0xff]   ;;  %v8526_v28 = vld [vmem:[#allocation5 + $0x20] ss:$48 sps:$4 sm:$0xff]  }
 0x186   :  { %1269 = vmatprep.subr.bf16.mxu1 %v8483_v52  ;;  %v266_v7 = vmul.f32 %v8595_v5, %v9378_v13  ;;  %v8490_v13 = vld [vmem:[#allocation5 + $0x260] ss:$48 sps:$4 sm:$0xff]  }
 0x187   :  { %v9519_v52 = vld [vmem:[#allocation7] sm:$0xff] }
 0x188   :  { %1157 = vmatpush1.bf16.msra.mxu0 %v8475_v50  ;;  %v9447_v16 = vpack.c.bf16 %v267_v6, %v266_v7 }
 0x189   :  { %1270 = vmatpush1.bf16.msra.mxu1 %v8481_v15  ;;  %1368 = vmatprep.subr.bf16.mxu0 %v8486_v51 }
 0x18a   :  { %989 = vmatmul.mubr.bf16.gmra.mxu0 %v9423_v58  ;;  %1102 = vmatmul.mubr.bf16.gmra.mxu1 %v9423_v58 }
 0x18b   :  { %998 = vmatprep.mubr.bf16.mxu0 %v9226_v56  ;;  %1111 = vmatprep.mubr.bf16.mxu1 %v9226_v56 }
 0x18c   :  { %1481 = vmatprep.subr.bf16.mxu1 %v8489_v59 }
 0x192   :  { %999 = vmatmul.mubr.bf16.gmra.mxu0 %v9431_v62  ;;  %1112 = vmatmul.mubr.bf16.gmra.mxu1 %v9431_v62 }
 0x193   :  { %1008 = vmatprep.mubr.bf16.mxu0 %v9226_v56  ;;  %1121 = vmatprep.mubr.bf16.mxu1 %v9226_v56 }
 0x19a   :  { %1009 = vmatmul.mubr.bf16.gmra.mxu0 %v9439_v4  ;;  %1122 = vmatmul.mubr.bf16.gmra.mxu1 %v9439_v4 }
 0x19b   :  { %1018 = vmatprep.mubr.bf16.mxu0 %v9226_v56  ;;  %1131 = vmatprep.mubr.bf16.mxu1 %v9226_v56 }
 0x1a2   :  { %1019 = vmatmul.mubr.bf16.gmra.mxu0 %v9447_v16  ;;  %1132 = vmatmul.mubr.bf16.gmra.mxu1 %v9447_v16 }
 0x1a3   :  { %1174 = vmatprep.mubr.bf16.mxu0 %v9226_v56  ;;  %1287 = vmatprep.mubr.bf16.mxu1 %v9226_v56 }
 0x1aa   :  { %1175 = vmatmul.mubr.bf16.vlgmr.msra.gmra.mxu0 %v9391_v35  ;;  %1288 = vmatmul.mubr.bf16.vlgmr.msra.gmra.mxu1 %v9391_v35 }
 0x1ab   :  { %1184 = vmatprep.mubr.bf16.mxu0 %v9226_v56  ;;  %1297 = vmatprep.mubr.bf16.mxu1 %v9226_v56 }
 0x1ac   :  { %1369 = vmatpush1.bf16.msra.mxu0 %v8484_v11  ;;  %1482 = vmatpush1.bf16.msra.mxu1 %v8487_v27 }
 0x1ad   :  { %1370 = vmatprep.subr.bf16.mxu0 %v8492_v8  ;;  %1483 = vmatprep.subr.bf16.mxu1 %v8495_v19 }
 0x1b0   :  { %1371 = vmatpush1.bf16.msra.mxu0 %v8490_v13  ;;  %1484 = vmatpush1.bf16.msra.mxu1 %v8493_v41 }
 0x1b1   :  { %1372 = vmatprep.subr.bf16.mxu0 %v8498_v45  ;;  %1485 = vmatprep.subr.bf16.mxu1 %v8501_v20 }
 0x1b2   :  { %1185 = vmatmul.mubr.bf16.gmra.mxu0 %v9399_v54  ;;  %1298 = vmatmul.mubr.bf16.gmra.mxu1 %v9399_v54 }
 0x1b3   :  { %1194 = vmatprep.mubr.bf16.mxu0 %v9226_v56  ;;  %1307 = vmatprep.mubr.bf16.mxu1 %v9226_v56 }
 0x1b4   :  { %1373 = vmatpush1.bf16.msra.mxu0 %v8496_v21  ;;  %1486 = vmatpush1.bf16.msra.mxu1 %v8499_v22 }
 0x1b5   :  { %1374 = vmatprep.subr.bf16.mxu0 %v8504_v23  ;;  %1487 = vmatprep.subr.bf16.mxu1 %v8507_v24 }
 0x1b8   :  { %1375 = vmatpush1.bf16.msra.mxu0 %v8502_v44  ;;  %1488 = vmatpush1.bf16.msra.mxu1 %v8505_v25 }
 0x1b9   :  { %1376 = vmatprep.subr.bf16.mxu0 %v8510_v26  ;;  %1489 = vmatprep.subr.bf16.mxu1 %v8513_v10 }
 0x1ba   :  { %1195 = vmatmul.mubr.bf16.gmra.mxu0 %v9407_v18  ;;  %1308 = vmatmul.mubr.bf16.gmra.mxu1 %v9407_v18 }
 0x1bb   :  { %1204 = vmatprep.mubr.bf16.mxu0 %v9226_v56  ;;  %1317 = vmatprep.mubr.bf16.mxu1 %v9226_v56 }
 0x1bc   :  { %1377 = vmatpush1.bf16.msra.mxu0 %v8508_v30  ;;  %1490 = vmatpush1.bf16.msra.mxu1 %v8511_v31 }
 0x1bd   :  { %1378 = vmatprep.subr.bf16.mxu0 %v8516_v32  ;;  %1491 = vmatprep.subr.bf16.mxu1 %v8519_v33 }
 0x1c0   :  { %1379 = vmatpush1.bf16.msra.mxu0 %v8514_v34  ;;  %1492 = vmatpush1.bf16.msra.mxu1 %v8517_v38 }
 0x1c1   :  { %1380 = vmatprep.subr.bf16.mxu0 %v8522_v39  ;;  %1493 = vmatprep.subr.bf16.mxu1 %v8525_v12 }
 0x1c2   :  { %1205 = vmatmul.mubr.bf16.gmra.mxu0 %v9415_v40  ;;  %1318 = vmatmul.mubr.bf16.gmra.mxu1 %v9415_v40 }
 0x1c3   :  { %1214 = vmatprep.mubr.bf16.mxu0 %v9226_v56  ;;  %1327 = vmatprep.mubr.bf16.mxu1 %v9226_v56 }
 0x1c4   :  { %1381 = vmatpush1.bf16.msra.mxu0 %v8520_v53  ;;  %1494 = vmatpush1.bf16.msra.mxu1 %v8523_v42 }
 0x1c5   :  { %1382 = vmatprep.subr.bf16.mxu0 %v8528_v43  ;;  %1495 = vmatprep.subr.bf16.mxu1 %v8531_v46 }
 0x1c8   :  { %1383 = vmatpush1.bf16.msra.mxu0 %v8526_v28  ;;  %1496 = vmatpush1.bf16.msra.mxu1 %v8529_v36 }
 0x1ca   :  { %1215 = vmatmul.mubr.bf16.gmra.mxu0 %v9423_v58  ;;  %1328 = vmatmul.mubr.bf16.gmra.mxu1 %v9423_v58 }
 0x1cb   :  { %1224 = vmatprep.mubr.bf16.mxu0 %v9226_v56  ;;  %1337 = vmatprep.mubr.bf16.mxu1 %v9226_v56 }
 0x1d2   :  { %1225 = vmatmul.mubr.bf16.gmra.mxu0 %v9431_v62  ;;  %1338 = vmatmul.mubr.bf16.gmra.mxu1 %v9431_v62 }
 0x1d3   :  { %1234 = vmatprep.mubr.bf16.mxu0 %v9226_v56  ;;  %1347 = vmatprep.mubr.bf16.mxu1 %v9226_v56 }
 0x1da   :  { %1235 = vmatmul.mubr.bf16.gmra.mxu0 %v9439_v4  ;;  %1348 = vmatmul.mubr.bf16.gmra.mxu1 %v9439_v4 }
 0x1db   :  { %1244 = vmatprep.mubr.bf16.mxu0 %v9226_v56  ;;  %1357 = vmatprep.mubr.bf16.mxu1 %v9226_v56 }
 0x1e2   :  { %1245 = vmatmul.mubr.bf16.gmra.mxu0 %v9447_v16  ;;  %1358 = vmatmul.mubr.bf16.gmra.mxu1 %v9447_v16 }
 0x1e3   :  { %1400 = vmatprep.mubr.bf16.mxu0 %v9226_v56  ;;  %1513 = vmatprep.mubr.bf16.mxu1 %v9226_v56 }
 0x1ea   :  { %1401 = vmatmul.mubr.bf16.vlgmr.msra.gmra.mxu0 %v9391_v35  ;;  %1514 = vmatmul.mubr.bf16.vlgmr.msra.gmra.mxu1 %v9391_v35  ;;  %v376_v35 = vlaneseq }
 0x1eb   :  { %1410 = vmatprep.mubr.bf16.mxu0 %v9226_v56  ;;  %1523 = vmatprep.mubr.bf16.mxu1 %v9226_v56 }
 0x1f2   :  { %1411 = vmatmul.mubr.bf16.gmra.mxu0 %v9399_v54  ;;  %1524 = vmatmul.mubr.bf16.gmra.mxu1 %v9399_v54  ;;  %v9515_v54 = vshrl.u32 %v376_v35, 7 }
 0x1f3   :  { %1420 = vmatprep.mubr.bf16.mxu0 %v9226_v56  ;;  %1533 = vmatprep.mubr.bf16.mxu1 %v9226_v56 }
 0x1f4   :  { %v12510_v34 = vsub.s32 1, %v9515_v54  ;;  %v12509_v12 = vsub.s32 3, %v9515_v54 }
 0x1fa   :  { %1421 = vmatmul.mubr.bf16.gmra.mxu0 %v9407_v18  ;;  %1534 = vmatmul.mubr.bf16.gmra.mxu1 %v9407_v18  ;;  %v12508_v18 = vsub.s32 0, %v9515_v54 }
 0x1fb   :  { %1430 = vmatprep.mubr.bf16.mxu0 %v9226_v56  ;;  %1543 = vmatprep.mubr.bf16.mxu1 %v9226_v56 }
 0x1fc   :  { %v9524_v14 = vrot.slane %v9519_v52, %v12508_v18 }
 0x202   :  { %1431 = vmatmul.mubr.bf16.gmra.mxu0 %v9415_v40  ;;  %1544 = vmatmul.mubr.bf16.gmra.mxu1 %v9415_v40  ;;  %v12511_v40 = vsub.s32 2, %v9515_v54 }
 0x203   :  { %1440 = vmatprep.mubr.bf16.mxu0 %v9226_v56  ;;  %1553 = vmatprep.mubr.bf16.mxu1 %v9226_v56 }
 0x20a   :  { %1441 = vmatmul.mubr.bf16.gmra.mxu0 %v9423_v58  ;;  %1554 = vmatmul.mubr.bf16.gmra.mxu1 %v9423_v58 }
 0x20b   :  { %1450 = vmatprep.mubr.bf16.mxu0 %v9226_v56  ;;  %1563 = vmatprep.mubr.bf16.mxu1 %v9226_v56 }
 0x212   :  { %1451 = vmatmul.mubr.bf16.gmra.mxu0 %v9431_v62  ;;  %1564 = vmatmul.mubr.bf16.gmra.mxu1 %v9431_v62 }
 0x213   :  { %1460 = vmatprep.mubr.bf16.mxu0 %v9226_v56  ;;  %1573 = vmatprep.mubr.bf16.mxu1 %v9226_v56 }
 0x21a   :  { %1461 = vmatmul.mubr.bf16.gmra.mxu0 %v9439_v4  ;;  %1574 = vmatmul.mubr.bf16.gmra.mxu1 %v9439_v4 }
 0x21b   :  { %1470 = vmatprep.mubr.bf16.mxu0 %v9226_v56  ;;  %1583 = vmatprep.mubr.bf16.mxu1 %v9226_v56  ;;  %v9529_v56 = vrot.slane %v9519_v52, %v12511_v40 }
 0x222   :  { %1471 = vmatmul.mubr.bf16.gmra.mxu0 %v9447_v16  ;;  %1584 = vmatmul.mubr.bf16.gmra.mxu1 %v9447_v16 }
 0x22a   :  { %v950_v47 = vpop.f32.mrf.mxu0  ;;  %v1063_v48 = vpop.f32.mrf.mxu1 }
 0x22b   :  { %v951_v55 = vadd.f32 %v950_v47, %v9524_v14  ;;  %v1064_v37 = vadd.f32 %v1063_v48, %v9529_v56 }
 0x22c   :  { %v9531_v49 = vpop.f32.mrf.mxu0  ;;  %v9533_v50 = vpop.f32.mrf.mxu1 }
 0x22d   :  { %12661 = vst [vmem:[#allocation15_spill] sm:$0xff] %v9533_v50 }
 0x22e   :  { %v954_v15 = vpop.f32.mrf.mxu0  ;;  %v1067_v51 = vpop.f32.mrf.mxu1 }
 0x22f   :  { %v955_v57 = vadd.f32 %v954_v15, %v9524_v14  ;;  %v1068_v58 = vadd.f32 %v1067_v51, %v9529_v56  ;;  %v9602_v15 = vrot.slane %v9519_v52, %v12510_v34  ;;  %v9607_v51 = vrot.slane %v9519_v52, %v12509_v12 }
 0x230   :  { %v9539_v59 = vpop.f32.mrf.mxu0  ;;  %v9541_v1 = vpop.f32.mrf.mxu1 }
 0x231   :  { %12662 = vst [vmem:[#allocation16_spill] sm:$0xff] %v9541_v1  ;;  %v9543_v60 = vpack.c.bf16 %v955_v57, %v951_v55  ;;  %v9545_v61 = vpack.c.bf16 %v1068_v58, %v1064_v37  ;;  %12672 = vst [vmem:[#allocation26_spill] sm:$0xff] %v9607_v51 }
 0x232   :  { %v960_v0 = vpop.f32.mrf.mxu0  ;;  %v1073_v29 = vpop.f32.mrf.mxu1 }
 0x233   :  { %v961_v62 = vadd.f32 %v960_v0, %v9524_v14  ;;  %7632 = vmatprep.mubr.msk.bf16.mxu0 %vm1662_vm0, %v9543_v60  ;;  %v1074_v4 = vadd.f32 %v1073_v29, %v9529_v56 }
 0x234   :  { %v9550_v63 = vpop.f32.mrf.mxu0  ;;  %v9552_v2 = vpop.f32.mrf.mxu1 }
 0x235   :  { %12663 = vst [vmem:[#allocation17_spill] sm:$0xff] %v9552_v2 }
 0x236   :  { %v964_v3 = vpop.f32.mrf.mxu0  ;;  %v1077_v17 = vpop.f32.mrf.mxu1 }
 0x237   :  { %v965_v9 = vadd.f32 %v964_v3, %v9524_v14  ;;  %v1078_v5 = vadd.f32 %v1077_v17, %v9529_v56 }
 0x238   :  { %v9557_v6 = vpop.f32.mrf.mxu0  ;;  %v9559_v7 = vpop.f32.mrf.mxu1 }
 0x239   :  { %12664 = vst [vmem:[#allocation18_spill] sm:$0xff] %v9559_v7  ;;  %v9561_v16 = vpack.c.bf16 %v1078_v5, %v1074_v4  ;;  %v9563_v11 = vpack.c.bf16 %v965_v9, %v961_v62 }
 0x23a   :  { %v970_v27 = vpop.f32.mrf.mxu0  ;;  %v1083_v8 = vpop.f32.mrf.mxu1 }
 0x23b   :  { %12665 = vst [vmem:[#allocation19_spill] sm:$0xff] %v9561_v16  ;;  %v971_v19 = vadd.f32 %v970_v27, %v9524_v14  ;;  %v1084_v21 = vadd.f32 %v1083_v8, %v9529_v56 }
 0x23c   :  { %v9566_v13 = vpop.f32.mrf.mxu0  ;;  %v9568_v41 = vpop.f32.mrf.mxu1 }
 0x23d   :  { %12666 = vst [vmem:[#allocation20_spill] sm:$0xff] %v9568_v41 }
 0x23e   :  { %v974_v45 = vpop.f32.mrf.mxu0  ;;  %v1087_v20 = vpop.f32.mrf.mxu1 }
 0x23f   :  { %v975_v22 = vadd.f32 %v974_v45, %v9524_v14  ;;  %v1088_v23 = vadd.f32 %v1087_v20, %v9529_v56 }
 0x240   :  { %v9573_v24 = vpop.f32.mrf.mxu0  ;;  %v9575_v44 = vpop.f32.mrf.mxu1 }
 0x241   :  { %12667 = vst [vmem:[#allocation21_spill] sm:$0xff] %v9575_v44  ;;  %v9577_v25 = vpack.c.bf16 %v1088_v23, %v1084_v21  ;;  %v9579_v26 = vpack.c.bf16 %v975_v22, %v971_v19 }
 0x242   :  { %v980_v10 = vpop.f32.mrf.mxu0  ;;  %v1093_v30 = vpop.f32.mrf.mxu1 }
 0x243   :  { %12668 = vst [vmem:[#allocation22_spill] sm:$0xff] %v9577_v25  ;;  %v981_v31 = vadd.f32 %v980_v10, %v9524_v14  ;;  %v1094_v53 = vadd.f32 %v1093_v30, %v9529_v56 }
 0x244   :  { %v9582_v32 = vpop.f32.mrf.mxu0  ;;  %v9584_v33 = vpop.f32.mrf.mxu1 }
 0x245   :  { %12669 = vst [vmem:[#allocation23_spill] sm:$0xff] %v9584_v33 }
 0x246   :  { %v984_v38 = vpop.f32.mrf.mxu0  ;;  %v1097_v39 = vpop.f32.mrf.mxu1 }
 0x247   :  { %v985_v42 = vadd.f32 %v984_v38, %v9524_v14  ;;  %v1098_v43 = vadd.f32 %v1097_v39, %v9529_v56 }
 0x248   :  { %v9591_v46 = vpop.f32.mrf.mxu0  ;;  %v9593_v28 = vpop.f32.mrf.mxu1 }
 0x249   :  { %12670 = vst [vmem:[#allocation24_spill] sm:$0xff] %v9593_v28  ;;  %v9595_v36 = vpack.c.bf16 %v1098_v43, %v1094_v53  ;;  %v9597_v35 = vpack.c.bf16 %v985_v42, %v981_v31 }
 0x24a   :  { %v990_v47 = vpop.f32.mrf.mxu0  ;;  %v1103_v48 = vpop.f32.mrf.mxu1 }
 0x24b   :  { %12671 = vst [vmem:[#allocation25_spill] sm:$0xff] %v9595_v36  ;;  %v991_v55 = vadd.f32 %v990_v47, %v9524_v14  ;;  %v1104_v37 = vadd.f32 %v1103_v48, %v9529_v56 }
 0x24c   :  { %v992_v57 = vpop.f32.mrf.mxu0  ;;  %v1105_v58 = vpop.f32.mrf.mxu1 }
 0x24d   :  { %v993_v0 = vadd.f32 %v992_v57, %v9602_v15  ;;  %v1106_v29 = vadd.f32 %v1105_v58, %v9607_v51 }
 0x24e   :  { %v994_v62 = vpop.f32.mrf.mxu0  ;;  %v1107_v3 = vpop.f32.mrf.mxu1 }
 0x24f   :  { %v995_v17 = vadd.f32 %v994_v62, %v9524_v14  ;;  %v1108_v4 = vadd.f32 %v1107_v3, %v9529_v56 }
 0x250   :  { %v996_v9 = vpop.f32.mrf.mxu0  ;;  %v1109_v5 = vpop.f32.mrf.mxu1 }
 0x251   :  { %v9615_v27 = vpack.c.bf16 %v995_v17, %v991_v55  ;;  %v9617_v8 = vpack.c.bf16 %v1108_v4, %v1104_v37  ;;  %v997_v19 = vadd.f32 %v996_v9, %v9602_v15  ;;  %v1110_v45 = vadd.f32 %v1109_v5, %v9607_v51 }
 0x252   :  { %v1000_v20 = vpop.f32.mrf.mxu0  ;;  %v1113_v21 = vpop.f32.mrf.mxu1 }
 0x253   :  { %12673 = vst [vmem:[#allocation27_spill] sm:$0xff] %v9615_v27  ;;  %12674 = vst [vmem:[#allocation28_spill] sm:$0xff] %v9617_v8  ;;  %v9621_v22 = vpack.c.bf16 %v997_v19, %v993_v0  ;;  %v9623_v23 = vpack.c.bf16 %v1110_v45, %v1106_v29  ;;  %v1001_v10 = vadd.f32 %v1000_v20, %v9524_v14 }
 0x254   :  { %v1114_v30 = vadd.f32 %v1113_v21, %v9529_v56  ;;  %v1002_v31 = vpop.f32.mrf.mxu0  ;;  %v1115_v38 = vpop.f32.mrf.mxu1 }
 0x255   :  { %12675 = vst [vmem:[#allocation29_spill] sm:$0xff] %v9621_v22  ;;  %12676 = vst [vmem:[#allocation30_spill] sm:$0xff] %v9623_v23  ;;  %v1003_v39 = vadd.f32 %v1002_v31, %v9602_v15  ;;  %v1116_v53 = vadd.f32 %v1115_v38, %v9607_v51 }
 0x256   :  { %v1004_v42 = vpop.f32.mrf.mxu0  ;;  %v1117_v43 = vpop.f32.mrf.mxu1 }
 0x257   :  { %v1005_v47 = vadd.f32 %v1004_v42, %v9524_v14  ;;  %v1118_v48 = vadd.f32 %v1117_v43, %v9529_v56 }
 0x258   :  { %v1006_v55 = vpop.f32.mrf.mxu0  ;;  %v1119_v37 = vpop.f32.mrf.mxu1 }
 0x259   :  { %v9631_v57 = vpack.c.bf16 %v1005_v47, %v1001_v10  ;;  %v9633_v58 = vpack.c.bf16 %v1118_v48, %v1114_v30  ;;  %v1007_v0 = vadd.f32 %v1006_v55, %v9602_v15  ;;  %v1120_v29 = vadd.f32 %v1119_v37, %v9607_v51 }
 0x25a   :  { %v1010_v62 = vpop.f32.mrf.mxu0  ;;  %v1123_v3 = vpop.f32.mrf.mxu1 }
 0x25b   :  { %12677 = vst [vmem:[#allocation31_spill] sm:$0xff] %v9631_v57  ;;  %12678 = vst [vmem:[#allocation32_spill] sm:$0xff] %v9633_v58  ;;  %v9637_v17 = vpack.c.bf16 %v1007_v0, %v1003_v39  ;;  %v9639_v4 = vpack.c.bf16 %v1120_v29, %v1116_v53  ;;  %v1011_v9 = vadd.f32 %v1010_v62, %v9524_v14 }
 0x25c   :  { %v1124_v5 = vadd.f32 %v1123_v3, %v9529_v56  ;;  %v1012_v19 = vpop.f32.mrf.mxu0  ;;  %v1125_v45 = vpop.f32.mrf.mxu1 }
 0x25d   :  { %12679 = vst [vmem:[#allocation33_spill] sm:$0xff] %v9637_v17  ;;  %12680 = vst [vmem:[#allocation34_spill] sm:$0xff] %v9639_v4  ;;  %v1013_v20 = vadd.f32 %v1012_v19, %v9602_v15  ;;  %v1126_v21 = vadd.f32 %v1125_v45, %v9607_v51 }
 0x25e   :  { %v1014_v10 = vpop.f32.mrf.mxu0  ;;  %v1127_v30 = vpop.f32.mrf.mxu1 }
 0x25f   :  { %v1015_v31 = vadd.f32 %v1014_v10, %v9524_v14  ;;  %v1128_v38 = vadd.f32 %v1127_v30, %v9529_v56 }
 0x260   :  { %v1016_v39 = vpop.f32.mrf.mxu0  ;;  %v1129_v42 = vpop.f32.mrf.mxu1 }
 0x261   :  { %v9647_v53 = vpack.c.bf16 %v1015_v31, %v1011_v9  ;;  %v9649_v43 = vpack.c.bf16 %v1128_v38, %v1124_v5  ;;  %v1017_v47 = vadd.f32 %v1016_v39, %v9602_v15  ;;  %v1130_v48 = vadd.f32 %v1129_v42, %v9607_v51 }
 0x262   :  { %v1020_v55 = vpop.f32.mrf.mxu0  ;;  %v1133_v37 = vpop.f32.mrf.mxu1 }
 0x263   :  { %12681 = vst [vmem:[#allocation35_spill] sm:$0xff] %v9647_v53  ;;  %12682 = vst [vmem:[#allocation36_spill] sm:$0xff] %v9649_v43  ;;  %v9653_v0 = vpack.c.bf16 %v1017_v47, %v1013_v20  ;;  %v9655_v29 = vpack.c.bf16 %v1130_v48, %v1126_v21  ;;  %v1021_v62 = vadd.f32 %v1020_v55, %v9524_v14  ;;  %v402_v20 = vsub.s32 6, %v9515_v54 }
 0x264   :  { %v1134_v3 = vadd.f32 %v1133_v37, %v9529_v56  ;;  %v1022_v19 = vpop.f32.mrf.mxu0  ;;  %v1135_v45 = vpop.f32.mrf.mxu1  ;;  %v398_v53 = vsub.s32 5, %v9515_v54 }
 0x265   :  { %12683 = vst [vmem:[#allocation37_spill] sm:$0xff] %v9653_v0  ;;  %12684 = vst [vmem:[#allocation38_spill] sm:$0xff] %v9655_v29  ;;  %v1023_v9 = vadd.f32 %v1022_v19, %v9602_v15  ;;  %v1136_v5 = vadd.f32 %v1135_v45, %v9607_v51 }
 0x266   :  { %v1024_v10 = vpop.f32.mrf.mxu0  ;;  %v1137_v30 = vpop.f32.mrf.mxu1 }
 0x267   :  { %v1025_v31 = vadd.f32 %v1024_v10, %v9524_v14  ;;  %v1138_v38 = vadd.f32 %v1137_v30, %v9529_v56  ;;  %v9675_v14 = vrot.slane %v9519_v52, %v402_v20 }
 0x268   :  { %v1026_v21 = vpop.f32.mrf.mxu0  ;;  %v1139_v39 = vpop.f32.mrf.mxu1 }
 0x269   :  { %v9664_v42 = vpack.c.bf16 %v1025_v31, %v1021_v62  ;;  %v9666_v47 = vpack.c.bf16 %v1138_v38, %v1134_v3  ;;  %v1027_v48 = vadd.f32 %v1026_v21, %v9602_v15  ;;  %v1140_v55 = vadd.f32 %v1139_v39, %v9607_v51 }
 0x26a   :  { %v1176_v37 = vpop.f32.mrf.mxu0  ;;  %v1289_v19 = vpop.f32.mrf.mxu1 }
 0x26b   :  { %12685 = vst [vmem:[#allocation39_spill] sm:$0xff] %v9664_v42  ;;  %12686 = vst [vmem:[#allocation40_spill] sm:$0xff] %v9666_v47  ;;  %v9670_v45 = vpack.c.bf16 %v1027_v48, %v1023_v9  ;;  %v9672_v18 = vpack.c.bf16 %v1140_v55, %v1136_v5  ;;  %v1290_v30 = vadd.f32 %v1289_v19, %v9675_v14 }
 0x26c   :  { %v9677_v56 = vpop.f32.mrf.mxu0  ;;  %v9679_v10 = vpop.f32.mrf.mxu1 }
 0x26d   :  { %12687 = vst [vmem:[#allocation41_spill] sm:$0xff] %v9670_v45  ;;  %12688 = vst [vmem:[#allocation42_spill] sm:$0xff] %v9672_v18  ;;  %v394_v18 = vsub.s32 4, %v9515_v54 }
 0x26e   :  { %12689 = vst [vmem:[#allocation43_spill] sm:$0xff] %v9679_v10  ;;  %v1180_v62 = vpop.f32.mrf.mxu0  ;;  %v1293_v3 = vpop.f32.mrf.mxu1 }
 0x26f   :  { %v1294_v31 = vadd.f32 %v1293_v3, %v9675_v14  ;;  %v9707_v47 = vrot.slane %v9519_v52, %v394_v18 }
 0x270   :  { %v9683_v38 = vpop.f32.mrf.mxu0  ;;  %v9685_v21 = vpop.f32.mrf.mxu1 }
 0x271   :  { %12690 = vst [vmem:[#allocation44_spill] sm:$0xff] %v9685_v21  ;;  %v9687_v9 = vpack.c.bf16 %v1294_v31, %v1290_v30 }
 0x272   :  { %v1186_v5 = vpop.f32.mrf.mxu0  ;;  %v1299_v39 = vpop.f32.mrf.mxu1 }
 0x273   :  { %12691 = vst [vmem:[#allocation45_spill] sm:$0xff] %v9687_v9  ;;  %v1300_v34 = vadd.f32 %v1299_v39, %v9675_v14 }
 0x274   :  { %v9689_v20 = vpop.f32.mrf.mxu0  ;;  %v9691_v48 = vpop.f32.mrf.mxu1 }
 0x275   :  { %12692 = vst [vmem:[#allocation46_spill] sm:$0xff] %v9691_v48 }
 0x276   :  { %v1190_v55 = vpop.f32.mrf.mxu0  ;;  %v1303_v12 = vpop.f32.mrf.mxu1 }
 0x277   :  { %v1304_v19 = vadd.f32 %v1303_v12, %v9675_v14  ;;  %v1191_v0 = vadd.f32 %v1190_v55, %v9707_v47 }
 0x278   :  { %v9695_v40 = vpop.f32.mrf.mxu0  ;;  %v9697_v3 = vpop.f32.mrf.mxu1 }
 0x279   :  { %12693 = vst [vmem:[#allocation47_spill] sm:$0xff] %v9697_v3  ;;  %v9700_v30 = vpack.c.bf16 %v1304_v19, %v1300_v34 }
 0x27a   :  { %v1196_v31 = vpop.f32.mrf.mxu0  ;;  %v1309_v29 = vpop.f32.mrf.mxu1 }
 0x27b   :  { %v1197_v12 = vadd.f32 %v1196_v31, %v9707_v47  ;;  %v1310_v58 = vadd.f32 %v1309_v29, %v9675_v14  ;;  %v1187_v31 = vadd.f32 %v1186_v5, %v9707_v47 }
 0x27c   :  { %v9702_v4 = vpop.f32.mrf.mxu0  ;;  %v9704_v23 = vpop.f32.mrf.mxu1 }
 0x27d   :  { %12694 = vst [vmem:[#allocation48_spill] sm:$0xff] %v9704_v23 }
 0x27e   :  { %v1200_v39 = vpop.f32.mrf.mxu0  ;;  %v1313_v43 = vpop.f32.mrf.mxu1 }
 0x27f   :  { %v1201_v8 = vadd.f32 %v1200_v39, %v9707_v47  ;;  %v1314_v34 = vadd.f32 %v1313_v43, %v9675_v14  ;;  %v9729_v39 = vpack.c.bf16 %v1191_v0, %v1187_v31  ;;  %v1177_v0 = vadd.f32 %v1176_v37, %v9707_v47 }
 0x280   :  { %v9713_v19 = vpop.f32.mrf.mxu0  ;;  %v9715_v45 = vpop.f32.mrf.mxu1 }
 0x281   :  { %12695 = vst [vmem:[#allocation49_spill] sm:$0xff] %v9715_v45  ;;  %v9718_v17 = vpack.c.bf16 %v1201_v8, %v1197_v12  ;;  %v9720_v18 = vpack.c.bf16 %v1314_v34, %v1310_v58  ;;  %v406_v8 = vsub.s32 7, %v9515_v54  ;;  %v1181_v58 = vadd.f32 %v1180_v62, %v9707_v47 }
 0x282   :  { %v1206_v22 = vpop.f32.mrf.mxu0  ;;  %v1319_v42 = vpop.f32.mrf.mxu1 }
 0x283   :  { %1941 = vrot.lane.b32.xlu1 %v9718_v17, %s9224_s0  ;;  %v1207_v34 = vadd.f32 %v1206_v22, %v9707_v47  ;;  %v1320_v5 = vadd.f32 %v1319_v42, %v9675_v14  ;;  %v9747_v41 = vpack.c.bf16 %v1181_v58, %v1177_v0 }
 0x284   :  { %v9725_v29 = vpop.f32.mrf.mxu0  ;;  %v9727_v43 = vpop.f32.mrf.mxu1 }
 0x285   :  { %12696 = vst [vmem:[#allocation50_spill] sm:$0xff] %v9727_v43 }
 0x286   :  { %v1210_v55 = vpop.f32.mrf.mxu0  ;;  %v1323_v12 = vpop.f32.mrf.mxu1 }
 0x287   :  { %v1211_v57 = vadd.f32 %v1210_v55, %v9707_v47  ;;  %v1324_v27 = vadd.f32 %v1323_v12, %v9675_v14  ;;  %1939 = vrot.lane.b32.xlu1 %v9729_v39, %s9224_s0  ;;  %v9750_v55 = vrot.slane %v9519_v52, %v398_v53  ;;  %v9753_v12 = vrot.slane %v9519_v52, %v406_v8 }
 0x288   :  { %v9741_v31 = vpop.f32.mrf.mxu0  ;;  %v9743_v33 = vpop.f32.mrf.mxu1 }
 0x289   :  { %12697 = vst [vmem:[#allocation51_spill] sm:$0xff] %v9743_v33  ;;  %v1606_v62 = vpack.c.bf16 %v1211_v57, %v1207_v34  ;;  %v9745_v28 = vpack.c.bf16 %v1324_v27, %v1320_v5  ;;  %12698 = vst [vmem:[#allocation52_spill] sm:$0xff] %v9753_v12 }
 0x28a   :  { %v1216_v22 = vpop.f32.mrf.mxu0  ;;  %v1329_v42 = vpop.f32.mrf.mxu1 }
 0x28b   :  { %v1217_v2 = vadd.f32 %v1216_v22, %v9707_v47  ;;  %v1330_v37 = vadd.f32 %v1329_v42, %v9675_v14  ;;  %1943 = vrot.lane.b32.xlu0 %v1606_v62, %s9224_s0  ;;  %8152 = vmatprep.subr.msk.bf16.mxu0 %vm1662_vm0, %v1606_v62  ;;  %v1685_v58 = vsel %vm1662_vm0, %v1606_v62, 0 }
 0x28c   :  { %1937 = vrot.lane.b32.xlu1 %v9747_v41, %s9224_s0  ;;  %v1218_v27 = vpop.f32.mrf.mxu0  ;;  %v1331_v57 = vpop.f32.mrf.mxu1  ;;  %7625 = vmatpush3.bf16.xpose.msra.mxu0 %v1685_v58 }
 0x28d   :  { %v1219_v53 = vadd.f32 %v1218_v27, %v9750_v55  ;;  %v1332_v52 = vadd.f32 %v1331_v57, %v9753_v12  ;;  %8153 = vmatprep.subr.msk.bf16.mxu0 %vm1662_vm0, %v9718_v17 }
 0x28e   :  { %v1220_v8 = vpop.f32.mrf.mxu0  ;;  %v1333_v34 = vpop.f32.mrf.mxu1 }
 0x28f   :  { %v1221_v5 = vadd.f32 %v1220_v8, %v9707_v47  ;;  %v1334_v0 = vadd.f32 %v1333_v34, %v9675_v14  ;;  %1925 = vrot.lane.b32.xlu0 %v9543_v60, %s9224_s0 }
 0x290   :  { %1927 = vrot.lane.b32.xlu1 %v9563_v11, %s9224_s0  ;;  %v1222_v62 = vpop.f32.mrf.mxu0  ;;  %v1335_v22 = vpop.f32.mrf.mxu1 }
 0x291   :  { %v9772_v42 = vpack.c.bf16 %v1221_v5, %v1217_v2  ;;  %v9774_v27 = vpack.c.bf16 %v1334_v0, %v1330_v37  ;;  %v1223_v57 = vadd.f32 %v1222_v62, %v9750_v55  ;;  %v1336_v58 = vadd.f32 %v1335_v22, %v9753_v12 }
 0x292   :  { %v1226_v44 = vpop.f32.mrf.mxu0  ;;  %v1339_v8 = vpop.f32.mrf.mxu1  ;;  %v1682_v5 = vsel %vm1662_vm0, %v9718_v17, 0 }
 0x293   :  { %12699 = vst [vmem:[#allocation53_spill] sm:$0xff] %v9772_v42  ;;  %12700 = vst [vmem:[#allocation54_spill] sm:$0xff] %v9774_v27  ;;  %v9778_v7 = vpack.c.bf16 %v1223_v57, %v1219_v53  ;;  %v9780_v34 = vpack.c.bf16 %v1336_v58, %v1332_v52  ;;  %v1227_v60 = vadd.f32 %v1226_v44, %v9707_v47  ;;  %1929 = vrot.lane.b32.xlu0 %v9579_v26, %s9224_s0 }
 0x294   :  { %v1340_v10 = vadd.f32 %v1339_v8, %v9675_v14  ;;  %1931 = vrot.lane.b32.xlu1 %v9597_v35, %s9224_s0  ;;  %v1228_v2 = vpop.f32.mrf.mxu0  ;;  %v1341_v37 = vpop.f32.mrf.mxu1  ;;  %7627 = vmatpush3.bf16.xpose.msra.mxu0 %v1682_v5 }
 0x295   :  { %12701 = vst [vmem:[#allocation55_spill] sm:$0xff] %v9778_v7  ;;  %12702 = vst [vmem:[#allocation56_spill] sm:$0xff] %v9780_v34  ;;  %v1229_v53 = vadd.f32 %v1228_v2, %v9750_v55  ;;  %v1342_v52 = vadd.f32 %v1341_v37, %v9753_v12  ;;  %8154 = vmatprep.subr.msk.bf16.mxu0 %vm1662_vm0, %v9729_v39 }
 0x296   :  { %v1230_v44 = vpop.f32.mrf.mxu0  ;;  %v1343_v0 = vpop.f32.mrf.mxu1 }
 0x297   :  { %v1231_v62 = vadd.f32 %v1230_v44, %v9707_v47  ;;  %v1344_v22 = vadd.f32 %v1343_v0, %v9675_v14 }
 0x298   :  { %v1232_v57 = vpop.f32.mrf.mxu0  ;;  %v1345_v58 = vpop.f32.mrf.mxu1 }
 0x299   :  { %v9796_v8 = vpack.c.bf16 %v1231_v62, %v1227_v60  ;;  %v9798_v34 = vpack.c.bf16 %v1344_v22, %v1340_v10  ;;  %v1233_v17 = vadd.f32 %v1232_v57, %v9750_v55  ;;  %v1346_v2 = vadd.f32 %v1345_v58, %v9753_v12 }
 0x29a   :  { %v1236_v37 = vpop.f32.mrf.mxu0  ;;  %v1349_v5 = vpop.f32.mrf.mxu1  ;;  %v1679_v10 = vsel %vm1662_vm0, %v9729_v39, 0 }
 0x29b   :  { %12703 = vst [vmem:[#allocation57_spill] sm:$0xff] %v9796_v8  ;;  %12704 = vst [vmem:[#allocation58_spill] sm:$0xff] %v9798_v34  ;;  %v9802_v27 = vpack.c.bf16 %v1233_v17, %v1229_v53  ;;  %v9804_v7 = vpack.c.bf16 %v1346_v2, %v1342_v52  ;;  %v1237_v44 = vadd.f32 %v1236_v37, %v9707_v47 }
 0x29c   :  { %v1350_v0 = vadd.f32 %v1349_v5, %v9675_v14  ;;  %v1238_v42 = vpop.f32.mrf.mxu0  ;;  %v1351_v21 = vpop.f32.mrf.mxu1  ;;  %7629 = vmatpush3.bf16.xpose.msra.mxu0 %v1679_v10 }
 0x29d   :  { %12705 = vst [vmem:[#allocation59_spill] sm:$0xff] %v9802_v27  ;;  %12706 = vst [vmem:[#allocation60_spill] sm:$0xff] %v9804_v7  ;;  %v1239_v60 = vadd.f32 %v1238_v42, %v9750_v55  ;;  %v1352_v62 = vadd.f32 %v1351_v21, %v9753_v12  ;;  %8155 = vmatprep.subr.msk.bf16.mxu0 %vm1662_vm0, %v9747_v41 }
 0x29e   :  { %v1240_v53 = vpop.f32.mrf.mxu0  ;;  %v1353_v52 = vpop.f32.mrf.mxu1 }
 0x29f   :  { %v1241_v22 = vadd.f32 %v1240_v53, %v9707_v47  ;;  %v1354_v57 = vadd.f32 %v1353_v52, %v9675_v14 }
 0x2a0   :  { %v1242_v58 = vpop.f32.mrf.mxu0  ;;  %v1355_v17 = vpop.f32.mrf.mxu1 }
 0x2a1   :  { %v9816_v2 = vpack.c.bf16 %v1241_v22, %v1237_v44  ;;  %v9818_v37 = vpack.c.bf16 %v1354_v57, %v1350_v0  ;;  %v1243_v39 = vadd.f32 %v1242_v58, %v9750_v55  ;;  %v1356_v21 = vadd.f32 %v1355_v17, %v9753_v12  ;;  %v373_v0 = vld [vmem:[#allocation7 + $0x8] sm:$0xf] }
 0x2a2   :  { %v1246_v42 = vpop.f32.mrf.mxu0  ;;  %v1359_v5 = vpop.f32.mrf.mxu1  ;;  %v1676_v44 = vsel %vm1662_vm0, %v9747_v41, 0  ;;  %v12712_v41 = vsub.s32 1, %v9515_v54 }
 0x2a3   :  { %12707 = vst [vmem:[#allocation61_spill] sm:$0xff] %v9816_v2  ;;  %12708 = vst [vmem:[#allocation62_spill] sm:$0xff] %v9818_v37  ;;  %v9822_v10 = vpack.c.bf16 %v1243_v39, %v1239_v60  ;;  %v9824_v7 = vpack.c.bf16 %v1356_v21, %v1352_v62  ;;  %v1247_v53 = vadd.f32 %v1246_v42, %v9707_v47  ;;  %v12711_v39 = vsub.s32 2, %v9515_v54 }
 0x2a4   :  { %v1360_v52 = vadd.f32 %v1359_v5, %v9675_v14  ;;  %v1248_v34 = vpop.f32.mrf.mxu0  ;;  %v1361_v27 = vpop.f32.mrf.mxu1  ;;  %7631 = vmatpush3.bf16.xpose.msra.mxu0 %v1676_v44 }
 0x2a5   :  { %12709 = vst [vmem:[#allocation63_spill] sm:$0xff] %v9822_v10  ;;  %12710 = vst [vmem:[#allocation64_spill] sm:$0xff] %v9824_v7  ;;  %v1249_v22 = vadd.f32 %v1248_v34, %v9750_v55  ;;  %v1362_v57 = vadd.f32 %v1361_v27, %v9753_v12  ;;  %v9836_v21 = vrot.slane %v373_v0, %v12711_v39  ;;  %v12713_v34 = vsub.s32 3, %v9515_v54 }
 0x2a6   :  { %v1250_v58 = vpop.f32.mrf.mxu0  ;;  %v1363_v60 = vpop.f32.mrf.mxu1  ;;  %v9840_v7 = vrot.slane %v373_v0, %v12712_v41 }
 0x2a7   :  { %v1251_v62 = vadd.f32 %v1250_v58, %v9707_v47  ;;  %v1364_v17 = vadd.f32 %v1363_v60, %v9675_v14  ;;  %v9844_v27 = vrot.slane %v373_v0, %v12713_v34 }
 0x2a8   :  { %v1252_v42 = vpop.f32.mrf.mxu0  ;;  %v1365_v5 = vpop.f32.mrf.mxu1 }
 0x2a9   :  { %v9846_v44 = vpack.c.bf16 %v1251_v62, %v1247_v53  ;;  %v9848_v37 = vpack.c.bf16 %v1364_v17, %v1360_v52  ;;  %v1253_v47 = vadd.f32 %v1252_v42, %v9750_v55  ;;  %v1366_v14 = vadd.f32 %v1365_v5, %v9753_v12 }
 0x2aa   :  { %v9852_v58 = vpop.f32.mrf.mxu0  ;;  %v1515_v60 = vpop.f32.mrf.mxu1 }
 0x2ab   :  { %12714 = vst [vmem:[#allocation65_spill] sm:$0xff] %v9846_v44  ;;  %12715 = vst [vmem:[#allocation66_spill] sm:$0xff] %v9848_v37  ;;  %v9854_v39 = vpack.c.bf16 %v1253_v47, %v1249_v22  ;;  %v9856_v10 = vpack.c.bf16 %v1366_v14, %v1362_v57  ;;  %v1516_v41 = vadd.f32 %v1515_v60, %v9836_v21  ;;  %7633 = vmatmul.mubr.msk.bf16.vlgmr.msra.gmra.mxu0 %vm1662_vm0, %v9563_v11 }
 0x2ac   :  { %v1404_v53 = vpop.f32.mrf.mxu0  ;;  %v1517_v62 = vpop.f32.mrf.mxu1  ;;  %7636 = vmatprep.mubr.msk.bf16.mxu0 %vm1662_vm0, %v9579_v26 }
 0x2ad   :  { %12716 = vst [vmem:[#allocation67_spill] sm:$0xff] %v9854_v39  ;;  %12717 = vst [vmem:[#allocation68_spill] sm:$0xff] %v9856_v10  ;;  %v1405_v52 = vadd.f32 %v1404_v53, %v9840_v7  ;;  %v1518_v17 = vadd.f32 %v1517_v62, %v9844_v27 }
 0x2ae   :  { %v9865_v42 = vpop.f32.mrf.mxu0  ;;  %v1519_v22 = vpop.f32.mrf.mxu1 }
 0x2af   :  { %v1520_v57 = vadd.f32 %v1519_v22, %v9836_v21 }
 0x2b0   :  { %v1408_v5 = vpop.f32.mrf.mxu0  ;;  %v1521_v34 = vpop.f32.mrf.mxu1 }
 0x2b1   :  { %v9868_v47 = vpack.c.bf16 %v1520_v57, %v1516_v41  ;;  %v1409_v11 = vadd.f32 %v1408_v5, %v9840_v7  ;;  %v1522_v14 = vadd.f32 %v1521_v34, %v9844_v27 }
 0x2b2   :  { %v9872_v60 = vpop.f32.mrf.mxu0  ;;  %v1525_v53 = vpop.f32.mrf.mxu1 }
 0x2b3   :  { %v9874_v62 = vpack.c.bf16 %v1409_v11, %v1405_v52  ;;  %v9876_v10 = vpack.c.bf16 %v1522_v14, %v1518_v17  ;;  %v1526_v26 = vadd.f32 %v1525_v53, %v9836_v21  ;;  %7637 = vmatmul.mubr.msk.bf16.gmra.mxu0 %vm1662_vm0, %v9597_v35 }
 0x2b4   :  { %v1414_v22 = vpop.f32.mrf.mxu0  ;;  %v1527_v37 = vpop.f32.mrf.mxu1 }
 0x2b5   :  { %12718 = vst [vmem:[#allocation69_spill] sm:$0xff] %v9876_v10  ;;  %v1415_v41 = vadd.f32 %v1414_v22, %v9840_v7  ;;  %v1528_v57 = vadd.f32 %v1527_v37, %v9844_v27 }
 0x2b6   :  { %v1416_v5 = vpop.f32.mrf.mxu0  ;;  %v1529_v34 = vpop.f32.mrf.mxu1 }
 0x2b7   :  { %v1530_v39 = vadd.f32 %v1529_v34, %v9836_v21  ;;  %v12720_v34 = vsub.s32 0, %v9515_v54 }
 0x2b8   :  { %v1418_v8 = vpop.f32.mrf.mxu0  ;;  %v1531_v52 = vpop.f32.mrf.mxu1 }
 0x2b9   :  { %v9884_v11 = vpack.c.bf16 %v1530_v39, %v1526_v26  ;;  %v1419_v17 = vadd.f32 %v1418_v8, %v9840_v7  ;;  %v1532_v14 = vadd.f32 %v1531_v52, %v9844_v27  ;;  %v9895_v50 = vrot.slane %v373_v0, %v12720_v34 }
 0x2ba   :  { %v1422_v53 = vpop.f32.mrf.mxu0  ;;  %v1535_v35 = vpop.f32.mrf.mxu1 }
 0x2bb   :  { %v9888_v2 = vpack.c.bf16 %v1419_v17, %v1415_v41  ;;  %v9890_v44 = vpack.c.bf16 %v1532_v14, %v1528_v57  ;;  %v1536_v37 = vadd.f32 %v1535_v35, %v9836_v21  ;;  %v1423_v3 = vadd.f32 %v1422_v53, %v9895_v50 }
 0x2bc   :  { %v1424_v22 = vpop.f32.mrf.mxu0  ;;  %v1537_v48 = vpop.f32.mrf.mxu1 }
 0x2bd   :  { %12719 = vst [vmem:[#allocation70_spill] sm:$0xff] %v9890_v44  ;;  %v1425_v39 = vadd.f32 %v1424_v22, %v9840_v7  ;;  %v1538_v8 = vadd.f32 %v1537_v48, %v9844_v27 }
 0x2be   :  { %v1426_v26 = vpop.f32.mrf.mxu0  ;;  %v1539_v52 = vpop.f32.mrf.mxu1 }
 0x2bf   :  { %v1427_v41 = vadd.f32 %v1426_v26, %v9895_v50  ;;  %v1540_v57 = vadd.f32 %v1539_v52, %v9836_v21 }
 0x2c0   :  { %v1428_v17 = vpop.f32.mrf.mxu0  ;;  %v1541_v14 = vpop.f32.mrf.mxu1 }
 0x2c1   :  { %v1634_v35 = vpack.c.bf16 %v1427_v41, %v1423_v3  ;;  %v9902_v1 = vpack.c.bf16 %v1540_v57, %v1536_v37  ;;  %v1429_v54 = vadd.f32 %v1428_v17, %v9840_v7  ;;  %v1542_v0 = vadd.f32 %v1541_v14, %v9844_v27 }
 0x2c2   :  { %v1432_v22 = vpop.f32.mrf.mxu0  ;;  %v1545_v34 = vpop.f32.mrf.mxu1 }
 0x2c3   :  { %v9906_v48 = vpack.c.bf16 %v1429_v54, %v1425_v39  ;;  %v9908_v51 = vpack.c.bf16 %v1542_v0, %v1538_v8  ;;  %v1546_v53 = vadd.f32 %v1545_v34, %v9836_v21  ;;  %2118 = vrot.lane.b32.xlu1 %v1634_v35, %s9224_s0  ;;  %v1433_v17 = vadd.f32 %v1432_v22, %v9895_v50 }
 0x2c4   :  { %v1434_v26 = vpop.f32.mrf.mxu0  ;;  %v1547_v52 = vpop.f32.mrf.mxu1 }
 0x2c5   :  { %12721 = vst [vmem:[#allocation71_spill] sm:$0xff] %v9908_v51  ;;  %v1435_v3 = vadd.f32 %v1434_v26, %v9840_v7  ;;  %v1548_v37 = vadd.f32 %v1547_v52, %v9844_v27  ;;  %v1417_v26 = vadd.f32 %v1416_v5, %v9895_v50 }
 0x2c6   :  { %v1436_v41 = vpop.f32.mrf.mxu0  ;;  %v1549_v57 = vpop.f32.mrf.mxu1 }
 0x2c7   :  { %v1437_v14 = vadd.f32 %v1436_v41, %v9895_v50  ;;  %v1550_v39 = vadd.f32 %v1549_v57, %v9836_v21 }
 0x2c8   :  { %v1438_v8 = vpop.f32.mrf.mxu0  ;;  %v1551_v54 = vpop.f32.mrf.mxu1 }
 0x2c9   :  { %v1638_v0 = vpack.c.bf16 %v1437_v14, %v1433_v17  ;;  %v9917_v34 = vpack.c.bf16 %v1550_v39, %v1546_v53  ;;  %v1439_v23 = vadd.f32 %v1438_v8, %v9840_v7  ;;  %v1552_v45 = vadd.f32 %v1551_v54, %v9844_v27 }
 0x2ca   :  { %v1442_v52 = vpop.f32.mrf.mxu0  ;;  %v1555_v43 = vpop.f32.mrf.mxu1  ;;  %v1413_v14 = vadd.f32 %v9872_v60, %v9895_v50  ;;  %v1403_v54 = vadd.f32 %v9852_v58, %v9895_v50 }
 0x2cb   :  { %v9922_v33 = vpack.c.bf16 %v1439_v23, %v1435_v3  ;;  %v9924_v22 = vpack.c.bf16 %v1552_v45, %v1548_v37  ;;  %v1443_v41 = vadd.f32 %v1442_v52, %v9895_v50  ;;  %v1556_v57 = vadd.f32 %v1555_v43, %v9836_v21  ;;  %7640 = vmatprep.subr.bf16.mxu1 %v1638_v0 }
 0x2cc   :  { %2120 = vrot.lane.b32.xlu0 %v1638_v0, %s9224_s0  ;;  %v1444_v53 = vpop.f32.mrf.mxu0  ;;  %v1557_v17 = vpop.f32.mrf.mxu1  ;;  %7641 = vmatpush3.bf16.msra.mxu1 %v1638_v0  ;;  %v1407_v45 = vadd.f32 %v9865_v42, %v9895_v50  ;;  %v9935_v43 = vpack.c.bf16 %v1417_v26, %v1413_v14 }
 0x2cd   :  { %12722 = vst [vmem:[#allocation72_spill] sm:$0xff] %v9924_v22  ;;  %v1445_v5 = vadd.f32 %v1444_v53, %v9840_v7  ;;  %v1558_v23 = vadd.f32 %v1557_v17, %v9844_v27  ;;  %7642 = vmatprep.subr.bf16.mxu1 %v1634_v35 }
 0x2ce   :  { %v1446_v3 = vpop.f32.mrf.mxu0  ;;  %v1559_v37 = vpop.f32.mrf.mxu1  ;;  %v9948_v26 = vpack.c.bf16 %v1407_v45, %v1403_v54 }
 0x2cf   :  { %v1447_v39 = vadd.f32 %v1446_v3, %v9895_v50  ;;  %v1560_v8 = vadd.f32 %v1559_v37, %v9836_v21 }
 0x2d0   :  { %v1448_v60 = vpop.f32.mrf.mxu0  ;;  %v1561_v0 = vpop.f32.mrf.mxu1  ;;  %7643 = vmatpush3.bf16.msra.mxu1 %v1634_v35 }
 0x2d1   :  { %v9941_v52 = vpack.c.bf16 %v1447_v39, %v1443_v41  ;;  %v9943_v53 = vpack.c.bf16 %v1560_v8, %v1556_v57  ;;  %v1449_v42 = vadd.f32 %v1448_v60, %v9840_v7  ;;  %v1562_v17 = vadd.f32 %v1561_v0, %v9844_v27  ;;  %7644 = vmatprep.subr.bf16.mxu1 %v9935_v43 }
 0x2d2   :  { %v1452_v14 = vpop.f32.mrf.mxu0  ;;  %v1565_v3 = vpop.f32.mrf.mxu1 }
 0x2d3   :  { %12723 = vst [vmem:[#allocation73_spill] sm:$0xff] %v9941_v52  ;;  %12724 = vst [vmem:[#allocation74_spill] sm:$0xff] %v9943_v53  ;;  %v9950_v37 = vpack.c.bf16 %v1449_v42, %v1445_v5  ;;  %v9952_v58 = vpack.c.bf16 %v1562_v17, %v1558_v23  ;;  %v1453_v35 = vadd.f32 %v1452_v14, %v9895_v50 }
 0x2d4   :  { %v1566_v41 = vadd.f32 %v1565_v3, %v9836_v21  ;;  %v1454_v57 = vpop.f32.mrf.mxu0  ;;  %v1567_v39 = vpop.f32.mrf.mxu1  ;;  %7645 = vmatpush3.bf16.msra.mxu1 %v9935_v43 }
 0x2d5   :  { %12725 = vst [vmem:[#allocation75_spill] sm:$0xff] %v9950_v37  ;;  %12726 = vst [vmem:[#allocation76_spill] sm:$0xff] %v9952_v58  ;;  %v1455_v8 = vadd.f32 %v1454_v57, %v9840_v7  ;;  %v1568_v60 = vadd.f32 %v1567_v39, %v9844_v27  ;;  %7646 = vmatprep.subr.bf16.mxu1 %v9948_v26 }
 0x2d6   :  { %v1456_v45 = vpop.f32.mrf.mxu0  ;;  %v1569_v54 = vpop.f32.mrf.mxu1 }
 0x2d7   :  { %v1457_v5 = vadd.f32 %v1456_v45, %v9895_v50  ;;  %v1570_v23 = vadd.f32 %v1569_v54, %v9836_v21 }
 0x2d8   :  { %v1458_v0 = vpop.f32.mrf.mxu0  ;;  %v1571_v42 = vpop.f32.mrf.mxu1  ;;  %7647 = vmatpush3.bf16.msra.mxu1 %v9948_v26 }
 0x2d9   :  { %v9963_v17 = vpack.c.bf16 %v1457_v5, %v1453_v35  ;;  %v9965_v14 = vpack.c.bf16 %v1570_v23, %v1566_v41  ;;  %v1459_v3 = vadd.f32 %v1458_v0, %v9840_v7  ;;  %v1572_v57 = vadd.f32 %v1571_v42, %v9844_v27 }
 0x2da   :  { %v1462_v39 = vpop.f32.mrf.mxu0  ;;  %v1575_v58 = vpop.f32.mrf.mxu1 }
 0x2db   :  { %12727 = vst [vmem:[#allocation77_spill] sm:$0xff] %v9963_v17  ;;  %12728 = vst [vmem:[#allocation78_spill] sm:$0xff] %v9965_v14  ;;  %v9969_v53 = vpack.c.bf16 %v1459_v3, %v1455_v8  ;;  %v9971_v37 = vpack.c.bf16 %v1572_v57, %v1568_v60  ;;  %v1463_v45 = vadd.f32 %v1462_v39, %v9895_v50 }
 0x2dc   :  { %v1576_v54 = vadd.f32 %v1575_v58, %v9836_v21  ;;  %v1464_v52 = vpop.f32.mrf.mxu0  ;;  %v1577_v12 = vpop.f32.mrf.mxu1 }
 0x2dd   :  { %12729 = vst [vmem:[#allocation79_spill] sm:$0xff] %v9969_v53  ;;  %12730 = vst [vmem:[#allocation80_spill] sm:$0xff] %v9971_v37  ;;  %v1465_v35 = vadd.f32 %v1464_v52, %v9840_v7  ;;  %v1578_v41 = vadd.f32 %v1577_v12, %v9844_v27 }
 0x2de   :  { %v1466_v5 = vpop.f32.mrf.mxu0  ;;  %v1579_v23 = vpop.f32.mrf.mxu1 }
 0x2df   :  { %v1467_v0 = vadd.f32 %v1466_v5, %v9895_v50  ;;  %v1580_v42 = vadd.f32 %v1579_v23, %v9836_v21 }
 0x2e0   :  { %v1468_v8 = vpop.f32.mrf.mxu0  ;;  %v1581_v3 = vpop.f32.mrf.mxu1 }
 0x2e1   :  { %v9979_v60 = vpack.c.bf16 %v1467_v0, %v1463_v45  ;;  %v9981_v57 = vpack.c.bf16 %v1580_v42, %v1576_v54  ;;  %v1469_v58 = vadd.f32 %v1468_v8, %v9840_v7  ;;  %v1582_v39 = vadd.f32 %v1581_v3, %v9844_v27 }
 0x2e2   :  { %v1472_v37 = vpop.f32.mrf.mxu0  ;;  %v1585_v52 = vpop.f32.mrf.mxu1 }
 0x2e3   :  { %12731 = vst [vmem:[#allocation81_spill] sm:$0xff] %v9979_v60  ;;  %12732 = vst [vmem:[#allocation82_spill] sm:$0xff] %v9981_v57  ;;  %v9985_v14 = vpack.c.bf16 %v1469_v58, %v1465_v35  ;;  %v9987_v12 = vpack.c.bf16 %v1582_v39, %v1578_v41  ;;  %v1473_v5 = vadd.f32 %v1472_v37, %v9895_v50 }
 0x2e4   :  { %v1586_v23 = vadd.f32 %v1585_v52, %v9836_v21  ;;  %v1474_v53 = vpop.f32.mrf.mxu0  ;;  %v1587_v17 = vpop.f32.mrf.mxu1 }
 0x2e5   :  { %12733 = vst [vmem:[#allocation83_spill] sm:$0xff] %v9985_v14  ;;  %12734 = vst [vmem:[#allocation84_spill] sm:$0xff] %v9987_v12  ;;  %v1475_v45 = vadd.f32 %v1474_v53, %v9840_v7  ;;  %v1588_v54 = vadd.f32 %v1587_v17, %v9844_v27 }
 0x2e6   :  { %v1476_v0 = vpop.f32.mrf.mxu0  ;;  %v1589_v42 = vpop.f32.mrf.mxu1 }
 0x2e7   :  { %v1477_v8 = vadd.f32 %v1476_v0, %v9895_v50  ;;  %v1590_v3 = vadd.f32 %v1589_v42, %v9836_v21 }
 0x2e8   :  { %v1478_v35 = vpop.f32.mrf.mxu0  ;;  %v1591_v58 = vpop.f32.mrf.mxu1 }
 0x2e9   :  { %v9995_v41 = vpack.c.bf16 %v1477_v8, %v1473_v5  ;;  %v9997_v39 = vpack.c.bf16 %v1590_v3, %v1586_v23  ;;  %v1479_v37 = vadd.f32 %v1478_v35, %v9840_v7  ;;  %v1592_v52 = vadd.f32 %v1591_v58, %v9844_v27 }
 0x2eb   :  { %12735 = vst [vmem:[#allocation85_spill] sm:$0xff] %v9995_v41  ;;  %12736 = vst [vmem:[#allocation86_spill] sm:$0xff] %v9997_v39  ;;  %v10001_v12 = vpack.c.bf16 %v1479_v37, %v1475_v45  ;;  %v10003_v53 = vpack.c.bf16 %v1592_v52, %v1588_v54 }
 0x2ed   :  { %12737 = vst [vmem:[#allocation87_spill] sm:$0xff] %v10001_v12  ;;  %12738 = vst [vmem:[#allocation88_spill] sm:$0xff] %v10003_v53 }
 0x2f5   :  { %v1942_v21 = vpop.permute.xlu1 %1941 }
 0x2f6   :  { %v1964_v7 = vsel %vm1662_vm0, %v1942_v21, 0 }
 0x2f9   :  { %v1940_v23 = vpop.permute.xlu1 %1939 }
 0x2fa   :  { %v1961_v27 = vsel %vm1662_vm0, %v1940_v23, 0 }
 0x2fd   :  { %v1944_v17 = vpop.permute.xlu0 %1943 }
 0x2fe   :  { %8156 = vmatprep.subr.msk.bf16.mxu0 %vm1662_vm0, %v1944_v17  ;;  %v1967_v50 = vsel %vm1662_vm0, %v1944_v17, 0  ;;  %v1938_v45 = vpop.permute.xlu1 %1937 }
 0x2ff   :  { %7657 = vmatpush3.bf16.xpose.msra.mxu0 %v1967_v50  ;;  %v1958_v54 = vsel %vm1662_vm0, %v1938_v45, 0 }
 0x300   :  { %8157 = vmatprep.subr.msk.bf16.mxu0 %vm1662_vm0, %v1942_v21 }
 0x301   :  { %v1926_v5 = vpop.permute.xlu0 %1925 }
 0x302   :  { %7664 = vmatprep.mubr.msk.bf16.mxu0 %vm1662_vm0, %v1926_v5  ;;  %v1928_v0 = vpop.permute.xlu1 %1927 }
 0x305   :  { %v1930_v42 = vpop.permute.xlu0 %1929 }
 0x306   :  { %v1932_v8 = vpop.permute.xlu1 %1931 }
 0x307   :  { %7659 = vmatpush3.bf16.xpose.msra.mxu0 %v1964_v7 }
 0x308   :  { %8158 = vmatprep.subr.msk.bf16.mxu0 %vm1662_vm0, %v1940_v23 }
 0x30f   :  { %7661 = vmatpush3.bf16.xpose.msra.mxu0 %v1961_v27 }
 0x310   :  { %8159 = vmatprep.subr.msk.bf16.mxu0 %vm1662_vm0, %v1938_v45 }
 0x317   :  { %7663 = vmatpush3.bf16.xpose.msra.mxu0 %v1958_v54 }
 0x318   :  { %7704 = vmatprep.subr.bf16.mxu0 %v9922_v33 }
 0x31e   :  { %7665 = vmatmul.mubr.msk.bf16.vlgmr.msra.gmra.mxu0 %vm1662_vm0, %v1928_v0 }
 0x31f   :  { %7668 = vmatprep.mubr.msk.bf16.mxu0 %vm1662_vm0, %v1930_v42  ;;  %7705 = vmatpush3.bf16.msra.mxu0 %v9922_v33 }
 0x320   :  { %7706 = vmatprep.subr.bf16.mxu0 %v9906_v48 }
 0x323   :  { %7707 = vmatpush3.bf16.msra.mxu0 %v9906_v48 }
 0x324   :  { %7708 = vmatprep.subr.bf16.mxu0 %v9888_v2 }
 0x326   :  { %7669 = vmatmul.mubr.msk.bf16.gmra.mxu0 %vm1662_vm0, %v1932_v8 }
 0x327   :  { %7709 = vmatpush3.bf16.msra.mxu0 %v9888_v2 }
 0x328   :  { %7710 = vmatprep.subr.bf16.mxu0 %v9874_v62 }
 0x32b   :  { %7711 = vmatpush3.bf16.msra.mxu0 %v9874_v62 }
 0x335   :  { %v2119_v60 = vpop.permute.xlu1 %2118 }
 0x33e   :  { %v10025_v3 = vpop.permute.xlu0 %2120 }
 0x33f   :  { %7672 = vmatprep.subr.bf16.mxu1 %v10025_v3 }
 0x36b   :  { %v7634_v35 = vpop.f32.mrf.mxu0 }
 0x36c   :  { %v1758_v58 = vsel %vm1662_vm0, %v7634_v35, -inf }
 0x36d   :  { %1759 = vmax.xlane.f32.xlu0 %v1758_v58  ;;  %v1721_v37 = vpop.f32.mrf.mxu0 }
 0x36e   :  { %v1752_v17 = vsel %vm1662_vm0, %v1721_v37, -inf }
 0x36f   :  { %v7635_v52 = vpop.f32.mrf.mxu0 }
 0x370   :  { %v1761_v7 = vsel %vm1662_vm0, %v7635_v52, -inf }
 0x371   :  { %1753 = vmax.xlane.f32.xlu0 %v1752_v17  ;;  %v1724_v50 = vpop.f32.mrf.mxu0 }
 0x372   :  { %v1755_v21 = vsel %vm1662_vm0, %v1724_v50, -inf }
 0x373   :  { %1756 = vmax.xlane.f32.xlu1 %v1755_v21  ;;  %v7638_v5 = vpop.f32.mrf.mxu0 }
 0x374   :  { %v1770_v45 = vsel %vm1662_vm0, %v7638_v5, -inf }
 0x375   :  { %1762 = vmax.xlane.f32.xlu0 %v1761_v7  ;;  %v10032_v23 = vpop.f32.mrf.mxu0 }
 0x376   :  { %v1764_v42 = vsel %vm1662_vm0, %v10032_v23, -inf }
 0x377   :  { %v7639_v27 = vpop.f32.mrf.mxu0 }
 0x378   :  { %v1773_v54 = vsel %vm1662_vm0, %v7639_v27, -inf }
 0x379   :  { %1771 = vmax.xlane.f32.xlu0 %v1770_v45  ;;  %1774 = vmax.xlane.f32.xlu1 %v1773_v54  ;;  %v1740_v0 = vpop.f32.mrf.mxu0 }
 0x37a   :  { %v1767_v8 = vsel %vm1662_vm0, %v1740_v0, -inf }
 0x37d   :  { %1765 = vmax.xlane.f32.xlu0 %v1764_v42  ;;  %1768 = vmax.xlane.f32.xlu1 %v1767_v8 }
 0x3de   :  { %v10039_v58 = vpop.f32.mrf.mxu0 }
 0x3df   :  { %v2040_v17 = vsel %vm1662_vm0, %v10039_v58, -inf }
 0x3e0   :  { %2041 = vmax.xlane.f32.xlu0 %v2040_v17  ;;  %v10043_v21 = vpop.f32.mrf.mxu0 }
 0x3e1   :  { %v2034_v45 = vsel %vm1662_vm0, %v10043_v21, -inf }
 0x3e2   :  { %v10045_v7 = vpop.f32.mrf.mxu0 }
 0x3e3   :  { %v2043_v54 = vsel %vm1662_vm0, %v10045_v7, -inf }
 0x3e4   :  { %2035 = vmax.xlane.f32.xlu0 %v2034_v45  ;;  %v10051_v53 = vpop.f32.mrf.mxu0  ;;  %2044 = vmax.xlane.f32.xlu1 %v2043_v54 }
 0x3e5   :  { %v2037_v17 = vsel %vm1662_vm0, %v10051_v53, -inf }
 0x3e6   :  { %v10053_v42 = vpop.f32.mrf.mxu0 }
 0x3e7   :  { %v2052_v8 = vsel %vm1662_vm0, %v10053_v42, -inf }
 0x3e8   :  { %2053 = vmax.xlane.f32.xlu0 %v2052_v8  ;;  %v10059_v57 = vpop.f32.mrf.mxu0  ;;  %2038 = vmax.xlane.f32.xlu1 %v2037_v17 }
 0x3e9   :  { %v2046_v45 = vsel %vm1662_vm0, %v10059_v57, -inf }
 0x3ea   :  { %v10061_v39 = vpop.f32.mrf.mxu0 }
 0x3eb   :  { %v2055_v12 = vsel %vm1662_vm0, %v10061_v39, -inf }
 0x3ec   :  { %v10065_v14 = vpop.f32.mrf.mxu0  ;;  %2047 = vmax.xlane.f32.xlu1 %v2046_v45 }
 0x3ed   :  { %v2049_v54 = vsel %vm1662_vm0, %v10065_v14, -inf }
 0x3ee   :  { %2050 = vmax.xlane.f32.xlu0 %v2049_v54 }
 0x3f0   :  { %2056 = vmax.xlane.f32.xlu1 %v2055_v12 }
 0x3f6   :  { %v1760_v8 = vpop.xlane.xlu0 %1759 }
 0x3f7   :  { %v1778_v41 = vsub.f32 %v7634_v35, %v1760_v8 }
 0x3f9   :  { %v1788_v36 = vmul.f32 1.442695, %v1778_v41 }
 0x3fa   :  { %v1754_v17 = vpop.xlane.xlu0 %1753 }
 0x3fb   :  { %v1776_v10 = vsub.f32 %v1721_v37, %v1754_v17 }
 0x3fc   :  { %v1757_v44 = vpop.xlane.xlu1 %1756 }
 0x3fd   :  { %v1784_v51 = vmul.f32 1.442695, %v1776_v10  ;;  %v1777_v22 = vsub.f32 %v1724_v50, %v1757_v44 }
 0x3fe   :  { %v1763_v25 = vpop.xlane.xlu0 %1762 }
 0x3ff   :  { %v1786_v16 = vmul.f32 1.442695, %v1777_v22  ;;  %v1779_v45 = vsub.f32 %v7635_v52, %v1763_v25  ;;  %8596 = vpow2.f32 %v1784_v51 }
 0x401   :  { %2114 = vrot.lane.b32.xlu1 %v9948_v26, %s9224_s0  ;;  %8598 = vpow2.f32 %v1786_v16  ;;  %v1790_v54 = vmul.f32 1.442695, %v1779_v45 }
 0x402   :  { %8600 = vpow2.f32 %v1788_v36  ;;  %v1772_v12 = vpop.xlane.xlu0 %1771  ;;  %v1775_v9 = vpop.xlane.xlu1 %1774 }
 0x403   :  { %8602 = vpow2.f32 %v1790_v54  ;;  %v1782_v35 = vsub.f32 %v7638_v5, %v1772_v12  ;;  %v1783_v8 = vsub.f32 %v7639_v27, %v1775_v9 }
 0x404   :  { %2116 = vrot.lane.b32.xlu0 %v9935_v43, %s9224_s0 }
 0x405   :  { %v1796_v10 = vmul.f32 1.442695, %v1782_v35  ;;  %v1798_v44 = vmul.f32 1.442695, %v1783_v8 }
 0x406   :  { %v1766_v41 = vpop.xlane.xlu0 %1765  ;;  %v1769_v22 = vpop.xlane.xlu1 %1768 }
 0x407   :  { %v1780_v25 = vsub.f32 %v10032_v23, %v1766_v41  ;;  %v1781_v51 = vsub.f32 %v1740_v0, %v1769_v22  ;;  %8604 = vpow2.f32 %v1796_v10 }
 0x408   :  { %8606 = vpow2.f32 %v1798_v44 }
 0x409   :  { %v1792_v26 = vmul.f32 1.442695, %v1780_v25  ;;  %v1794_v16 = vmul.f32 1.442695, %v1781_v51 }
 0x40b   :  { %8608 = vpow2.f32 %v1792_v26 }
 0x40c   :  { %8610 = vpow2.f32 %v1794_v16  ;;  %v10076_v36 = vpop.eup %8596 }
 0x40d   :  { %12739 = vst [vmem:[#allocation89_spill] sm:$0xff] %v10076_v36 }
 0x40e   :  { %v10078_v37 = vpop.eup %8598 }
 0x40f   :  { %12740 = vst [vmem:[#allocation90_spill] sm:$0xff] %v10078_v37  ;;  %v10080_v9 = vpop.eup %8600  ;;  %v1824_v43 = vpack.c.bf16 %v10078_v37, %v10076_v36 }
 0x410   :  { %12741 = vst [vmem:[#allocation91_spill] sm:$0xff] %v10080_v9  ;;  %v10084_v52 = vpop.eup %8602 }
 0x411   :  { %12742 = vst [vmem:[#allocation92_spill] sm:$0xff] %v10084_v52  ;;  %v1825_v50 = vpack.c.bf16 %v10084_v52, %v10080_v9  ;;  %7648 = vmatprep.mubr.msk.bf16.mxu1 %vm1662_vm0, %v1824_v43 }
 0x413   :  { %7649 = vmatmul.mubr.msk.bf16.vlgmr.msra.gmra.mxu1 %vm1662_vm0, %v1825_v50 }
 0x414   :  { %7673 = vmatpush3.bf16.msra.mxu1 %v10025_v3  ;;  %v10091_v5 = vpop.eup %8604 }
 0x415   :  { %7674 = vmatprep.subr.bf16.mxu1 %v2119_v60  ;;  %12743 = vst [vmem:[#allocation93_spill] sm:$0xff] %v10091_v5  ;;  %v10093_v23 = vpop.eup %8606 }
 0x416   :  { %12744 = vst [vmem:[#allocation94_spill] sm:$0xff] %v10093_v23  ;;  %v1827_v45 = vpack.c.bf16 %v10093_v23, %v10091_v5 }
 0x418   :  { %v10095_v27 = vpop.eup %8608  ;;  %7675 = vmatpush3.bf16.msra.mxu1 %v2119_v60 }
 0x419   :  { %12745 = vst [vmem:[#allocation95_spill] sm:$0xff] %v10095_v27  ;;  %v10097_v0 = vpop.eup %8610 }
 0x41a   :  { %12746 = vst [vmem:[#allocation96_spill] sm:$0xff] %v10097_v0  ;;  %v1826_v17 = vpack.c.bf16 %v10097_v0, %v10095_v27 }
 0x41c   :  { %7652 = vmatprep.mubr.msk.bf16.mxu1 %vm1662_vm0, %v1826_v17 }
 0x41d   :  { %7653 = vmatmul.mubr.msk.bf16.gmra.mxu1 %vm1662_vm0, %v1827_v45 }
 0x469   :  { %v2042_v3 = vpop.xlane.xlu0 %2041 }
 0x46a   :  { %v2060_v60 = vsub.f32 %v10039_v58, %v2042_v3 }
 0x46c   :  { %v2070_v51 = vmul.f32 1.442695, %v2060_v60  ;;  %v1203_v60 = vadd.f32 %v9713_v19, %v9750_v55 }
 0x46d   :  { %v2036_v54 = vpop.xlane.xlu0 %2035  ;;  %v2045_v12 = vpop.xlane.xlu1 %2044 }
 0x46e   :  { %v2058_v35 = vsub.f32 %v10043_v21, %v2036_v54  ;;  %v2061_v8 = vsub.f32 %v10045_v7, %v2045_v12 }
 0x470   :  { %v2066_v10 = vmul.f32 1.442695, %v2058_v35  ;;  %v2072_v41 = vmul.f32 1.442695, %v2061_v8  ;;  %v1209_v35 = vadd.f32 %v9725_v29, %v9750_v55 }
 0x471   :  { %v2039_v44 = vpop.xlane.xlu1 %2038  ;;  %v2054_v22 = vpop.xlane.xlu0 %2053 }
 0x472   :  { %v2059_v25 = vsub.f32 %v10051_v53, %v2039_v44  ;;  %8612 = vpow2.f32 %v2066_v10  ;;  %v2064_v16 = vsub.f32 %v10053_v42, %v2054_v22  ;;  %v1213_v42 = vadd.f32 %v9741_v31, %v9750_v55 }
 0x473   :  { %8614 = vpow2.f32 %v2072_v41  ;;  %v1199_v44 = vadd.f32 %v9702_v4, %v9750_v55 }
 0x474   :  { %v2068_v26 = vmul.f32 1.442695, %v2059_v25  ;;  %v2078_v17 = vmul.f32 1.442695, %v2064_v16 }
 0x475   :  { %v2048_v43 = vpop.xlane.xlu1 %2047  ;;  %v10140_v25 = vpack.c.bf16 %v1203_v60, %v1199_v44 }
 0x476   :  { %v2062_v50 = vsub.f32 %v10059_v57, %v2048_v43  ;;  %8616 = vpow2.f32 %v2068_v26  ;;  %v957_v43 = vadd.f32 %v9539_v59, %v9602_v15 }
 0x477   :  { %v2051_v21 = vpop.xlane.xlu0 %2050  ;;  %8618 = vpow2.f32 %v2070_v51  ;;  %v2242_v59 = vsel %vm1662_vm0, %v10140_v25, 0 }
 0x478   :  { %v2074_v7 = vmul.f32 1.442695, %v2062_v50  ;;  %v2063_v58 = vsub.f32 %v10065_v14, %v2051_v21  ;;  %v10117_v14 = vpack.c.bf16 %v1213_v42, %v1209_v35  ;;  %v1193_v50 = vadd.f32 %v9695_v40, %v9750_v55 }
 0x479   :  { %v2057_v45 = vpop.xlane.xlu1 %2056  ;;  %v1183_v40 = vadd.f32 %v9683_v38, %v9750_v55  ;;  %v977_v38 = vadd.f32 %v9573_v24, %v9602_v15 }
 0x47a   :  { %v2076_v3 = vmul.f32 1.442695, %v2063_v58  ;;  %v2065_v53 = vsub.f32 %v10061_v39, %v2057_v45  ;;  %8620 = vpow2.f32 %v2074_v7  ;;  %v2245_v19 = vsel %vm1662_vm0, %v10117_v14, 0 }
 0x47b   :  { %v2117_v54 = vpop.permute.xlu0 %2116  ;;  %v953_v7 = vadd.f32 %v9531_v49, %v9602_v15  ;;  %v1189_v58 = vadd.f32 %v9689_v20, %v9750_v55  ;;  %v1179_v49 = vadd.f32 %v9677_v56, %v9750_v55  ;;  %v963_v56 = vadd.f32 %v9550_v63, %v9602_v15 }
 0x47c   :  { %8622 = vpow2.f32 %v2076_v3  ;;  %v2080_v12 = vmul.f32 1.442695, %v2065_v53  ;;  %7676 = vmatprep.subr.bf16.mxu1 %v2117_v54  ;;  %v973_v55 = vadd.f32 %v9566_v13, %v9602_v15 }
 0x47d   :  { %8624 = vpow2.f32 %v2078_v17  ;;  %7677 = vmatpush3.bf16.msra.mxu1 %v2117_v54  ;;  %v2115_v57 = vpop.permute.xlu1 %2114  ;;  %v10166_v17 = vpack.c.bf16 %v957_v43, %v953_v7  ;;  %v1599_v45 = vpack.c.bf16 %v1193_v50, %v1189_v58  ;;  %v10178_v20 = vpack.c.bf16 %v1183_v40, %v1179_v49 }
 0x47e   :  { %8626 = vpow2.f32 %v2080_v12  ;;  %7678 = vmatprep.subr.bf16.mxu1 %v2115_v57  ;;  %v967_v54 = vadd.f32 %v9557_v6, %v9602_v15  ;;  %v2221_v12 = vpack.c.bf16 %v977_v38, %v973_v55  ;;  %v983_v6 = vadd.f32 %v9582_v32, %v9602_v15 }
 0x47f   :  { %v10119_v39 = vpop.eup %8612  ;;  %v2239_v3 = vsel %vm1662_vm0, %v1599_v45, 0  ;;  %v2236_v53 = vsel %vm1662_vm0, %v10178_v20, 0 }
 0x480   :  { %v10123_v31 = vpop.eup %8614  ;;  %v2220_v42 = vpack.c.bf16 %v967_v54, %v963_v56 }
 0x481   :  { %7679 = vmatpush3.bf16.msra.mxu1 %v2115_v57  ;;  %v987_v57 = vadd.f32 %v9591_v46, %v9602_v15 }
 0x482   :  { %8160 = vmatprep.subr.msk.bf16.mxu1 %vm1662_vm0, %v10117_v14 }
 0x483   :  { %v10125_v8 = vpop.eup %8616  ;;  %v2222_v35 = vpack.c.bf16 %v987_v57, %v983_v6 }
 0x484   :  { %v10129_v10 = vpop.eup %8618  ;;  %v2106_v29 = vpack.c.bf16 %v10125_v8, %v10119_v39 }
 0x485   :  { %v2107_v41 = vpack.c.bf16 %v10123_v31, %v10129_v10 }
 0x486   :  { %7680 = vmatprep.mubr.msk.bf16.mxu1 %vm1662_vm0, %v2106_v29 }
 0x487   :  { %v10138_v22 = vpop.eup %8620  ;;  %7681 = vmatmul.mubr.msk.bf16.vlgmr.msra.gmra.mxu1 %vm1662_vm0, %v2107_v41 }
 0x488   :  { %7689 = vmatpush3.bf16.xpose.msra.mxu1 %v2245_v19 }
 0x489   :  { %v10145_v51 = vpop.eup %8622  ;;  %8161 = vmatprep.subr.msk.bf16.mxu1 %vm1662_vm0, %v10140_v25 }
 0x48a   :  { %v10147_v26 = vpop.eup %8624  ;;  %v2108_v4 = vpack.c.bf16 %v10145_v51, %v10138_v22 }
 0x48b   :  { %v10153_v16 = vpop.eup %8626 }
 0x48c   :  { %7684 = vmatprep.mubr.msk.bf16.mxu1 %vm1662_vm0, %v2108_v4  ;;  %v2109_v21 = vpack.c.bf16 %v10153_v16, %v10147_v26 }
 0x48f   :  { %7685 = vmatmul.mubr.msk.bf16.gmra.mxu1 %vm1662_vm0, %v2109_v21 }
 0x490   :  { %7691 = vmatpush3.bf16.xpose.msra.mxu1 %v2242_v59  ;;  %7696 = vmatprep.mubr.msk.bf16.mxu1 %vm1662_vm0, %v10166_v17 }
 0x491   :  { %8162 = vmatprep.subr.msk.bf16.mxu1 %vm1662_vm0, %v1599_v45 }
 0x498   :  { %7693 = vmatpush3.bf16.xpose.msra.mxu1 %v2239_v3 }
 0x499   :  { %8163 = vmatprep.subr.msk.bf16.mxu1 %vm1662_vm0, %v10178_v20 }
 0x4a0   :  { %7695 = vmatpush3.bf16.xpose.msra.mxu1 %v2236_v53 }
 0x4a7   :  { %7697 = vmatmul.mubr.msk.bf16.vlgmr.msra.gmra.mxu1 %vm1662_vm0, %v2220_v42 }
 0x4a8   :  { %7700 = vmatprep.mubr.msk.bf16.mxu1 %vm1662_vm0, %v2221_v12 }
 0x4af   :  { %7701 = vmatmul.mubr.msk.bf16.gmra.mxu1 %vm1662_vm0, %v2222_v35 }
 0x4d3   :  { %v10200_v24 = vpop.f32.mrf.mxu1 }
 0x4d4   :  { %12747 = vst [vmem:[#allocation97_spill] sm:$0xff] %v10200_v24 }
 0x4d5   :  { %v10202_v63 = vpop.f32.mrf.mxu1 }
 0x4d6   :  { %12748 = vst [vmem:[#allocation98_spill] sm:$0xff] %v10202_v63 }
 0x4d7   :  { %v10204_v13 = vpop.f32.mrf.mxu1 }
 0x4d8   :  { %12749 = vst [vmem:[#allocation99_spill] sm:$0xff] %v10204_v13 }
 0x4d9   :  { %v10206_v60 = vpop.f32.mrf.mxu1 }
 0x4da   :  { %12750 = vst [vmem:[#allocation100_spill] sm:$0xff] %v10206_v60 }
 0x4dd   :  { %v10208_v29 = vpop.f32.mrf.mxu1 }
 0x4de   :  { %12751 = vst [vmem:[#allocation101_spill] sm:$0xff] %v10208_v29 }
 0x4df   :  { %v10210_v44 = vpop.f32.mrf.mxu1 }
 0x4e0   :  { %12752 = vst [vmem:[#allocation102_spill] sm:$0xff] %v10210_v44 }
 0x4e1   :  { %v10212_v41 = vpop.f32.mrf.mxu1 }
 0x4e2   :  { %12753 = vst [vmem:[#allocation103_spill] sm:$0xff] %v10212_v41 }
 0x4e3   :  { %v10214_v46 = vpop.f32.mrf.mxu1 }
 0x4e4   :  { %12754 = vst [vmem:[#allocation104_spill] sm:$0xff] %v10214_v46 }
 0x547   :  { %v10216_v32 = vpop.f32.mrf.mxu1 }
 0x548   :  { %12755 = vst [vmem:[#allocation105_spill] sm:$0xff] %v10216_v32 }
 0x549   :  { %v10218_v15 = vpop.f32.mrf.mxu1 }
 0x54a   :  { %12756 = vst [vmem:[#allocation106_spill] sm:$0xff] %v10218_v15 }
 0x54b   :  { %v10220_v19 = vpop.f32.mrf.mxu1 }
 0x54c   :  { %12757 = vst [vmem:[#allocation107_spill] sm:$0xff] %v10220_v19 }
 0x54d   :  { %v10222_v4 = vpop.f32.mrf.mxu1 }
 0x54e   :  { %12758 = vst [vmem:[#allocation108_spill] sm:$0xff] %v10222_v4 }
 0x54f   :  { %v10224_v43 = vpop.f32.mrf.mxu1 }
 0x550   :  { %12759 = vst [vmem:[#allocation109_spill] sm:$0xff] %v10224_v43 }
 0x551   :  { %v10226_v50 = vpop.f32.mrf.mxu1 }
 0x552   :  { %12760 = vst [vmem:[#allocation110_spill] sm:$0xff] %v10226_v50 }
 0x553   :  { %v10228_v21 = vpop.f32.mrf.mxu1 }
 0x554   :  { %12761 = vst [vmem:[#allocation111_spill] sm:$0xff] %v10228_v21 }
 0x555   :  { %v10230_v7 = vpop.f32.mrf.mxu1 }
 0x556   :  { %12762 = vst [vmem:[#allocation112_spill] sm:$0xff] %v10230_v7 }
 0x567   :  { %v7698_v58 = vpop.f32.mrf.mxu1 }
 0x568   :  { %v2318_v59 = vsel %vm1662_vm0, %v7698_v58, -inf }
 0x569   :  { %2319 = vmax.xlane.f32.xlu0 %v2318_v59  ;;  %v2281_v40 = vpop.f32.mrf.mxu1 }
 0x56a   :  { %v2312_v49 = vsel %vm1662_vm0, %v2281_v40, -inf }
 0x56b   :  { %2313 = vmax.xlane.f32.xlu1 %v2312_v49  ;;  %v7699_v3 = vpop.f32.mrf.mxu1 }
 0x56c   :  { %v2321_v54 = vsel %vm1662_vm0, %v7699_v3, -inf }
 0x56d   :  { %v2284_v53 = vpop.f32.mrf.mxu1 }
 0x56e   :  { %v2315_v38 = vsel %vm1662_vm0, %v2284_v53, -inf }
 0x56f   :  { %2322 = vmax.xlane.f32.xlu1 %v2321_v54  ;;  %2316 = vmax.xlane.f32.xlu0 %v2315_v38  ;;  %v10236_v56 = vpop.f32.mrf.mxu1 }
 0x570   :  { %v2330_v55 = vsel %vm1662_vm0, %v10236_v56, -inf }
 0x571   :  { %v10240_v57 = vpop.f32.mrf.mxu1 }
 0x572   :  { %v2324_v6 = vsel %vm1662_vm0, %v10240_v57, -inf }
 0x573   :  { %2331 = vmax.xlane.f32.xlu0 %v2330_v55  ;;  %v7703_v59 = vpop.f32.mrf.mxu1 }
 0x574   :  { %v2333_v49 = vsel %vm1662_vm0, %v7703_v59, -inf }
 0x575   :  { %v2300_v54 = vpop.f32.mrf.mxu1 }
 0x577   :  { %2325 = vmax.xlane.f32.xlu0 %v2324_v6 }
 0x580   :  { %2501 = vrot.lane.b32.xlu1 %v10140_v25, %s9224_s0  ;;  %v2327_v25 = vsel %vm1662_vm0, %v2300_v54, -inf }
 0x584   :  { %2499 = vrot.lane.b32.xlu1 %v1599_v45, %s9224_s0 }
 0x58d   :  { %2503 = vrot.lane.b32.xlu0 %v10117_v14, %s9224_s0 }
 0x591   :  { %2485 = vrot.lane.b32.xlu0 %v10166_v17, %s9224_s0 }
 0x595   :  { %2489 = vrot.lane.b32.xlu0 %v2221_v12, %s9224_s0 }
 0x599   :  { %2680 = vrot.lane.b32.xlu0 %v9922_v33, %s9224_s0 }
 0x5a8   :  { %2334 = vmax.xlane.f32.xlu1 %v2333_v49 }
 0x5ac   :  { %2328 = vmax.xlane.f32.xlu1 %v2327_v25 }
 0x5bd   :  { %2497 = vrot.lane.b32.xlu1 %v10178_v20, %s9224_s0 }
 0x5c1   :  { %2487 = vrot.lane.b32.xlu1 %v2220_v42, %s9224_s0 }
 0x5c5   :  { %2491 = vrot.lane.b32.xlu1 %v2222_v35, %s9224_s0 }
 0x5c9   :  { %2678 = vrot.lane.b32.xlu1 %v9906_v48, %s9224_s0 }
 0x5f2   :  { %v2320_v14 = vpop.xlane.xlu0 %2319 }
 0x5f3   :  { %v2338_v33 = vsub.f32 %v7698_v58, %v2320_v14 }
 0x5f4   :  { %v2314_v17 = vpop.xlane.xlu1 %2313 }
 0x5f5   :  { %v2336_v45 = vsub.f32 %v2281_v40, %v2314_v17  ;;  %v2348_v12 = vmul.f32 1.442695, %v2338_v33 }
 0x5f7   :  { %v2344_v38 = vmul.f32 1.442695, %v2336_v45  ;;  %8628 = vpow2.f32 %v2348_v12 }
 0x5f8   :  { %v2323_v55 = vpop.xlane.xlu1 %2322  ;;  %v2317_v6 = vpop.xlane.xlu0 %2316 }
 0x5f9   :  { %v2339_v49 = vsub.f32 %v7699_v3, %v2323_v55  ;;  %v2337_v25 = vsub.f32 %v2284_v53, %v2317_v6  ;;  %8630 = vpow2.f32 %v2344_v38 }
 0x5fb   :  { %v2350_v41 = vmul.f32 1.442695, %v2339_v49  ;;  %v2346_v20 = vmul.f32 1.442695, %v2337_v25 }
 0x5fc   :  { %v2332_v42 = vpop.xlane.xlu0 %2331  ;;  %v2502_v45 = vpop.permute.xlu1 %2501 }
 0x5fd   :  { %8632 = vpow2.f32 %v2350_v41  ;;  %v2524_v38 = vsel %vm1662_vm0, %v2502_v45, 0 }
 0x5fe   :  { %8634 = vpow2.f32 %v2346_v20  ;;  %v2342_v20 = vsub.f32 %v10236_v56, %v2332_v42 }
 0x600   :  { %v2326_v35 = vpop.xlane.xlu0 %2325  ;;  %v2500_v55 = vpop.permute.xlu1 %2499 }
 0x601   :  { %v2521_v6 = vsel %vm1662_vm0, %v2500_v55, 0  ;;  %v2340_v49 = vsub.f32 %v10240_v57, %v2326_v35 }
 0x604   :  { %v2504_v29 = vpop.permute.xlu0 %2503  ;;  %v10263_v48 = vpop.eup %8628 }
 0x605   :  { %8164 = vmatprep.subr.msk.bf16.mxu0 %vm1662_vm0, %v2504_v29  ;;  %12763 = vst [vmem:[#allocation113_spill] sm:$0xff] %v10263_v48  ;;  %v2527_v17 = vsel %vm1662_vm0, %v2504_v29, 0 }
 0x606   :  { %v10265_v40 = vpop.eup %8630 }
 0x607   :  { %12764 = vst [vmem:[#allocation114_spill] sm:$0xff] %v10265_v40 }
 0x608   :  { %v2486_v58 = vpop.permute.xlu0 %2485 }
 0x60a   :  { %v10267_v14 = vpop.eup %8632 }
 0x60b   :  { %12765 = vst [vmem:[#allocation115_spill] sm:$0xff] %v10267_v14  ;;  %v10269_v3 = vpop.eup %8634  ;;  %v2385_v53 = vpack.c.bf16 %v10267_v14, %v10263_v48 }
 0x60c   :  { %12766 = vst [vmem:[#allocation116_spill] sm:$0xff] %v10269_v3  ;;  %v2490_v33 = vpop.permute.xlu0 %2489  ;;  %v2384_v41 = vpack.c.bf16 %v10269_v3, %v10265_v40 }
 0x60e   :  { %7712 = vmatprep.mubr.msk.bf16.mxu0 %vm1662_vm0, %v2384_v41 }
 0x60f   :  { %7713 = vmatmul.mubr.msk.bf16.vlgmr.msra.gmra.mxu0 %vm1662_vm0, %v2385_v53  ;;  %v2352_v53 = vmul.f32 1.442695, %v2340_v49 }
 0x610   :  { %7721 = vmatpush3.bf16.xpose.msra.mxu0 %v2527_v17  ;;  %v2681_v12 = vpop.permute.xlu0 %2680 }
 0x611   :  { %8165 = vmatprep.subr.msk.bf16.mxu0 %vm1662_vm0, %v2502_v45  ;;  %7736 = vmatprep.subr.bf16.mxu1 %v2681_v12  ;;  %8636 = vpow2.f32 %v2352_v53 }
 0x612   :  { %7737 = vmatpush3.bf16.msra.mxu1 %v2681_v12  ;;  %v2356_v12 = vmul.f32 1.442695, %v2342_v20 }
 0x618   :  { %7723 = vmatpush3.bf16.xpose.msra.mxu0 %v2524_v38 }
 0x619   :  { %8166 = vmatprep.subr.msk.bf16.mxu0 %vm1662_vm0, %v2500_v55 }
 0x620   :  { %7725 = vmatpush3.bf16.xpose.msra.mxu0 %v2521_v6 }
 0x631   :  { %v2335_v25 = vpop.xlane.xlu1 %2334 }
 0x632   :  { %v2343_v29 = vsub.f32 %v7703_v59, %v2335_v25  ;;  %v10287_v59 = vpop.eup %8636 }
 0x633   :  { %12767 = vst [vmem:[#allocation117_spill] sm:$0xff] %v10287_v59 }
 0x634   :  { %v2358_v41 = vmul.f32 1.442695, %v2343_v29 }
 0x635   :  { %v2329_v17 = vpop.xlane.xlu1 %2328 }
 0x636   :  { %v2341_v46 = vsub.f32 %v2300_v54, %v2329_v17  ;;  %8638 = vpow2.f32 %v2358_v41 }
 0x638   :  { %v2354_v45 = vmul.f32 1.442695, %v2341_v46 }
 0x639   :  { %v2498_v38 = vpop.permute.xlu1 %2497 }
 0x63a   :  { %8640 = vpow2.f32 %v2354_v45  ;;  %8167 = vmatprep.subr.msk.bf16.mxu0 %vm1662_vm0, %v2498_v38  ;;  %v2518_v55 = vsel %vm1662_vm0, %v2498_v38, 0 }
 0x63b   :  { %8642 = vpow2.f32 %v2356_v12  ;;  %7727 = vmatpush3.bf16.xpose.msra.mxu0 %v2518_v55 }
 0x63c   :  { %7768 = vmatprep.subr.bf16.mxu0 %v9917_v34 }
 0x63d   :  { %v2488_v57 = vpop.permute.xlu1 %2487 }
 0x641   :  { %v2492_v56 = vpop.permute.xlu1 %2491 }
 0x643   :  { %v10289_v54 = vpop.eup %8638 }
 0x644   :  { %12768 = vst [vmem:[#allocation118_spill] sm:$0xff] %v10289_v54 }
 0x645   :  { %v2679_v42 = vpop.permute.xlu1 %2678 }
 0x646   :  { %7738 = vmatprep.subr.bf16.mxu1 %v2679_v42 }
 0x647   :  { %v10291_v46 = vpop.eup %8640  ;;  %7739 = vmatpush3.bf16.msra.mxu1 %v2679_v42 }
 0x648   :  { %12769 = vst [vmem:[#allocation119_spill] sm:$0xff] %v10291_v46  ;;  %v10293_v35 = vpop.eup %8642  ;;  %v2386_v6 = vpack.c.bf16 %v10291_v46, %v10287_v59 }
 0x649   :  { %12770 = vst [vmem:[#allocation120_spill] sm:$0xff] %v10293_v35  ;;  %v2387_v49 = vpack.c.bf16 %v10289_v54, %v10293_v35 }
 0x64a   :  { %7716 = vmatprep.mubr.msk.bf16.mxu0 %vm1662_vm0, %v2386_v6 }
 0x64b   :  { %7717 = vmatmul.mubr.msk.bf16.gmra.mxu0 %vm1662_vm0, %v2387_v49 }
 0x64c   :  { %7728 = vmatprep.mubr.msk.bf16.mxu0 %vm1662_vm0, %v2486_v58 }
 0x653   :  { %7729 = vmatmul.mubr.msk.bf16.vlgmr.msra.gmra.mxu0 %vm1662_vm0, %v2488_v57 }
 0x654   :  { %7769 = vmatpush3.bf16.msra.mxu0 %v9917_v34  ;;  %7732 = vmatprep.mubr.msk.bf16.mxu0 %vm1662_vm0, %v2490_v33 }
 0x655   :  { %7770 = vmatprep.subr.bf16.mxu0 %v9902_v1 }
 0x658   :  { %7771 = vmatpush3.bf16.msra.mxu0 %v9902_v1 }
 0x659   :  { %7772 = vmatprep.subr.bf16.mxu0 %v9884_v11 }
 0x65b   :  { %7733 = vmatmul.mubr.msk.bf16.gmra.mxu0 %vm1662_vm0, %v2492_v56 }
 0x65c   :  { %7773 = vmatpush3.bf16.msra.mxu0 %v9884_v11 }
 0x65d   :  { %7774 = vmatprep.subr.bf16.mxu0 %v9868_v47 }
 0x660   :  { %7775 = vmatpush3.bf16.msra.mxu0 %v9868_v47 }
 0x6cf   :  { %v10312_v58 = vpop.f32.mrf.mxu0 }
 0x6d0   :  { %12771 = vst [vmem:[#allocation121_spill] sm:$0xff] %v10312_v58 }
 0x6d1   :  { %v10314_v25 = vpop.f32.mrf.mxu0 }
 0x6d2   :  { %12772 = vst [vmem:[#allocation122_spill] sm:$0xff] %v10314_v25 }
 0x6d3   :  { %v10316_v29 = vpop.f32.mrf.mxu0 }
 0x6d4   :  { %12773 = vst [vmem:[#allocation123_spill] sm:$0xff] %v10316_v29 }
 0x6d5   :  { %v10318_v33 = vpop.f32.mrf.mxu0 }
 0x6d6   :  { %12774 = vst [vmem:[#allocation124_spill] sm:$0xff] %v10318_v33 }
 0x70b   :  { %v10320_v20 = vpop.f32.mrf.mxu0 }
 0x70c   :  { %12775 = vst [vmem:[#allocation125_spill] sm:$0xff] %v10320_v20 }
 0x70d   :  { %v10322_v53 = vpop.f32.mrf.mxu0 }
 0x70e   :  { %12776 = vst [vmem:[#allocation126_spill] sm:$0xff] %v10322_v53 }
 0x70f   :  { %v10324_v41 = vpop.f32.mrf.mxu0 }
 0x710   :  { %12777 = vst [vmem:[#allocation127_spill] sm:$0xff] %v10324_v41 }
 0x711   :  { %v10326_v17 = vpop.f32.mrf.mxu0 }
 0x712   :  { %12778 = vst [vmem:[#allocation128_spill] sm:$0xff] %v10326_v17 }
 0x713   :  { %v7730_v12 = vpop.f32.mrf.mxu0 }
 0x714   :  { %v2600_v45 = vsel %vm1662_vm0, %v7730_v12, -inf }
 0x715   :  { %2601 = vmax.xlane.f32.xlu0 %v2600_v45  ;;  %v2563_v38 = vpop.f32.mrf.mxu0 }
 0x716   :  { %v2594_v57 = vsel %vm1662_vm0, %v2563_v38, -inf }
 0x717   :  { %v7731_v55 = vpop.f32.mrf.mxu0 }
 0x718   :  { %v2603_v49 = vsel %vm1662_vm0, %v7731_v55, -inf }
 0x719   :  { %2595 = vmax.xlane.f32.xlu0 %v2594_v57  ;;  %v2566_v56 = vpop.f32.mrf.mxu0 }
 0x71a   :  { %v2597_v42 = vsel %vm1662_vm0, %v2566_v56, -inf }
 0x71b   :  { %2598 = vmax.xlane.f32.xlu1 %v2597_v42  ;;  %v7734_v6 = vpop.f32.mrf.mxu0 }
 0x71c   :  { %v2612_v45 = vsel %vm1662_vm0, %v7734_v6, -inf }
 0x71d   :  { %2604 = vmax.xlane.f32.xlu0 %v2603_v49  ;;  %v2579_v41 = vpop.f32.mrf.mxu0 }
 0x71e   :  { %v2606_v20 = vsel %vm1662_vm0, %v2579_v41, -inf }
 0x71f   :  { %2607 = vmax.xlane.f32.xlu1 %v2606_v20  ;;  %v7735_v44 = vpop.f32.mrf.mxu0 }
 0x720   :  { %v2615_v53 = vsel %vm1662_vm0, %v7735_v44, -inf }
 0x721   :  { %2613 = vmax.xlane.f32.xlu0 %v2612_v45  ;;  %v2582_v17 = vpop.f32.mrf.mxu0 }
 0x722   :  { %v2609_v57 = vsel %vm1662_vm0, %v2582_v17, -inf }
 0x723   :  { %2616 = vmax.xlane.f32.xlu1 %v2615_v53 }
 0x725   :  { %2610 = vmax.xlane.f32.xlu0 %v2609_v57 }
 0x734   :  { %2674 = vrot.lane.b32.xlu1 %v9874_v62, %s9224_s0 }
 0x73b   :  { %2676 = vrot.lane.b32.xlu0 %v9888_v2, %s9224_s0 }
 0x79e   :  { %v2602_v42 = vpop.xlane.xlu0 %2601 }
 0x79f   :  { %v2620_v49 = vsub.f32 %v7730_v12, %v2602_v42 }
 0x7a1   :  { %v2630_v58 = vmul.f32 1.442695, %v2620_v49 }
 0x7a2   :  { %v2596_v20 = vpop.xlane.xlu0 %2595 }
 0x7a3   :  { %v2618_v13 = vsub.f32 %v2563_v38, %v2596_v20 }
 0x7a4   :  { %v2599_v24 = vpop.xlane.xlu1 %2598 }
 0x7a5   :  { %v2626_v29 = vmul.f32 1.442695, %v2618_v13  ;;  %v2619_v45 = vsub.f32 %v2566_v56, %v2599_v24 }
 0x7a6   :  { %v2605_v60 = vpop.xlane.xlu0 %2604 }
 0x7a7   :  { %v2628_v63 = vmul.f32 1.442695, %v2619_v45  ;;  %v2621_v53 = vsub.f32 %v7731_v55, %v2605_v60  ;;  %8644 = vpow2.f32 %v2626_v29 }
 0x7a8   :  { %v2608_v33 = vpop.xlane.xlu1 %2607 }
 0x7a9   :  { %8646 = vpow2.f32 %v2628_v63  ;;  %v2632_v57 = vmul.f32 1.442695, %v2621_v53  ;;  %v2622_v25 = vsub.f32 %v2579_v41, %v2608_v33  ;;  %v2805_v41 = vsel %vm1662_vm0, %v9745_v28, 0 }
 0x7aa   :  { %8648 = vpow2.f32 %v2630_v58  ;;  %v2614_v62 = vpop.xlane.xlu0 %2613 }
 0x7ab   :  { %8650 = vpow2.f32 %v2632_v57  ;;  %v2624_v2 = vsub.f32 %v7734_v6, %v2614_v62  ;;  %v2634_v12 = vmul.f32 1.442695, %v2622_v25  ;;  %v2802_v57 = vsel %vm1662_vm0, %v9720_v18, 0 }
 0x7ac   :  { %v2617_v21 = vpop.xlane.xlu1 %2616  ;;  %v2799_v62 = vsel %vm1662_vm0, %v9700_v30, 0 }
 0x7ad   :  { %v2625_v42 = vsub.f32 %v7735_v44, %v2617_v21  ;;  %v2638_v24 = vmul.f32 1.442695, %v2624_v2  ;;  %8652 = vpow2.f32 %v2634_v12  ;;  %v12779_v2 = vld [vmem:[#allocation45_spill] sm:$0xff] }
 0x7ae   :  { %v2611_v38 = vpop.xlane.xlu0 %2610  ;;  %v2796_v12 = vsel %vm1662_vm0, %v12779_v2, 0 }
 0x7af   :  { %v2640_v20 = vmul.f32 1.442695, %v2625_v42  ;;  %v2623_v13 = vsub.f32 %v2582_v17, %v2611_v38  ;;  %v12780_v42 = vld [vmem:[#allocation19_spill] sm:$0xff]  ;;  %v12781_v38 = vld [vmem:[#allocation22_spill] sm:$0xff] }
 0x7b0   :  { %v2675_v63 = vpop.permute.xlu1 %2674 }
 0x7b1   :  { %v2636_v56 = vmul.f32 1.442695, %v2623_v13  ;;  %8654 = vpow2.f32 %v2640_v20  ;;  %v12782_v20 = vld [vmem:[#allocation25_spill] sm:$0xff] }
 0x7b2   :  { %v2677_v60 = vpop.permute.xlu0 %2676 }
 0x7b3   :  { %8656 = vpow2.f32 %v2636_v56  ;;  %7740 = vmatprep.subr.bf16.mxu1 %v2677_v60 }
 0x7b4   :  { %8658 = vpow2.f32 %v2638_v24  ;;  %7741 = vmatpush3.bf16.msra.mxu1 %v2677_v60  ;;  %v10340_v58 = vpop.eup %8644 }
 0x7b5   :  { %7742 = vmatprep.subr.bf16.mxu1 %v2675_v63 }
 0x7b6   :  { %v10342_v29 = vpop.eup %8646 }
 0x7b7   :  { %v10344_v25 = vpop.eup %8648  ;;  %v2666_v44 = vpack.c.bf16 %v10342_v29, %v10340_v58 }
 0x7b8   :  { %v10348_v21 = vpop.eup %8650  ;;  %7743 = vmatpush3.bf16.msra.mxu1 %v2675_v63 }
 0x7b9   :  { %v2667_v33 = vpack.c.bf16 %v10348_v21, %v10344_v25  ;;  %7744 = vmatprep.mubr.msk.bf16.mxu1 %vm1662_vm0, %v2666_v44  ;;  %8168 = vmatprep.subr.msk.bf16.mxu1 %vm1662_vm0, %v9745_v28 }
 0x7ba   :  { %v10360_v17 = vpop.eup %8652 }
 0x7bb   :  { %7745 = vmatmul.mubr.msk.bf16.vlgmr.msra.gmra.mxu1 %vm1662_vm0, %v2667_v33 }
 0x7bc   :  { %7753 = vmatpush3.bf16.xpose.msra.mxu1 %v2805_v41 }
 0x7bd   :  { %8169 = vmatprep.subr.msk.bf16.mxu1 %vm1662_vm0, %v9720_v18 }
 0x7be   :  { %v10362_v55 = vpop.eup %8654 }
 0x7c0   :  { %v10364_v6 = vpop.eup %8656 }
 0x7c1   :  { %v10366_v49 = vpop.eup %8658  ;;  %v2668_v45 = vpack.c.bf16 %v10364_v6, %v10360_v17 }
 0x7c2   :  { %v2669_v53 = vpack.c.bf16 %v10362_v55, %v10366_v49 }
 0x7c3   :  { %7748 = vmatprep.mubr.msk.bf16.mxu1 %vm1662_vm0, %v2668_v45 }
 0x7c4   :  { %7749 = vmatmul.mubr.msk.bf16.gmra.mxu1 %vm1662_vm0, %v2669_v53 }
 0x7c5   :  { %7755 = vmatpush3.bf16.xpose.msra.mxu1 %v2802_v57  ;;  %7760 = vmatprep.mubr.msk.bf16.mxu1 %vm1662_vm0, %v9545_v61 }
 0x7c6   :  { %8170 = vmatprep.subr.msk.bf16.mxu1 %vm1662_vm0, %v9700_v30 }
 0x7cd   :  { %7757 = vmatpush3.bf16.xpose.msra.mxu1 %v2799_v62 }
 0x7ce   :  { %8171 = vmatprep.subr.msk.bf16.mxu1 %vm1662_vm0, %v12779_v2 }
 0x7d5   :  { %7759 = vmatpush3.bf16.xpose.msra.mxu1 %v2796_v12 }
 0x7dc   :  { %7761 = vmatmul.mubr.msk.bf16.vlgmr.msra.gmra.mxu1 %vm1662_vm0, %v12780_v42 }
 0x7dd   :  { %7764 = vmatprep.mubr.msk.bf16.mxu1 %vm1662_vm0, %v12781_v38 }
 0x7e4   :  { %7765 = vmatmul.mubr.msk.bf16.gmra.mxu1 %vm1662_vm0, %v12782_v20 }
 0x87b   :  { %v10392_v13 = vpop.f32.mrf.mxu1 }
 0x87c   :  { %12783 = vst [vmem:[#allocation45_spill] sm:$0xff] %v10392_v13 }
 0x87d   :  { %v10394_v24 = vpop.f32.mrf.mxu1 }
 0x87e   :  { %12784 = vst [vmem:[#allocation19_spill] sm:$0xff] %v10394_v24 }
 0x87f   :  { %v10396_v56 = vpop.f32.mrf.mxu1 }
 0x880   :  { %12785 = vst [vmem:[#allocation22_spill] sm:$0xff] %v10396_v56 }
 0x881   :  { %v10398_v60 = vpop.f32.mrf.mxu1 }
 0x882   :  { %12786 = vst [vmem:[#allocation25_spill] sm:$0xff] %v10398_v60 }
 0x884   :  { %v10400_v63 = vpop.f32.mrf.mxu1 }
 0x885   :  { %12787 = vst [vmem:[#allocation129_spill] sm:$0xff] %v10400_v63 }
 0x886   :  { %v10402_v44 = vpop.f32.mrf.mxu1 }
 0x887   :  { %12788 = vst [vmem:[#allocation130_spill] sm:$0xff] %v10402_v44 }
 0x888   :  { %v10404_v33 = vpop.f32.mrf.mxu1 }
 0x889   :  { %12789 = vst [vmem:[#allocation131_spill] sm:$0xff] %v10404_v33 }
 0x88a   :  { %v10406_v41 = vpop.f32.mrf.mxu1 }
 0x88b   :  { %12790 = vst [vmem:[#allocation132_spill] sm:$0xff] %v10406_v41 }
 0x89c   :  { %v7762_v45 = vpop.f32.mrf.mxu1 }
 0x89d   :  { %v2878_v53 = vsel %vm1662_vm0, %v7762_v45, -inf }
 0x89e   :  { %2879 = vmax.xlane.f32.xlu0 %v2878_v53  ;;  %v2841_v57 = vpop.f32.mrf.mxu1 }
 0x89f   :  { %v2872_v62 = vsel %vm1662_vm0, %v2841_v57, -inf }
 0x8a0   :  { %2873 = vmax.xlane.f32.xlu1 %v2872_v62  ;;  %v7763_v12 = vpop.f32.mrf.mxu1 }
 0x8a1   :  { %v2881_v7 = vsel %vm1662_vm0, %v7763_v12, -inf }
 0x8a2   :  { %v2844_v43 = vpop.f32.mrf.mxu1 }
 0x8a3   :  { %v2875_v63 = vsel %vm1662_vm0, %v2844_v43, -inf }
 0x8a4   :  { %2882 = vmax.xlane.f32.xlu1 %v2881_v7  ;;  %2876 = vmax.xlane.f32.xlu0 %v2875_v63  ;;  %v10412_v44 = vpop.f32.mrf.mxu1 }
 0x8a5   :  { %v2890_v33 = vsel %vm1662_vm0, %v10412_v44, -inf }
 0x8a6   :  { %v10416_v41 = vpop.f32.mrf.mxu1 }
 0x8a7   :  { %v2884_v53 = vsel %vm1662_vm0, %v10416_v41, -inf }
 0x8a8   :  { %2891 = vmax.xlane.f32.xlu0 %v2890_v33  ;;  %v7767_v7 = vpop.f32.mrf.mxu1 }
 0x8a9   :  { %v2893_v63 = vsel %vm1662_vm0, %v7767_v7, -inf }
 0x8aa   :  { %v2860_v33 = vpop.f32.mrf.mxu1 }
 0x8ac   :  { %2885 = vmax.xlane.f32.xlu0 %v2884_v53 }
 0x8b5   :  { %3061 = vrot.lane.b32.xlu1 %v9720_v18, %s9224_s0  ;;  %v2887_v18 = vsel %vm1662_vm0, %v2860_v33, -inf }
 0x8b9   :  { %3059 = vrot.lane.b32.xlu1 %v9700_v30, %s9224_s0 }
 0x8c2   :  { %3063 = vrot.lane.b32.xlu0 %v9745_v28, %s9224_s0 }
 0x8c6   :  { %3045 = vrot.lane.b32.xlu0 %v9545_v61, %s9224_s0 }
 0x8ca   :  { %3049 = vrot.lane.b32.xlu0 %v12781_v38, %s9224_s0 }
 0x8ce   :  { %3240 = vrot.lane.b32.xlu0 %v9917_v34, %s9224_s0 }
 0x8dd   :  { %2894 = vmax.xlane.f32.xlu1 %v2893_v63 }
 0x8e1   :  { %2888 = vmax.xlane.f32.xlu1 %v2887_v18 }
 0x8f2   :  { %3057 = vrot.lane.b32.xlu1 %v12779_v2, %s9224_s0 }
 0x8f6   :  { %3047 = vrot.lane.b32.xlu1 %v12780_v42, %s9224_s0 }
 0x8fa   :  { %3051 = vrot.lane.b32.xlu1 %v12782_v20, %s9224_s0 }
 0x8fe   :  { %3238 = vrot.lane.b32.xlu1 %v9902_v1, %s9224_s0 }
 0x927   :  { %v2880_v61 = vpop.xlane.xlu0 %2879 }
 0x928   :  { %v2898_v28 = vsub.f32 %v7762_v45, %v2880_v61 }
 0x929   :  { %v2874_v30 = vpop.xlane.xlu1 %2873 }
 0x92a   :  { %v2896_v34 = vsub.f32 %v2841_v57, %v2874_v30  ;;  %v2908_v38 = vmul.f32 1.442695, %v2898_v28 }
 0x92c   :  { %v2904_v62 = vmul.f32 1.442695, %v2896_v34  ;;  %8660 = vpow2.f32 %v2908_v38 }
 0x92d   :  { %v2883_v53 = vpop.xlane.xlu1 %2882  ;;  %v2877_v63 = vpop.xlane.xlu0 %2876 }
 0x92e   :  { %v2899_v18 = vsub.f32 %v7763_v12, %v2883_v53  ;;  %v2897_v50 = vsub.f32 %v2844_v43, %v2877_v63  ;;  %8662 = vpow2.f32 %v2904_v62 }
 0x930   :  { %v2910_v2 = vmul.f32 1.442695, %v2899_v18  ;;  %v2906_v56 = vmul.f32 1.442695, %v2897_v50 }
 0x931   :  { %v2892_v42 = vpop.xlane.xlu0 %2891  ;;  %v3062_v30 = vpop.permute.xlu1 %3061 }
 0x932   :  { %8664 = vpow2.f32 %v2910_v2  ;;  %v3084_v38 = vsel %vm1662_vm0, %v3062_v30, 0  ;;  %v2902_v2 = vsub.f32 %v10412_v44, %v2892_v42 }
 0x933   :  { %8666 = vpow2.f32 %v2906_v56 }
 0x935   :  { %v2886_v20 = vpop.xlane.xlu0 %2885  ;;  %v3060_v62 = vpop.permute.xlu1 %3059 }
 0x936   :  { %v3081_v53 = vsel %vm1662_vm0, %v3060_v62, 0  ;;  %v2900_v63 = vsub.f32 %v10416_v41, %v2886_v20  ;;  %v12795_v41 = vld [vmem:[#allocation72_spill] sm:$0xff] }
 0x939   :  { %v3064_v13 = vpop.permute.xlu0 %3063  ;;  %v10443_v1 = vpop.eup %8660 }
 0x93a   :  { %8172 = vmatprep.subr.msk.bf16.mxu0 %vm1662_vm0, %v3064_v13  ;;  %12791 = vst [vmem:[#allocation133_spill] sm:$0xff] %v10443_v1  ;;  %v3087_v28 = vsel %vm1662_vm0, %v3064_v13, 0 }
 0x93b   :  { %v10445_v57 = vpop.eup %8662 }
 0x93c   :  { %12792 = vst [vmem:[#allocation134_spill] sm:$0xff] %v10445_v57 }
 0x93d   :  { %v3046_v45 = vpop.permute.xlu0 %3045 }
 0x93f   :  { %v10447_v61 = vpop.eup %8664 }
 0x940   :  { %12793 = vst [vmem:[#allocation135_spill] sm:$0xff] %v10447_v61  ;;  %v10449_v12 = vpop.eup %8666  ;;  %v2945_v43 = vpack.c.bf16 %v10447_v61, %v10443_v1 }
 0x941   :  { %12794 = vst [vmem:[#allocation136_spill] sm:$0xff] %v10449_v12  ;;  %v3050_v50 = vpop.permute.xlu0 %3049  ;;  %v2944_v56 = vpack.c.bf16 %v10449_v12, %v10445_v57 }
 0x943   :  { %7776 = vmatprep.mubr.msk.bf16.mxu0 %vm1662_vm0, %v2944_v56 }
 0x944   :  { %7777 = vmatmul.mubr.msk.bf16.vlgmr.msra.gmra.mxu0 %vm1662_vm0, %v2945_v43  ;;  %v2912_v43 = vmul.f32 1.442695, %v2900_v63 }
 0x945   :  { %7785 = vmatpush3.bf16.xpose.msra.mxu0 %v3087_v28  ;;  %v3241_v34 = vpop.permute.xlu0 %3240 }
 0x946   :  { %8173 = vmatprep.subr.msk.bf16.mxu0 %vm1662_vm0, %v3062_v30  ;;  %7800 = vmatprep.subr.bf16.mxu1 %v3241_v34  ;;  %8668 = vpow2.f32 %v2912_v43  ;;  %v12802_v43 = vld [vmem:[#allocation69_spill] sm:$0xff] }
 0x947   :  { %7801 = vmatpush3.bf16.msra.mxu1 %v3241_v34  ;;  %v2916_v34 = vmul.f32 1.442695, %v2902_v2  ;;  %v12801_v2 = vld [vmem:[#allocation70_spill] sm:$0xff] }
 0x94d   :  { %7787 = vmatpush3.bf16.xpose.msra.mxu0 %v3084_v38 }
 0x94e   :  { %8174 = vmatprep.subr.msk.bf16.mxu0 %vm1662_vm0, %v3060_v62 }
 0x953   :  { %v10467_v42 = vpop.eup %8668 }
 0x954   :  { %12796 = vst [vmem:[#allocation72_spill] sm:$0xff] %v10467_v42 }
 0x955   :  { %7789 = vmatpush3.bf16.xpose.msra.mxu0 %v3081_v53 }
 0x966   :  { %v2895_v18 = vpop.xlane.xlu1 %2894 }
 0x967   :  { %v2903_v13 = vsub.f32 %v7767_v7, %v2895_v18 }
 0x969   :  { %v2918_v56 = vmul.f32 1.442695, %v2903_v13  ;;  %v12800_v13 = vld [vmem:[#allocation71_spill] sm:$0xff] }
 0x96a   :  { %v2889_v28 = vpop.xlane.xlu1 %2888 }
 0x96b   :  { %v2901_v19 = vsub.f32 %v2860_v33, %v2889_v28  ;;  %8670 = vpow2.f32 %v2918_v56 }
 0x96d   :  { %v2914_v30 = vmul.f32 1.442695, %v2901_v19 }
 0x96e   :  { %v3058_v38 = vpop.permute.xlu1 %3057 }
 0x96f   :  { %8672 = vpow2.f32 %v2914_v30  ;;  %8175 = vmatprep.subr.msk.bf16.mxu0 %vm1662_vm0, %v3058_v38  ;;  %v3078_v62 = vsel %vm1662_vm0, %v3058_v38, 0 }
 0x970   :  { %8674 = vpow2.f32 %v2916_v34  ;;  %7791 = vmatpush3.bf16.xpose.msra.mxu0 %v3078_v62 }
 0x971   :  { %7832 = vmatprep.subr.bf16.mxu0 %v12795_v41 }
 0x972   :  { %v3048_v7 = vpop.permute.xlu1 %3047 }
 0x976   :  { %v3052_v44 = vpop.permute.xlu1 %3051 }
 0x978   :  { %v10469_v33 = vpop.eup %8670 }
 0x979   :  { %12797 = vst [vmem:[#allocation137_spill] sm:$0xff] %v10469_v33 }
 0x97a   :  { %v3239_v20 = vpop.permute.xlu1 %3238 }
 0x97b   :  { %7802 = vmatprep.subr.bf16.mxu1 %v3239_v20 }
 0x97c   :  { %v10471_v19 = vpop.eup %8672  ;;  %7803 = vmatpush3.bf16.msra.mxu1 %v3239_v20 }
 0x97d   :  { %12798 = vst [vmem:[#allocation138_spill] sm:$0xff] %v10471_v19  ;;  %v10473_v53 = vpop.eup %8674  ;;  %v2946_v63 = vpack.c.bf16 %v10471_v19, %v10467_v42 }
 0x97e   :  { %12799 = vst [vmem:[#allocation139_spill] sm:$0xff] %v10473_v53  ;;  %v2947_v18 = vpack.c.bf16 %v10469_v33, %v10473_v53 }
 0x97f   :  { %7780 = vmatprep.mubr.msk.bf16.mxu0 %vm1662_vm0, %v2946_v63 }
 0x980   :  { %7781 = vmatmul.mubr.msk.bf16.gmra.mxu0 %vm1662_vm0, %v2947_v18 }
 0x981   :  { %7792 = vmatprep.mubr.msk.bf16.mxu0 %vm1662_vm0, %v3046_v45 }
 0x988   :  { %7793 = vmatmul.mubr.msk.bf16.vlgmr.msra.gmra.mxu0 %vm1662_vm0, %v3048_v7 }
 0x989   :  { %7833 = vmatpush3.bf16.msra.mxu0 %v12795_v41  ;;  %7796 = vmatprep.mubr.msk.bf16.mxu0 %vm1662_vm0, %v3050_v50 }
 0x98a   :  { %7834 = vmatprep.subr.bf16.mxu0 %v12800_v13 }
 0x98d   :  { %7835 = vmatpush3.bf16.msra.mxu0 %v12800_v13 }
 0x98e   :  { %7836 = vmatprep.subr.bf16.mxu0 %v12801_v2 }
 0x990   :  { %7797 = vmatmul.mubr.msk.bf16.gmra.mxu0 %vm1662_vm0, %v3052_v44 }
 0x991   :  { %7837 = vmatpush3.bf16.msra.mxu0 %v12801_v2 }
 0x992   :  { %7838 = vmatprep.subr.bf16.mxu0 %v12802_v43 }
 0x995   :  { %7839 = vmatpush3.bf16.msra.mxu0 %v12802_v43 }
 0xa04   :  { %v10492_v45 = vpop.f32.mrf.mxu0 }
 0xa05   :  { %12803 = vst [vmem:[#allocation71_spill] sm:$0xff] %v10492_v45 }
 0xa06   :  { %v10494_v56 = vpop.f32.mrf.mxu0 }
 0xa07   :  { %12804 = vst [vmem:[#allocation70_spill] sm:$0xff] %v10494_v56 }
 0xa08   :  { %v10496_v28 = vpop.f32.mrf.mxu0 }
 0xa09   :  { %12805 = vst [vmem:[#allocation69_spill] sm:$0xff] %v10496_v28 }
 0xa0a   :  { %v10498_v50 = vpop.f32.mrf.mxu0 }
 0xa0b   :  { %12806 = vst [vmem:[#allocation140_spill] sm:$0xff] %v10498_v50 }
 0xa40   :  { %v10500_v34 = vpop.f32.mrf.mxu0 }
 0xa41   :  { %12807 = vst [vmem:[#allocation141_spill] sm:$0xff] %v10500_v34 }
 0xa42   :  { %v10502_v30 = vpop.f32.mrf.mxu0 }
 0xa43   :  { %12808 = vst [vmem:[#allocation142_spill] sm:$0xff] %v10502_v30 }
 0xa44   :  { %v10504_v38 = vpop.f32.mrf.mxu0 }
 0xa45   :  { %12809 = vst [vmem:[#allocation143_spill] sm:$0xff] %v10504_v38 }
 0xa46   :  { %v10506_v62 = vpop.f32.mrf.mxu0 }
 0xa47   :  { %12810 = vst [vmem:[#allocation144_spill] sm:$0xff] %v10506_v62 }
 0xa48   :  { %v7794_v7 = vpop.f32.mrf.mxu0 }
 0xa49   :  { %v3160_v44 = vsel %vm1662_vm0, %v7794_v7, -inf }
 0xa4a   :  { %3161 = vmax.xlane.f32.xlu0 %v3160_v44  ;;  %v3123_v20 = vpop.f32.mrf.mxu0 }
 0xa4b   :  { %v3154_v18 = vsel %vm1662_vm0, %v3123_v20, -inf }
 0xa4c   :  { %v7795_v63 = vpop.f32.mrf.mxu0 }
 0xa4d   :  { %v3163_v30 = vsel %vm1662_vm0, %v7795_v63, -inf }
 0xa4e   :  { %3155 = vmax.xlane.f32.xlu0 %v3154_v18  ;;  %v3126_v28 = vpop.f32.mrf.mxu0 }
 0xa4f   :  { %v3157_v45 = vsel %vm1662_vm0, %v3126_v28, -inf }
 0xa50   :  { %3158 = vmax.xlane.f32.xlu1 %v3157_v45  ;;  %v7798_v34 = vpop.f32.mrf.mxu0 }
 0xa51   :  { %v3172_v44 = vsel %vm1662_vm0, %v7798_v34, -inf }
 0xa52   :  { %3164 = vmax.xlane.f32.xlu0 %v3163_v30  ;;  %v3139_v38 = vpop.f32.mrf.mxu0 }
 0xa53   :  { %v3166_v62 = vsel %vm1662_vm0, %v3139_v38, -inf }
 0xa54   :  { %3167 = vmax.xlane.f32.xlu1 %v3166_v62  ;;  %v7799_v50 = vpop.f32.mrf.mxu0 }
 0xa55   :  { %v3175_v53 = vsel %vm1662_vm0, %v7799_v50, -inf }
 0xa56   :  { %3173 = vmax.xlane.f32.xlu0 %v3172_v44  ;;  %v3142_v56 = vpop.f32.mrf.mxu0 }
 0xa57   :  { %v3169_v18 = vsel %vm1662_vm0, %v3142_v56, -inf }
 0xa58   :  { %3176 = vmax.xlane.f32.xlu1 %v3175_v53 }
 0xa5a   :  { %3170 = vmax.xlane.f32.xlu0 %v3169_v18 }
 0xa69   :  { %3234 = vrot.lane.b32.xlu1 %v9868_v47, %s9224_s0 }
 0xa70   :  { %3236 = vrot.lane.b32.xlu0 %v9884_v11, %s9224_s0 }
 0xad3   :  { %v3162_v45 = vpop.xlane.xlu0 %3161 }
 0xad4   :  { %v3180_v30 = vsub.f32 %v7794_v7, %v3162_v45 }
 0xad6   :  { %v3190_v42 = vmul.f32 1.442695, %v3180_v30 }
 0xad7   :  { %v3156_v62 = vpop.xlane.xlu0 %3155 }
 0xad8   :  { %v3178_v33 = vsub.f32 %v3123_v20, %v3156_v62 }
 0xad9   :  { %v3159_v32 = vpop.xlane.xlu1 %3158 }
 0xada   :  { %v3186_v19 = vmul.f32 1.442695, %v3178_v33  ;;  %v3179_v44 = vsub.f32 %v3126_v28, %v3159_v32 }
 0xadb   :  { %v3165_v60 = vpop.xlane.xlu0 %3164 }
 0xadc   :  { %v3188_v24 = vmul.f32 1.442695, %v3179_v44  ;;  %v3181_v53 = vsub.f32 %v7795_v63, %v3165_v60  ;;  %8676 = vpow2.f32 %v3186_v19  ;;  %v12811_v19 = vld [vmem:[#allocation52_spill] sm:$0xff]  ;;  %v12812_v63 = vld [vmem:[#allocation51_spill] sm:$0xff] }
 0xadd   :  { %v3168_v15 = vpop.xlane.xlu1 %3167 }
 0xade   :  { %8678 = vpow2.f32 %v3188_v24  ;;  %v3192_v18 = vmul.f32 1.442695, %v3181_v53  ;;  %v3182_v4 = vsub.f32 %v3139_v38, %v3168_v15  ;;  %v1326_v24 = vadd.f32 %v12812_v63, %v12811_v19  ;;  %v12820_v63 = vld [vmem:[#allocation47_spill] sm:$0xff] }
 0xadf   :  { %8680 = vpow2.f32 %v3190_v42  ;;  %v3174_v47 = vpop.xlane.xlu0 %3173 }
 0xae0   :  { %8682 = vpow2.f32 %v3192_v18  ;;  %v3184_v11 = vsub.f32 %v7798_v34, %v3174_v47  ;;  %v3194_v7 = vmul.f32 1.442695, %v3182_v4  ;;  %v12813_v4 = vld [vmem:[#allocation50_spill] sm:$0xff]  ;;  %v12814_v34 = vld [vmem:[#allocation49_spill] sm:$0xff]  ;;  %v12815_v18 = vld [vmem:[#allocation48_spill] sm:$0xff] }
 0xae1   :  { %v3177_v61 = vpop.xlane.xlu1 %3176  ;;  %v1316_v38 = vadd.f32 %v12814_v34, %v12811_v19  ;;  %v1312_v47 = vadd.f32 %v12815_v18, %v12811_v19 }
 0xae2   :  { %v3185_v45 = vsub.f32 %v7799_v50, %v3177_v61  ;;  %v3198_v32 = vmul.f32 1.442695, %v3184_v11  ;;  %8684 = vpow2.f32 %v3194_v7  ;;  %v1322_v61 = vadd.f32 %v12813_v4, %v12811_v19  ;;  %v12822_v4 = vld [vmem:[#allocation15_spill] sm:$0xff] }
 0xae3   :  { %v3171_v20 = vpop.xlane.xlu0 %3170  ;;  %v10545_v7 = vpack.c.bf16 %v1316_v38, %v1312_v47  ;;  %v12823_v38 = vld [vmem:[#allocation46_spill] sm:$0xff] }
 0xae4   :  { %v3200_v62 = vmul.f32 1.442695, %v3185_v45  ;;  %v3183_v33 = vsub.f32 %v3142_v56, %v3171_v20  ;;  %v10532_v30 = vpack.c.bf16 %v1326_v24, %v1322_v61  ;;  %v1306_v24 = vadd.f32 %v12820_v63, %v12811_v19 }
 0xae5   :  { %v3235_v15 = vpop.permute.xlu1 %3234 }
 0xae6   :  { %v3196_v28 = vmul.f32 1.442695, %v3183_v33  ;;  %8686 = vpow2.f32 %v3200_v62  ;;  %v3365_v45 = vsel %vm1662_vm0, %v10532_v30, 0  ;;  %v12818_v33 = vld [vmem:[#allocation26_spill] sm:$0xff] }
 0xae7   :  { %v3237_v60 = vpop.permute.xlu0 %3236  ;;  %v1066_v61 = vadd.f32 %v12822_v4, %v12818_v33  ;;  %v12825_v4 = vld [vmem:[#allocation43_spill] sm:$0xff] }
 0xae8   :  { %8688 = vpow2.f32 %v3196_v28  ;;  %7804 = vmatprep.subr.bf16.mxu1 %v3237_v60 }
 0xae9   :  { %8690 = vpow2.f32 %v3198_v32  ;;  %7805 = vmatpush3.bf16.msra.mxu1 %v3237_v60  ;;  %v10522_v42 = vpop.eup %8676  ;;  %v12819_v32 = vld [vmem:[#allocation16_spill] sm:$0xff] }
 0xaea   :  { %7806 = vmatprep.subr.bf16.mxu1 %v3235_v15  ;;  %v1070_v28 = vadd.f32 %v12819_v32, %v12818_v33  ;;  %v12824_v32 = vld [vmem:[#allocation44_spill] sm:$0xff] }
 0xaeb   :  { %v10526_v56 = vpop.eup %8678  ;;  %v1296_v63 = vadd.f32 %v12824_v32, %v12811_v19  ;;  %v12828_v32 = vld [vmem:[#allocation17_spill] sm:$0xff] }
 0xaec   :  { %v10528_v50 = vpop.eup %8680  ;;  %v3226_v44 = vpack.c.bf16 %v10526_v56, %v10522_v42  ;;  %v3339_v47 = vpack.c.bf16 %v1070_v28, %v1066_v61  ;;  %v1076_v1 = vadd.f32 %v12828_v32, %v12818_v33 }
 0xaed   :  { %v10536_v53 = vpop.eup %8682  ;;  %7807 = vmatpush3.bf16.msra.mxu1 %v3235_v15 }
 0xaee   :  { %v3227_v11 = vpack.c.bf16 %v10536_v53, %v10528_v50  ;;  %7808 = vmatprep.mubr.msk.bf16.mxu1 %vm1662_vm0, %v3226_v44  ;;  %8176 = vmatprep.subr.msk.bf16.mxu1 %vm1662_vm0, %v10532_v30  ;;  %v1302_v44 = vadd.f32 %v12823_v38, %v12811_v19  ;;  %v1292_v38 = vadd.f32 %v12825_v4, %v12811_v19  ;;  %v12829_v19 = vld [vmem:[#allocation20_spill] sm:$0xff] }
 0xaef   :  { %v10552_v20 = vpop.eup %8684 }
 0xaf0   :  { %7809 = vmatmul.mubr.msk.bf16.vlgmr.msra.gmra.mxu1 %vm1662_vm0, %v3227_v11  ;;  %12816 = vst [vmem:[#allocation52_spill] sm:$0xff] %v10552_v20  ;;  %v1601_v11 = vpack.c.bf16 %v1306_v24, %v1302_v44  ;;  %v1597_v28 = vpack.c.bf16 %v1296_v63, %v1292_v38  ;;  %v1086_v63 = vadd.f32 %v12829_v19, %v12818_v33 }
 0xaf1   :  { %7817 = vmatpush3.bf16.xpose.msra.mxu1 %v3365_v45  ;;  %v3362_v45 = vsel %vm1662_vm0, %v10545_v7, 0 }
 0xaf2   :  { %8177 = vmatprep.subr.msk.bf16.mxu1 %vm1662_vm0, %v10545_v7  ;;  %v3359_v61 = vsel %vm1662_vm0, %v1601_v11, 0  ;;  %v3356_v24 = vsel %vm1662_vm0, %v1597_v28, 0 }
 0xaf3   :  { %v10554_v62 = vpop.eup %8686 }
 0xaf4   :  { %12817 = vst [vmem:[#allocation51_spill] sm:$0xff] %v10554_v62 }
 0xaf5   :  { %v10558_v60 = vpop.eup %8688 }
 0xaf6   :  { %v10562_v15 = vpop.eup %8690  ;;  %v3228_v34 = vpack.c.bf16 %v10558_v60, %v10552_v20 }
 0xaf7   :  { %12821 = vst [vmem:[#allocation50_spill] sm:$0xff] %v10562_v15  ;;  %v3229_v18 = vpack.c.bf16 %v10554_v62, %v10562_v15 }
 0xaf8   :  { %7812 = vmatprep.mubr.msk.bf16.mxu1 %vm1662_vm0, %v3228_v34  ;;  %v12826_v34 = vld [vmem:[#allocation18_spill] sm:$0xff] }
 0xaf9   :  { %7813 = vmatmul.mubr.msk.bf16.gmra.mxu1 %vm1662_vm0, %v3229_v18  ;;  %v1080_v44 = vadd.f32 %v12826_v34, %v12818_v33  ;;  %v12827_v18 = vld [vmem:[#allocation21_spill] sm:$0xff]  ;;  %v12831_v34 = vld [vmem:[#allocation23_spill] sm:$0xff] }
 0xafa   :  { %7819 = vmatpush3.bf16.xpose.msra.mxu1 %v3362_v45  ;;  %7824 = vmatprep.mubr.msk.bf16.mxu1 %vm1662_vm0, %v3339_v47  ;;  %v1090_v45 = vadd.f32 %v12827_v18, %v12818_v33  ;;  %v1096_v23 = vadd.f32 %v12831_v34, %v12818_v33 }
 0xafb   :  { %8178 = vmatprep.subr.msk.bf16.mxu1 %vm1662_vm0, %v1601_v11  ;;  %v3340_v4 = vpack.c.bf16 %v1080_v44, %v1076_v1 }
 0xafc   :  { %v3341_v38 = vpack.c.bf16 %v1090_v45, %v1086_v63 }
 0xb02   :  { %7821 = vmatpush3.bf16.xpose.msra.mxu1 %v3359_v61  ;;  %v12830_v61 = vld [vmem:[#allocation24_spill] sm:$0xff] }
 0xb03   :  { %8179 = vmatprep.subr.msk.bf16.mxu1 %vm1662_vm0, %v1597_v28 }
 0xb0a   :  { %7823 = vmatpush3.bf16.xpose.msra.mxu1 %v3356_v24  ;;  %v1100_v24 = vadd.f32 %v12830_v61, %v12818_v33 }
 0xb0c   :  { %v3342_v5 = vpack.c.bf16 %v1100_v24, %v1096_v23 }
 0xb11   :  { %7825 = vmatmul.mubr.msk.bf16.vlgmr.msra.gmra.mxu1 %vm1662_vm0, %v3340_v4 }
 0xb12   :  { %7828 = vmatprep.mubr.msk.bf16.mxu1 %vm1662_vm0, %v3341_v38 }
 0xb19   :  { %7829 = vmatmul.mubr.msk.bf16.gmra.mxu1 %vm1662_vm0, %v3342_v5 }
 0xbb0   :  { %v10600_v18 = vpop.f32.mrf.mxu1 }
 0xbb1   :  { %12832 = vst [vmem:[#allocation49_spill] sm:$0xff] %v10600_v18 }
 0xbb2   :  { %v10602_v32 = vpop.f32.mrf.mxu1 }
 0xbb3   :  { %12833 = vst [vmem:[#allocation48_spill] sm:$0xff] %v10602_v32 }
 0xbb4   :  { %v10604_v19 = vpop.f32.mrf.mxu1 }
 0xbb5   :  { %12834 = vst [vmem:[#allocation26_spill] sm:$0xff] %v10604_v19 }
 0xbb6   :  { %v10606_v1 = vpop.f32.mrf.mxu1 }
 0xbb7   :  { %12835 = vst [vmem:[#allocation16_spill] sm:$0xff] %v10606_v1 }
 0xbb9   :  { %v10608_v44 = vpop.f32.mrf.mxu1 }
 0xbba   :  { %12836 = vst [vmem:[#allocation47_spill] sm:$0xff] %v10608_v44 }
 0xbbb   :  { %v10610_v45 = vpop.f32.mrf.mxu1 }
 0xbbc   :  { %12837 = vst [vmem:[#allocation15_spill] sm:$0xff] %v10610_v45 }
 0xbbd   :  { %v10612_v63 = vpop.f32.mrf.mxu1 }
 0xbbe   :  { %12838 = vst [vmem:[#allocation46_spill] sm:$0xff] %v10612_v63 }
 0xbbf   :  { %v10614_v61 = vpop.f32.mrf.mxu1 }
 0xbc0   :  { %12839 = vst [vmem:[#allocation44_spill] sm:$0xff] %v10614_v61 }
 0xbd1   :  { %v7826_v33 = vpop.f32.mrf.mxu1 }
 0xbd2   :  { %v3438_v23 = vsel %vm1662_vm0, %v7826_v33, -inf }
 0xbd3   :  { %3439 = vmax.xlane.f32.xlu0 %v3438_v23  ;;  %v3401_v24 = vpop.f32.mrf.mxu1 }
 0xbd4   :  { %v3432_v34 = vsel %vm1662_vm0, %v3401_v24, -inf }
 0xbd5   :  { %3433 = vmax.xlane.f32.xlu1 %v3432_v34  ;;  %v7827_v18 = vpop.f32.mrf.mxu1 }
 0xbd6   :  { %v3441_v1 = vsel %vm1662_vm0, %v7827_v18, -inf }
 0xbd7   :  { %v3404_v19 = vpop.f32.mrf.mxu1 }
 0xbd8   :  { %v3435_v44 = vsel %vm1662_vm0, %v3404_v19, -inf }
 0xbd9   :  { %3442 = vmax.xlane.f32.xlu1 %v3441_v1  ;;  %3436 = vmax.xlane.f32.xlu0 %v3435_v44  ;;  %v10620_v45 = vpop.f32.mrf.mxu1 }
 0xbda   :  { %v3450_v63 = vsel %vm1662_vm0, %v10620_v45, -inf }
 0xbdb   :  { %v10624_v61 = vpop.f32.mrf.mxu1 }
 0xbdc   :  { %v3444_v23 = vsel %vm1662_vm0, %v10624_v61, -inf }
 0xbdd   :  { %3451 = vmax.xlane.f32.xlu0 %v3450_v63  ;;  %v7831_v1 = vpop.f32.mrf.mxu1 }
 0xbde   :  { %v3453_v44 = vsel %vm1662_vm0, %v7831_v1, -inf }
 0xbdf   :  { %v3420_v63 = vpop.f32.mrf.mxu1 }
 0xbe0   :  { %v3447_v34 = vsel %vm1662_vm0, %v3420_v63, -inf }
 0xbe1   :  { %3445 = vmax.xlane.f32.xlu0 %v3444_v23 }
 0xbea   :  { %3621 = vrot.lane.b32.xlu1 %v10545_v7, %s9224_s0 }
 0xbee   :  { %3619 = vrot.lane.b32.xlu1 %v1601_v11, %s9224_s0 }
 0xbf7   :  { %3623 = vrot.lane.b32.xlu0 %v10532_v30, %s9224_s0 }
 0xbfb   :  { %3605 = vrot.lane.b32.xlu0 %v3339_v47, %s9224_s0 }
 0xbff   :  { %3609 = vrot.lane.b32.xlu0 %v3341_v38, %s9224_s0 }
 0xc03   :  { %3800 = vrot.lane.b32.xlu0 %v12795_v41, %s9224_s0 }
 0xc12   :  { %3454 = vmax.xlane.f32.xlu1 %v3453_v44 }
 0xc16   :  { %3448 = vmax.xlane.f32.xlu1 %v3447_v34 }
 0xc27   :  { %3617 = vrot.lane.b32.xlu1 %v1597_v28, %s9224_s0 }
 0xc2b   :  { %3607 = vrot.lane.b32.xlu1 %v3340_v4, %s9224_s0 }
 0xc2f   :  { %3611 = vrot.lane.b32.xlu1 %v3342_v5, %s9224_s0 }
 0xc33   :  { %3798 = vrot.lane.b32.xlu1 %v12800_v13, %s9224_s0 }
 0xc5c   :  { %v3440_v30 = vpop.xlane.xlu0 %3439 }
 0xc5d   :  { %v3458_v7 = vsub.f32 %v7826_v33, %v3440_v30 }
 0xc5e   :  { %v3434_v41 = vpop.xlane.xlu1 %3433 }
 0xc5f   :  { %v3456_v47 = vsub.f32 %v3401_v24, %v3434_v41  ;;  %v3468_v11 = vmul.f32 1.442695, %v3458_v7 }
 0xc61   :  { %v3464_v38 = vmul.f32 1.442695, %v3456_v47  ;;  %8692 = vpow2.f32 %v3468_v11 }
 0xc62   :  { %v3443_v23 = vpop.xlane.xlu1 %3442  ;;  %v3437_v44 = vpop.xlane.xlu0 %3436 }
 0xc63   :  { %v3459_v32 = vsub.f32 %v7827_v18, %v3443_v23  ;;  %v3457_v54 = vsub.f32 %v3404_v19, %v3437_v44  ;;  %8694 = vpow2.f32 %v3464_v38 }
 0xc65   :  { %v3470_v34 = vmul.f32 1.442695, %v3459_v32  ;;  %v3466_v28 = vmul.f32 1.442695, %v3457_v54 }
 0xc66   :  { %v3452_v4 = vpop.xlane.xlu0 %3451  ;;  %v3622_v41 = vpop.permute.xlu1 %3621 }
 0xc67   :  { %8696 = vpow2.f32 %v3470_v34  ;;  %v3644_v11 = vsel %vm1662_vm0, %v3622_v41, 0 }
 0xc68   :  { %8698 = vpow2.f32 %v3466_v28  ;;  %v3462_v28 = vsub.f32 %v10620_v45, %v3452_v4 }
 0xc6a   :  { %v3446_v5 = vpop.xlane.xlu0 %3445  ;;  %v3620_v38 = vpop.permute.xlu1 %3619 }
 0xc6b   :  { %v3641_v23 = vsel %vm1662_vm0, %v3620_v38, 0  ;;  %v3460_v44 = vsub.f32 %v10624_v61, %v3446_v5  ;;  %v12844_v61 = vld [vmem:[#allocation85_spill] sm:$0xff] }
 0xc6e   :  { %v3624_v35 = vpop.permute.xlu0 %3623  ;;  %v10645_v13 = vpop.eup %8692 }
 0xc6f   :  { %8180 = vmatprep.subr.msk.bf16.mxu0 %vm1662_vm0, %v3624_v35  ;;  %12840 = vst [vmem:[#allocation43_spill] sm:$0xff] %v10645_v13  ;;  %v3647_v7 = vsel %vm1662_vm0, %v3624_v35, 0 }
 0xc70   :  { %v10647_v24 = vpop.eup %8694 }
 0xc71   :  { %12841 = vst [vmem:[#allocation18_spill] sm:$0xff] %v10647_v24 }
 0xc72   :  { %v3606_v33 = vpop.permute.xlu0 %3605 }
 0xc74   :  { %v10649_v30 = vpop.eup %8696 }
 0xc75   :  { %12842 = vst [vmem:[#allocation21_spill] sm:$0xff] %v10649_v30  ;;  %v10651_v18 = vpop.eup %8698  ;;  %v3505_v54 = vpack.c.bf16 %v10649_v30, %v10645_v13 }
 0xc76   :  { %12843 = vst [vmem:[#allocation17_spill] sm:$0xff] %v10651_v18  ;;  %v3610_v32 = vpop.permute.xlu0 %3609  ;;  %v3504_v19 = vpack.c.bf16 %v10651_v18, %v10647_v24 }
 0xc78   :  { %7840 = vmatprep.mubr.msk.bf16.mxu0 %vm1662_vm0, %v3504_v19 }
 0xc79   :  { %7841 = vmatmul.mubr.msk.bf16.vlgmr.msra.gmra.mxu0 %vm1662_vm0, %v3505_v54  ;;  %v3472_v54 = vmul.f32 1.442695, %v3460_v44 }
 0xc7a   :  { %7849 = vmatpush3.bf16.xpose.msra.mxu0 %v3647_v7  ;;  %v3801_v47 = vpop.permute.xlu0 %3800 }
 0xc7b   :  { %8181 = vmatprep.subr.msk.bf16.mxu0 %vm1662_vm0, %v3622_v41  ;;  %7864 = vmatprep.subr.bf16.mxu1 %v3801_v47  ;;  %8700 = vpow2.f32 %v3472_v54  ;;  %v12851_v54 = vld [vmem:[#allocation73_spill] sm:$0xff] }
 0xc7c   :  { %7865 = vmatpush3.bf16.msra.mxu1 %v3801_v47  ;;  %v3476_v47 = vmul.f32 1.442695, %v3462_v28  ;;  %v12850_v28 = vld [vmem:[#allocation77_spill] sm:$0xff] }
 0xc82   :  { %7851 = vmatpush3.bf16.xpose.msra.mxu0 %v3644_v11 }
 0xc83   :  { %8182 = vmatprep.subr.msk.bf16.mxu0 %vm1662_vm0, %v3620_v38 }
 0xc88   :  { %v10669_v4 = vpop.eup %8700 }
 0xc89   :  { %12845 = vst [vmem:[#allocation20_spill] sm:$0xff] %v10669_v4 }
 0xc8a   :  { %7853 = vmatpush3.bf16.xpose.msra.mxu0 %v3641_v23 }
 0xc9b   :  { %v3455_v34 = vpop.xlane.xlu1 %3454 }
 0xc9c   :  { %v3463_v35 = vsub.f32 %v7831_v1, %v3455_v34 }
 0xc9e   :  { %v3478_v19 = vmul.f32 1.442695, %v3463_v35  ;;  %v12849_v35 = vld [vmem:[#allocation81_spill] sm:$0xff] }
 0xc9f   :  { %v3449_v7 = vpop.xlane.xlu1 %3448 }
 0xca0   :  { %v3461_v30 = vsub.f32 %v3420_v63, %v3449_v7  ;;  %8702 = vpow2.f32 %v3478_v19 }
 0xca2   :  { %v3474_v41 = vmul.f32 1.442695, %v3461_v30 }
 0xca3   :  { %v3618_v11 = vpop.permute.xlu1 %3617 }
 0xca4   :  { %8704 = vpow2.f32 %v3474_v41  ;;  %8183 = vmatprep.subr.msk.bf16.mxu0 %vm1662_vm0, %v3618_v11  ;;  %v3638_v38 = vsel %vm1662_vm0, %v3618_v11, 0 }
 0xca5   :  { %8706 = vpow2.f32 %v3476_v47  ;;  %7855 = vmatpush3.bf16.xpose.msra.mxu0 %v3638_v38 }
 0xca6   :  { %7896 = vmatprep.subr.bf16.mxu0 %v12844_v61 }
 0xca7   :  { %v3608_v1 = vpop.permute.xlu1 %3607 }
 0xcab   :  { %v3612_v45 = vpop.permute.xlu1 %3611 }
 0xcad   :  { %v10671_v63 = vpop.eup %8702 }
 0xcae   :  { %12846 = vst [vmem:[#allocation24_spill] sm:$0xff] %v10671_v63 }
 0xcaf   :  { %v3799_v5 = vpop.permute.xlu1 %3798 }
 0xcb0   :  { %7866 = vmatprep.subr.bf16.mxu1 %v3799_v5 }
 0xcb1   :  { %v10673_v30 = vpop.eup %8704  ;;  %7867 = vmatpush3.bf16.msra.mxu1 %v3799_v5 }
 0xcb2   :  { %12847 = vst [vmem:[#allocation23_spill] sm:$0xff] %v10673_v30  ;;  %v10675_v23 = vpop.eup %8706  ;;  %v3506_v44 = vpack.c.bf16 %v10673_v30, %v10669_v4 }
 0xcb3   :  { %12848 = vst [vmem:[#allocation85_spill] sm:$0xff] %v10675_v23  ;;  %v3507_v34 = vpack.c.bf16 %v10671_v63, %v10675_v23 }
 0xcb4   :  { %7844 = vmatprep.mubr.msk.bf16.mxu0 %vm1662_vm0, %v3506_v44 }
 0xcb5   :  { %7845 = vmatmul.mubr.msk.bf16.gmra.mxu0 %vm1662_vm0, %v3507_v34 }
 0xcb6   :  { %7856 = vmatprep.mubr.msk.bf16.mxu0 %vm1662_vm0, %v3606_v33 }
 0xcbd   :  { %7857 = vmatmul.mubr.msk.bf16.vlgmr.msra.gmra.mxu0 %vm1662_vm0, %v3608_v1 }
 0xcbe   :  { %7897 = vmatpush3.bf16.msra.mxu0 %v12844_v61  ;;  %7860 = vmatprep.mubr.msk.bf16.mxu0 %vm1662_vm0, %v3610_v32 }
 0xcbf   :  { %7898 = vmatprep.subr.bf16.mxu0 %v12849_v35 }
 0xcc2   :  { %7899 = vmatpush3.bf16.msra.mxu0 %v12849_v35 }
 0xcc3   :  { %7900 = vmatprep.subr.bf16.mxu0 %v12850_v28 }
 0xcc5   :  { %7861 = vmatmul.mubr.msk.bf16.gmra.mxu0 %vm1662_vm0, %v3612_v45 }
 0xcc6   :  { %7901 = vmatpush3.bf16.msra.mxu0 %v12850_v28 }
 0xcc7   :  { %7902 = vmatprep.subr.bf16.mxu0 %v12851_v54 }
 0xcca   :  { %7903 = vmatpush3.bf16.msra.mxu0 %v12851_v54 }
 0xd39   :  { %v10694_v33 = vpop.f32.mrf.mxu0 }
 0xd3a   :  { %12852 = vst [vmem:[#allocation81_spill] sm:$0xff] %v10694_v33 }
 0xd3b   :  { %v10696_v19 = vpop.f32.mrf.mxu0 }
 0xd3c   :  { %12853 = vst [vmem:[#allocation77_spill] sm:$0xff] %v10696_v19 }
 0xd3d   :  { %v10698_v7 = vpop.f32.mrf.mxu0 }
 0xd3e   :  { %12854 = vst [vmem:[#allocation73_spill] sm:$0xff] %v10698_v7 }
 0xd3f   :  { %v10700_v32 = vpop.f32.mrf.mxu0 }
 0xd40   :  { %12855 = vst [vmem:[#allocation145_spill] sm:$0xff] %v10700_v32 }
 0xd75   :  { %v10702_v47 = vpop.f32.mrf.mxu0 }
 0xd76   :  { %12856 = vst [vmem:[#allocation146_spill] sm:$0xff] %v10702_v47 }
 0xd77   :  { %v10704_v41 = vpop.f32.mrf.mxu0 }
 0xd78   :  { %12857 = vst [vmem:[#allocation147_spill] sm:$0xff] %v10704_v41 }
 0xd79   :  { %v10706_v11 = vpop.f32.mrf.mxu0 }
 0xd7a   :  { %12858 = vst [vmem:[#allocation148_spill] sm:$0xff] %v10706_v11 }
 0xd7b   :  { %v10708_v38 = vpop.f32.mrf.mxu0 }
 0xd7c   :  { %12859 = vst [vmem:[#allocation149_spill] sm:$0xff] %v10708_v38 }
 0xd7d   :  { %v7858_v1 = vpop.f32.mrf.mxu0 }
 0xd7e   :  { %v3720_v45 = vsel %vm1662_vm0, %v7858_v1, -inf }
 0xd7f   :  { %3721 = vmax.xlane.f32.xlu0 %v3720_v45  ;;  %v3683_v5 = vpop.f32.mrf.mxu0 }
 0xd80   :  { %v3714_v34 = vsel %vm1662_vm0, %v3683_v5, -inf }
 0xd81   :  { %v7859_v44 = vpop.f32.mrf.mxu0 }
 0xd82   :  { %v3723_v41 = vsel %vm1662_vm0, %v7859_v44, -inf }
 0xd83   :  { %3715 = vmax.xlane.f32.xlu0 %v3714_v34  ;;  %v3686_v7 = vpop.f32.mrf.mxu0 }
 0xd84   :  { %v3717_v33 = vsel %vm1662_vm0, %v3686_v7, -inf }
 0xd85   :  { %3718 = vmax.xlane.f32.xlu1 %v3717_v33  ;;  %v7862_v47 = vpop.f32.mrf.mxu0 }
 0xd86   :  { %v3732_v45 = vsel %vm1662_vm0, %v7862_v47, -inf }
 0xd87   :  { %3724 = vmax.xlane.f32.xlu0 %v3723_v41  ;;  %v3699_v11 = vpop.f32.mrf.mxu0 }
 0xd88   :  { %v3726_v38 = vsel %vm1662_vm0, %v3699_v11, -inf }
 0xd89   :  { %3727 = vmax.xlane.f32.xlu1 %v3726_v38  ;;  %v7863_v32 = vpop.f32.mrf.mxu0 }
 0xd8a   :  { %v3735_v63 = vsel %vm1662_vm0, %v7863_v32, -inf }
 0xd8b   :  { %3733 = vmax.xlane.f32.xlu0 %v3732_v45  ;;  %v3702_v19 = vpop.f32.mrf.mxu0 }
 0xd8c   :  { %v3729_v34 = vsel %vm1662_vm0, %v3702_v19, -inf }
 0xd8d   :  { %3736 = vmax.xlane.f32.xlu1 %v3735_v63 }
 0xd8f   :  { %3730 = vmax.xlane.f32.xlu0 %v3729_v34 }
 0xd9e   :  { %3794 = vrot.lane.b32.xlu1 %v12802_v43, %s9224_s0 }
 0xda5   :  { %3796 = vrot.lane.b32.xlu0 %v12801_v2, %s9224_s0 }
 0xe08   :  { %v3722_v33 = vpop.xlane.xlu0 %3721 }
 0xe09   :  { %v3740_v41 = vsub.f32 %v7858_v1, %v3722_v33 }
 0xe0b   :  { %v3750_v13 = vmul.f32 1.442695, %v3740_v41 }
 0xe0c   :  { %v3716_v38 = vpop.xlane.xlu0 %3715 }
 0xe0d   :  { %v3738_v23 = vsub.f32 %v3683_v5, %v3716_v38 }
 0xe0e   :  { %v3719_v4 = vpop.xlane.xlu1 %3718 }
 0xe0f   :  { %v3746_v30 = vmul.f32 1.442695, %v3738_v23  ;;  %v3739_v45 = vsub.f32 %v3686_v7, %v3719_v4 }
 0xe10   :  { %v3725_v12 = vpop.xlane.xlu0 %3724 }
 0xe11   :  { %v3748_v57 = vmul.f32 1.442695, %v3739_v45  ;;  %v3741_v63 = vsub.f32 %v7859_v44, %v3725_v12  ;;  %8708 = vpow2.f32 %v3746_v30 }
 0xe12   :  { %v3728_v0 = vpop.xlane.xlu1 %3727 }
 0xe13   :  { %8710 = vpow2.f32 %v3748_v57  ;;  %v3752_v34 = vmul.f32 1.442695, %v3741_v63  ;;  %v3742_v27 = vsub.f32 %v3699_v11, %v3728_v0  ;;  %v12861_v11 = vld [vmem:[#allocation61_spill] sm:$0xff] }
 0xe14   :  { %8712 = vpow2.f32 %v3750_v13  ;;  %v3734_v43 = vpop.xlane.xlu0 %3733 }
 0xe15   :  { %8714 = vpow2.f32 %v3752_v34  ;;  %v3744_v2 = vsub.f32 %v7862_v47, %v3734_v43  ;;  %v3754_v1 = vmul.f32 1.442695, %v3742_v27 }
 0xe16   :  { %v3737_v18 = vpop.xlane.xlu1 %3736 }
 0xe17   :  { %v3745_v33 = vsub.f32 %v7863_v32, %v3737_v18  ;;  %v3758_v4 = vmul.f32 1.442695, %v3744_v2  ;;  %8716 = vpow2.f32 %v3754_v1  ;;  %v12860_v32 = vld [vmem:[#allocation65_spill] sm:$0xff]  ;;  %v4082_v2 = vsel %vm1662_vm0, %v12861_v11, 0  ;;  %v12865_v1 = vld [vmem:[#allocation27_spill] sm:$0xff] }
 0xe18   :  { %v3731_v5 = vpop.xlane.xlu0 %3730  ;;  %v4085_v47 = vsel %vm1662_vm0, %v12860_v32, 0 }
 0xe19   :  { %v3760_v38 = vmul.f32 1.442695, %v3745_v33  ;;  %v3743_v23 = vsub.f32 %v3702_v19, %v3731_v5  ;;  %v12866_v33 = vld [vmem:[#allocation57_spill] sm:$0xff] }
 0xe1a   :  { %v3795_v57 = vpop.permute.xlu1 %3794  ;;  %v4079_v5 = vsel %vm1662_vm0, %v12866_v33, 0 }
 0xe1b   :  { %v3756_v7 = vmul.f32 1.442695, %v3743_v23  ;;  %8718 = vpow2.f32 %v3760_v38  ;;  %v12867_v38 = vld [vmem:[#allocation53_spill] sm:$0xff] }
 0xe1c   :  { %v3797_v12 = vpop.permute.xlu0 %3796  ;;  %v4076_v23 = vsel %vm1662_vm0, %v12867_v38, 0 }
 0xe1d   :  { %8720 = vpow2.f32 %v3756_v7  ;;  %7868 = vmatprep.subr.bf16.mxu1 %v3797_v12  ;;  %v12869_v7 = vld [vmem:[#allocation35_spill] sm:$0xff] }
 0xe1e   :  { %8722 = vpow2.f32 %v3758_v4  ;;  %7869 = vmatpush3.bf16.msra.mxu1 %v3797_v12  ;;  %v10722_v0 = vpop.eup %8708  ;;  %v12868_v4 = vld [vmem:[#allocation31_spill] sm:$0xff] }
 0xe1f   :  { %7870 = vmatprep.subr.bf16.mxu1 %v3795_v57  ;;  %v12870_v12 = vld [vmem:[#allocation39_spill] sm:$0xff] }
 0xe20   :  { %v10724_v13 = vpop.eup %8710 }
 0xe21   :  { %v10726_v27 = vpop.eup %8712  ;;  %v3786_v18 = vpack.c.bf16 %v10724_v13, %v10722_v0 }
 0xe22   :  { %v10730_v30 = vpop.eup %8714  ;;  %7871 = vmatpush3.bf16.msra.mxu1 %v3795_v57 }
 0xe23   :  { %v3787_v19 = vpack.c.bf16 %v10730_v30, %v10726_v27  ;;  %7872 = vmatprep.mubr.msk.bf16.mxu1 %vm1662_vm0, %v3786_v18  ;;  %8184 = vmatprep.subr.msk.bf16.mxu1 %vm1662_vm0, %v12860_v32 }
 0xe24   :  { %v10742_v44 = vpop.eup %8716 }
 0xe25   :  { %7873 = vmatmul.mubr.msk.bf16.vlgmr.msra.gmra.mxu1 %vm1662_vm0, %v3787_v19  ;;  %12862 = vst [vmem:[#allocation65_spill] sm:$0xff] %v10742_v44 }
 0xe26   :  { %7881 = vmatpush3.bf16.xpose.msra.mxu1 %v4085_v47 }
 0xe27   :  { %8185 = vmatprep.subr.msk.bf16.mxu1 %vm1662_vm0, %v12861_v11 }
 0xe28   :  { %v10744_v41 = vpop.eup %8718 }
 0xe29   :  { %12863 = vst [vmem:[#allocation61_spill] sm:$0xff] %v10744_v41 }
 0xe2a   :  { %v10746_v45 = vpop.eup %8720 }
 0xe2b   :  { %v10748_v63 = vpop.eup %8722  ;;  %v3788_v34 = vpack.c.bf16 %v10746_v45, %v10742_v44 }
 0xe2c   :  { %12864 = vst [vmem:[#allocation150_spill] sm:$0xff] %v10748_v63  ;;  %v3789_v43 = vpack.c.bf16 %v10744_v41, %v10748_v63 }
 0xe2d   :  { %7876 = vmatprep.mubr.msk.bf16.mxu1 %vm1662_vm0, %v3788_v34 }
 0xe2e   :  { %7877 = vmatmul.mubr.msk.bf16.gmra.mxu1 %vm1662_vm0, %v3789_v43 }
 0xe2f   :  { %7883 = vmatpush3.bf16.xpose.msra.mxu1 %v4082_v2  ;;  %7888 = vmatprep.mubr.msk.bf16.mxu1 %vm1662_vm0, %v12865_v1 }
 0xe30   :  { %8186 = vmatprep.subr.msk.bf16.mxu1 %vm1662_vm0, %v12866_v33 }
 0xe37   :  { %7885 = vmatpush3.bf16.xpose.msra.mxu1 %v4079_v5 }
 0xe38   :  { %8187 = vmatprep.subr.msk.bf16.mxu1 %vm1662_vm0, %v12867_v38 }
 0xe3f   :  { %7887 = vmatpush3.bf16.xpose.msra.mxu1 %v4076_v23 }
 0xe46   :  { %7889 = vmatmul.mubr.msk.bf16.vlgmr.msra.gmra.mxu1 %vm1662_vm0, %v12868_v4 }
 0xe47   :  { %7892 = vmatprep.mubr.msk.bf16.mxu1 %vm1662_vm0, %v12869_v7 }
 0xe4e   :  { %7893 = vmatmul.mubr.msk.bf16.gmra.mxu1 %vm1662_vm0, %v12870_v12 }
 0xee5   :  { %v10774_v57 = vpop.f32.mrf.mxu1 }
 0xee6   :  { %12871 = vst [vmem:[#allocation27_spill] sm:$0xff] %v10774_v57 }
 0xee7   :  { %v10776_v18 = vpop.f32.mrf.mxu1 }
 0xee8   :  { %12872 = vst [vmem:[#allocation57_spill] sm:$0xff] %v10776_v18 }
 0xee9   :  { %v10778_v19 = vpop.f32.mrf.mxu1 }
 0xeea   :  { %12873 = vst [vmem:[#allocation53_spill] sm:$0xff] %v10778_v19 }
 0xeeb   :  { %v10780_v47 = vpop.f32.mrf.mxu1 }
 0xeec   :  { %12874 = vst [vmem:[#allocation31_spill] sm:$0xff] %v10780_v47 }
 0xeee   :  { %v10782_v34 = vpop.f32.mrf.mxu1 }
 0xeef   :  { %12875 = vst [vmem:[#allocation35_spill] sm:$0xff] %v10782_v34 }
 0xef0   :  { %v10784_v43 = vpop.f32.mrf.mxu1 }
 0xef1   :  { %12876 = vst [vmem:[#allocation39_spill] sm:$0xff] %v10784_v43 }
 0xef2   :  { %v10786_v2 = vpop.f32.mrf.mxu1 }
 0xef3   :  { %12877 = vst [vmem:[#allocation151_spill] sm:$0xff] %v10786_v2 }
 0xef4   :  { %v10788_v5 = vpop.f32.mrf.mxu1 }
 0xef5   :  { %12878 = vst [vmem:[#allocation152_spill] sm:$0xff] %v10788_v5 }
 0xf06   :  { %v7890_v23 = vpop.f32.mrf.mxu1 }
 0xf07   :  { %v4158_v24 = vsel %vm1662_vm0, %v7890_v23, -inf }
 0xf08   :  { %4159 = vmax.xlane.f32.xlu0 %v4158_v24  ;;  %v4121_v46 = vpop.f32.mrf.mxu1 }
 0xf09   :  { %v4152_v57 = vsel %vm1662_vm0, %v4121_v46, -inf }
 0xf0a   :  { %4153 = vmax.xlane.f32.xlu1 %v4152_v57  ;;  %v7891_v18 = vpop.f32.mrf.mxu1 }
 0xf0b   :  { %v4161_v47 = vsel %vm1662_vm0, %v7891_v18, -inf }
 0xf0c   :  { %v4124_v19 = vpop.f32.mrf.mxu1 }
 0xf0d   :  { %v4155_v34 = vsel %vm1662_vm0, %v4124_v19, -inf }
 0xf0e   :  { %4162 = vmax.xlane.f32.xlu1 %v4161_v47  ;;  %4156 = vmax.xlane.f32.xlu0 %v4155_v34  ;;  %v10794_v43 = vpop.f32.mrf.mxu1 }
 0xf0f   :  { %v4170_v2 = vsel %vm1662_vm0, %v10794_v43, -inf }
 0xf10   :  { %v10798_v5 = vpop.f32.mrf.mxu1 }
 0xf11   :  { %v4164_v24 = vsel %vm1662_vm0, %v10798_v5, -inf }
 0xf12   :  { %4171 = vmax.xlane.f32.xlu0 %v4170_v2  ;;  %v7895_v57 = vpop.f32.mrf.mxu1 }
 0xf13   :  { %v4173_v47 = vsel %vm1662_vm0, %v7895_v57, -inf }
 0xf14   :  { %v4140_v34 = vpop.f32.mrf.mxu1 }
 0xf16   :  { %4165 = vmax.xlane.f32.xlu0 %v4164_v24 }
 0xf1f   :  { %4341 = vrot.lane.b32.xlu1 %v12861_v11, %s9224_s0  ;;  %v4167_v11 = vsel %vm1662_vm0, %v4140_v34, -inf }
 0xf23   :  { %4339 = vrot.lane.b32.xlu1 %v12866_v33, %s9224_s0 }
 0xf2c   :  { %4343 = vrot.lane.b32.xlu0 %v12860_v32, %s9224_s0 }
 0xf30   :  { %4325 = vrot.lane.b32.xlu0 %v12865_v1, %s9224_s0 }
 0xf34   :  { %4329 = vrot.lane.b32.xlu0 %v12869_v7, %s9224_s0 }
 0xf38   :  { %4520 = vrot.lane.b32.xlu0 %v12844_v61, %s9224_s0 }
 0xf47   :  { %4174 = vmax.xlane.f32.xlu1 %v4173_v47 }
 0xf4b   :  { %4168 = vmax.xlane.f32.xlu1 %v4167_v11 }
 0xf5c   :  { %4337 = vrot.lane.b32.xlu1 %v12867_v38, %s9224_s0 }
 0xf60   :  { %4327 = vrot.lane.b32.xlu1 %v12868_v4, %s9224_s0 }
 0xf64   :  { %4331 = vrot.lane.b32.xlu1 %v12870_v12, %s9224_s0 }
 0xf68   :  { %4518 = vrot.lane.b32.xlu1 %v12849_v35, %s9224_s0 }
 0xf91   :  { %v4160_v61 = vpop.xlane.xlu0 %4159 }
 0xf92   :  { %v4178_v32 = vsub.f32 %v7890_v23, %v4160_v61 }
 0xf93   :  { %v4154_v1 = vpop.xlane.xlu1 %4153 }
 0xf94   :  { %v4176_v33 = vsub.f32 %v4121_v46, %v4154_v1  ;;  %v4188_v7 = vmul.f32 1.442695, %v4178_v32 }
 0xf96   :  { %v4184_v2 = vmul.f32 1.442695, %v4176_v33  ;;  %8724 = vpow2.f32 %v4188_v7 }
 0xf97   :  { %v4163_v24 = vpop.xlane.xlu1 %4162  ;;  %v4157_v47 = vpop.xlane.xlu0 %4156 }
 0xf98   :  { %v4179_v11 = vsub.f32 %v7891_v18, %v4163_v24  ;;  %v4177_v59 = vsub.f32 %v4124_v19, %v4157_v47  ;;  %8726 = vpow2.f32 %v4184_v2 }
 0xf9a   :  { %v4190_v38 = vmul.f32 1.442695, %v4179_v11  ;;  %v4186_v52 = vmul.f32 1.442695, %v4177_v59 }
 0xf9b   :  { %v4172_v4 = vpop.xlane.xlu0 %4171  ;;  %v4342_v1 = vpop.permute.xlu1 %4341 }
 0xf9c   :  { %8728 = vpow2.f32 %v4190_v38  ;;  %v4364_v7 = vsel %vm1662_vm0, %v4342_v1, 0  ;;  %v4182_v38 = vsub.f32 %v10794_v43, %v4172_v4 }
 0xf9d   :  { %8730 = vpow2.f32 %v4186_v52 }
 0xf9f   :  { %v4166_v12 = vpop.xlane.xlu0 %4165  ;;  %v4340_v2 = vpop.permute.xlu1 %4339 }
 0xfa0   :  { %v4361_v24 = vsel %vm1662_vm0, %v4340_v2, 0  ;;  %v4180_v47 = vsub.f32 %v10798_v5, %v4166_v12  ;;  %v12883_v5 = vld [vmem:[#allocation87_spill] sm:$0xff] }
 0xfa3   :  { %v4344_v9 = vpop.permute.xlu0 %4343  ;;  %v10825_v35 = vpop.eup %8724 }
 0xfa4   :  { %8188 = vmatprep.subr.msk.bf16.mxu0 %vm1662_vm0, %v4344_v9  ;;  %12879 = vst [vmem:[#allocation153_spill] sm:$0xff] %v10825_v35  ;;  %v4367_v32 = vsel %vm1662_vm0, %v4344_v9, 0 }
 0xfa5   :  { %v10827_v23 = vpop.eup %8726 }
 0xfa6   :  { %12880 = vst [vmem:[#allocation154_spill] sm:$0xff] %v10827_v23 }
 0xfa7   :  { %v4326_v46 = vpop.permute.xlu0 %4325 }
 0xfa9   :  { %v10829_v61 = vpop.eup %8728 }
 0xfaa   :  { %12881 = vst [vmem:[#allocation155_spill] sm:$0xff] %v10829_v61  ;;  %v10831_v18 = vpop.eup %8730  ;;  %v4225_v59 = vpack.c.bf16 %v10829_v61, %v10825_v35 }
 0xfab   :  { %12882 = vst [vmem:[#allocation156_spill] sm:$0xff] %v10831_v18  ;;  %v4330_v19 = vpop.permute.xlu0 %4329  ;;  %v4224_v52 = vpack.c.bf16 %v10831_v18, %v10827_v23 }
 0xfad   :  { %7904 = vmatprep.mubr.msk.bf16.mxu0 %vm1662_vm0, %v4224_v52 }
 0xfae   :  { %7905 = vmatmul.mubr.msk.bf16.vlgmr.msra.gmra.mxu0 %vm1662_vm0, %v4225_v59  ;;  %v4192_v59 = vmul.f32 1.442695, %v4180_v47 }
 0xfaf   :  { %7913 = vmatpush3.bf16.xpose.msra.mxu0 %v4367_v32  ;;  %v4521_v33 = vpop.permute.xlu0 %4520 }
 0xfb0   :  { %8189 = vmatprep.subr.msk.bf16.mxu0 %vm1662_vm0, %v4342_v1  ;;  %7928 = vmatprep.subr.bf16.mxu1 %v4521_v33  ;;  %8732 = vpow2.f32 %v4192_v59  ;;  %v12890_v59 = vld [vmem:[#allocation75_spill] sm:$0xff] }
 0xfb1   :  { %7929 = vmatpush3.bf16.msra.mxu1 %v4521_v33  ;;  %v4196_v33 = vmul.f32 1.442695, %v4182_v38  ;;  %v12889_v38 = vld [vmem:[#allocation79_spill] sm:$0xff] }
 0xfb7   :  { %7915 = vmatpush3.bf16.xpose.msra.mxu0 %v4364_v7 }
 0xfb8   :  { %8190 = vmatprep.subr.msk.bf16.mxu0 %vm1662_vm0, %v4340_v2 }
 0xfbd   :  { %v10849_v4 = vpop.eup %8732 }
 0xfbe   :  { %12884 = vst [vmem:[#allocation87_spill] sm:$0xff] %v10849_v4 }
 0xfbf   :  { %7917 = vmatpush3.bf16.xpose.msra.mxu0 %v4361_v24 }
 0xfd0   :  { %v4175_v11 = vpop.xlane.xlu1 %4174 }
 0xfd1   :  { %v4183_v9 = vsub.f32 %v7895_v57, %v4175_v11 }
 0xfd3   :  { %v4198_v52 = vmul.f32 1.442695, %v4183_v9  ;;  %v12888_v9 = vld [vmem:[#allocation83_spill] sm:$0xff] }
 0xfd4   :  { %v4169_v32 = vpop.xlane.xlu1 %4168 }
 0xfd5   :  { %v4181_v35 = vsub.f32 %v4140_v34, %v4169_v32  ;;  %8734 = vpow2.f32 %v4198_v52 }
 0xfd7   :  { %v4194_v1 = vmul.f32 1.442695, %v4181_v35 }
 0xfd8   :  { %v4338_v7 = vpop.permute.xlu1 %4337 }
 0xfd9   :  { %8736 = vpow2.f32 %v4194_v1  ;;  %8191 = vmatprep.subr.msk.bf16.mxu0 %vm1662_vm0, %v4338_v7  ;;  %v4358_v2 = vsel %vm1662_vm0, %v4338_v7, 0 }
 0xfda   :  { %8738 = vpow2.f32 %v4196_v33  ;;  %7919 = vmatpush3.bf16.xpose.msra.mxu0 %v4358_v2 }
 0xfdb   :  { %7960 = vmatprep.subr.bf16.mxu0 %v12883_v5 }
 0xfdc   :  { %v4328_v57 = vpop.permute.xlu1 %4327 }
 0xfe0   :  { %v4332_v43 = vpop.permute.xlu1 %4331 }
 0xfe2   :  { %v10851_v34 = vpop.eup %8734 }
 0xfe3   :  { %12885 = vst [vmem:[#allocation157_spill] sm:$0xff] %v10851_v34 }
 0xfe4   :  { %v4519_v12 = vpop.permute.xlu1 %4518 }
 0xfe5   :  { %7930 = vmatprep.subr.bf16.mxu1 %v4519_v12 }
 0xfe6   :  { %v10853_v35 = vpop.eup %8736  ;;  %7931 = vmatpush3.bf16.msra.mxu1 %v4519_v12 }
 0xfe7   :  { %12886 = vst [vmem:[#allocation158_spill] sm:$0xff] %v10853_v35  ;;  %v10855_v24 = vpop.eup %8738  ;;  %v4226_v47 = vpack.c.bf16 %v10853_v35, %v10849_v4 }
 0xfe8   :  { %12887 = vst [vmem:[#allocation159_spill] sm:$0xff] %v10855_v24  ;;  %v4227_v11 = vpack.c.bf16 %v10851_v34, %v10855_v24 }
 0xfe9   :  { %7908 = vmatprep.mubr.msk.bf16.mxu0 %vm1662_vm0, %v4226_v47 }
 0xfea   :  { %7909 = vmatmul.mubr.msk.bf16.gmra.mxu0 %vm1662_vm0, %v4227_v11 }
 0xfeb   :  { %7920 = vmatprep.mubr.msk.bf16.mxu0 %vm1662_vm0, %v4326_v46 }
 0xff2   :  { %7921 = vmatmul.mubr.msk.bf16.vlgmr.msra.gmra.mxu0 %vm1662_vm0, %v4328_v57 }
 0xff3   :  { %7961 = vmatpush3.bf16.msra.mxu0 %v12883_v5  ;;  %7924 = vmatprep.mubr.msk.bf16.mxu0 %vm1662_vm0, %v4330_v19 }
 0xff4   :  { %7962 = vmatprep.subr.bf16.mxu0 %v12888_v9 }
 0xff7   :  { %7963 = vmatpush3.bf16.msra.mxu0 %v12888_v9 }
 0xff8   :  { %7964 = vmatprep.subr.bf16.mxu0 %v12889_v38 }
 0xffa   :  { %7925 = vmatmul.mubr.msk.bf16.gmra.mxu0 %vm1662_vm0, %v4332_v43 }
 0xffb   :  { %7965 = vmatpush3.bf16.msra.mxu0 %v12889_v38 }
 0xffc   :  { %7966 = vmatprep.subr.bf16.mxu0 %v12890_v59 }
 0xfff   :  { %7967 = vmatpush3.bf16.msra.mxu0 %v12890_v59 }
0x106e   :  { %v10874_v46 = vpop.f32.mrf.mxu0 }
0x106f   :  { %12891 = vst [vmem:[#allocation83_spill] sm:$0xff] %v10874_v46 }
0x1070   :  { %v10876_v52 = vpop.f32.mrf.mxu0 }
0x1071   :  { %12892 = vst [vmem:[#allocation79_spill] sm:$0xff] %v10876_v52 }
0x1072   :  { %v10878_v32 = vpop.f32.mrf.mxu0 }
0x1073   :  { %12893 = vst [vmem:[#allocation75_spill] sm:$0xff] %v10878_v32 }
0x1074   :  { %v10880_v19 = vpop.f32.mrf.mxu0 }
0x1075   :  { %12894 = vst [vmem:[#allocation160_spill] sm:$0xff] %v10880_v19 }
0x10aa   :  { %v10882_v33 = vpop.f32.mrf.mxu0 }
0x10ab   :  { %12895 = vst [vmem:[#allocation161_spill] sm:$0xff] %v10882_v33 }
0x10ac   :  { %v10884_v1 = vpop.f32.mrf.mxu0 }
0x10ad   :  { %12896 = vst [vmem:[#allocation162_spill] sm:$0xff] %v10884_v1 }
0x10ae   :  { %v10886_v7 = vpop.f32.mrf.mxu0 }
0x10af   :  { %12897 = vst [vmem:[#allocation163_spill] sm:$0xff] %v10886_v7 }
0x10b0   :  { %v10888_v2 = vpop.f32.mrf.mxu0 }
0x10b1   :  { %12898 = vst [vmem:[#allocation164_spill] sm:$0xff] %v10888_v2 }
0x10b2   :  { %v7922_v57 = vpop.f32.mrf.mxu0 }
0x10b3   :  { %v4440_v43 = vsel %vm1662_vm0, %v7922_v57, -inf }
0x10b4   :  { %4441 = vmax.xlane.f32.xlu0 %v4440_v43  ;;  %v4403_v12 = vpop.f32.mrf.mxu0 }
0x10b5   :  { %v4434_v11 = vsel %vm1662_vm0, %v4403_v12, -inf }
0x10b6   :  { %v7923_v47 = vpop.f32.mrf.mxu0 }
0x10b7   :  { %v4443_v1 = vsel %vm1662_vm0, %v7923_v47, -inf }
0x10b8   :  { %4435 = vmax.xlane.f32.xlu0 %v4434_v11  ;;  %v4406_v46 = vpop.f32.mrf.mxu0 }
0x10b9   :  { %v4437_v32 = vsel %vm1662_vm0, %v4406_v46, -inf }
0x10ba   :  { %4438 = vmax.xlane.f32.xlu1 %v4437_v32  ;;  %v7926_v33 = vpop.f32.mrf.mxu0 }
0x10bb   :  { %v4452_v43 = vsel %vm1662_vm0, %v7926_v33, -inf }
0x10bc   :  { %4444 = vmax.xlane.f32.xlu0 %v4443_v1  ;;  %v4419_v7 = vpop.f32.mrf.mxu0 }
0x10bd   :  { %v4446_v2 = vsel %vm1662_vm0, %v4419_v7, -inf }
0x10be   :  { %4447 = vmax.xlane.f32.xlu1 %v4446_v2  ;;  %v7927_v19 = vpop.f32.mrf.mxu0 }
0x10bf   :  { %v4455_v24 = vsel %vm1662_vm0, %v7927_v19, -inf }
0x10c0   :  { %4453 = vmax.xlane.f32.xlu0 %v4452_v43  ;;  %v4422_v52 = vpop.f32.mrf.mxu0 }
0x10c1   :  { %v4449_v11 = vsel %vm1662_vm0, %v4422_v52, -inf }
0x10c2   :  { %4456 = vmax.xlane.f32.xlu1 %v4455_v24 }
0x10c4   :  { %4450 = vmax.xlane.f32.xlu0 %v4449_v11 }
0x10d3   :  { %4514 = vrot.lane.b32.xlu1 %v12851_v54, %s9224_s0 }
0x10da   :  { %4516 = vrot.lane.b32.xlu0 %v12850_v28, %s9224_s0 }
0x113d   :  { %v4442_v32 = vpop.xlane.xlu0 %4441 }
0x113e   :  { %v4460_v1 = vsub.f32 %v7922_v57, %v4442_v32 }
0x1140   :  { %v4470_v61 = vmul.f32 1.442695, %v4460_v1 }
0x1141   :  { %v4436_v2 = vpop.xlane.xlu0 %4435 }
0x1142   :  { %v4458_v34 = vsub.f32 %v4403_v12, %v4436_v2 }
0x1143   :  { %v4439_v4 = vpop.xlane.xlu1 %4438 }
0x1144   :  { %v4466_v35 = vmul.f32 1.442695, %v4458_v34  ;;  %v4459_v43 = vsub.f32 %v4406_v46, %v4439_v4 }
0x1145   :  { %v4445_v18 = vpop.xlane.xlu0 %4444 }
0x1146   :  { %v4468_v23 = vmul.f32 1.442695, %v4459_v43  ;;  %v4461_v24 = vsub.f32 %v7923_v47, %v4445_v18  ;;  %8740 = vpow2.f32 %v4466_v35 }
0x1147   :  { %v4448_v14 = vpop.xlane.xlu1 %4447 }
0x1148   :  { %8742 = vpow2.f32 %v4468_v23  ;;  %v4472_v11 = vmul.f32 1.442695, %v4461_v24  ;;  %v4462_v48 = vsub.f32 %v4419_v7, %v4448_v14  ;;  %v12904_v7 = vld [vmem:[#allocation63_spill] sm:$0xff] }
0x1149   :  { %8744 = vpow2.f32 %v4470_v61  ;;  %v4454_v54 = vpop.xlane.xlu0 %4453 }
0x114a   :  { %8746 = vpow2.f32 %v4472_v11  ;;  %v4464_v28 = vsub.f32 %v7926_v33, %v4454_v54  ;;  %v4474_v57 = vmul.f32 1.442695, %v4462_v48 }
0x114b   :  { %v4457_v37 = vpop.xlane.xlu1 %4456 }
0x114c   :  { %v4465_v32 = vsub.f32 %v7927_v19, %v4457_v37  ;;  %v4478_v4 = vmul.f32 1.442695, %v4464_v28  ;;  %8748 = vpow2.f32 %v4474_v57  ;;  %v12903_v19 = vld [vmem:[#allocation67_spill] sm:$0xff]  ;;  %v4642_v28 = vsel %vm1662_vm0, %v12904_v7, 0  ;;  %v12909_v57 = vld [vmem:[#allocation29_spill] sm:$0xff] }
0x114d   :  { %v4451_v12 = vpop.xlane.xlu0 %4450  ;;  %v4645_v33 = vsel %vm1662_vm0, %v12903_v19, 0 }
0x114e   :  { %v4480_v2 = vmul.f32 1.442695, %v4465_v32  ;;  %v4463_v34 = vsub.f32 %v4422_v52, %v4451_v12  ;;  %v12910_v32 = vld [vmem:[#allocation59_spill] sm:$0xff] }
0x114f   :  { %v4515_v23 = vpop.permute.xlu1 %4514  ;;  %v4639_v12 = vsel %vm1662_vm0, %v12910_v32, 0 }
0x1150   :  { %v4476_v46 = vmul.f32 1.442695, %v4463_v34  ;;  %8750 = vpow2.f32 %v4480_v2  ;;  %v12911_v2 = vld [vmem:[#allocation55_spill] sm:$0xff] }
0x1151   :  { %v4517_v18 = vpop.permute.xlu0 %4516  ;;  %v4636_v34 = vsel %vm1662_vm0, %v12911_v2, 0 }
0x1152   :  { %8752 = vpow2.f32 %v4476_v46  ;;  %7932 = vmatprep.subr.bf16.mxu1 %v4517_v18  ;;  %v12913_v46 = vld [vmem:[#allocation37_spill] sm:$0xff] }
0x1153   :  { %8754 = vpow2.f32 %v4478_v4  ;;  %7933 = vmatpush3.bf16.msra.mxu1 %v4517_v18  ;;  %v10902_v14 = vpop.eup %8740  ;;  %v12912_v4 = vld [vmem:[#allocation33_spill] sm:$0xff] }
0x1154   :  { %12899 = vst [vmem:[#allocation165_spill] sm:$0xff] %v10902_v14  ;;  %7934 = vmatprep.subr.bf16.mxu1 %v4515_v23  ;;  %v12914_v18 = vld [vmem:[#allocation41_spill] sm:$0xff] }
0x1155   :  { %v10904_v61 = vpop.eup %8742 }
0x1156   :  { %12900 = vst [vmem:[#allocation166_spill] sm:$0xff] %v10904_v61  ;;  %v10906_v48 = vpop.eup %8744  ;;  %v4506_v37 = vpack.c.bf16 %v10904_v61, %v10902_v14 }
0x1157   :  { %12901 = vst [vmem:[#allocation167_spill] sm:$0xff] %v10906_v48  ;;  %v10910_v35 = vpop.eup %8746  ;;  %7935 = vmatpush3.bf16.msra.mxu1 %v4515_v23 }
0x1158   :  { %12902 = vst [vmem:[#allocation168_spill] sm:$0xff] %v10910_v35  ;;  %v4507_v52 = vpack.c.bf16 %v10910_v35, %v10906_v48  ;;  %7936 = vmatprep.mubr.msk.bf16.mxu1 %vm1662_vm0, %v4506_v37  ;;  %8192 = vmatprep.subr.msk.bf16.mxu1 %vm1662_vm0, %v12903_v19 }
0x1159   :  { %v10922_v47 = vpop.eup %8748 }
0x115a   :  { %7937 = vmatmul.mubr.msk.bf16.vlgmr.msra.gmra.mxu1 %vm1662_vm0, %v4507_v52  ;;  %12905 = vst [vmem:[#allocation67_spill] sm:$0xff] %v10922_v47 }
0x115b   :  { %7945 = vmatpush3.bf16.xpose.msra.mxu1 %v4645_v33 }
0x115c   :  { %8193 = vmatprep.subr.msk.bf16.mxu1 %vm1662_vm0, %v12904_v7 }
0x115d   :  { %v10924_v1 = vpop.eup %8750 }
0x115e   :  { %12906 = vst [vmem:[#allocation63_spill] sm:$0xff] %v10924_v1 }
0x115f   :  { %v10926_v43 = vpop.eup %8752 }
0x1160   :  { %12907 = vst [vmem:[#allocation169_spill] sm:$0xff] %v10926_v43  ;;  %v10928_v24 = vpop.eup %8754  ;;  %v4508_v11 = vpack.c.bf16 %v10926_v43, %v10922_v47 }
0x1161   :  { %12908 = vst [vmem:[#allocation170_spill] sm:$0xff] %v10928_v24  ;;  %v4509_v54 = vpack.c.bf16 %v10924_v1, %v10928_v24 }
0x1162   :  { %7940 = vmatprep.mubr.msk.bf16.mxu1 %vm1662_vm0, %v4508_v11 }
0x1163   :  { %7941 = vmatmul.mubr.msk.bf16.gmra.mxu1 %vm1662_vm0, %v4509_v54 }
0x1164   :  { %7947 = vmatpush3.bf16.xpose.msra.mxu1 %v4642_v28  ;;  %7952 = vmatprep.mubr.msk.bf16.mxu1 %vm1662_vm0, %v12909_v57 }
0x1165   :  { %8194 = vmatprep.subr.msk.bf16.mxu1 %vm1662_vm0, %v12910_v32 }
0x116c   :  { %7949 = vmatpush3.bf16.xpose.msra.mxu1 %v4639_v12 }
0x116d   :  { %8195 = vmatprep.subr.msk.bf16.mxu1 %vm1662_vm0, %v12911_v2 }
0x1174   :  { %7951 = vmatpush3.bf16.xpose.msra.mxu1 %v4636_v34 }
0x117b   :  { %7953 = vmatmul.mubr.msk.bf16.vlgmr.msra.gmra.mxu1 %vm1662_vm0, %v12912_v4 }
0x117c   :  { %7956 = vmatprep.mubr.msk.bf16.mxu1 %vm1662_vm0, %v12913_v46 }
0x1183   :  { %7957 = vmatmul.mubr.msk.bf16.gmra.mxu1 %vm1662_vm0, %v12914_v18 }
0x121a   :  { %v10954_v23 = vpop.f32.mrf.mxu1 }
0x121b   :  { %12915 = vst [vmem:[#allocation29_spill] sm:$0xff] %v10954_v23 }
0x121c   :  { %v10956_v37 = vpop.f32.mrf.mxu1 }
0x121d   :  { %12916 = vst [vmem:[#allocation59_spill] sm:$0xff] %v10956_v37 }
0x121e   :  { %v10958_v52 = vpop.f32.mrf.mxu1 }
0x121f   :  { %12917 = vst [vmem:[#allocation55_spill] sm:$0xff] %v10958_v52 }
0x1220   :  { %v10960_v33 = vpop.f32.mrf.mxu1 }
0x1221   :  { %12918 = vst [vmem:[#allocation33_spill] sm:$0xff] %v10960_v33 }
0x1223   :  { %v10962_v11 = vpop.f32.mrf.mxu1 }
0x1224   :  { %12919 = vst [vmem:[#allocation37_spill] sm:$0xff] %v10962_v11 }
0x1225   :  { %v10964_v54 = vpop.f32.mrf.mxu1 }
0x1226   :  { %12920 = vst [vmem:[#allocation41_spill] sm:$0xff] %v10964_v54 }
0x1227   :  { %v10966_v28 = vpop.f32.mrf.mxu1 }
0x1228   :  { %12921 = vst [vmem:[#allocation171_spill] sm:$0xff] %v10966_v28 }
0x1229   :  { %v10968_v12 = vpop.f32.mrf.mxu1 }
0x122a   :  { %12922 = vst [vmem:[#allocation172_spill] sm:$0xff] %v10968_v12 }
0x123b   :  { %v7954_v34 = vpop.f32.mrf.mxu1 }
0x123c   :  { %v4718_v36 = vsel %vm1662_vm0, %v7954_v34, -inf }
0x123d   :  { %4719 = vmax.xlane.f32.xlu0 %v4718_v36  ;;  %v4681_v3 = vpop.f32.mrf.mxu1 }
0x123e   :  { %v4712_v23 = vsel %vm1662_vm0, %v4681_v3, -inf }
0x123f   :  { %4713 = vmax.xlane.f32.xlu1 %v4712_v23  ;;  %v7955_v37 = vpop.f32.mrf.mxu1 }
0x1240   :  { %v4721_v33 = vsel %vm1662_vm0, %v7955_v37, -inf }
0x1241   :  { %v4684_v52 = vpop.f32.mrf.mxu1 }
0x1242   :  { %v4715_v11 = vsel %vm1662_vm0, %v4684_v52, -inf }
0x1243   :  { %4722 = vmax.xlane.f32.xlu1 %v4721_v33  ;;  %4716 = vmax.xlane.f32.xlu0 %v4715_v11  ;;  %v10974_v54 = vpop.f32.mrf.mxu1 }
0x1244   :  { %v4730_v28 = vsel %vm1662_vm0, %v10974_v54, -inf }
0x1245   :  { %v10978_v12 = vpop.f32.mrf.mxu1 }
0x1246   :  { %v4724_v36 = vsel %vm1662_vm0, %v10978_v12, -inf }
0x1247   :  { %4731 = vmax.xlane.f32.xlu0 %v4730_v28  ;;  %v7959_v23 = vpop.f32.mrf.mxu1 }
0x1248   :  { %v4733_v33 = vsel %vm1662_vm0, %v7959_v23, -inf }
0x1249   :  { %v4700_v11 = vpop.f32.mrf.mxu1 }
0x124b   :  { %4725 = vmax.xlane.f32.xlu0 %v4724_v36 }
0x1254   :  { %4901 = vrot.lane.b32.xlu1 %v12904_v7, %s9224_s0  ;;  %v4727_v7 = vsel %vm1662_vm0, %v4700_v11, -inf }
0x1258   :  { %4899 = vrot.lane.b32.xlu1 %v12910_v32, %s9224_s0 }
0x1261   :  { %4903 = vrot.lane.b32.xlu0 %v12903_v19, %s9224_s0 }
0x1265   :  { %4885 = vrot.lane.b32.xlu0 %v12909_v57, %s9224_s0 }
0x1269   :  { %4889 = vrot.lane.b32.xlu0 %v12913_v46, %s9224_s0 }
0x126d   :  { %5080 = vrot.lane.b32.xlu0 %v12883_v5, %s9224_s0 }
0x127c   :  { %4734 = vmax.xlane.f32.xlu1 %v4733_v33 }
0x1280   :  { %4728 = vmax.xlane.f32.xlu1 %v4727_v7 }
0x1291   :  { %4897 = vrot.lane.b32.xlu1 %v12911_v2, %s9224_s0 }
0x1295   :  { %4887 = vrot.lane.b32.xlu1 %v12912_v4, %s9224_s0 }
0x1299   :  { %4891 = vrot.lane.b32.xlu1 %v12914_v18, %s9224_s0 }
0x129d   :  { %5078 = vrot.lane.b32.xlu1 %v12888_v9, %s9224_s0 }
0x12c6   :  { %v4720_v5 = vpop.xlane.xlu0 %4719 }
0x12c7   :  { %v4738_v19 = vsub.f32 %v7954_v34, %v4720_v5 }
0x12c8   :  { %v4714_v57 = vpop.xlane.xlu1 %4713 }
0x12c9   :  { %v4736_v32 = vsub.f32 %v4681_v3, %v4714_v57  ;;  %v4748_v46 = vmul.f32 1.442695, %v4738_v19 }
0x12cb   :  { %v4744_v28 = vmul.f32 1.442695, %v4736_v32  ;;  %8756 = vpow2.f32 %v4748_v46 }
0x12cc   :  { %v4723_v36 = vpop.xlane.xlu1 %4722  ;;  %v4717_v33 = vpop.xlane.xlu0 %4716 }
0x12cd   :  { %v4739_v7 = vsub.f32 %v7955_v37, %v4723_v36  ;;  %v4737_v40 = vsub.f32 %v4684_v52, %v4717_v33  ;;  %8758 = vpow2.f32 %v4744_v28 }
0x12cf   :  { %v4750_v2 = vmul.f32 1.442695, %v4739_v7  ;;  %v4746_v1 = vmul.f32 1.442695, %v4737_v40 }
0x12d0   :  { %v4732_v4 = vpop.xlane.xlu0 %4731  ;;  %v4902_v57 = vpop.permute.xlu1 %4901 }
0x12d1   :  { %8760 = vpow2.f32 %v4750_v2  ;;  %v4924_v46 = vsel %vm1662_vm0, %v4902_v57, 0  ;;  %v4742_v2 = vsub.f32 %v10974_v54, %v4732_v4 }
0x12d2   :  { %8762 = vpow2.f32 %v4746_v1 }
0x12d4   :  { %v4726_v18 = vpop.xlane.xlu0 %4725  ;;  %v4900_v28 = vpop.permute.xlu1 %4899 }
0x12d5   :  { %v4921_v36 = vsel %vm1662_vm0, %v4900_v28, 0  ;;  %v4740_v33 = vsub.f32 %v10978_v12, %v4726_v18  ;;  %v12927_v12 = vld [vmem:[#allocation86_spill] sm:$0xff] }
0x12d8   :  { %v4904_v24 = vpop.permute.xlu0 %4903  ;;  %v11005_v9 = vpop.eup %8756 }
0x12d9   :  { %8196 = vmatprep.subr.msk.bf16.mxu0 %vm1662_vm0, %v4904_v24  ;;  %12923 = vst [vmem:[#allocation173_spill] sm:$0xff] %v11005_v9  ;;  %v4927_v19 = vsel %vm1662_vm0, %v4904_v24, 0 }
0x12da   :  { %v11007_v34 = vpop.eup %8758 }
0x12db   :  { %12924 = vst [vmem:[#allocation174_spill] sm:$0xff] %v11007_v34 }
0x12dc   :  { %v4886_v3 = vpop.permute.xlu0 %4885 }
0x12de   :  { %v11009_v5 = vpop.eup %8760 }
0x12df   :  { %12925 = vst [vmem:[#allocation175_spill] sm:$0xff] %v11009_v5  ;;  %v11011_v37 = vpop.eup %8762  ;;  %v4785_v40 = vpack.c.bf16 %v11009_v5, %v11005_v9 }
0x12e0   :  { %12926 = vst [vmem:[#allocation176_spill] sm:$0xff] %v11011_v37  ;;  %v4890_v52 = vpop.permute.xlu0 %4889  ;;  %v4784_v1 = vpack.c.bf16 %v11011_v37, %v11007_v34 }
0x12e2   :  { %7968 = vmatprep.mubr.msk.bf16.mxu0 %vm1662_vm0, %v4784_v1 }
0x12e3   :  { %7969 = vmatmul.mubr.msk.bf16.vlgmr.msra.gmra.mxu0 %vm1662_vm0, %v4785_v40  ;;  %v4752_v40 = vmul.f32 1.442695, %v4740_v33 }
0x12e4   :  { %7977 = vmatpush3.bf16.xpose.msra.mxu0 %v4927_v19  ;;  %v5081_v32 = vpop.permute.xlu0 %5080 }
0x12e5   :  { %8197 = vmatprep.subr.msk.bf16.mxu0 %vm1662_vm0, %v4902_v57  ;;  %7992 = vmatprep.subr.bf16.mxu1 %v5081_v32  ;;  %8764 = vpow2.f32 %v4752_v40  ;;  %v12934_v40 = vld [vmem:[#allocation74_spill] sm:$0xff] }
0x12e6   :  { %7993 = vmatpush3.bf16.msra.mxu1 %v5081_v32  ;;  %v4756_v32 = vmul.f32 1.442695, %v4742_v2  ;;  %v12933_v2 = vld [vmem:[#allocation78_spill] sm:$0xff] }
0x12ec   :  { %7979 = vmatpush3.bf16.xpose.msra.mxu0 %v4924_v46 }
0x12ed   :  { %8198 = vmatprep.subr.msk.bf16.mxu0 %vm1662_vm0, %v4900_v28 }
0x12f2   :  { %v11029_v4 = vpop.eup %8764 }
0x12f3   :  { %12928 = vst [vmem:[#allocation86_spill] sm:$0xff] %v11029_v4 }
0x12f4   :  { %7981 = vmatpush3.bf16.xpose.msra.mxu0 %v4921_v36 }
0x1305   :  { %v4735_v7 = vpop.xlane.xlu1 %4734 }
0x1306   :  { %v4743_v24 = vsub.f32 %v7959_v23, %v4735_v7 }
0x1308   :  { %v4758_v1 = vmul.f32 1.442695, %v4743_v24  ;;  %v12932_v24 = vld [vmem:[#allocation82_spill] sm:$0xff] }
0x1309   :  { %v4729_v19 = vpop.xlane.xlu1 %4728 }
0x130a   :  { %v4741_v9 = vsub.f32 %v4700_v11, %v4729_v19  ;;  %8766 = vpow2.f32 %v4758_v1 }
0x130c   :  { %v4754_v57 = vmul.f32 1.442695, %v4741_v9 }
0x130d   :  { %v4898_v46 = vpop.permute.xlu1 %4897 }
0x130e   :  { %8768 = vpow2.f32 %v4754_v57  ;;  %8199 = vmatprep.subr.msk.bf16.mxu0 %vm1662_vm0, %v4898_v46  ;;  %v4918_v28 = vsel %vm1662_vm0, %v4898_v46, 0 }
0x130f   :  { %8770 = vpow2.f32 %v4756_v32  ;;  %7983 = vmatpush3.bf16.xpose.msra.mxu0 %v4918_v28 }
0x1310   :  { %8024 = vmatprep.subr.bf16.mxu0 %v12927_v12 }
0x1311   :  { %v4888_v23 = vpop.permute.xlu1 %4887 }
0x1315   :  { %v4892_v54 = vpop.permute.xlu1 %4891 }
0x1317   :  { %v11031_v11 = vpop.eup %8766 }
0x1318   :  { %12929 = vst [vmem:[#allocation177_spill] sm:$0xff] %v11031_v11 }
0x1319   :  { %v5079_v18 = vpop.permute.xlu1 %5078 }
0x131a   :  { %7994 = vmatprep.subr.bf16.mxu1 %v5079_v18 }
0x131b   :  { %v11033_v9 = vpop.eup %8768  ;;  %7995 = vmatpush3.bf16.msra.mxu1 %v5079_v18 }
0x131c   :  { %12930 = vst [vmem:[#allocation178_spill] sm:$0xff] %v11033_v9  ;;  %v11035_v36 = vpop.eup %8770  ;;  %v4786_v33 = vpack.c.bf16 %v11033_v9, %v11029_v4 }
0x131d   :  { %12931 = vst [vmem:[#allocation179_spill] sm:$0xff] %v11035_v36  ;;  %v4787_v7 = vpack.c.bf16 %v11031_v11, %v11035_v36 }
0x131e   :  { %7972 = vmatprep.mubr.msk.bf16.mxu0 %vm1662_vm0, %v4786_v33 }
0x131f   :  { %7973 = vmatmul.mubr.msk.bf16.gmra.mxu0 %vm1662_vm0, %v4787_v7 }
0x1320   :  { %7984 = vmatprep.mubr.msk.bf16.mxu0 %vm1662_vm0, %v4886_v3 }
0x1327   :  { %7985 = vmatmul.mubr.msk.bf16.vlgmr.msra.gmra.mxu0 %vm1662_vm0, %v4888_v23 }
0x1328   :  { %8025 = vmatpush3.bf16.msra.mxu0 %v12927_v12  ;;  %7988 = vmatprep.mubr.msk.bf16.mxu0 %vm1662_vm0, %v4890_v52 }
0x1329   :  { %8026 = vmatprep.subr.bf16.mxu0 %v12932_v24 }
0x132c   :  { %8027 = vmatpush3.bf16.msra.mxu0 %v12932_v24 }
0x132d   :  { %8028 = vmatprep.subr.bf16.mxu0 %v12933_v2 }
0x132f   :  { %7989 = vmatmul.mubr.msk.bf16.gmra.mxu0 %vm1662_vm0, %v4892_v54 }
0x1330   :  { %8029 = vmatpush3.bf16.msra.mxu0 %v12933_v2 }
0x1331   :  { %8030 = vmatprep.subr.bf16.mxu0 %v12934_v40 }
0x1334   :  { %8031 = vmatpush3.bf16.msra.mxu0 %v12934_v40 }
0x13a3   :  { %v11054_v3 = vpop.f32.mrf.mxu0 }
0x13a4   :  { %12935 = vst [vmem:[#allocation82_spill] sm:$0xff] %v11054_v3 }
0x13a5   :  { %v11056_v1 = vpop.f32.mrf.mxu0 }
0x13a6   :  { %12936 = vst [vmem:[#allocation78_spill] sm:$0xff] %v11056_v1 }
0x13a7   :  { %v11058_v19 = vpop.f32.mrf.mxu0 }
0x13a8   :  { %12937 = vst [vmem:[#allocation74_spill] sm:$0xff] %v11058_v19 }
0x13a9   :  { %v11060_v52 = vpop.f32.mrf.mxu0 }
0x13aa   :  { %12938 = vst [vmem:[#allocation180_spill] sm:$0xff] %v11060_v52 }
0x13df   :  { %v11062_v32 = vpop.f32.mrf.mxu0 }
0x13e0   :  { %12939 = vst [vmem:[#allocation181_spill] sm:$0xff] %v11062_v32 }
0x13e1   :  { %v11064_v57 = vpop.f32.mrf.mxu0 }
0x13e2   :  { %12940 = vst [vmem:[#allocation182_spill] sm:$0xff] %v11064_v57 }
0x13e3   :  { %v11066_v46 = vpop.f32.mrf.mxu0 }
0x13e4   :  { %12941 = vst [vmem:[#allocation183_spill] sm:$0xff] %v11066_v46 }
0x13e5   :  { %v11068_v28 = vpop.f32.mrf.mxu0 }
0x13e6   :  { %12942 = vst [vmem:[#allocation184_spill] sm:$0xff] %v11068_v28 }
0x13e7   :  { %v7986_v23 = vpop.f32.mrf.mxu0 }
0x13e8   :  { %v5000_v54 = vsel %vm1662_vm0, %v7986_v23, -inf }
0x13e9   :  { %5001 = vmax.xlane.f32.xlu0 %v5000_v54  ;;  %v4963_v18 = vpop.f32.mrf.mxu0 }
0x13ea   :  { %v4994_v7 = vsel %vm1662_vm0, %v4963_v18, -inf }
0x13eb   :  { %v7987_v33 = vpop.f32.mrf.mxu0 }
0x13ec   :  { %v5003_v57 = vsel %vm1662_vm0, %v7987_v33, -inf }
0x13ed   :  { %4995 = vmax.xlane.f32.xlu0 %v4994_v7  ;;  %v4966_v3 = vpop.f32.mrf.mxu0 }
0x13ee   :  { %v4997_v19 = vsel %vm1662_vm0, %v4966_v3, -inf }
0x13ef   :  { %4998 = vmax.xlane.f32.xlu1 %v4997_v19  ;;  %v7990_v32 = vpop.f32.mrf.mxu0 }
0x13f0   :  { %v5012_v54 = vsel %vm1662_vm0, %v7990_v32, -inf }
0x13f1   :  { %5004 = vmax.xlane.f32.xlu0 %v5003_v57  ;;  %v4979_v46 = vpop.f32.mrf.mxu0 }
0x13f2   :  { %v5006_v28 = vsel %vm1662_vm0, %v4979_v46, -inf }
0x13f3   :  { %5007 = vmax.xlane.f32.xlu1 %v5006_v28  ;;  %v7991_v52 = vpop.f32.mrf.mxu0 }
0x13f4   :  { %v5015_v36 = vsel %vm1662_vm0, %v7991_v52, -inf }
0x13f5   :  { %5013 = vmax.xlane.f32.xlu0 %v5012_v54  ;;  %v4982_v1 = vpop.f32.mrf.mxu0 }
0x13f6   :  { %v5009_v7 = vsel %vm1662_vm0, %v4982_v1, -inf }
0x13f7   :  { %5016 = vmax.xlane.f32.xlu1 %v5015_v36 }
0x13f9   :  { %5010 = vmax.xlane.f32.xlu0 %v5009_v7 }
0x1408   :  { %5074 = vrot.lane.b32.xlu1 %v12890_v59, %s9224_s0 }
0x140f   :  { %5076 = vrot.lane.b32.xlu0 %v12889_v38, %s9224_s0 }
0x1472   :  { %v5002_v19 = vpop.xlane.xlu0 %5001 }
0x1473   :  { %v5020_v57 = vsub.f32 %v7986_v23, %v5002_v19 }
0x1475   :  { %v5030_v5 = vmul.f32 1.442695, %v5020_v57 }
0x1476   :  { %v4996_v28 = vpop.xlane.xlu0 %4995 }
0x1477   :  { %v5018_v11 = vsub.f32 %v4963_v18, %v4996_v28 }
0x1478   :  { %v4999_v4 = vpop.xlane.xlu1 %4998 }
0x1479   :  { %v5026_v9 = vmul.f32 1.442695, %v5018_v11  ;;  %v5019_v54 = vsub.f32 %v4966_v3, %v4999_v4 }
0x147a   :  { %v5005_v37 = vpop.xlane.xlu0 %5004 }
0x147b   :  { %v5028_v34 = vmul.f32 1.442695, %v5019_v54  ;;  %v5021_v36 = vsub.f32 %v7987_v33, %v5005_v37  ;;  %8772 = vpow2.f32 %v5026_v9 }
0x147c   :  { %v5008_v43 = vpop.xlane.xlu1 %5007 }
0x147d   :  { %8774 = vpow2.f32 %v5028_v34  ;;  %v5032_v7 = vmul.f32 1.442695, %v5021_v36  ;;  %v5022_v47 = vsub.f32 %v4979_v46, %v5008_v43  ;;  %v12947_v46 = vld [vmem:[#allocation62_spill] sm:$0xff] }
0x147e   :  { %8776 = vpow2.f32 %v5030_v5  ;;  %v5014_v59 = vpop.xlane.xlu0 %5013 }
0x147f   :  { %8778 = vpow2.f32 %v5032_v7  ;;  %v5024_v38 = vsub.f32 %v7990_v32, %v5014_v59  ;;  %v5034_v23 = vmul.f32 1.442695, %v5022_v47 }
0x1480   :  { %v5017_v35 = vpop.xlane.xlu1 %5016 }
0x1481   :  { %v5025_v19 = vsub.f32 %v7991_v52, %v5017_v35  ;;  %v5038_v4 = vmul.f32 1.442695, %v5024_v38  ;;  %8780 = vpow2.f32 %v5034_v23  ;;  %v12946_v52 = vld [vmem:[#allocation66_spill] sm:$0xff]  ;;  %v5202_v38 = vsel %vm1662_vm0, %v12947_v46, 0  ;;  %v12952_v23 = vld [vmem:[#allocation28_spill] sm:$0xff] }
0x1482   :  { %v5011_v18 = vpop.xlane.xlu0 %5010  ;;  %v5205_v32 = vsel %vm1662_vm0, %v12946_v52, 0 }
0x1483   :  { %v5040_v28 = vmul.f32 1.442695, %v5025_v19  ;;  %v5023_v11 = vsub.f32 %v4982_v1, %v5011_v18  ;;  %v12953_v19 = vld [vmem:[#allocation58_spill] sm:$0xff] }
0x1484   :  { %v5075_v34 = vpop.permute.xlu1 %5074  ;;  %v5199_v18 = vsel %vm1662_vm0, %v12953_v19, 0 }
0x1485   :  { %v5036_v3 = vmul.f32 1.442695, %v5023_v11  ;;  %8782 = vpow2.f32 %v5040_v28  ;;  %v12954_v28 = vld [vmem:[#allocation54_spill] sm:$0xff] }
0x1486   :  { %v5077_v37 = vpop.permute.xlu0 %5076  ;;  %v5196_v11 = vsel %vm1662_vm0, %v12954_v28, 0 }
0x1487   :  { %8784 = vpow2.f32 %v5036_v3  ;;  %7996 = vmatprep.subr.bf16.mxu1 %v5077_v37  ;;  %v12956_v3 = vld [vmem:[#allocation36_spill] sm:$0xff] }
0x1488   :  { %8786 = vpow2.f32 %v5038_v4  ;;  %7997 = vmatpush3.bf16.msra.mxu1 %v5077_v37  ;;  %v11082_v43 = vpop.eup %8772  ;;  %v12955_v4 = vld [vmem:[#allocation32_spill] sm:$0xff] }
0x1489   :  { %12943 = vst [vmem:[#allocation185_spill] sm:$0xff] %v11082_v43  ;;  %7998 = vmatprep.subr.bf16.mxu1 %v5075_v34  ;;  %v12957_v37 = vld [vmem:[#allocation40_spill] sm:$0xff] }
0x148a   :  { %v11084_v5 = vpop.eup %8774 }
0x148b   :  { %v11086_v47 = vpop.eup %8776  ;;  %v5066_v35 = vpack.c.bf16 %v11084_v5, %v11082_v43 }
0x148c   :  { %12944 = vst [vmem:[#allocation186_spill] sm:$0xff] %v11086_v47  ;;  %v11090_v9 = vpop.eup %8778  ;;  %7999 = vmatpush3.bf16.msra.mxu1 %v5075_v34 }
0x148d   :  { %12945 = vst [vmem:[#allocation187_spill] sm:$0xff] %v11090_v9  ;;  %v5067_v1 = vpack.c.bf16 %v11090_v9, %v11086_v47  ;;  %8000 = vmatprep.mubr.msk.bf16.mxu1 %vm1662_vm0, %v5066_v35  ;;  %8200 = vmatprep.subr.msk.bf16.mxu1 %vm1662_vm0, %v12946_v52 }
0x148e   :  { %v11102_v33 = vpop.eup %8780 }
0x148f   :  { %8001 = vmatmul.mubr.msk.bf16.vlgmr.msra.gmra.mxu1 %vm1662_vm0, %v5067_v1  ;;  %12948 = vst [vmem:[#allocation66_spill] sm:$0xff] %v11102_v33 }
0x1490   :  { %8009 = vmatpush3.bf16.xpose.msra.mxu1 %v5205_v32 }
0x1491   :  { %8201 = vmatprep.subr.msk.bf16.mxu1 %vm1662_vm0, %v12947_v46 }
0x1492   :  { %v11104_v57 = vpop.eup %8782 }
0x1493   :  { %12949 = vst [vmem:[#allocation62_spill] sm:$0xff] %v11104_v57 }
0x1494   :  { %v11106_v54 = vpop.eup %8784 }
0x1495   :  { %12950 = vst [vmem:[#allocation188_spill] sm:$0xff] %v11106_v54  ;;  %v11108_v36 = vpop.eup %8786  ;;  %v5068_v7 = vpack.c.bf16 %v11106_v54, %v11102_v33 }
0x1496   :  { %12951 = vst [vmem:[#allocation189_spill] sm:$0xff] %v11108_v36  ;;  %v5069_v59 = vpack.c.bf16 %v11104_v57, %v11108_v36 }
0x1497   :  { %8004 = vmatprep.mubr.msk.bf16.mxu1 %vm1662_vm0, %v5068_v7 }
0x1498   :  { %8005 = vmatmul.mubr.msk.bf16.gmra.mxu1 %vm1662_vm0, %v5069_v59 }
0x1499   :  { %8011 = vmatpush3.bf16.xpose.msra.mxu1 %v5202_v38  ;;  %8016 = vmatprep.mubr.msk.bf16.mxu1 %vm1662_vm0, %v12952_v23 }
0x149a   :  { %8202 = vmatprep.subr.msk.bf16.mxu1 %vm1662_vm0, %v12953_v19 }
0x14a1   :  { %8013 = vmatpush3.bf16.xpose.msra.mxu1 %v5199_v18 }
0x14a2   :  { %8203 = vmatprep.subr.msk.bf16.mxu1 %vm1662_vm0, %v12954_v28 }
0x14a9   :  { %8015 = vmatpush3.bf16.xpose.msra.mxu1 %v5196_v11 }
0x14b0   :  { %8017 = vmatmul.mubr.msk.bf16.vlgmr.msra.gmra.mxu1 %vm1662_vm0, %v12955_v4 }
0x14b1   :  { %8020 = vmatprep.mubr.msk.bf16.mxu1 %vm1662_vm0, %v12956_v3 }
0x14b8   :  { %8021 = vmatmul.mubr.msk.bf16.gmra.mxu1 %vm1662_vm0, %v12957_v37 }
0x154f   :  { %v11134_v34 = vpop.f32.mrf.mxu1 }
0x1550   :  { %12958 = vst [vmem:[#allocation28_spill] sm:$0xff] %v11134_v34 }
0x1551   :  { %v11136_v35 = vpop.f32.mrf.mxu1 }
0x1552   :  { %12959 = vst [vmem:[#allocation58_spill] sm:$0xff] %v11136_v35 }
0x1553   :  { %v11138_v1 = vpop.f32.mrf.mxu1 }
0x1554   :  { %12960 = vst [vmem:[#allocation54_spill] sm:$0xff] %v11138_v1 }
0x1555   :  { %v11140_v32 = vpop.f32.mrf.mxu1 }
0x1556   :  { %12961 = vst [vmem:[#allocation32_spill] sm:$0xff] %v11140_v32 }
0x1558   :  { %v11142_v7 = vpop.f32.mrf.mxu1 }
0x1559   :  { %12962 = vst [vmem:[#allocation36_spill] sm:$0xff] %v11142_v7 }
0x155a   :  { %v11144_v59 = vpop.f32.mrf.mxu1 }
0x155b   :  { %12963 = vst [vmem:[#allocation40_spill] sm:$0xff] %v11144_v59 }
0x155c   :  { %v11146_v38 = vpop.f32.mrf.mxu1 }
0x155d   :  { %12964 = vst [vmem:[#allocation190_spill] sm:$0xff] %v11146_v38 }
0x155e   :  { %v11148_v18 = vpop.f32.mrf.mxu1 }
0x155f   :  { %12965 = vst [vmem:[#allocation191_spill] sm:$0xff] %v11148_v18 }
0x1570   :  { %v8018_v11 = vpop.f32.mrf.mxu1 }
0x1571   :  { %v5278_v57 = vsel %vm1662_vm0, %v8018_v11, -inf }
0x1572   :  { %5279 = vmax.xlane.f32.xlu0 %v5278_v57  ;;  %v5241_v36 = vpop.f32.mrf.mxu1 }
0x1573   :  { %v5272_v34 = vsel %vm1662_vm0, %v5241_v36, -inf }
0x1574   :  { %5273 = vmax.xlane.f32.xlu1 %v5272_v34  ;;  %v8019_v35 = vpop.f32.mrf.mxu1 }
0x1575   :  { %v5281_v32 = vsel %vm1662_vm0, %v8019_v35, -inf }
0x1576   :  { %v5244_v1 = vpop.f32.mrf.mxu1 }
0x1577   :  { %v5275_v7 = vsel %vm1662_vm0, %v5244_v1, -inf }
0x1578   :  { %5282 = vmax.xlane.f32.xlu1 %v5281_v32  ;;  %5276 = vmax.xlane.f32.xlu0 %v5275_v7  ;;  %v11154_v59 = vpop.f32.mrf.mxu1 }
0x1579   :  { %v5290_v38 = vsel %vm1662_vm0, %v11154_v59, -inf }
0x157a   :  { %v11158_v18 = vpop.f32.mrf.mxu1 }
0x157b   :  { %v5284_v57 = vsel %vm1662_vm0, %v11158_v18, -inf }
0x157c   :  { %5291 = vmax.xlane.f32.xlu0 %v5290_v38  ;;  %v8023_v34 = vpop.f32.mrf.mxu1 }
0x157d   :  { %v5293_v32 = vsel %vm1662_vm0, %v8023_v34, -inf }
0x157e   :  { %v5260_v7 = vpop.f32.mrf.mxu1 }
0x1580   :  { %5285 = vmax.xlane.f32.xlu0 %v5284_v57 }
0x1589   :  { %5461 = vrot.lane.b32.xlu1 %v12947_v46, %s9224_s0  ;;  %v5287_v46 = vsel %vm1662_vm0, %v5260_v7, -inf }
0x158d   :  { %5459 = vrot.lane.b32.xlu1 %v12953_v19, %s9224_s0 }
0x1596   :  { %5463 = vrot.lane.b32.xlu0 %v12946_v52, %s9224_s0 }
0x159a   :  { %5445 = vrot.lane.b32.xlu0 %v12952_v23, %s9224_s0 }
0x159e   :  { %5449 = vrot.lane.b32.xlu0 %v12956_v3, %s9224_s0 }
0x15a2   :  { %5640 = vrot.lane.b32.xlu0 %v12927_v12, %s9224_s0 }
0x15b1   :  { %5294 = vmax.xlane.f32.xlu1 %v5293_v32 }
0x15b5   :  { %5288 = vmax.xlane.f32.xlu1 %v5287_v46 }
0x15c6   :  { %5457 = vrot.lane.b32.xlu1 %v12954_v28, %s9224_s0 }
0x15ca   :  { %5447 = vrot.lane.b32.xlu1 %v12955_v4, %s9224_s0 }
0x15ce   :  { %5451 = vrot.lane.b32.xlu1 %v12957_v37, %s9224_s0 }
0x15d2   :  { %5638 = vrot.lane.b32.xlu1 %v12932_v24, %s9224_s0 }
0x15fb   :  { %v5280_v12 = vpop.xlane.xlu0 %5279 }
0x15fc   :  { %v5298_v52 = vsub.f32 %v8018_v11, %v5280_v12 }
0x15fd   :  { %v5274_v23 = vpop.xlane.xlu1 %5273 }
0x15fe   :  { %v5296_v19 = vsub.f32 %v5241_v36, %v5274_v23  ;;  %v5308_v3 = vmul.f32 1.442695, %v5298_v52 }
0x1600   :  { %v5304_v38 = vmul.f32 1.442695, %v5296_v19  ;;  %8788 = vpow2.f32 %v5308_v3 }
0x1601   :  { %v5283_v57 = vpop.xlane.xlu1 %5282  ;;  %v5277_v32 = vpop.xlane.xlu0 %5276 }
0x1602   :  { %v5299_v46 = vsub.f32 %v8019_v35, %v5283_v57  ;;  %v5297_v54 = vsub.f32 %v5244_v1, %v5277_v32  ;;  %8790 = vpow2.f32 %v5304_v38 }
0x1604   :  { %v5310_v28 = vmul.f32 1.442695, %v5299_v46  ;;  %v5306_v33 = vmul.f32 1.442695, %v5297_v54 }
0x1605   :  { %v5292_v4 = vpop.xlane.xlu0 %5291  ;;  %v5462_v23 = vpop.permute.xlu1 %5461 }
0x1606   :  { %8792 = vpow2.f32 %v5310_v28  ;;  %v5484_v3 = vsel %vm1662_vm0, %v5462_v23, 0  ;;  %v5302_v28 = vsub.f32 %v11154_v59, %v5292_v4 }
0x1607   :  { %8794 = vpow2.f32 %v5306_v33 }
0x1609   :  { %v5286_v37 = vpop.xlane.xlu0 %5285  ;;  %v5460_v38 = vpop.permute.xlu1 %5459 }
0x160a   :  { %v5481_v57 = vsel %vm1662_vm0, %v5460_v38, 0  ;;  %v5300_v32 = vsub.f32 %v11158_v18, %v5286_v37  ;;  %v12970_v18 = vld [vmem:[#allocation88_spill] sm:$0xff] }
0x160d   :  { %v5464_v48 = vpop.permute.xlu0 %5463  ;;  %v11185_v24 = vpop.eup %8788 }
0x160e   :  { %8204 = vmatprep.subr.msk.bf16.mxu0 %vm1662_vm0, %v5464_v48  ;;  %12966 = vst [vmem:[#allocation192_spill] sm:$0xff] %v11185_v24  ;;  %v5487_v52 = vsel %vm1662_vm0, %v5464_v48, 0 }
0x160f   :  { %v11187_v11 = vpop.eup %8790 }
0x1610   :  { %12967 = vst [vmem:[#allocation193_spill] sm:$0xff] %v11187_v11 }
0x1611   :  { %v5446_v36 = vpop.permute.xlu0 %5445 }
0x1613   :  { %v11189_v12 = vpop.eup %8792 }
0x1614   :  { %12968 = vst [vmem:[#allocation194_spill] sm:$0xff] %v11189_v12  ;;  %v11191_v35 = vpop.eup %8794  ;;  %v5345_v54 = vpack.c.bf16 %v11189_v12, %v11185_v24 }
0x1615   :  { %12969 = vst [vmem:[#allocation195_spill] sm:$0xff] %v11191_v35  ;;  %v5450_v1 = vpop.permute.xlu0 %5449  ;;  %v5344_v33 = vpack.c.bf16 %v11191_v35, %v11187_v11 }
0x1617   :  { %8032 = vmatprep.mubr.msk.bf16.mxu0 %vm1662_vm0, %v5344_v33 }
0x1618   :  { %8033 = vmatmul.mubr.msk.bf16.vlgmr.msra.gmra.mxu0 %vm1662_vm0, %v5345_v54  ;;  %v5312_v54 = vmul.f32 1.442695, %v5300_v32 }
0x1619   :  { %8041 = vmatpush3.bf16.xpose.msra.mxu0 %v5487_v52  ;;  %v5641_v19 = vpop.permute.xlu0 %5640 }
0x161a   :  { %8205 = vmatprep.subr.msk.bf16.mxu0 %vm1662_vm0, %v5462_v23  ;;  %8056 = vmatprep.subr.bf16.mxu1 %v5641_v19  ;;  %8796 = vpow2.f32 %v5312_v54  ;;  %v12977_v54 = vld [vmem:[#allocation76_spill] sm:$0xff] }
0x161b   :  { %8057 = vmatpush3.bf16.msra.mxu1 %v5641_v19  ;;  %v5316_v19 = vmul.f32 1.442695, %v5302_v28  ;;  %v12976_v28 = vld [vmem:[#allocation80_spill] sm:$0xff] }
0x1621   :  { %8043 = vmatpush3.bf16.xpose.msra.mxu0 %v5484_v3 }
0x1622   :  { %8206 = vmatprep.subr.msk.bf16.mxu0 %vm1662_vm0, %v5460_v38 }
0x1627   :  { %v11209_v4 = vpop.eup %8796 }
0x1628   :  { %12971 = vst [vmem:[#allocation88_spill] sm:$0xff] %v11209_v4 }
0x1629   :  { %8045 = vmatpush3.bf16.xpose.msra.mxu0 %v5481_v57 }
0x163a   :  { %v5295_v46 = vpop.xlane.xlu1 %5294 }
0x163b   :  { %v5303_v48 = vsub.f32 %v8023_v34, %v5295_v46 }
0x163d   :  { %v5318_v33 = vmul.f32 1.442695, %v5303_v48  ;;  %v12975_v48 = vld [vmem:[#allocation84_spill] sm:$0xff] }
0x163e   :  { %v5289_v52 = vpop.xlane.xlu1 %5288 }
0x163f   :  { %v5301_v24 = vsub.f32 %v5260_v7, %v5289_v52  ;;  %8798 = vpow2.f32 %v5318_v33 }
0x1641   :  { %v5314_v23 = vmul.f32 1.442695, %v5301_v24 }
0x1642   :  { %v5458_v3 = vpop.permute.xlu1 %5457 }
0x1643   :  { %8800 = vpow2.f32 %v5314_v23  ;;  %8207 = vmatprep.subr.msk.bf16.mxu0 %vm1662_vm0, %v5458_v3  ;;  %v5478_v38 = vsel %vm1662_vm0, %v5458_v3, 0 }
0x1644   :  { %8802 = vpow2.f32 %v5316_v19  ;;  %8047 = vmatpush3.bf16.xpose.msra.mxu0 %v5478_v38 }
0x1645   :  { %8088 = vmatprep.subr.bf16.mxu0 %v12970_v18 }
0x1646   :  { %v5448_v34 = vpop.permute.xlu1 %5447 }
0x164a   :  { %v5452_v59 = vpop.permute.xlu1 %5451 }
0x164c   :  { %v11211_v7 = vpop.eup %8798 }
0x164d   :  { %12972 = vst [vmem:[#allocation196_spill] sm:$0xff] %v11211_v7 }
0x164e   :  { %v5639_v37 = vpop.permute.xlu1 %5638 }
0x164f   :  { %8058 = vmatprep.subr.bf16.mxu1 %v5639_v37 }
0x1650   :  { %v11213_v24 = vpop.eup %8800  ;;  %8059 = vmatpush3.bf16.msra.mxu1 %v5639_v37 }
0x1651   :  { %12973 = vst [vmem:[#allocation197_spill] sm:$0xff] %v11213_v24  ;;  %v11215_v57 = vpop.eup %8802  ;;  %v5346_v32 = vpack.c.bf16 %v11213_v24, %v11209_v4 }
0x1652   :  { %12974 = vst [vmem:[#allocation198_spill] sm:$0xff] %v11215_v57  ;;  %v5347_v46 = vpack.c.bf16 %v11211_v7, %v11215_v57 }
0x1653   :  { %8036 = vmatprep.mubr.msk.bf16.mxu0 %vm1662_vm0, %v5346_v32 }
0x1654   :  { %8037 = vmatmul.mubr.msk.bf16.gmra.mxu0 %vm1662_vm0, %v5347_v46 }
0x1655   :  { %8048 = vmatprep.mubr.msk.bf16.mxu0 %vm1662_vm0, %v5446_v36 }
0x165c   :  { %8049 = vmatmul.mubr.msk.bf16.vlgmr.msra.gmra.mxu0 %vm1662_vm0, %v5448_v34 }
0x165d   :  { %8089 = vmatpush3.bf16.msra.mxu0 %v12970_v18  ;;  %8052 = vmatprep.mubr.msk.bf16.mxu0 %vm1662_vm0, %v5450_v1 }
0x165e   :  { %8090 = vmatprep.subr.bf16.mxu0 %v12975_v48 }
0x1661   :  { %8091 = vmatpush3.bf16.msra.mxu0 %v12975_v48 }
0x1662   :  { %8092 = vmatprep.subr.bf16.mxu0 %v12976_v28 }
0x1664   :  { %8053 = vmatmul.mubr.msk.bf16.gmra.mxu0 %vm1662_vm0, %v5452_v59 }
0x1665   :  { %8093 = vmatpush3.bf16.msra.mxu0 %v12976_v28 }
0x1666   :  { %8094 = vmatprep.subr.bf16.mxu0 %v12977_v54 }
0x1669   :  { %8095 = vmatpush3.bf16.msra.mxu0 %v12977_v54 }
0x16d8   :  { %v11234_v36 = vpop.f32.mrf.mxu0 }
0x16d9   :  { %12978 = vst [vmem:[#allocation84_spill] sm:$0xff] %v11234_v36 }
0x16da   :  { %v11236_v33 = vpop.f32.mrf.mxu0 }
0x16db   :  { %12979 = vst [vmem:[#allocation80_spill] sm:$0xff] %v11236_v33 }
0x16dc   :  { %v11238_v52 = vpop.f32.mrf.mxu0 }
0x16dd   :  { %12980 = vst [vmem:[#allocation76_spill] sm:$0xff] %v11238_v52 }
0x16de   :  { %v11240_v1 = vpop.f32.mrf.mxu0 }
0x16df   :  { %12981 = vst [vmem:[#allocation199_spill] sm:$0xff] %v11240_v1 }
0x1714   :  { %v11242_v19 = vpop.f32.mrf.mxu0 }
0x1715   :  { %12982 = vst [vmem:[#allocation200_spill] sm:$0xff] %v11242_v19 }
0x1716   :  { %v11244_v23 = vpop.f32.mrf.mxu0 }
0x1717   :  { %12983 = vst [vmem:[#allocation201_spill] sm:$0xff] %v11244_v23 }
0x1718   :  { %v11246_v3 = vpop.f32.mrf.mxu0 }
0x1719   :  { %12984 = vst [vmem:[#allocation202_spill] sm:$0xff] %v11246_v3 }
0x171a   :  { %v11248_v38 = vpop.f32.mrf.mxu0 }
0x171b   :  { %12985 = vst [vmem:[#allocation203_spill] sm:$0xff] %v11248_v38 }
0x171c   :  { %v8050_v34 = vpop.f32.mrf.mxu0 }
0x171d   :  { %v5560_v59 = vsel %vm1662_vm0, %v8050_v34, -inf }
0x171e   :  { %5561 = vmax.xlane.f32.xlu0 %v5560_v59  ;;  %v5523_v37 = vpop.f32.mrf.mxu0 }
0x171f   :  { %v5554_v46 = vsel %vm1662_vm0, %v5523_v37, -inf }
0x1720   :  { %v8051_v32 = vpop.f32.mrf.mxu0 }
0x1721   :  { %v5563_v23 = vsel %vm1662_vm0, %v8051_v32, -inf }
0x1722   :  { %5555 = vmax.xlane.f32.xlu0 %v5554_v46  ;;  %v5526_v52 = vpop.f32.mrf.mxu0 }
0x1723   :  { %v5557_v36 = vsel %vm1662_vm0, %v5526_v52, -inf }
0x1724   :  { %5558 = vmax.xlane.f32.xlu1 %v5557_v36  ;;  %v8054_v19 = vpop.f32.mrf.mxu0  ;;  %v12986_v36 = vld [vmem:[#allocation64_spill] sm:$0xff] }
0x1725   :  { %v5572_v59 = vsel %vm1662_vm0, %v8054_v19, -inf }
0x1726   :  { %5564 = vmax.xlane.f32.xlu0 %v5563_v23  ;;  %v5539_v3 = vpop.f32.mrf.mxu0  ;;  %v12987_v23 = vld [vmem:[#allocation60_spill] sm:$0xff] }
0x1727   :  { %v5566_v38 = vsel %vm1662_vm0, %v5539_v3, -inf }
0x1728   :  { %5567 = vmax.xlane.f32.xlu1 %v5566_v38  ;;  %v8055_v1 = vpop.f32.mrf.mxu0  ;;  %v12988_v38 = vld [vmem:[#allocation68_spill] sm:$0xff] }
0x1729   :  { %v5575_v7 = vsel %vm1662_vm0, %v8055_v1, -inf }
0x172a   :  { %5573 = vmax.xlane.f32.xlu0 %v5572_v59  ;;  %v5542_v33 = vpop.f32.mrf.mxu0  ;;  %v12990_v59 = vld [vmem:[#allocation30_spill] sm:$0xff] }
0x172b   :  { %v5569_v46 = vsel %vm1662_vm0, %v5542_v33, -inf }
0x172c   :  { %5576 = vmax.xlane.f32.xlu1 %v5575_v7  ;;  %v12989_v7 = vld [vmem:[#allocation56_spill] sm:$0xff] }
0x172e   :  { %5570 = vmax.xlane.f32.xlu0 %v5569_v46  ;;  %v12992_v46 = vld [vmem:[#allocation38_spill] sm:$0xff] }
0x173d   :  { %5634 = vrot.lane.b32.xlu1 %v12934_v40, %s9224_s0  ;;  %v12991_v40 = vld [vmem:[#allocation34_spill] sm:$0xff] }
0x1741   :  { %6021 = vrot.lane.b32.xlu1 %v12986_v36, %s9224_s0 }
0x1744   :  { %5636 = vrot.lane.b32.xlu0 %v12933_v2, %s9224_s0  ;;  %v12993_v2 = vld [vmem:[#allocation42_spill] sm:$0xff] }
0x1745   :  { %6019 = vrot.lane.b32.xlu1 %v12987_v23, %s9224_s0 }
0x1748   :  { %6023 = vrot.lane.b32.xlu0 %v12988_v38, %s9224_s0 }
0x1749   :  { %6017 = vrot.lane.b32.xlu1 %v12989_v7, %s9224_s0 }
0x174c   :  { %6005 = vrot.lane.b32.xlu0 %v12990_v59, %s9224_s0 }
0x174d   :  { %6007 = vrot.lane.b32.xlu1 %v12991_v40, %s9224_s0 }
0x1750   :  { %6009 = vrot.lane.b32.xlu0 %v12992_v46, %s9224_s0 }
0x1751   :  { %6011 = vrot.lane.b32.xlu1 %v12993_v2, %s9224_s0 }
0x17a7   :  { %v5562_v24 = vpop.xlane.xlu0 %5561 }
0x17a8   :  { %v5580_v57 = vsub.f32 %v8050_v34, %v5562_v24 }
0x17aa   :  { %v5590_v15 = vmul.f32 1.442695, %v5580_v57 }
0x17ab   :  { %v5556_v4 = vpop.xlane.xlu0 %5555 }
0x17ac   :  { %v5578_v12 = vsub.f32 %v5523_v37, %v5556_v4 }
0x17ad   :  { %v5559_v11 = vpop.xlane.xlu1 %5558 }
0x17ae   :  { %v5586_v35 = vmul.f32 1.442695, %v5578_v12  ;;  %v5579_v62 = vsub.f32 %v5526_v52, %v5559_v11 }
0x17af   :  { %v5565_v47 = vpop.xlane.xlu0 %5564 }
0x17b0   :  { %v5588_v63 = vmul.f32 1.442695, %v5579_v62  ;;  %v5581_v14 = vsub.f32 %v8051_v32, %v5565_v47  ;;  %8804 = vpow2.f32 %v5586_v35  ;;  %v5765_v47 = vsel %vm1662_vm0, %v12988_v38, 0 }
0x17b1   :  { %v5568_v9 = vpop.xlane.xlu1 %5567  ;;  %v5759_v32 = vsel %vm1662_vm0, %v12987_v23, 0 }
0x17b2   :  { %8806 = vpow2.f32 %v5588_v63  ;;  %v5592_v20 = vmul.f32 1.442695, %v5581_v14  ;;  %v5582_v41 = vsub.f32 %v5539_v3, %v5568_v9  ;;  %v5762_v3 = vsel %vm1662_vm0, %v12986_v36, 0 }
0x17b3   :  { %8808 = vpow2.f32 %v5590_v15  ;;  %v5574_v43 = vpop.xlane.xlu0 %5573 }
0x17b4   :  { %8810 = vpow2.f32 %v5592_v20  ;;  %v5584_v61 = vsub.f32 %v8054_v19, %v5574_v43  ;;  %v5594_v24 = vmul.f32 1.442695, %v5582_v41 }
0x17b5   :  { %v5577_v44 = vpop.xlane.xlu1 %5576 }
0x17b6   :  { %v5585_v34 = vsub.f32 %v8055_v1, %v5577_v44  ;;  %v5598_v11 = vmul.f32 1.442695, %v5584_v61  ;;  %8812 = vpow2.f32 %v5594_v24 }
0x17b7   :  { %v5571_v4 = vpop.xlane.xlu0 %5570 }
0x17b8   :  { %v5600_v37 = vmul.f32 1.442695, %v5585_v34  ;;  %v5583_v12 = vsub.f32 %v5542_v33, %v5571_v4 }
0x17b9   :  { %v5635_v63 = vpop.permute.xlu1 %5634 }
0x17ba   :  { %v5596_v57 = vmul.f32 1.442695, %v5583_v12  ;;  %8814 = vpow2.f32 %v5600_v37 }
0x17bb   :  { %v5637_v62 = vpop.permute.xlu0 %5636 }
0x17bc   :  { %8816 = vpow2.f32 %v5596_v57  ;;  %8060 = vmatprep.subr.bf16.mxu1 %v5637_v62 }
0x17bd   :  { %8818 = vpow2.f32 %v5598_v11  ;;  %8061 = vmatpush3.bf16.msra.mxu1 %v5637_v62  ;;  %v11278_v15 = vpop.eup %8804 }
0x17be   :  { %8062 = vmatprep.subr.bf16.mxu1 %v5635_v63 }
0x17bf   :  { %v11280_v20 = vpop.eup %8806  ;;  %v11282_v41 = vpop.permute.xlu0 %6023 }
0x17c0   :  { %v11284_v44 = vpop.eup %8808  ;;  %8212 = vmatprep.subr.msk.bf16.mxu0 %vm1662_vm0, %v11282_v41  ;;  %v5626_v14 = vpack.c.bf16 %v11280_v20, %v11278_v15 }
0x17c1   :  { %v11290_v61 = vpop.eup %8810  ;;  %8063 = vmatpush3.bf16.msra.mxu1 %v5635_v63 }
0x17c2   :  { %v5627_v43 = vpack.c.bf16 %v11290_v61, %v11284_v44  ;;  %8064 = vmatprep.mubr.msk.bf16.mxu1 %vm1662_vm0, %v5626_v14  ;;  %8208 = vmatprep.subr.msk.bf16.mxu1 %vm1662_vm0, %v12988_v38  ;;  %v5756_v38 = vsel %vm1662_vm0, %v12989_v7, 0 }
0x17c3   :  { %v11302_v9 = vpop.eup %8812 }
0x17c4   :  { %8065 = vmatmul.mubr.msk.bf16.vlgmr.msra.gmra.mxu1 %vm1662_vm0, %v5627_v43 }
0x17c5   :  { %8073 = vmatpush3.bf16.xpose.msra.mxu1 %v5765_v47 }
0x17c6   :  { %8209 = vmatprep.subr.msk.bf16.mxu1 %vm1662_vm0, %v12986_v36 }
0x17c7   :  { %v11304_v35 = vpop.eup %8814 }
0x17c9   :  { %v11306_v33 = vpop.eup %8816 }
0x17ca   :  { %v11308_v52 = vpop.eup %8818  ;;  %v5628_v1 = vpack.c.bf16 %v11306_v33, %v11302_v9 }
0x17cb   :  { %v5629_v19 = vpack.c.bf16 %v11304_v35, %v11308_v52 }
0x17cc   :  { %8068 = vmatprep.mubr.msk.bf16.mxu1 %vm1662_vm0, %v5628_v1 }
0x17cd   :  { %8069 = vmatmul.mubr.msk.bf16.gmra.mxu1 %vm1662_vm0, %v5629_v19  ;;  %v2645_v19 = vsel %vm1662_vm0, %v10342_v29, 0.0  ;;  %v2648_v29 = vsel %vm1662_vm0, %v10344_v25, 0.0  ;;  %v3205_v25 = vsel %vm1662_vm0, %v10526_v56, 0.0  ;;  %v2103_v56 = vsel %vm1662_vm0, %v10153_v16, 0.0  ;;  %v11430_v16 = vpop.permute.xlu1 %6021 }
0x17ce   :  { %8075 = vmatpush3.bf16.xpose.msra.mxu1 %v5762_v3  ;;  %8080 = vmatprep.mubr.msk.bf16.mxu1 %vm1662_vm0, %v12990_v59  ;;  %v2642_v3 = vsel %vm1662_vm0, %v10340_v58, 0.0  ;;  %v2657_v58 = vsel %vm1662_vm0, %v10364_v6, 0.0  ;;  %v3762_v6 = vsel %vm1662_vm0, %v10722_v0, 0.0  ;;  %v2660_v0 = vsel %vm1662_vm0, %v10366_v49, 0.0 }
0x17cf   :  { %8210 = vmatprep.subr.msk.bf16.mxu1 %vm1662_vm0, %v12987_v23  ;;  %v5045_v49 = vsel %vm1662_vm0, %v11084_v5, 0.0 }
0x17d6   :  { %8077 = vmatpush3.bf16.xpose.msra.mxu1 %v5759_v32  ;;  %v13002_v32 = vld [vmem:[#allocation65_spill] sm:$0xff] }
0x17d7   :  { %8211 = vmatprep.subr.msk.bf16.mxu1 %vm1662_vm0, %v12989_v7 }
0x17de   :  { %8079 = vmatpush3.bf16.xpose.msra.mxu1 %v5756_v38  ;;  %v13003_v38 = vld [vmem:[#allocation166_spill] sm:$0xff] }
0x17e5   :  { %8081 = vmatmul.mubr.msk.bf16.vlgmr.msra.gmra.mxu1 %vm1662_vm0, %v12991_v40 }
0x17e6   :  { %8084 = vmatprep.mubr.msk.bf16.mxu1 %vm1662_vm0, %v12992_v46 }
0x17ed   :  { %8085 = vmatmul.mubr.msk.bf16.gmra.mxu1 %vm1662_vm0, %v12993_v2 }
0x1884   :  { %v11334_v36 = vpop.f32.mrf.mxu1 }
0x1885   :  { %12994 = vst [vmem:[#allocation64_spill] sm:$0xff] %v11334_v36 }
0x1886   :  { %v11336_v23 = vpop.f32.mrf.mxu1 }
0x1887   :  { %12995 = vst [vmem:[#allocation60_spill] sm:$0xff] %v11336_v23 }
0x1888   :  { %v11338_v59 = vpop.f32.mrf.mxu1 }
0x1889   :  { %12996 = vst [vmem:[#allocation68_spill] sm:$0xff] %v11338_v59 }
0x188a   :  { %v11340_v24 = vpop.f32.mrf.mxu1 }
0x188b   :  { %12997 = vst [vmem:[#allocation56_spill] sm:$0xff] %v11340_v24  ;;  %v13100_v24 = vld [vmem:[#allocation22_spill] sm:$0xff] }
0x188d   :  { %v11342_v34 = vpop.f32.mrf.mxu1 }
0x188e   :  { %12998 = vst [vmem:[#allocation30_spill] sm:$0xff] %v11342_v34  ;;  %v13094_v34 = vld [vmem:[#allocation137_spill] sm:$0xff] }
0x188f   :  { %v11344_v7 = vpop.f32.mrf.mxu1 }
0x1890   :  { %12999 = vst [vmem:[#allocation34_spill] sm:$0xff] %v11344_v7  ;;  %v13092_v7 = vld [vmem:[#allocation175_spill] sm:$0xff] }
0x1891   :  { %v11346_v4 = vpop.f32.mrf.mxu1 }
0x1892   :  { %13000 = vst [vmem:[#allocation38_spill] sm:$0xff] %v11346_v4  ;;  %v4769_v4 = vsel %vm1662_vm0, %v13092_v7, 0.0 }
0x1893   :  { %v11348_v40 = vpop.f32.mrf.mxu1 }
0x1894   :  { %13001 = vst [vmem:[#allocation42_spill] sm:$0xff] %v11348_v40 }
0x18a5   :  { %v11350_v46 = vpop.f32.mrf.mxu1 }
0x18a6   :  { %v5838_v2 = vsel %vm1662_vm0, %v11350_v46, -inf }
0x18a7   :  { %5839 = vmax.xlane.f32.xlu0 %v5838_v2  ;;  %v11354_v37 = vpop.f32.mrf.mxu1  ;;  %v4485_v2 = vsel %vm1662_vm0, %v13003_v38, 0.0 }
0x18a8   :  { %v5832_v12 = vsel %vm1662_vm0, %v11354_v37, -inf }
0x18a9   :  { %5833 = vmax.xlane.f32.xlu1 %v5832_v12  ;;  %v11358_v11 = vpop.f32.mrf.mxu1  ;;  %v13004_v12 = vld [vmem:[#allocation185_spill] sm:$0xff] }
0x18aa   :  { %v5841_v62 = vsel %vm1662_vm0, %v11358_v11, -inf  ;;  %v5042_v5 = vsel %vm1662_vm0, %v13004_v12, 0.0  ;;  %v13014_v12 = vld [vmem:[#allocation168_spill] sm:$0xff] }
0x18ab   :  { %v11360_v57 = vpop.f32.mrf.mxu1 }
0x18ac   :  { %v5835_v63 = vsel %vm1662_vm0, %v11360_v57, -inf }
0x18ad   :  { %5842 = vmax.xlane.f32.xlu1 %v5841_v62  ;;  %5836 = vmax.xlane.f32.xlu0 %v5835_v63  ;;  %v11366_v14 = vpop.f32.mrf.mxu1 }
0x18ae   :  { %v5850_v43 = vsel %vm1662_vm0, %v11366_v14, -inf }
0x18af   :  { %v11370_v47 = vpop.f32.mrf.mxu1 }
0x18b0   :  { %v5844_v1 = vsel %vm1662_vm0, %v11370_v47, -inf }
0x18b1   :  { %5851 = vmax.xlane.f32.xlu0 %v5850_v43  ;;  %v13006_v43 = vld [vmem:[#allocation52_spill] sm:$0xff] }
0x18b5   :  { %5845 = vmax.xlane.f32.xlu0 %v5844_v1  ;;  %v11452_v1 = vpop.permute.xlu0 %6005 }
0x18be   :  { %6198 = vrot.lane.b32.xlu1 %v12975_v48, %s9224_s0  ;;  %v2651_v48 = vsel %vm1662_vm0, %v10348_v21, 0.0  ;;  %v2088_v21 = vsel %vm1662_vm0, %v10129_v10, 0.0  ;;  %v2663_v10 = vsel %vm1662_vm0, %v10362_v55, 0.0  ;;  %v3768_v55 = vsel %vm1662_vm0, %v10726_v27, 0.0  ;;  %v11436_v27 = vpop.permute.xlu1 %6019 }
0x18c2   :  { %6196 = vrot.lane.b32.xlu1 %v12976_v28, %s9224_s0  ;;  %v2082_v28 = vsel %vm1662_vm0, %v10119_v39, 0.0  ;;  %v3765_v39 = vsel %vm1662_vm0, %v10724_v13, 0.0  ;;  %v2094_v13 = vsel %vm1662_vm0, %v10138_v22, 0.0  ;;  %v3211_v22 = vsel %vm1662_vm0, %v10536_v53, 0.0  ;;  %v11446_v62 = vpop.permute.xlu1 %6017 }
0x18c3   :  { %v3208_v53 = vsel %vm1662_vm0, %v10528_v50, 0.0  ;;  %v13005_v50 = vld [vmem:[#allocation61_spill] sm:$0xff] }
0x18c4   :  { %v3783_v63 = vsel %vm1662_vm0, %v13005_v50, 0.0 }
0x18c6   :  { %6194 = vrot.lane.b32.xlu1 %v12977_v54, %s9224_s0  ;;  %v2091_v54 = vsel %vm1662_vm0, %v10123_v31, 0.0  ;;  %v2097_v31 = vsel %vm1662_vm0, %v10145_v51, 0.0  ;;  %v3771_v51 = vsel %vm1662_vm0, %v10730_v30, 0.0  ;;  %v2100_v30 = vsel %vm1662_vm0, %v10147_v26, 0.0 }
0x18c7   :  { %v3774_v26 = vsel %vm1662_vm0, %v13002_v32, 0.0 }
0x18cb   :  { %6200 = vrot.lane.b32.xlu0 %v12970_v18, %s9224_s0  ;;  %v2085_v18 = vsel %vm1662_vm0, %v10125_v8, 0.0  ;;  %v2654_v8 = vsel %vm1662_vm0, %v10360_v17, 0.0  ;;  %v3202_v17 = vsel %vm1662_vm0, %v10522_v42, 0.0  ;;  %v3777_v42 = vsel %vm1662_vm0, %v10746_v45, 0.0 }
0x18cc   :  { %v3217_v45 = vsel %vm1662_vm0, %v10558_v60, 0.0  ;;  %v3214_v60 = vsel %vm1662_vm0, %v13006_v43, 0.0 }
0x18ea   :  { %2646 = vadd.xlane.f32.xlu1 %v2645_v19  ;;  %2643 = vadd.xlane.f32.xlu0 %v2642_v3  ;;  %v11454_v19 = vpop.permute.xlu1 %6007  ;;  %v13007_v3 = vld [vmem:[#allocation187_spill] sm:$0xff] }
0x18ee   :  { %2652 = vadd.xlane.f32.xlu1 %v2651_v48  ;;  %2083 = vadd.xlane.f32.xlu0 %v2082_v28  ;;  %v5051_v48 = vsel %vm1662_vm0, %v13007_v3, 0.0  ;;  %v13008_v28 = vld [vmem:[#allocation165_spill] sm:$0xff] }
0x18f2   :  { %2092 = vadd.xlane.f32.xlu1 %v2091_v54  ;;  %2086 = vadd.xlane.f32.xlu0 %v2085_v18  ;;  %v4482_v54 = vsel %vm1662_vm0, %v13008_v28, 0.0  ;;  %v11460_v18 = vpop.f32.mrf.mxu1 }
0x18f6   :  { %2658 = vadd.xlane.f32.xlu1 %v2657_v58  ;;  %2649 = vadd.xlane.f32.xlu0 %v2648_v29  ;;  %v11462_v58 = vpop.permute.xlu0 %6009  ;;  %v13009_v29 = vld [vmem:[#allocation150_spill] sm:$0xff] }
0x18fa   :  { %3766 = vadd.xlane.f32.xlu1 %v3765_v39  ;;  %2089 = vadd.xlane.f32.xlu0 %v2088_v21  ;;  %v3780_v39 = vsel %vm1662_vm0, %v13009_v29, 0.0  ;;  %v5853_v21 = vsel %vm1662_vm0, %v11460_v18, -inf }
0x18fe   :  { %2098 = vadd.xlane.f32.xlu1 %v2097_v31  ;;  %2655 = vadd.xlane.f32.xlu0 %v2654_v8  ;;  %v11468_v31 = vpop.permute.xlu1 %6011  ;;  %v11470_v8 = vpop.f32.mrf.mxu1 }
0x1902   :  { %3206 = vadd.xlane.f32.xlu1 %v3205_v25  ;;  %3763 = vadd.xlane.f32.xlu0 %v3762_v6 }
0x1906   :  { %2664 = vadd.xlane.f32.xlu1 %v2663_v10  ;;  %2095 = vadd.xlane.f32.xlu0 %v2094_v13  ;;  %v13010_v10 = vld [vmem:[#allocation186_spill] sm:$0xff] }
0x1907   :  { %v5048_v13 = vsel %vm1662_vm0, %v13010_v10, 0.0 }
0x190a   :  { %3772 = vadd.xlane.f32.xlu1 %v3771_v51  ;;  %3203 = vadd.xlane.f32.xlu0 %v3202_v17  ;;  %v5847_v51 = vsel %vm1662_vm0, %v11470_v8, -inf }
0x190e   :  { %2104 = vadd.xlane.f32.xlu1 %v2103_v56  ;;  %2661 = vadd.xlane.f32.xlu0 %v2660_v0 }
0x1912   :  { %3212 = vadd.xlane.f32.xlu1 %v3211_v22  ;;  %3769 = vadd.xlane.f32.xlu0 %v3768_v55  ;;  %v13011_v22 = vld [vmem:[#allocation50_spill] sm:$0xff] }
0x1913   :  { %v3220_v55 = vsel %vm1662_vm0, %v13011_v22, 0.0 }
0x1916   :  { %3778 = vadd.xlane.f32.xlu1 %v3777_v42  ;;  %2101 = vadd.xlane.f32.xlu0 %v2100_v30  ;;  %v13012_v42 = vld [vmem:[#allocation51_spill] sm:$0xff] }
0x1917   :  { %v3223_v30 = vsel %vm1662_vm0, %v13012_v42, 0.0 }
0x191a   :  { %5046 = vadd.xlane.f32.xlu1 %v5045_v49  ;;  %3209 = vadd.xlane.f32.xlu0 %v3208_v53 }
0x191e   :  { %3218 = vadd.xlane.f32.xlu1 %v3217_v45  ;;  %3775 = vadd.xlane.f32.xlu0 %v3774_v26  ;;  %v13013_v26 = vld [vmem:[#allocation167_spill] sm:$0xff] }
0x191f   :  { %v4488_v38 = vsel %vm1662_vm0, %v13013_v26, 0.0  ;;  %v6044_v26 = vsel %vm1662_vm0, %v11430_v16, 0 }
0x1922   :  { %4486 = vadd.xlane.f32.xlu1 %v4485_v2  ;;  %5043 = vadd.xlane.f32.xlu0 %v5042_v5  ;;  %v4491_v5 = vsel %vm1662_vm0, %v13014_v12, 0.0 }
0x1926   :  { %3784 = vadd.xlane.f32.xlu1 %v3783_v63  ;;  %3215 = vadd.xlane.f32.xlu0 %v3214_v60  ;;  %v13015_v63 = vld [vmem:[#allocation66_spill] sm:$0xff] }
0x192a   :  { %5052 = vadd.xlane.f32.xlu1 %v5051_v48  ;;  %4483 = vadd.xlane.f32.xlu0 %v4482_v54  ;;  %v13017_v48 = vld [vmem:[#allocation67_spill] sm:$0xff]  ;;  %v13018_v54 = vld [vmem:[#allocation169_spill] sm:$0xff] }
0x192b   :  { %v4494_v28 = vsel %vm1662_vm0, %v13017_v48, 0.0  ;;  %v4497_v29 = vsel %vm1662_vm0, %v13018_v54, 0.0  ;;  %v13029_v54 = vld [vmem:[#allocation91_spill] sm:$0xff] }
0x192e   :  { %3781 = vadd.xlane.f32.xlu0 %v3780_v39  ;;  %5854 = vmax.xlane.f32.xlu1 %v5853_v21  ;;  %v5602_v21 = vsel %vm1662_vm0, %v11278_v15, 0.0  ;;  %v13020_v15 = vld [vmem:[#allocation62_spill] sm:$0xff] }
0x192f   :  { %v5063_v22 = vsel %vm1662_vm0, %v13020_v15, 0.0 }
0x1930   :  { %v5840_v25 = vpop.xlane.xlu0 %5839 }
0x1931   :  { %v5858_v6 = vsub.f32 %v11350_v46, %v5840_v25  ;;  %v5605_v25 = vsel %vm1662_vm0, %v11280_v20, 0.0 }
0x1932   :  { %5049 = vadd.xlane.f32.xlu0 %v5048_v13  ;;  %5848 = vmax.xlane.f32.xlu1 %v5847_v51  ;;  %v5834_v17 = vpop.xlane.xlu1 %5833 }
0x1933   :  { %v5856_v56 = vsub.f32 %v11354_v37, %v5834_v17  ;;  %v5868_v0 = vmul.f32 1.442695, %v5858_v6 }
0x1935   :  { %v5864_v49 = vmul.f32 1.442695, %v5856_v56  ;;  %8820 = vpow2.f32 %v5868_v0  ;;  %v13019_v56 = vld [vmem:[#allocation189_spill] sm:$0xff] }
0x1936   :  { %v5837_v46 = vpop.xlane.xlu0 %5836  ;;  %3221 = vadd.xlane.f32.xlu0 %v3220_v55  ;;  %3224 = vadd.xlane.f32.xlu1 %v3223_v30  ;;  %v5843_v53 = vpop.xlane.xlu1 %5842  ;;  %v5060_v0 = vsel %vm1662_vm0, %v13019_v56, 0.0  ;;  %v6047_v30 = vsel %vm1662_vm0, %v11282_v41, 0  ;;  %v5611_v41 = vsel %vm1662_vm0, %v11290_v61, 0.0  ;;  %v13026_v61 = vld [vmem:[#allocation90_spill] sm:$0xff] }
0x1937   :  { %v5857_v45 = vsub.f32 %v11360_v57, %v5837_v46  ;;  %v5859_v32 = vsub.f32 %v11358_v11, %v5843_v53  ;;  %8822 = vpow2.f32 %v5864_v49  ;;  %v5054_v57 = vsel %vm1662_vm0, %v13015_v63, 0.0  ;;  %v13016_v11 = vld [vmem:[#allocation188_spill] sm:$0xff]  ;;  %v13021_v49 = vld [vmem:[#allocation170_spill] sm:$0xff]  ;;  %v13022_v53 = vld [vmem:[#allocation63_spill] sm:$0xff] }
0x1938   :  { %v5057_v43 = vsel %vm1662_vm0, %v13016_v11, 0.0  ;;  %v4500_v46 = vsel %vm1662_vm0, %v13021_v49, 0.0  ;;  %v1803_v63 = vsel %vm1662_vm0, %v13026_v61, 0.0  ;;  %v5617_v11 = vsel %vm1662_vm0, %v11306_v33, 0.0  ;;  %v13041_v61 = vld [vmem:[#allocation43_spill] sm:$0xff] }
0x1939   :  { %v5866_v37 = vmul.f32 1.442695, %v5857_v45  ;;  %v5870_v2 = vmul.f32 1.442695, %v5859_v32  ;;  %v4503_v45 = vsel %vm1662_vm0, %v13022_v53, 0.0  ;;  %v5608_v32 = vsel %vm1662_vm0, %v11284_v44, 0.0 }
0x193a   :  { %v11488_v50 = vpop.xlane.xlu0 %5851  ;;  %4489 = vadd.xlane.f32.xlu0 %v4488_v38  ;;  %4492 = vadd.xlane.f32.xlu1 %v4491_v5  ;;  %v6199_v3 = vpop.permute.xlu1 %6198  ;;  %v13023_v38 = vld [vmem:[#allocation114_spill] sm:$0xff]  ;;  %v13025_v44 = vld [vmem:[#allocation89_spill] sm:$0xff] }
0x193b   :  { %8824 = vpow2.f32 %v5866_v37  ;;  %v2360_v37 = vsel %vm1662_vm0, %v13023_v38, 0.0  ;;  %v1800_v5 = vsel %vm1662_vm0, %v13025_v44, 0.0  ;;  %v13037_v53 = vld [vmem:[#allocation134_spill] sm:$0xff] }
0x193c   :  { %8826 = vpow2.f32 %v5870_v2  ;;  %v13024_v2 = vld [vmem:[#allocation116_spill] sm:$0xff] }
0x193d   :  { %v2363_v12 = vsel %vm1662_vm0, %v13024_v2, 0.0 }
0x193e   :  { %5055 = vadd.xlane.f32.xlu0 %v5054_v57  ;;  %v11494_v60 = vpop.xlane.xlu0 %5845  ;;  %5058 = vadd.xlane.f32.xlu1 %v5057_v43  ;;  %v6197_v10 = vpop.permute.xlu1 %6196  ;;  %v5614_v57 = vsel %vm1662_vm0, %v11302_v9, 0.0  ;;  %v5620_v43 = vsel %vm1662_vm0, %v11308_v52, 0.0  ;;  %v13027_v9 = vld [vmem:[#allocation113_spill] sm:$0xff]  ;;  %v1806_v52 = vsel %vm1662_vm0, %v13029_v54, 0.0 }
0x193f   :  { %v2366_v48 = vsel %vm1662_vm0, %v13027_v9, 0.0  ;;  %v13044_v9 = vld [vmem:[#allocation94_spill] sm:$0xff] }
0x1942   :  { %4495 = vadd.xlane.f32.xlu0 %v4494_v28  ;;  %v6201_v39 = vpop.permute.xlu0 %6200  ;;  %4498 = vadd.xlane.f32.xlu1 %v4497_v29  ;;  %v11504_v6 = vpop.eup %8820  ;;  %v13028_v28 = vld [vmem:[#allocation115_spill] sm:$0xff]  ;;  %v13030_v29 = vld [vmem:[#allocation92_spill] sm:$0xff] }
0x1943   :  { %8120 = vmatprep.subr.bf16.mxu1 %v6201_v39  ;;  %v6195_v42 = vpop.permute.xlu1 %6194  ;;  %v2369_v33 = vsel %vm1662_vm0, %v13028_v28, 0.0 }
0x1944   :  { %8121 = vmatpush3.bf16.msra.mxu1 %v6201_v39  ;;  %v11506_v13 = vpop.eup %8822  ;;  %v13031_v39 = vld [vmem:[#allocation117_spill] sm:$0xff] }
0x1945   :  { %8122 = vmatprep.subr.bf16.mxu1 %v6199_v3 }
0x1946   :  { %5603 = vadd.xlane.f32.xlu0 %v5602_v21  ;;  %5606 = vadd.xlane.f32.xlu1 %v5605_v25  ;;  %v13032_v21 = vld [vmem:[#allocation119_spill] sm:$0xff] }
0x1947   :  { %v2375_v25 = vsel %vm1662_vm0, %v13032_v21, 0.0 }
0x1948   :  { %v11508_v51 = vpop.eup %8824  ;;  %8123 = vmatpush3.bf16.msra.mxu1 %v6199_v3  ;;  %v5623_v3 = vsel %vm1662_vm0, %v11304_v35, 0.0  ;;  %v1809_v35 = vsel %vm1662_vm0, %v13030_v29, 0.0 }
0x1949   :  { %v11510_v17 = vpop.eup %8826  ;;  %8124 = vmatprep.subr.bf16.mxu1 %v6197_v10  ;;  %v5904_v20 = vpack.c.bf16 %v11508_v51, %v11506_v13 }
0x194a   :  { %v5905_v55 = vpack.c.bf16 %v11510_v17, %v11504_v6  ;;  %5061 = vadd.xlane.f32.xlu0 %v5060_v0  ;;  %5064 = vadd.xlane.f32.xlu1 %v5063_v22  ;;  %v13034_v0 = vld [vmem:[#allocation17_spill] sm:$0xff] }
0x194b   :  { %8096 = vmatprep.mubr.msk.bf16.mxu0 %vm1662_vm0, %v5904_v20  ;;  %v3483_v15 = vsel %vm1662_vm0, %v13034_v0, 0.0  ;;  %v13035_v20 = vld [vmem:[#allocation95_spill] sm:$0xff] }
0x194c   :  { %8097 = vmatmul.mubr.msk.bf16.vlgmr.msra.gmra.mxu0 %vm1662_vm0, %v5905_v55  ;;  %8125 = vmatpush3.bf16.msra.mxu1 %v6197_v10  ;;  %v13033_v10 = vld [vmem:[#allocation18_spill] sm:$0xff]  ;;  %v1812_v55 = vsel %vm1662_vm0, %v13035_v20, 0.0 }
0x194d   :  { %8105 = vmatpush3.bf16.xpose.msra.mxu0 %v6047_v30  ;;  %8126 = vmatprep.subr.bf16.mxu1 %v6195_v42  ;;  %v3480_v56 = vsel %vm1662_vm0, %v13033_v10, 0.0 }
0x194e   :  { %8213 = vmatprep.subr.msk.bf16.mxu0 %vm1662_vm0, %v11430_v16  ;;  %4501 = vadd.xlane.f32.xlu0 %v4500_v46  ;;  %v6041_v16 = vsel %vm1662_vm0, %v11436_v27, 0 }
0x194f   :  { %4504 = vadd.xlane.f32.xlu1 %v4503_v45  ;;  %v2920_v45 = vsel %vm1662_vm0, %v13037_v53, 0.0  ;;  %v13050_v53 = vld [vmem:[#allocation25_spill] sm:$0xff] }
0x1950   :  { %8127 = vmatpush3.bf16.msra.mxu1 %v6195_v42  ;;  %v13036_v42 = vld [vmem:[#allocation96_spill] sm:$0xff] }
0x1951   :  { %v1815_v30 = vsel %vm1662_vm0, %v13036_v42, 0.0 }
0x1952   :  { %5609 = vadd.xlane.f32.xlu0 %v5608_v32  ;;  %v13038_v32 = vld [vmem:[#allocation136_spill] sm:$0xff] }
0x1953   :  { %5612 = vadd.xlane.f32.xlu1 %v5611_v41  ;;  %v2923_v41 = vsel %vm1662_vm0, %v13038_v32, 0.0 }
0x1955   :  { %8107 = vmatpush3.bf16.xpose.msra.mxu0 %v6044_v26 }
0x1956   :  { %8214 = vmatprep.subr.msk.bf16.mxu0 %vm1662_vm0, %v11436_v27  ;;  %2361 = vadd.xlane.f32.xlu0 %v2360_v37  ;;  %v6038_v27 = vsel %vm1662_vm0, %v11446_v62, 0  ;;  %v13039_v37 = vld [vmem:[#allocation120_spill] sm:$0xff] }
0x1957   :  { %2364 = vadd.xlane.f32.xlu1 %v2363_v12  ;;  %v2378_v2 = vsel %vm1662_vm0, %v13039_v37, 0.0  ;;  %v13040_v12 = vld [vmem:[#allocation118_spill] sm:$0xff] }
0x1958   :  { %v2381_v44 = vsel %vm1662_vm0, %v13040_v12, 0.0 }
0x195a   :  { %1801 = vadd.xlane.f32.xlu0 %v1800_v5 }
0x195b   :  { %1804 = vadd.xlane.f32.xlu1 %v1803_v63  ;;  %v3486_v63 = vsel %vm1662_vm0, %v13041_v61, 0.0 }
0x195d   :  { %8109 = vmatpush3.bf16.xpose.msra.mxu0 %v6041_v16  ;;  %v13042_v16 = vld [vmem:[#allocation21_spill] sm:$0xff] }
0x195e   :  { %8215 = vmatprep.subr.msk.bf16.mxu0 %vm1662_vm0, %v11446_v62  ;;  %5615 = vadd.xlane.f32.xlu0 %v5614_v57  ;;  %v2372_v62 = vsel %vm1662_vm0, %v13031_v39, 0.0  ;;  %v3489_v57 = vsel %vm1662_vm0, %v13042_v16, 0.0 }
0x195f   :  { %5618 = vadd.xlane.f32.xlu1 %v5617_v11 }
0x1962   :  { %5621 = vadd.xlane.f32.xlu0 %v5620_v43 }
0x1963   :  { %5624 = vadd.xlane.f32.xlu1 %v5623_v3  ;;  %v13043_v3 = vld [vmem:[#allocation93_spill] sm:$0xff] }
0x1965   :  { %8111 = vmatpush3.bf16.xpose.msra.mxu0 %v6038_v27  ;;  %v1818_v27 = vsel %vm1662_vm0, %v13043_v3, 0.0 }
0x1966   :  { %2367 = vadd.xlane.f32.xlu0 %v2366_v48  ;;  %v1821_v48 = vsel %vm1662_vm0, %v13044_v9, 0.0 }
0x1967   :  { %2370 = vadd.xlane.f32.xlu1 %v2369_v33  ;;  %v13045_v33 = vld [vmem:[#allocation133_spill] sm:$0xff] }
0x1968   :  { %v2926_v54 = vsel %vm1662_vm0, %v13045_v33, 0.0 }
0x196a   :  { %1807 = vadd.xlane.f32.xlu0 %v1806_v52  ;;  %v13046_v52 = vld [vmem:[#allocation135_spill] sm:$0xff] }
0x196b   :  { %1810 = vadd.xlane.f32.xlu1 %v1809_v35  ;;  %v2929_v29 = vsel %vm1662_vm0, %v13046_v52, 0.0 }
0x196e   :  { %2373 = vadd.xlane.f32.xlu0 %v2372_v62 }
0x196f   :  { %2376 = vadd.xlane.f32.xlu1 %v2375_v25 }
0x1972   :  { %3481 = vadd.xlane.f32.xlu0 %v3480_v56  ;;  %v13047_v56 = vld [vmem:[#allocation108_spill] sm:$0xff] }
0x1973   :  { %3484 = vadd.xlane.f32.xlu1 %v3483_v15  ;;  %v2647_v22 = vpop.xlane.xlu1 %2646  ;;  %v2644_v49 = vpop.xlane.xlu0 %2643 }
0x1976   :  { %1813 = vadd.xlane.f32.xlu0 %v1812_v55 }
0x1977   :  { %1816 = vadd.xlane.f32.xlu1 %v1815_v30  ;;  %v11580_v46 = vpop.xlane.xlu1 %2652  ;;  %v2084_v38 = vpop.xlane.xlu0 %2083  ;;  %v13049_v30 = vld [vmem:[#allocation19_spill] sm:$0xff] }
0x197a   :  { %2921 = vadd.xlane.f32.xlu0 %v2920_v45 }
0x197b   :  { %2924 = vadd.xlane.f32.xlu1 %v2923_v41  ;;  %v11586_v26 = vpop.xlane.xlu1 %2092  ;;  %v2087_v11 = vpop.xlane.xlu0 %2086 }
0x197c   :  { %8828 = vrcp.f32 %v2087_v11  ;;  %v5862_v11 = vsub.f32 %v11366_v14, %v11488_v50  ;;  %v13056_v14 = vld [vmem:[#allocation174_spill] sm:$0xff] }
0x197d   :  { %8830 = vrcp.f32 %v2084_v38  ;;  %v4760_v50 = vsel %vm1662_vm0, %v13056_v14, 0.0 }
0x197e   :  { %2379 = vadd.xlane.f32.xlu0 %v2378_v2  ;;  %8832 = vrcp.f32 %v2644_v49  ;;  %v5876_v33 = vmul.f32 1.442695, %v5862_v11  ;;  %v13066_v11 = vld [vmem:[#allocation105_spill] sm:$0xff] }
0x197f   :  { %2382 = vadd.xlane.f32.xlu1 %v2381_v44  ;;  %v11592_v5 = vpop.xlane.xlu1 %2658  ;;  %8834 = vrcp.f32 %v2647_v22  ;;  %v13048_v22 = vld [vmem:[#allocation106_spill] sm:$0xff] }
0x1982   :  { %3487 = vadd.xlane.f32.xlu0 %v3486_v63  ;;  %v5860_v63 = vsub.f32 %v11370_v47, %v11494_v60  ;;  %v13055_v47 = vld [vmem:[#allocation20_spill] sm:$0xff] }
0x1983   :  { %3490 = vadd.xlane.f32.xlu1 %v3489_v57  ;;  %v11598_v43 = vpop.xlane.xlu1 %3766 }
0x1984   :  { %v5872_v3 = vmul.f32 1.442695, %v5860_v63 }
0x1986   :  { %1819 = vadd.xlane.f32.xlu0 %v1818_v27  ;;  %8836 = vpow2.f32 %v5872_v3 }
0x1987   :  { %1822 = vadd.xlane.f32.xlu1 %v1821_v48  ;;  %v11604_v28 = vpop.xlane.xlu1 %2098 }
0x1989   :  { %v8829_v62 = vpop.eup %8828 }
0x198a   :  { %2927 = vadd.xlane.f32.xlu0 %v2926_v54  ;;  %v8831_v25 = vpop.eup %8830  ;;  %v2212_v0 = vmul.f32 %v8829_v62, %v13047_v56  ;;  %v11644_v54 = vpop.xlane.xlu0 %2649 }
0x198b   :  { %2930 = vadd.xlane.f32.xlu1 %v2929_v29  ;;  %v11610_v35 = vpop.xlane.xlu1 %3206  ;;  %v8833_v10 = vpop.eup %8832  ;;  %v2211_v55 = vmul.f32 %v8831_v25, %v13048_v22  ;;  %v13054_v29 = vld [vmem:[#allocation23_spill] sm:$0xff]  ;;  %v13060_v22 = vld [vmem:[#allocation154_spill] sm:$0xff] }
0x198c   :  { %v8835_v15 = vpop.eup %8834  ;;  %v2771_v49 = vmul.f32 %v8833_v10, %v13049_v30  ;;  %v3495_v62 = vsel %vm1662_vm0, %v13054_v29, 0.0  ;;  %v13058_v10 = vld [vmem:[#allocation72_spill] sm:$0xff] }
0x198d   :  { %v8233_v42 = vpack.i.bf16 %v2212_v0, %v2211_v55  ;;  %v2772_v45 = vmul.f32 %v8835_v15, %v13050_v53  ;;  %v2932_v56 = vsel %vm1662_vm0, %v13058_v10, 0.0  ;;  %v13059_v0 = vld [vmem:[#allocation138_spill] sm:$0xff]  ;;  %v4200_v55 = vsel %vm1662_vm0, %v13060_v22, 0.0  ;;  %v13062_v30 = vld [vmem:[#allocation156_spill] sm:$0xff] }
0x198e   :  { %v2090_v25 = vpop.xlane.xlu0 %2089  ;;  %v2935_v15 = vsel %vm1662_vm0, %v13059_v0, 0.0 }
0x198f   :  { %v11612_v39 = vpop.xlane.xlu1 %2664  ;;  %v8228_v41 = vpack.i.bf16 %v2772_v45, %v2771_v49  ;;  %v4203_v49 = vsel %vm1662_vm0, %v13062_v30, 0.0 }
0x1993   :  { %v11614_v21 = vpop.xlane.xlu1 %3772 }
0x1997   :  { %v11617_v20 = vpop.xlane.xlu1 %2104 }
0x199b   :  { %v11622_v32 = vpop.xlane.xlu1 %3212 }
0x199c   :  { %8234 = vrot.lane.b32.xlu1 %v8233_v42, %s9224_s0  ;;  %v11661_v42 = vpop.eup %8836 }
0x199d   :  { %13061 = vst [vmem:[#allocation61_spill] sm:$0xff] %v11661_v42 }
0x199f   :  { %v11625_v38 = vpop.xlane.xlu1 %3778 }
0x19a0   :  { %8229 = vrot.lane.b32.xlu0 %v8228_v41, %s9224_s0 }
0x19a3   :  { %v11628_v37 = vpop.xlane.xlu1 %5046 }
0x19a7   :  { %v11630_v2 = vpop.xlane.xlu1 %3218 }
0x19ab   :  { %v11632_v12 = vpop.xlane.xlu1 %4486 }
0x19ac   :  { %13051 = vst [vmem:[#allocation65_spill] sm:$0xff] %v11632_v12  ;;  %v13123_v12 = vld [vmem:[#allocation16_spill] sm:$0xff] }
0x19af   :  { %v11634_v44 = vpop.xlane.xlu1 %3784 }
0x19b0   :  { %13052 = vst [vmem:[#allocation166_spill] sm:$0xff] %v11634_v44  ;;  %v11897_v44 = vld [vmem:[#allocation8 + $0xd0] sm:$0xff]  }
0x19b1   :  { %13116 = vst [vmem:[#allocation93_spill] sm:$0xff] %v11897_v44 }
0x19b3   :  { %v11636_v61 = vpop.xlane.xlu1 %5052 }
0x19b4   :  { %13053 = vst [vmem:[#allocation185_spill] sm:$0xff] %v11636_v61 }
0x19b7   :  { %v5855_v16 = vpop.xlane.xlu1 %5854 }
0x19b8   :  { %v5863_v57 = vsub.f32 %v11460_v18, %v5855_v16  ;;  %v3492_v18 = vsel %vm1662_vm0, %v13055_v47, 0.0 }
0x19ba   :  { %v5878_v27 = vmul.f32 1.442695, %v5863_v57 }
0x19bb   :  { %v5849_v9 = vpop.xlane.xlu1 %5848 }
0x19bc   :  { %v5861_v48 = vsub.f32 %v11470_v8, %v5849_v9  ;;  %8838 = vpow2.f32 %v5878_v27  ;;  %v13057_v8 = vld [vmem:[#allocation176_spill] sm:$0xff]  ;;  %v13067_v27 = vld [vmem:[#allocation107_spill] sm:$0xff] }
0x19bd   :  { %v4763_v60 = vsel %vm1662_vm0, %v13057_v8, 0.0 }
0x19be   :  { %v5874_v52 = vmul.f32 1.442695, %v5861_v48 }
0x19bf   :  { %3496 = vadd.xlane.f32.xlu0 %v3495_v62 }
0x19c0   :  { %8840 = vpow2.f32 %v5874_v52  ;;  %3493 = vadd.xlane.f32.xlu1 %v3492_v18  ;;  %v11690_v52 = vpop.xlane.xlu0 %2655 }
0x19c1   :  { %8842 = vpow2.f32 %v5876_v33  ;;  %v13068_v33 = vld [vmem:[#allocation85_spill] sm:$0xff] }
0x19c2   :  { %8844 = vrcp.f32 %v2090_v25 }
0x19c3   :  { %4761 = vadd.xlane.f32.xlu0 %v4760_v50  ;;  %8846 = vrcp.f32 %v11586_v26 }
0x19c4   :  { %4764 = vadd.xlane.f32.xlu1 %v4763_v60  ;;  %v3764_v29 = vpop.xlane.xlu0 %3763  ;;  %8848 = vrcp.f32 %v11644_v54 }
0x19c5   :  { %8850 = vrcp.f32 %v11580_v46 }
0x19c6   :  { %8852 = vrcp.f32 %v3764_v29 }
0x19c7   :  { %2933 = vadd.xlane.f32.xlu0 %v2932_v56  ;;  %v11714_v56 = vpop.xlane.xlu1 %3224  ;;  %8854 = vrcp.f32 %v11598_v43 }
0x19c8   :  { %2936 = vadd.xlane.f32.xlu1 %v2935_v15  ;;  %v2096_v62 = vpop.xlane.xlu0 %2095  ;;  %13072 = vst [vmem:[#allocation51_spill] sm:$0xff] %v11714_v56 }
0x19c9   :  { %v11665_v53 = vpop.eup %8838  ;;  %8856 = vrcp.f32 %v2096_v62 }
0x19ca   :  { %13063 = vst [vmem:[#allocation52_spill] sm:$0xff] %v11665_v53  ;;  %8858 = vrcp.f32 %v11604_v28 }
0x19cb   :  { %4201 = vadd.xlane.f32.xlu0 %v4200_v55  ;;  %v11722_v55 = vpop.xlane.xlu1 %4492 }
0x19cc   :  { %4204 = vadd.xlane.f32.xlu1 %v4203_v49  ;;  %13076 = vst [vmem:[#allocation188_spill] sm:$0xff] %v11722_v55 }
0x19cd   :  { %v11667_v45 = vpop.eup %8840 }
0x19ce   :  { %13064 = vst [vmem:[#allocation187_spill] sm:$0xff] %v11667_v45  ;;  %v11669_v41 = vpop.eup %8842  ;;  %v5906_v63 = vpack.c.bf16 %v11667_v45, %v11661_v42 }
0x19cf   :  { %13065 = vst [vmem:[#allocation165_spill] sm:$0xff] %v11669_v41  ;;  %v5907_v26 = vpack.c.bf16 %v11665_v53, %v11669_v41  ;;  %v8845_v16 = vpop.eup %8844  ;;  %v13120_v41 = vld [vmem:[#allocation48_spill] sm:$0xff] }
0x19d0   :  { %8100 = vmatprep.mubr.msk.bf16.mxu0 %vm1662_vm0, %v5906_v63  ;;  %v8847_v57 = vpop.eup %8846  ;;  %v2213_v3 = vmul.f32 %v8845_v16, %v13066_v11  ;;  %v11728_v63 = vpop.xlane.xlu1 %5058 }
0x19d1   :  { %8101 = vmatmul.mubr.msk.bf16.gmra.mxu0 %vm1662_vm0, %v5907_v26  ;;  %v2214_v9 = vmul.f32 %v8847_v57, %v13067_v27  ;;  %13079 = vst [vmem:[#allocation189_spill] sm:$0xff] %v11728_v63  ;;  %v13112_v63 = vld [vmem:[#allocation153_spill] sm:$0xff] }
0x19d2   :  { %8112 = vmatprep.mubr.msk.bf16.mxu0 %vm1662_vm0, %v11452_v1  ;;  %v3498_v1 = vsel %vm1662_vm0, %v13068_v33, 0.0 }
0x19d3   :  { %v8243_v48 = vpack.i.bf16 %v2214_v9, %v2213_v3 }
0x19d4   :  { %v11738_v3 = vpop.xlane.xlu1 %4498 }
0x19d5   :  { %13084 = vst [vmem:[#allocation116_spill] sm:$0xff] %v11738_v3 }
0x19d9   :  { %8113 = vmatmul.mubr.msk.bf16.vlgmr.msra.gmra.mxu0 %vm1662_vm0, %v11454_v19  ;;  %v11692_v19 = vpop.xlane.xlu0 %3203 }
0x19da   :  { %8116 = vmatprep.mubr.msk.bf16.mxu0 %vm1662_vm0, %v11462_v58  ;;  %8860 = vrcp.f32 %v11692_v19 }
0x19db   :  { %8862 = vrcp.f32 %v11610_v35  ;;  %v4206_v35 = vsel %vm1662_vm0, %v13112_v63, 0.0  ;;  %v8542_v63 = vld [vmem:[#allocation8 + $0x78] sm:$0xff]  }
0x19dc   :  { %8864 = vrcp.f32 %v11690_v52  ;;  %7496 = vmatprep.subr.bf16.mxu1 %v8542_v63 }
0x19dd   :  { %8244 = vrot.lane.b32.xlu1 %v8243_v48, %s9224_s0  ;;  %v11694_v47 = vpop.xlane.xlu0 %2661  ;;  %8866 = vrcp.f32 %v11592_v5 }
0x19e1   :  { %8117 = vmatmul.mubr.msk.bf16.gmra.mxu0 %vm1662_vm0, %v11468_v31  ;;  %v11696_v18 = vpop.xlane.xlu0 %3769 }
0x19e2   :  { %8868 = vrcp.f32 %v11696_v18 }
0x19e3   :  { %8870 = vrcp.f32 %v11614_v21  ;;  %v5883_v21 = vsel %vm1662_vm0, %v11508_v51, 0.0 }
0x19e5   :  { %v11698_v58 = vpop.xlane.xlu0 %2101 }
0x19e6   :  { %8872 = vrcp.f32 %v11698_v58 }
0x19e7   :  { %8874 = vrcp.f32 %v11617_v20 }
0x19e9   :  { %v11700_v14 = vpop.xlane.xlu0 %3209 }
0x19ea   :  { %8876 = vrcp.f32 %v11700_v14 }
0x19ed   :  { %v11702_v50 = vpop.xlane.xlu0 %3775 }
0x19f1   :  { %v11704_v31 = vpop.xlane.xlu0 %5043 }
0x19f5   :  { %v11706_v8 = vpop.xlane.xlu0 %3215 }
0x19f9   :  { %v11708_v60 = vpop.xlane.xlu0 %4483 }
0x19fa   :  { %13069 = vst [vmem:[#allocation150_spill] sm:$0xff] %v11708_v60  ;;  %v11910_v60 = vld [vmem:[#allocation8 + $0x88] sm:$0xff]  }
0x19fb   :  { %13122 = vst [vmem:[#allocation106_spill] sm:$0xff] %v11910_v60 }
0x19fd   :  { %v11710_v25 = vpop.xlane.xlu0 %3781 }
0x19fe   :  { %13070 = vst [vmem:[#allocation186_spill] sm:$0xff] %v11710_v25 }
0x1a01   :  { %3499 = vadd.xlane.f32.xlu1 %v3498_v1  ;;  %v11712_v10 = vpop.xlane.xlu0 %5049  ;;  %v11748_v1 = vpop.xlane.xlu1 %5606 }
0x1a02   :  { %13071 = vst [vmem:[#allocation50_spill] sm:$0xff] %v11712_v10  ;;  %13088 = vst [vmem:[#allocation115_spill] sm:$0xff] %v11748_v1 }
0x1a05   :  { %v11718_v15 = vpop.xlane.xlu0 %3221 }
0x1a06   :  { %13074 = vst [vmem:[#allocation168_spill] sm:$0xff] %v11718_v15 }
0x1a09   :  { %v11726_v49 = vpop.xlane.xlu0 %4489 }
0x1a0a   :  { %13078 = vst [vmem:[#allocation169_spill] sm:$0xff] %v11726_v49 }
0x1a0c   :  { %v11716_v0 = vpop.f32.mrf.mxu0 }
0x1a0d   :  { %13073 = vst [vmem:[#allocation167_spill] sm:$0xff] %v11716_v0  ;;  %v11734_v57 = vpop.xlane.xlu0 %5055 }
0x1a0e   :  { %v11720_v22 = vpop.f32.mrf.mxu0  ;;  %13082 = vst [vmem:[#allocation63_spill] sm:$0xff] %v11734_v57 }
0x1a0f   :  { %13075 = vst [vmem:[#allocation66_spill] sm:$0xff] %v11720_v22 }
0x1a10   :  { %v11724_v30 = vpop.f32.mrf.mxu0 }
0x1a11   :  { %13077 = vst [vmem:[#allocation67_spill] sm:$0xff] %v11724_v30  ;;  %v11744_v48 = vpop.xlane.xlu0 %4495 }
0x1a12   :  { %v11730_v26 = vpop.f32.mrf.mxu0  ;;  %13087 = vst [vmem:[#allocation113_spill] sm:$0xff] %v11744_v48  ;;  %v11877_v48 = vld [vmem:[#allocation8 + $0xe0] sm:$0xff]  }
0x1a13   :  { %13080 = vst [vmem:[#allocation62_spill] sm:$0xff] %v11730_v26  ;;  %v11762_v26 = vpop.xlane.xlu1 %5064 }
0x1a14   :  { %13090 = vst [vmem:[#allocation92_spill] sm:$0xff] %v11762_v26 }
0x1a91   :  { %v11732_v16 = vpop.f32.mrf.mxu0 }
0x1a92   :  { %13081 = vst [vmem:[#allocation170_spill] sm:$0xff] %v11732_v16 }
0x1a93   :  { %v11736_v11 = vpop.f32.mrf.mxu0 }
0x1a94   :  { %13083 = vst [vmem:[#allocation114_spill] sm:$0xff] %v11736_v11  ;;  %v11756_v11 = vpop.xlane.xlu0 %5603 }
0x1a95   :  { %v11740_v27 = vpop.f32.mrf.mxu0  ;;  %13089 = vst [vmem:[#allocation91_spill] sm:$0xff] %v11756_v11 }
0x1a96   :  { %13085 = vst [vmem:[#allocation89_spill] sm:$0xff] %v11740_v27 }
0x1a97   :  { %v11742_v9 = vpop.f32.mrf.mxu0 }
0x1a98   :  { %13086 = vst [vmem:[#allocation90_spill] sm:$0xff] %v11742_v9  ;;  %v11769_v40 = vpop.xlane.xlu0 %5061 }
0x1a99   :  { %v11746_v33 = vpop.f32.mrf.mxu0  ;;  %13091 = vst [vmem:[#allocation117_spill] sm:$0xff] %v11769_v40  ;;  %v11866_v40 = vld [vmem:[#allocation8 + $0xa8] sm:$0xff]  }
0x1a9a   :  { %v6120_v30 = vsel %vm1662_vm0, %v11746_v33, -inf }
0x1a9b   :  { %6121 = vmax.xlane.f32.xlu0 %v6120_v30  ;;  %v11752_v16 = vpop.f32.mrf.mxu0 }
0x1a9c   :  { %v6114_v27 = vsel %vm1662_vm0, %v11752_v16, -inf  ;;  %v11779_v59 = vpop.xlane.xlu0 %4501 }
0x1a9d   :  { %v11754_v0 = vpop.f32.mrf.mxu0  ;;  %13095 = vst [vmem:[#allocation18_spill] sm:$0xff] %v11779_v59 }
0x1a9e   :  { %v6123_v30 = vsel %vm1662_vm0, %v11754_v0, -inf }
0x1a9f   :  { %6115 = vmax.xlane.f32.xlu0 %v6114_v27  ;;  %v11760_v9 = vpop.f32.mrf.mxu0  ;;  %v11774_v27 = vpop.xlane.xlu1 %4504 }
0x1aa0   :  { %v6117_v22 = vsel %vm1662_vm0, %v11760_v9, -inf  ;;  %13093 = vst [vmem:[#allocation119_spill] sm:$0xff] %v11774_v27  ;;  %v11786_v46 = vpop.xlane.xlu0 %5609  ;;  %v11852_v27 = vld [vmem:[#allocation8 + $0xb0] sm:$0xff]  }
0x1aa1   :  { %6118 = vmax.xlane.f32.xlu1 %v6117_v22  ;;  %v2941_v22 = vsel %vm1662_vm0, %v13094_v34, 0.0  ;;  %13098 = vst [vmem:[#allocation95_spill] sm:$0xff] %v11786_v46  ;;  %v13099_v34 = vld [vmem:[#allocation45_spill] sm:$0xff]  ;;  %v13102_v46 = vld [vmem:[#allocation31_spill] sm:$0xff] }
0x1aa3   :  { %6124 = vmax.xlane.f32.xlu0 %v6123_v30  ;;  %v11781_v54 = vpop.xlane.xlu1 %5612  ;;  %v13097_v30 = vld [vmem:[#allocation155_spill] sm:$0xff] }
0x1aa4   :  { %13096 = vst [vmem:[#allocation17_spill] sm:$0xff] %v11781_v54  ;;  %v4209_v7 = vsel %vm1662_vm0, %v13097_v30, 0.0  ;;  %v11792_v62 = vpop.xlane.xlu0 %2361  ;;  %v13101_v30 = vld [vmem:[#allocation57_spill] sm:$0xff] }
0x1aa5   :  { %4770 = vadd.xlane.f32.xlu1 %v4769_v4  ;;  %v8849_v4 = vpop.eup %8848 }
0x1aa6   :  { %v8851_v29 = vpop.eup %8850 }
0x1aa7   :  { %v11788_v36 = vpop.xlane.xlu1 %2364  ;;  %v8853_v43 = vpop.eup %8852  ;;  %v2774_v23 = vmul.f32 %v8851_v29, %v13100_v24 }
0x1aa8   :  { %v8855_v54 = vpop.eup %8854  ;;  %v11799_v56 = vpop.xlane.xlu0 %1801 }
0x1aa9   :  { %2942 = vadd.xlane.f32.xlu1 %v2941_v22  ;;  %v2773_v22 = vmul.f32 %v8849_v4, %v13099_v34  ;;  %v8857_v28 = vpop.eup %8856  ;;  %v3892_v55 = vmul.f32 %v8855_v54, %v13102_v46  ;;  %v13103_v34 = vld [vmem:[#allocation110_spill] sm:$0xff] }
0x1aaa   :  { %v8859_v49 = vpop.eup %8858  ;;  %v2215_v15 = vmul.f32 %v8857_v28, %v13103_v34  ;;  %v11811_v54 = vld [vmem:[#allocation8 + $0xf8] sm:$0xff]   ;;  %v11830_v28 = vpop.f32.mrf.mxu0 }
0x1aab   :  { %v8238_v1 = vpack.i.bf16 %v2774_v23, %v2773_v22  ;;  %v11794_v11 = vpop.xlane.xlu1 %1804  ;;  %v13105_v23 = vld [vmem:[#allocation112_spill] sm:$0xff]  ;;  %v11813_v46 = vld [vmem:[#allocation8 + $0xb8] sm:$0xff]   ;;  %7560 = vmatprep.subr.bf16.mxu0 %v11811_v54  ;;  %v6132_v34 = vsel %vm1662_vm0, %v11830_v28, -inf  ;;  %v8861_v52 = vpop.eup %8860 }
0x1aac   :  { %v2216_v29 = vmul.f32 %v8859_v49, %v13105_v23  ;;  %v11806_v61 = vpop.xlane.xlu0 %5615  ;;  %7561 = vmatpush3.bf16.msra.mxu0 %v11813_v46  ;;  %v11836_v23 = vpop.f32.mrf.mxu0  ;;  %v3331_v42 = vmul.f32 %v8861_v52, %v13120_v41 }
0x1aad   :  { %4210 = vadd.xlane.f32.xlu1 %v4209_v7  ;;  %v3891_v7 = vmul.f32 %v8853_v43, %v13101_v30  ;;  %13106 = vst [vmem:[#allocation134_spill] sm:$0xff] %v11806_v61  ;;  %v8863_v5 = vpop.eup %8862 }
0x1aae   :  { %v8258_v22 = vpack.i.bf16 %v2216_v29, %v2215_v15  ;;  %v11850_v45 = vpop.f32.mrf.mxu0  ;;  %v8865_v63 = vpop.eup %8864 }
0x1aaf   :  { %v8253_v4 = vpack.i.bf16 %v3892_v55, %v3891_v7  ;;  %v11802_v24 = vpop.xlane.xlu1 %5618  ;;  %v11815_v55 = vld [vmem:[#allocation8 + $0xf0] sm:$0xff]   ;;  %v8867_v41 = vpop.eup %8866 }
0x1ab0   :  { %13104 = vst [vmem:[#allocation96_spill] sm:$0xff] %v11802_v24  ;;  %v11817_v43 = vpop.xlane.xlu0 %5621  ;;  %7562 = vmatprep.subr.bf16.mxu0 %v11815_v55  ;;  %v11864_v26 = vpop.f32.mrf.mxu0 }
0x1ab1   :  { %13108 = vst [vmem:[#allocation120_spill] sm:$0xff] %v11817_v43  ;;  %v13109_v43 = vld [vmem:[#allocation24_spill] sm:$0xff]  ;;  %7563 = vmatpush3.bf16.msra.mxu0 %v11852_v27  ;;  %v6129_v3 = vsel %vm1662_vm0, %v11864_v26, -inf }
0x1ab2   :  { %v3501_v24 = vsel %vm1662_vm0, %v13109_v43, 0.0  ;;  %v6135_v43 = vsel %vm1662_vm0, %v11850_v45, -inf }
0x1ab4   :  { %v11824_v15 = vpop.xlane.xlu0 %2367 }
0x1ab8   :  { %v11828_v7 = vpop.xlane.xlu0 %1807 }
0x1ab9   :  { %8239 = vrot.lane.b32.xlu0 %v8238_v1, %s9224_s0  ;;  %v11809_v1 = vpop.xlane.xlu1 %5624 }
0x1aba   :  { %13107 = vst [vmem:[#allocation136_spill] sm:$0xff] %v11809_v1 }
0x1abc   :  { %v11838_v29 = vpop.xlane.xlu0 %2373 }
0x1abd   :  { %v11820_v30 = vpop.xlane.xlu1 %2370 }
0x1abe   :  { %8254 = vrot.lane.b32.xlu1 %v8253_v4, %s9224_s0 }
0x1ac0   :  { %v11846_v61 = vpop.xlane.xlu0 %3481 }
0x1ac1   :  { %v11826_v49 = vpop.xlane.xlu1 %1810  ;;  %8878 = vrcp.f32 %v11846_v61 }
0x1ac2   :  { %8259 = vrot.lane.b32.xlu1 %v8258_v22, %s9224_s0  ;;  %v6126_v22 = vsel %vm1662_vm0, %v11836_v23, -inf }
0x1ac5   :  { %v11832_v4 = vpop.xlane.xlu1 %2376 }
0x1ac9   :  { %v11842_v1 = vpop.xlane.xlu1 %3484 }
0x1aca   :  { %8880 = vrcp.f32 %v11842_v1  ;;  %v8869_v1 = vpop.eup %8868 }
0x1acb   :  { %8882 = vrcp.f32 %v11622_v32 }
0x1acc   :  { %8884 = vrcp.f32 %v11694_v47  ;;  %v13145_v47 = vld [vmem:[#allocation27_spill] sm:$0xff] }
0x1acd   :  { %v11848_v10 = vpop.xlane.xlu1 %1816 }
0x1ad1   :  { %v11872_v19 = vpop.xlane.xlu1 %2924 }
0x1ad5   :  { %v11891_v57 = vpop.xlane.xlu1 %2382 }
0x1ad6   :  { %13114 = vst [vmem:[#allocation43_spill] sm:$0xff] %v11891_v57  ;;  %v11908_v57 = vld [vmem:[#allocation8 + $0xc8] sm:$0xff]  }
0x1ad7   :  { %13121 = vst [vmem:[#allocation108_spill] sm:$0xff] %v11908_v57 }
0x1ad8   :  { %6133 = vmax.xlane.f32.xlu0 %v6132_v34  ;;  %v13110_v34 = vld [vmem:[#allocation173_spill] sm:$0xff] }
0x1ad9   :  { %v4766_v59 = vsel %vm1662_vm0, %v13110_v34, 0.0  ;;  %v13111_v34 = vld [vmem:[#allocation139_spill] sm:$0xff]  ;;  %v11904_v53 = vpop.xlane.xlu1 %3490 }
0x1ada   :  { %13119 = vst [vmem:[#allocation135_spill] sm:$0xff] %v11904_v53 }
0x1adc   :  { %6127 = vmax.xlane.f32.xlu0 %v6126_v22  ;;  %v11860_v22 = vld [vmem:[#allocation8 + $0xe8] sm:$0xff]  }
0x1add   :  { %7564 = vmatprep.subr.bf16.mxu0 %v11860_v22  ;;  %v11919_v53 = vpop.xlane.xlu1 %1822 }
0x1ade   :  { %7565 = vmatpush3.bf16.msra.mxu0 %v11866_v40  ;;  %13126 = vst [vmem:[#allocation23_spill] sm:$0xff] %v11919_v53 }
0x1adf   :  { %7566 = vmatprep.subr.bf16.mxu0 %v11877_v48 }
0x1ae0   :  { %3502 = vadd.xlane.f32.xlu0 %v3501_v24  ;;  %v11862_v24 = vpop.xlane.xlu0 %1813 }
0x1ae4   :  { %4767 = vadd.xlane.f32.xlu0 %v4766_v59  ;;  %v2938_v59 = vsel %vm1662_vm0, %v13111_v34, 0.0  ;;  %v11885_v34 = vpop.xlane.xlu0 %2921 }
0x1ae6   :  { %6136 = vmax.xlane.f32.xlu1 %v6135_v43  ;;  %v11879_v43 = vld [vmem:[#allocation8 + $0xa0] sm:$0xff]  }
0x1ae7   :  { %7567 = vmatpush3.bf16.msra.mxu0 %v11879_v43 }
0x1ae8   :  { %2939 = vadd.xlane.f32.xlu0 %v2938_v59  ;;  %v11888_v59 = vld [vmem:[#allocation8 + $0xd8] sm:$0xff]   ;;  %v11899_v25 = vpop.xlane.xlu0 %2379 }
0x1ae9   :  { %13113 = vst [vmem:[#allocation118_spill] sm:$0xff] %v11888_v59  ;;  %7568 = vmatprep.subr.bf16.mxu0 %v11888_v59  ;;  %13117 = vst [vmem:[#allocation94_spill] sm:$0xff] %v11899_v25  ;;  %v11917_v59 = vld [vmem:[#allocation8 + $0xc0] sm:$0xff]  }
0x1aea   :  { %6130 = vmax.xlane.f32.xlu1 %v6129_v3  ;;  %v11894_v3 = vld [vmem:[#allocation8 + $0x98] sm:$0xff]   ;;  %13125 = vst [vmem:[#allocation25_spill] sm:$0xff] %v11917_v59 }
0x1aeb   :  { %13115 = vst [vmem:[#allocation21_spill] sm:$0xff] %v11894_v3  ;;  %7569 = vmatpush3.bf16.msra.mxu0 %v11894_v3  ;;  %v3332_v3 = vmul.f32 %v8863_v5, %v13123_v12  ;;  %v13128_v12 = vld [vmem:[#allocation130_spill] sm:$0xff] }
0x1aec   :  { %4207 = vadd.xlane.f32.xlu0 %v4206_v35  ;;  %v11901_v35 = vld [vmem:[#allocation8 + $0x90] sm:$0xff]   ;;  %7570 = vmatprep.subr.bf16.mxu0 %v11897_v44  ;;  %v11914_v25 = vpop.xlane.xlu0 %3487  ;;  %v2775_v52 = vmul.f32 %v8865_v63, %v13128_v12 }
0x1aed   :  { %13118 = vst [vmem:[#allocation133_spill] sm:$0xff] %v11901_v35  ;;  %13124 = vst [vmem:[#allocation19_spill] sm:$0xff] %v11914_v25  ;;  %v8263_v44 = vpack.i.bf16 %v3332_v3, %v3331_v42  ;;  %v11930_v42 = vpop.xlane.xlu1 %2930 }
0x1aee   :  { %13130 = vst [vmem:[#allocation174_spill] sm:$0xff] %v11930_v42 }
0x1aef   :  { %7571 = vmatpush3.bf16.msra.mxu0 %v11901_v35  ;;  %v11921_v35 = vld [vmem:[#allocation8 + $0x80] sm:$0xff]  }
0x1af0   :  { %7572 = vmatprep.subr.bf16.mxu0 %v11908_v57  ;;  %13127 = vst [vmem:[#allocation20_spill] sm:$0xff] %v11921_v35  ;;  %v11927_v5 = vpop.xlane.xlu0 %1819 }
0x1af1   :  { %v11935_v25 = vpop.permute.xlu1 %8234 }
0x1af3   :  { %7573 = vmatpush3.bf16.msra.mxu0 %v11910_v60  ;;  %v13129_v60 = vld [vmem:[#allocation132_spill] sm:$0xff] }
0x1af4   :  { %7574 = vmatprep.subr.bf16.mxu0 %v11917_v59  ;;  %v2776_v57 = vmul.f32 %v8867_v41, %v13129_v60  ;;  %v11933_v53 = vpop.xlane.xlu0 %2927 }
0x1af5   :  { %13131 = vst [vmem:[#allocation176_spill] sm:$0xff] %v11933_v53  ;;  %v11939_v59 = vpop.xlane.xlu1 %3493  ;;  %v13138_v53 = vld [vmem:[#allocation86_spill] sm:$0xff] }
0x1af6   :  { %v8248_v3 = vpack.i.bf16 %v2776_v57, %v2775_v52  ;;  %13132 = vst [vmem:[#allocation72_spill] sm:$0xff] %v11939_v59  ;;  %v13137_v52 = vld [vmem:[#allocation178_spill] sm:$0xff]  ;;  %v4772_v59 = vsel %vm1662_vm0, %v13138_v53, 0.0  ;;  %v13140_v53 = vld [vmem:[#allocation195_spill] sm:$0xff] }
0x1af7   :  { %7575 = vmatpush3.bf16.msra.mxu0 %v11921_v35  ;;  %v5323_v18 = vsel %vm1662_vm0, %v13140_v53, 0.0 }
0x1af9   :  { %v11943_v12 = vpop.xlane.xlu1 %4764 }
0x1afa   :  { %13134 = vst [vmem:[#allocation154_spill] sm:$0xff] %v11943_v12  ;;  %v13139_v12 = vld [vmem:[#allocation158_spill] sm:$0xff] }
0x1afb   :  { %8264 = vrot.lane.b32.xlu1 %v8263_v44, %s9224_s0  ;;  %v11937_v44 = vpop.permute.xlu0 %8229 }
0x1afd   :  { %v11947_v60 = vpop.xlane.xlu1 %2936 }
0x1afe   :  { %13135 = vst [vmem:[#allocation156_spill] sm:$0xff] %v11947_v60  ;;  %v4215_v60 = vsel %vm1662_vm0, %v13139_v12, 0.0 }
0x1aff   :  { %v11941_v63 = vpop.xlane.xlu0 %3496 }
0x1b00   :  { %13133 = vst [vmem:[#allocation138_spill] sm:$0xff] %v11941_v63 }
0x1b01   :  { %v11951_v57 = vpop.xlane.xlu1 %4204 }
0x1b02   :  { %8249 = vrot.lane.b32.xlu0 %v8248_v3, %s9224_s0  ;;  %13136 = vst [vmem:[#allocation105_spill] sm:$0xff] %v11951_v57  ;;  %v4775_v3 = vsel %vm1662_vm0, %v13137_v52, 0.0  ;;  %v5880_v52 = vsel %vm1662_vm0, %v11506_v13, 0.0 }
0x1b03   :  { %v11945_v35 = vpop.xlane.xlu0 %4761 }
0x1b05   :  { %v11960_v63 = vpop.permute.xlu1 %8244 }
0x1b07   :  { %v11949_v41 = vpop.xlane.xlu0 %2933 }
0x1b0b   :  { %v11955_v42 = vpop.xlane.xlu0 %4201 }
0x1b1f   :  { %4776 = vadd.xlane.f32.xlu1 %v4775_v3  ;;  %v11968_v3 = vpop.xlane.xlu1 %3499 }
0x1b21   :  { %4773 = vadd.xlane.f32.xlu0 %v4772_v59 }
0x1b23   :  { %4216 = vadd.xlane.f32.xlu1 %v4215_v60 }
0x1b24   :  { %v6122_v57 = vpop.xlane.xlu0 %6121 }
0x1b25   :  { %5881 = vadd.xlane.f32.xlu0 %v5880_v52  ;;  %v6140_v59 = vsub.f32 %v11746_v33, %v6122_v57  ;;  %v13141_v57 = vld [vmem:[#allocation87_spill] sm:$0xff] }
0x1b26   :  { %v4212_v51 = vsel %vm1662_vm0, %v13141_v57, 0.0 }
0x1b27   :  { %5324 = vadd.xlane.f32.xlu1 %v5323_v18  ;;  %v6150_v20 = vmul.f32 1.442695, %v6140_v59  ;;  %v8871_v18 = vpop.eup %8870 }
0x1b28   :  { %v6116_v12 = vpop.xlane.xlu0 %6115 }
0x1b29   :  { %v6138_v13 = vsub.f32 %v11752_v16, %v6116_v12  ;;  %5884 = vadd.xlane.f32.xlu0 %v5883_v21  ;;  %v3893_v12 = vmul.f32 %v8869_v1, %v13145_v47  ;;  %v8873_v21 = vpop.eup %8872 }
0x1b2a   :  { %v6119_v58 = vpop.xlane.xlu1 %6118 }
0x1b2b   :  { %v6146_v60 = vmul.f32 1.442695, %v6138_v13  ;;  %v6139_v52 = vsub.f32 %v11760_v9, %v6119_v58  ;;  %v13143_v9 = vld [vmem:[#allocation193_spill] sm:$0xff]  ;;  %v8875_v58 = vpop.eup %8874 }
0x1b2c   :  { %v6125_v33 = vpop.xlane.xlu0 %6124  ;;  %v5320_v32 = vsel %vm1662_vm0, %v13143_v9, 0.0 }
0x1b2d   :  { %v6148_v14 = vmul.f32 1.442695, %v6139_v52  ;;  %v6141_v16 = vsub.f32 %v11754_v0, %v6125_v33  ;;  %4213 = vadd.xlane.f32.xlu0 %v4212_v51  ;;  %8886 = vpow2.f32 %v6146_v60  ;;  %v13146_v0 = vld [vmem:[#allocation53_spill] sm:$0xff]  ;;  %v8877_v60 = vpop.eup %8876 }
0x1b2e   :  { %v11986_v61 = vpop.xlane.xlu1 %4770  ;;  %v3894_v13 = vmul.f32 %v8871_v18, %v13146_v0  ;;  %v13148_v33 = vld [vmem:[#allocation109_spill] sm:$0xff]  ;;  %v8879_v51 = vpop.eup %8878 }
0x1b2f   :  { %13142 = vst [vmem:[#allocation107_spill] sm:$0xff] %v11986_v61  ;;  %8888 = vpow2.f32 %v6148_v14  ;;  %v6152_v53 = vmul.f32 1.442695, %v6141_v16  ;;  %v2217_v57 = vmul.f32 %v8873_v21, %v13148_v33  ;;  %v8881_v14 = vpop.eup %8880  ;;  %v13149_v16 = vld [vmem:[#allocation111_spill] sm:$0xff] }
0x1b30   :  { %8890 = vpow2.f32 %v6150_v20  ;;  %v8273_v20 = vpack.i.bf16 %v3894_v13, %v3893_v12  ;;  %v8883_v9 = vpop.eup %8882  ;;  %v13152_v13 = vld [vmem:[#allocation145_spill] sm:$0xff] }
0x1b31   :  { %8892 = vpow2.f32 %v6152_v53  ;;  %5321 = vadd.xlane.f32.xlu0 %v5320_v32  ;;  %v2218_v53 = vmul.f32 %v8875_v58, %v13149_v16  ;;  %v8885_v1 = vpop.eup %8884  ;;  %v3594_v21 = vmul.f32 %v8881_v14, %v13152_v13  ;;  %v8545_v14 = vld [vmem:[#allocation8 + $0x38] sm:$0xff]   ;;  %v13155_v13 = vld [vmem:[#allocation131_spill] sm:$0xff] }
0x1b32   :  { %v11990_v59 = vpop.xlane.xlu1 %2942  ;;  %8894 = vrcp.f32 %v11612_v39  ;;  %v13150_v39 = vld [vmem:[#allocation49_spill] sm:$0xff] }
0x1b33   :  { %13144 = vst [vmem:[#allocation85_spill] sm:$0xff] %v11990_v59  ;;  %v8278_v47 = vpack.i.bf16 %v2218_v53, %v2217_v57  ;;  %v3333_v59 = vmul.f32 %v8877_v60, %v13150_v39  ;;  %8896 = vrcp.f32 %v11885_v34 }
0x1b34   :  { %8898 = vrcp.f32 %v11872_v19  ;;  %v5889_v19 = vsel %vm1662_vm0, %v11510_v17, 0.0 }
0x1b35   :  { %8900 = vrcp.f32 %v11704_v31 }
0x1b36   :  { %v11995_v52 = vpop.xlane.xlu1 %4210  ;;  %8902 = vrcp.f32 %v11628_v37 }
0x1b37   :  { %13147 = vst [vmem:[#allocation175_spill] sm:$0xff] %v11995_v52  ;;  %v13151_v52 = vld [vmem:[#allocation77_spill] sm:$0xff]  ;;  %8904 = vrcp.f32 %v11706_v8 }
0x1b38   :  { %8274 = vrot.lane.b32.xlu1 %v8273_v20, %s9224_s0  ;;  %v3593_v12 = vmul.f32 %v8879_v51, %v13151_v52  ;;  %v13153_v20 = vld [vmem:[#allocation26_spill] sm:$0xff] }
0x1b39   :  { %v3334_v58 = vmul.f32 %v8883_v9, %v13153_v20  ;;  %v8547_v9 = vld [vmem:[#allocation8 + $0x70] sm:$0xff]  }
0x1b3a   :  { %v8255_v32 = vpop.permute.xlu1 %8254  ;;  %v12001_v18 = vpop.eup %8886 }
0x1b3b   :  { %v8257_v0 = vunpack.i.h.bf16 %v8255_v32  ;;  %v8256_v61 = vunpack.i.l.bf16 %v8255_v32  ;;  %v8283_v52 = vpack.i.bf16 %v3334_v58, %v3333_v59  ;;  %v8553_v58 = vld [vmem:[#allocation8 + $0x28] sm:$0xff]  }
0x1b3c   :  { %v12005_v33 = vpop.eup %8888  ;;  %8279 = vrot.lane.b32.xlu1 %v8278_v47, %s9224_s0 }
0x1b3d   :  { %v12009_v16 = vpop.eup %8890  ;;  %v6186_v57 = vpack.c.bf16 %v12005_v33, %v12001_v18  ;;  %v4051_v60 = vsel %vm1662_vm0, %v3593_v12, %v8256_v61  ;;  %v4052_v53 = vsel %vm1662_vm0, %v3594_v21, %v8257_v0  ;;  %v13154_v61 = vld [vmem:[#allocation129_spill] sm:$0xff]  ;;  %v8551_v21 = vld [vmem:[#allocation8 + $0x68] sm:$0xff]   ;;  %v6165_v31 = vsel %vm1662_vm0, %v12005_v33, 0.0 }
0x1b3e   :  { %v12015_v32 = vpop.eup %8892  ;;  %v6462_v51 = vpack.c.bf16 %v4052_v53, %v4051_v60  ;;  %v2777_v12 = vmul.f32 %v8885_v1, %v13154_v61  ;;  %v8549_v0 = vld [vmem:[#allocation8 + $0x30] sm:$0xff]   ;;  %v8555_v60 = vld [vmem:[#allocation8 + $0x20] sm:$0xff]   ;;  %v8556_v53 = vld [vmem:[#allocation8 + $0x58] sm:$0xff]   ;;  %v12026_v61 = vpop.permute.xlu0 %8239 }
0x1b3f   :  { %v6187_v39 = vpack.c.bf16 %v12015_v32, %v12009_v16  ;;  %8128 = vmatprep.mubr.msk.bf16.mxu1 %vm1662_vm0, %v6186_v57  ;;  %v8895_v47 = vpop.eup %8894  ;;  %v8554_v57 = vld [vmem:[#allocation8 + $0x60] sm:$0xff]   ;;  %v8558_v1 = vld [vmem:[#allocation8 + $0x50] sm:$0xff]  }
0x1b40   :  { %8284 = vrot.lane.b32.xlu1 %v8283_v52, %s9224_s0  ;;  %6883 = vmatprep.mubr.bf16.mxu0 %v6462_v51  ;;  %v2778_v59 = vmul.f32 %v8895_v47, %v13155_v13  ;;  %v8557_v52 = vld [vmem:[#allocation8 + $0x18] sm:$0xff]   ;;  %v8559_v51 = vld [vmem:[#allocation8 + $0x10] sm:$0xff]   ;;  %v8563_v47 = vld [vmem:[#allocation8] sm:$0xff]  }
0x1b41   :  { %8129 = vmatmul.mubr.msk.bf16.vlgmr.msra.gmra.mxu1 %vm1662_vm0, %v6187_v39  ;;  %v8561_v39 = vld [vmem:[#allocation8 + $0x8] sm:$0xff]  }
0x1b42   :  { %7497 = vmatpush3.bf16.msra.mxu1 %v8545_v14  ;;  %v8268_v20 = vpack.i.bf16 %v2778_v59, %v2777_v12  ;;  %v8560_v14 = vld [vmem:[#allocation8 + $0x48] sm:$0xff]   ;;  %v13156_v12 = vld [vmem:[#allocation177_spill] sm:$0xff]  ;;  %v13157_v59 = vld [vmem:[#allocation179_spill] sm:$0xff] }
0x1b43   :  { %7498 = vmatprep.subr.bf16.mxu1 %v8547_v9  ;;  %v8562_v9 = vld [vmem:[#allocation8 + $0x40] sm:$0xff]  }
0x1b46   :  { %7499 = vmatpush3.bf16.msra.mxu1 %v8549_v0  ;;  %v4781_v0 = vsel %vm1662_vm0, %v13156_v12, 0.0 }
0x1b47   :  { %8269 = vrot.lane.b32.xlu0 %v8268_v20, %s9224_s0  ;;  %7500 = vmatprep.subr.bf16.mxu1 %v8551_v21  ;;  %v4778_v21 = vsel %vm1662_vm0, %v13157_v59, 0.0  ;;  %v13158_v20 = vld [vmem:[#allocation157_spill] sm:$0xff] }
0x1b4a   :  { %7501 = vmatpush3.bf16.msra.mxu1 %v8553_v58  ;;  %v4221_v58 = vsel %vm1662_vm0, %v13158_v20, 0.0  ;;  %v6168_v20 = vsel %vm1662_vm0, %v12009_v16, 0.0 }
0x1b4b   :  { %7502 = vmatprep.subr.bf16.mxu1 %v8554_v57  ;;  %v5886_v57 = vsel %vm1662_vm0, %v11504_v6, 0.0 }
0x1b4e   :  { %7503 = vmatpush3.bf16.msra.mxu1 %v8555_v60 }
0x1b4f   :  { %7504 = vmatprep.subr.bf16.mxu1 %v8556_v53  ;;  %v12039_v53 = vpop.permute.xlu1 %8259 }
0x1b52   :  { %7505 = vmatpush3.bf16.msra.mxu1 %v8557_v52  ;;  %v13159_v52 = vld [vmem:[#allocation194_spill] sm:$0xff] }
0x1b53   :  { %7506 = vmatprep.subr.bf16.mxu1 %v8558_v1  ;;  %v5329_v1 = vsel %vm1662_vm0, %v13159_v52, 0.0 }
0x1b56   :  { %7507 = vmatpush3.bf16.msra.mxu1 %v8559_v51 }
0x1b57   :  { %7508 = vmatprep.subr.bf16.mxu1 %v8560_v14 }
0x1b5a   :  { %7509 = vmatpush3.bf16.msra.mxu1 %v8561_v39 }
0x1b5b   :  { %7510 = vmatprep.subr.bf16.mxu1 %v8562_v9 }
0x1b5e   :  { %7511 = vmatpush3.bf16.msra.mxu1 %v8563_v47  ;;  %v13161_v47 = vld [vmem:[#allocation192_spill] sm:$0xff] }
0x1b5f   :  { %8136 = vmatprep.subr.bf16.mxu1 %v11811_v54  ;;  %v5326_v12 = vsel %vm1662_vm0, %v13161_v47, 0.0 }
0x1b61   :  { %v6134_v13 = vpop.xlane.xlu0 %6133 }
0x1b62   :  { %v6144_v54 = vsub.f32 %v11830_v28, %v6134_v13  ;;  %v6171_v28 = vsel %vm1662_vm0, %v12015_v32, 0.0  ;;  %v8897_v32 = vpop.eup %8896 }
0x1b63   :  { %v8899_v8 = vpop.eup %8898 }
0x1b64   :  { %4782 = vadd.xlane.f32.xlu1 %v4781_v0  ;;  %v6158_v34 = vmul.f32 1.442695, %v6144_v54  ;;  %v13162_v0 = vld [vmem:[#allocation70_spill] sm:$0xff]  ;;  %v8901_v54 = vpop.eup %8900 }
0x1b65   :  { %v6128_v60 = vpop.xlane.xlu0 %6127  ;;  %v3033_v33 = vmul.f32 %v8897_v32, %v13162_v0  ;;  %v13167_v32 = vld [vmem:[#allocation122_spill] sm:$0xff] }
0x1b66   :  { %4779 = vadd.xlane.f32.xlu0 %v4778_v21  ;;  %v6142_v51 = vsub.f32 %v11836_v23, %v6128_v60  ;;  %8906 = vpow2.f32 %v6158_v34  ;;  %v13160_v23 = vld [vmem:[#allocation159_spill] sm:$0xff]  ;;  %v8903_v60 = vpop.eup %8902 }
0x1b67   :  { %v4218_v9 = vsel %vm1662_vm0, %v13160_v23, 0.0  ;;  %8908 = vrcp.f32 %v11792_v62 }
0x1b68   :  { %4222 = vadd.xlane.f32.xlu1 %v4221_v58  ;;  %v6154_v39 = vmul.f32 1.442695, %v6142_v51  ;;  %8910 = vrcp.f32 %v11788_v36 }
0x1b69   :  { %8912 = vrcp.f32 %v11630_v2  ;;  %v12063_v62 = vpop.xlane.xlu0 %3502  ;;  %v13163_v2 = vld [vmem:[#allocation140_spill] sm:$0xff] }
0x1b6a   :  { %5887 = vadd.xlane.f32.xlu0 %v5886_v57  ;;  %8914 = vpow2.f32 %v6154_v39  ;;  %v3034_v59 = vmul.f32 %v8899_v8, %v13163_v2  ;;  %v8231_v39 = vunpack.i.l.bf16 %v11937_v44 }
0x1b6b   :  { %8916 = vrcp.f32 %v11799_v56 }
0x1b6c   :  { %5330 = vadd.xlane.f32.xlu1 %v5329_v1  ;;  %v8905_v1 = vpop.eup %8904 }
0x1b6d   :  { %v12074_v52 = vpop.xlane.xlu0 %4767 }
0x1b6e   :  { %5890 = vadd.xlane.f32.xlu0 %v5889_v19 }
0x1b6f   :  { %v6137_v6 = vpop.xlane.xlu1 %6136 }
0x1b70   :  { %v6145_v14 = vsub.f32 %v11850_v45, %v6137_v6  ;;  %6172 = vadd.xlane.f32.xlu1 %v6171_v28  ;;  %v13165_v6 = vld [vmem:[#allocation32_spill] sm:$0xff] }
0x1b71   :  { %v5172_v28 = vmul.f32 %v8903_v60, %v13165_v6 }
0x1b72   :  { %4219 = vadd.xlane.f32.xlu0 %v4218_v9  ;;  %v6160_v17 = vmul.f32 1.442695, %v6145_v14  ;;  %v8232_v14 = vunpack.i.h.bf16 %v11937_v44  ;;  %v12086_v9 = vpop.xlane.xlu0 %2939 }
0x1b73   :  { %v6131_v37 = vpop.xlane.xlu1 %6130  ;;  %v8907_v16 = vpop.eup %8906 }
0x1b74   :  { %v6143_v45 = vsub.f32 %v11864_v26, %v6131_v37  ;;  %6166 = vadd.xlane.f32.xlu1 %v6165_v31  ;;  %8918 = vpow2.f32 %v6160_v17  ;;  %v8909_v51 = vpop.eup %8908  ;;  %v6180_v23 = vsel %vm1662_vm0, %v8907_v16, 0.0 }
0x1b75   :  { %v8911_v19 = vpop.eup %8910 }
0x1b76   :  { %v6156_v36 = vmul.f32 1.442695, %v6143_v45  ;;  %5327 = vadd.xlane.f32.xlu0 %v5326_v12  ;;  %v13168_v45 = vld [vmem:[#allocation124_spill] sm:$0xff] }
0x1b77   :  { %v8265_v13 = vpop.permute.xlu1 %8264  ;;  %v2474_v8 = vmul.f32 %v8911_v19, %v13168_v45  ;;  %v13169_v12 = vld [vmem:[#allocation44_spill] sm:$0xff] }
0x1b78   :  { %8920 = vpow2.f32 %v6156_v36  ;;  %v8267_v26 = vunpack.i.h.bf16 %v8265_v13  ;;  %v8266_v21 = vunpack.i.l.bf16 %v8265_v13 }
0x1b79   :  { %8922 = vrcp.f32 %v11794_v11  ;;  %v6162_v11 = vsel %vm1662_vm0, %v12001_v18, 0.0 }
0x1b7a   :  { %8924 = vrcp.f32 %v11824_v15  ;;  %v4044_v56 = vsel %vm1662_vm0, %v3034_v59, %v8267_v26  ;;  %v4043_v58 = vsel %vm1662_vm0, %v3033_v33, %v8266_v21  ;;  %6169 = vadd.xlane.f32.xlu0 %v6168_v20  ;;  %v13164_v15 = vld [vmem:[#allocation58_spill] sm:$0xff]  ;;  %v8237_v20 = vunpack.i.h.bf16 %v11935_v25 }
0x1b7b   :  { %8926 = vrcp.f32 %v11820_v30  ;;  %v6461_v57 = vpack.c.bf16 %v4044_v56, %v4043_v58  ;;  %v5171_v34 = vmul.f32 %v8901_v54, %v13164_v15  ;;  %v8913_v30 = vpop.eup %8912  ;;  %v8236_v56 = vunpack.i.l.bf16 %v11935_v25  ;;  %v12107_v58 = vpop.xlane.xlu0 %4207  ;;  %v13171_v25 = vld [vmem:[#allocation100_spill] sm:$0xff]  ;;  %v13173_v15 = vld [vmem:[#allocation123_spill] sm:$0xff] }
0x1b7c   :  { %8928 = vrcp.f32 %v11828_v7  ;;  %v8915_v18 = vpop.eup %8914  ;;  %v13166_v7 = vld [vmem:[#allocation15_spill] sm:$0xff]  ;;  %v3336_v36 = vmul.f32 %v8913_v30, %v13169_v12 }
0x1b7d   :  { %6884 = vmatmul.mubr.bf16.vlgmr.msra.gmra.mxu0 %v6461_v57  ;;  %8930 = vrcp.f32 %v11826_v49  ;;  %v8293_v17 = vpack.i.bf16 %v5172_v28, %v5171_v34  ;;  %v8917_v37 = vpop.eup %8916  ;;  %v3335_v31 = vmul.f32 %v8905_v1, %v13166_v7  ;;  %v2473_v49 = vmul.f32 %v8909_v51, %v13167_v32 }
0x1b7e   :  { %6163 = vadd.xlane.f32.xlu0 %v6162_v11  ;;  %8932 = vrcp.f32 %v11838_v29  ;;  %v6174_v29 = vsel %vm1662_vm0, %v8915_v18, 0.0  ;;  %v8241_v57 = vunpack.i.l.bf16 %v12026_v61  ;;  %v13172_v11 = vld [vmem:[#allocation121_spill] sm:$0xff] }
0x1b7f   :  { %8934 = vrcp.f32 %v11832_v4  ;;  %v4035_v0 = vsel %vm1662_vm0, %v2473_v49, %v8231_v39  ;;  %v4036_v4 = vsel %vm1662_vm0, %v2474_v8, %v8232_v14  ;;  %v8298_v59 = vpack.i.bf16 %v3336_v36, %v3335_v31  ;;  %v13174_v31 = vld [vmem:[#allocation97_spill] sm:$0xff]  ;;  %v13175_v49 = vld [vmem:[#allocation99_spill] sm:$0xff]  ;;  %v13177_v36 = vld [vmem:[#allocation128_spill] sm:$0xff] }
0x1b80   :  { %8936 = vrcp.f32 %v11702_v50  ;;  %v6460_v54 = vpack.c.bf16 %v4036_v4, %v4035_v0  ;;  %v8242_v50 = vunpack.i.h.bf16 %v12026_v61 }
0x1b81   :  { %v12092_v47 = vpop.eup %8918  ;;  %8938 = vrcp.f32 %v11625_v38  ;;  %v13170_v38 = vld [vmem:[#allocation98_spill] sm:$0xff] }
0x1b82   :  { %6181 = vadd.xlane.f32.xlu0 %v6180_v23  ;;  %v6189_v26 = vpack.c.bf16 %v12092_v47, %v8907_v16  ;;  %8940 = vrcp.f32 %v11862_v24  ;;  %v1913_v60 = vmul.f32 %v8917_v37, %v13170_v38  ;;  %v8247_v23 = vunpack.i.h.bf16 %v11960_v63  ;;  %v13180_v38 = vld [vmem:[#allocation102_spill] sm:$0xff] }
0x1b83   :  { %8942 = vrcp.f32 %v11848_v10  ;;  %v8250_v10 = vpop.permute.xlu0 %8249 }
0x1b84   :  { %v4027_v51 = vsel %vm1662_vm0, %v1913_v60, %v8236_v56  ;;  %v8252_v37 = vunpack.i.h.bf16 %v8250_v10  ;;  %v8251_v7 = vunpack.i.l.bf16 %v8250_v10  ;;  %v8261_v56 = vunpack.i.l.bf16 %v12039_v53  ;;  %v13192_v10 = vld [vmem:[#allocation106_spill] sm:$0xff] }
0x1b85   :  { %v12094_v44 = vpop.eup %8920  ;;  %8294 = vrot.lane.b32.xlu1 %v8293_v17, %s9224_s0 }
0x1b86   :  { %v8923_v33 = vpop.eup %8922  ;;  %6175 = vadd.xlane.f32.xlu0 %v6174_v29  ;;  %v6188_v13 = vpack.c.bf16 %v12094_v44, %v8915_v18  ;;  %v8246_v18 = vunpack.i.l.bf16 %v11960_v63  ;;  %v13176_v29 = vld [vmem:[#allocation126_spill] sm:$0xff] }
0x1b87   :  { %v8925_v2 = vpop.eup %8924  ;;  %v1914_v1 = vmul.f32 %v8923_v33, %v13171_v25  ;;  %v13181_v25 = vld [vmem:[#allocation104_spill] sm:$0xff] }
0x1b88   :  { %v8927_v21 = vpop.eup %8926  ;;  %8132 = vmatprep.mubr.msk.bf16.mxu1 %vm1662_vm0, %v6188_v13  ;;  %v2475_v16 = vmul.f32 %v8925_v2, %v13172_v11 }
0x1b89   :  { %8299 = vrot.lane.b32.xlu1 %v8298_v59, %s9224_s0  ;;  %8133 = vmatmul.mubr.msk.bf16.gmra.mxu1 %vm1662_vm0, %v6189_v26  ;;  %v2476_v34 = vmul.f32 %v8927_v21, %v13173_v15  ;;  %v4028_v24 = vsel %vm1662_vm0, %v1914_v1, %v8237_v20  ;;  %v8929_v61 = vpop.eup %8928  ;;  %v13178_v26 = vld [vmem:[#allocation39_spill] sm:$0xff]  ;;  %v13183_v15 = vld [vmem:[#allocation21_spill] sm:$0xff] }
0x1b8a   :  { %6786 = vmatprep.mubr.bf16.mxu1 %v6460_v54  ;;  %v4037_v19 = vsel %vm1662_vm0, %v2475_v16, %v8241_v57  ;;  %v8931_v28 = vpop.eup %8930  ;;  %v6459_v14 = vpack.c.bf16 %v4028_v24, %v4027_v51  ;;  %v1915_v32 = vmul.f32 %v8929_v61, %v13174_v31  ;;  %v13182_v16 = vld [vmem:[#allocation118_spill] sm:$0xff]  ;;  %v13185_v24 = vld [vmem:[#allocation19_spill] sm:$0xff]  ;;  %v13188_v51 = vld [vmem:[#allocation65_spill] sm:$0xff] }
0x1b8b   :  { %v4038_v6 = vsel %vm1662_vm0, %v2476_v34, %v8242_v50  ;;  %v8933_v30 = vpop.eup %8932  ;;  %v1916_v45 = vmul.f32 %v8931_v28, %v13175_v49  ;;  %v13179_v50 = vld [vmem:[#allocation152_spill] sm:$0xff]  ;;  %v13184_v34 = vld [vmem:[#allocation93_spill] sm:$0xff]  ;;  %8944 = vrcp.f32 %v13185_v24 }
0x1b8c   :  { %v8935_v39 = vpop.eup %8934  ;;  %v6464_v17 = vpack.c.bf16 %v4038_v6, %v4037_v19  ;;  %v2477_v12 = vmul.f32 %v8933_v30, %v13176_v29  ;;  %v4029_v4 = vsel %vm1662_vm0, %v1915_v32, %v8246_v18  ;;  %v13189_v61 = vld [vmem:[#allocation108_spill] sm:$0xff]  ;;  %v13190_v19 = vld [vmem:[#allocation23_spill] sm:$0xff]  ;;  %v13191_v6 = vld [vmem:[#allocation150_spill] sm:$0xff]  ;;  %v6177_v32 = vsel %vm1662_vm0, %v12094_v44, 0.0 }
0x1b8d   :  { %v8937_v8 = vpop.eup %8936  ;;  %v2478_v0 = vmul.f32 %v8935_v39, %v13177_v36  ;;  %v4030_v63 = vsel %vm1662_vm0, %v1916_v45, %v8247_v23  ;;  %v13193_v30 = vld [vmem:[#allocation94_spill] sm:$0xff]  ;;  %v13195_v39 = vld [vmem:[#allocation176_spill] sm:$0xff] }
0x1b8e   :  { %v8939_v33 = vpop.eup %8938  ;;  %v4039_v13 = vsel %vm1662_vm0, %v2477_v12, %v8251_v7  ;;  %v3895_v21 = vmul.f32 %v8937_v8, %v13178_v26  ;;  %v6463_v20 = vpack.c.bf16 %v4030_v63, %v4029_v4  ;;  %v13196_v18 = vld [vmem:[#allocation174_spill] sm:$0xff]  ;;  %v13198_v7 = vld [vmem:[#allocation20_spill] sm:$0xff]  ;;  %v13199_v63 = vld [vmem:[#allocation81_spill] sm:$0xff] }
0x1b8f   :  { %v4040_v2 = vsel %vm1662_vm0, %v2478_v0, %v8252_v37  ;;  %v8941_v59 = vpop.eup %8940  ;;  %v3896_v57 = vmul.f32 %v8939_v33, %v13179_v50  ;;  %v13200_v33 = vld [vmem:[#allocation73_spill] sm:$0xff] }
0x1b90   :  { %v6468_v54 = vpack.c.bf16 %v4040_v2, %v4039_v13  ;;  %v1917_v60 = vmul.f32 %v8941_v59, %v13180_v38 }
0x1b91   :  { %6787 = vmatmul.mubr.bf16.vlgmr.msra.gmra.mxu1 %v6459_v14  ;;  %v8288_v11 = vpack.i.bf16 %v3896_v57, %v3895_v21  ;;  %v13194_v14 = vld [vmem:[#allocation25_spill] sm:$0xff]  ;;  %v13202_v57 = vld [vmem:[#allocation103_spill] sm:$0xff] }
0x1b92   :  { %6794 = vmatprep.mubr.bf16.mxu1 %v6464_v17  ;;  %8144 = vmatpush3.bf16.msra.mxu1 %v11813_v46  ;;  %v8943_v46 = vpop.eup %8942  ;;  %v13197_v17 = vld [vmem:[#allocation43_spill] sm:$0xff] }
0x1b93   :  { %8137 = vmatprep.subr.bf16.mxu1 %v11815_v55  ;;  %v8262_v55 = vunpack.i.h.bf16 %v12039_v53  ;;  %v1918_v1 = vmul.f32 %v8943_v46, %v13181_v25 }
0x1b96   :  { %8145 = vmatpush3.bf16.msra.mxu1 %v11852_v27  ;;  %v4032_v27 = vsel %vm1662_vm0, %v1918_v1, %v8262_v55 }
0x1b97   :  { %8138 = vmatprep.subr.bf16.mxu1 %v11860_v22  ;;  %v4031_v22 = vsel %vm1662_vm0, %v1917_v60, %v8261_v56 }
0x1b98   :  { %v6467_v53 = vpack.c.bf16 %v4032_v27, %v4031_v22  ;;  %v8945_v49 = vpop.eup %8944  ;;  %v13203_v27 = vld [vmem:[#allocation61_spill] sm:$0xff] }
0x1b99   :  { %6795 = vmatmul.mubr.bf16.gmra.mxu1 %v6463_v20  ;;  %v3595_v4 = vmul.f32 %v8945_v49, %v13199_v63  ;;  %v5892_v22 = vsel %vm1662_vm0, %v13203_v27, 0.0  ;;  %v13210_v49 = vld [vmem:[#allocation127_spill] sm:$0xff] }
0x1b9a   :  { %6802 = vmatprep.mubr.bf16.mxu1 %v6468_v54  ;;  %8146 = vmatpush3.bf16.msra.mxu1 %v11866_v40  ;;  %v13186_v40 = vld [vmem:[#allocation135_spill] sm:$0xff]  ;;  %v13201_v54 = vld [vmem:[#allocation101_spill] sm:$0xff] }
0x1b9b   :  { %8139 = vmatprep.subr.bf16.mxu1 %v11877_v48  ;;  %8946 = vrcp.f32 %v13186_v40  ;;  %v13187_v48 = vld [vmem:[#allocation133_spill] sm:$0xff]  ;;  %v13204_v40 = vld [vmem:[#allocation59_spill] sm:$0xff] }
0x1b9c   :  { %8289 = vrot.lane.b32.xlu0 %v8288_v11, %s9224_s0  ;;  %8948 = vrcp.f32 %v13188_v51  ;;  %v13205_v51 = vld [vmem:[#allocation71_spill] sm:$0xff] }
0x1b9d   :  { %8950 = vrcp.f32 %v11927_v5  ;;  %v6183_v5 = vsel %vm1662_vm0, %v12092_v47, 0.0 }
0x1b9e   :  { %8147 = vmatpush3.bf16.msra.mxu1 %v11879_v43  ;;  %8952 = vrcp.f32 %v13190_v19  ;;  %v13206_v19 = vld [vmem:[#allocation69_spill] sm:$0xff] }
0x1b9f   :  { %8140 = vmatprep.subr.bf16.mxu1 %v13182_v16  ;;  %8954 = vrcp.f32 %v13191_v6 }
0x1ba0   :  { %8956 = vrcp.f32 %v13193_v30 }
0x1ba1   :  { %6803 = vmatmul.mubr.bf16.gmra.mxu1 %v6467_v53  ;;  %8958 = vrcp.f32 %v13195_v39  ;;  %v13207_v39 = vld [vmem:[#allocation165_spill] sm:$0xff] }
0x1ba2   :  { %8148 = vmatpush3.bf16.msra.mxu1 %v13183_v15  ;;  %8960 = vrcp.f32 %v13196_v18  ;;  %v13208_v18 = vld [vmem:[#allocation33_spill] sm:$0xff] }
0x1ba3   :  { %8141 = vmatprep.subr.bf16.mxu1 %v13184_v34  ;;  %8962 = vrcp.f32 %v13197_v17 }
0x1ba6   :  { %8149 = vmatpush3.bf16.msra.mxu1 %v13187_v48 }
0x1ba7   :  { %8142 = vmatprep.subr.bf16.mxu1 %v13189_v61 }
0x1ba8   :  { %v12159_v43 = vpop.xlane.xlu1 %4776  ;;  %v8947_v45 = vpop.eup %8946 }
0x1ba9   :  { %v8949_v47 = vpop.eup %8948  ;;  %v3596_v13 = vmul.f32 %v8947_v45, %v13200_v33 }
0x1baa   :  { %v12163_v28 = vpop.xlane.xlu0 %4773  ;;  %8150 = vmatpush3.bf16.msra.mxu1 %v13192_v10  ;;  %v8951_v12 = vpop.eup %8950  ;;  %v4612_v17 = vmul.f32 %v8949_v47, %v13208_v18  ;;  %v13211_v47 = vld [vmem:[#allocation52_spill] sm:$0xff]  ;;  %v13228_v18 = vld [vmem:[#allocation41_spill] sm:$0xff] }
0x1bab   :  { %8143 = vmatprep.subr.bf16.mxu1 %v13194_v14  ;;  %v8953_v2 = vpop.eup %8952  ;;  %v1919_v50 = vmul.f32 %v8951_v12, %v13201_v54  ;;  %v13216_v54 = vld [vmem:[#allocation63_spill] sm:$0xff] }
0x1bac   :  { %v12169_v23 = vpop.xlane.xlu1 %4216  ;;  %v8955_v26 = vpop.eup %8954  ;;  %v1920_v38 = vmul.f32 %v8953_v2, %v13202_v57  ;;  %v5901_v2 = vsel %vm1662_vm0, %v13211_v47, 0.0  ;;  %v13218_v57 = vld [vmem:[#allocation113_spill] sm:$0xff]  ;;  %v13233_v47 = vld [vmem:[#allocation50_spill] sm:$0xff] }
0x1bad   :  { %6184 = vadd.xlane.f32.xlu1 %v6183_v5  ;;  %v8957_v46 = vpop.eup %8956  ;;  %v4611_v48 = vmul.f32 %v8955_v26, %v13204_v40  ;;  %v5898_v5 = vsel %vm1662_vm0, %v13207_v39, 0.0  ;;  %v13225_v40 = vld [vmem:[#allocation151_spill] sm:$0xff] }
0x1bae   :  { %v12175_v37 = vpop.xlane.xlu0 %5881  ;;  %8151 = vmatpush3.bf16.msra.mxu1 %v13198_v7  ;;  %v8959_v56 = vpop.eup %8958  ;;  %v13209_v7 = vld [vmem:[#allocation125_spill] sm:$0xff] }
0x1baf   :  { %v8961_v1 = vpop.eup %8960  ;;  %v3035_v61 = vmul.f32 %v8959_v56, %v13205_v51  ;;  %v13215_v56 = vld [vmem:[#allocation166_spill] sm:$0xff] }
0x1bb0   :  { %v12178_v31 = vpop.xlane.xlu1 %5324  ;;  %v8963_v53 = vpop.eup %8962  ;;  %v3036_v6 = vmul.f32 %v8961_v1, %v13206_v19  ;;  %v13226_v19 = vld [vmem:[#allocation40_spill] sm:$0xff] }
0x1bb1   :  { %6178 = vadd.xlane.f32.xlu1 %v6177_v32  ;;  %v2479_v32 = vmul.f32 %v8957_v46, %v13209_v7  ;;  %v2480_v45 = vmul.f32 %v8963_v53, %v13210_v49  ;;  %v13213_v46 = vld [vmem:[#allocation198_spill] sm:$0xff]  ;;  %v13229_v7 = vld [vmem:[#allocation172_spill] sm:$0xff] }
0x1bb2   :  { %v12182_v8 = vpop.xlane.xlu0 %5884 }
0x1bb4   :  { %v8275_v29 = vpop.permute.xlu1 %8274 }
0x1bb5   :  { %v8277_v36 = vunpack.i.h.bf16 %v8275_v29  ;;  %v8276_v0 = vunpack.i.l.bf16 %v8275_v29 }
0x1bb6   :  { %v12186_v59 = vpop.xlane.xlu0 %4213 }
0x1bb7   :  { %v4053_v44 = vsel %vm1662_vm0, %v3595_v4, %v8276_v0  ;;  %v4054_v21 = vsel %vm1662_vm0, %v3596_v13, %v8277_v36  ;;  %v8303_v4 = vpack.i.bf16 %v4612_v17, %v4611_v48 }
0x1bb8   :  { %v8280_v20 = vpop.permute.xlu1 %8279  ;;  %v6466_v55 = vpack.c.bf16 %v4054_v21, %v4053_v44  ;;  %v13212_v44 = vld [vmem:[#allocation88_spill] sm:$0xff] }
0x1bb9   :  { %v8282_v60 = vunpack.i.h.bf16 %v8280_v20  ;;  %v8281_v25 = vunpack.i.l.bf16 %v8280_v20  ;;  %v5332_v21 = vsel %vm1662_vm0, %v13212_v44, 0.0  ;;  %v5338_v20 = vsel %vm1662_vm0, %v13213_v46, 0.0  ;;  %v13235_v44 = vld [vmem:[#allocation185_spill] sm:$0xff] }
0x1bba   :  { %v12192_v11 = vpop.xlane.xlu0 %5321  ;;  %6891 = vmatprep.mubr.bf16.mxu0 %v6466_v55  ;;  %v13214_v55 = vld [vmem:[#allocation186_spill] sm:$0xff]  ;;  %v13236_v46 = vld [vmem:[#allocation37_spill] sm:$0xff] }
0x1bbb   :  { %v4034_v16 = vsel %vm1662_vm0, %v1920_v38, %v8282_v60  ;;  %v4033_v15 = vsel %vm1662_vm0, %v1919_v50, %v8281_v25  ;;  %5893 = vadd.xlane.f32.xlu0 %v5892_v22  ;;  %8964 = vrcp.f32 %v13214_v55  ;;  %v13217_v50 = vld [vmem:[#allocation189_spill] sm:$0xff]  ;;  %v13219_v38 = vld [vmem:[#allocation116_spill] sm:$0xff]  ;;  %v13222_v22 = vld [vmem:[#allocation18_spill] sm:$0xff] }
0x1bbc   :  { %v6471_v34 = vpack.c.bf16 %v4034_v16, %v4033_v15  ;;  %v8285_v24 = vpop.permute.xlu1 %8284  ;;  %8966 = vrcp.f32 %v13215_v56  ;;  %v13220_v60 = vld [vmem:[#allocation117_spill] sm:$0xff]  ;;  %v13221_v25 = vld [vmem:[#allocation92_spill] sm:$0xff]  ;;  %v13223_v16 = vld [vmem:[#allocation119_spill] sm:$0xff] }
0x1bbd   :  { %v8287_v10 = vunpack.i.h.bf16 %v8285_v24  ;;  %v8286_v30 = vunpack.i.l.bf16 %v8285_v24  ;;  %8968 = vrcp.f32 %v13216_v54  ;;  %v13224_v15 = vld [vmem:[#allocation35_spill] sm:$0xff]  ;;  %v13238_v54 = vld [vmem:[#allocation168_spill] sm:$0xff] }
0x1bbe   :  { %v8270_v14 = vpop.permute.xlu0 %8269  ;;  %8970 = vrcp.f32 %v13217_v50  ;;  %v13237_v55 = vld [vmem:[#allocation171_spill] sm:$0xff] }
0x1bbf   :  { %v4046_v29 = vsel %vm1662_vm0, %v3036_v6, %v8287_v10  ;;  %v4045_v12 = vsel %vm1662_vm0, %v3035_v61, %v8286_v30  ;;  %v8272_v36 = vunpack.i.h.bf16 %v8270_v14  ;;  %v8271_v0 = vunpack.i.l.bf16 %v8270_v14  ;;  %5899 = vadd.xlane.f32.xlu0 %v5898_v5  ;;  %v13227_v10 = vld [vmem:[#allocation191_spill] sm:$0xff] }
0x1bc0   :  { %v6465_v63 = vpack.c.bf16 %v4046_v29, %v4045_v12  ;;  %8972 = vrcp.f32 %v13218_v57  ;;  %v13239_v50 = vld [vmem:[#allocation51_spill] sm:$0xff] }
0x1bc1   :  { %v4041_v33 = vsel %vm1662_vm0, %v2479_v32, %v8271_v0  ;;  %v4042_v13 = vsel %vm1662_vm0, %v2480_v45, %v8272_v36  ;;  %8974 = vrcp.f32 %v13219_v38  ;;  %v13230_v45 = vld [vmem:[#allocation187_spill] sm:$0xff]  ;;  %v13231_v0 = vld [vmem:[#allocation36_spill] sm:$0xff] }
0x1bc2   :  { %8304 = vrot.lane.b32.xlu1 %v8303_v4, %s9224_s0  ;;  %6892 = vmatmul.mubr.bf16.gmra.mxu0 %v6465_v63  ;;  %v6472_v26 = vpack.c.bf16 %v4042_v13, %v4041_v33  ;;  %8976 = vrcp.f32 %v13220_v60  ;;  %v5895_v29 = vsel %vm1662_vm0, %v13230_v45, 0.0  ;;  %v13232_v4 = vld [vmem:[#allocation190_spill] sm:$0xff]  ;;  %v13240_v38 = vld [vmem:[#allocation196_spill] sm:$0xff] }
0x1bc3   :  { %5902 = vadd.xlane.f32.xlu0 %v5901_v2  ;;  %8978 = vrcp.f32 %v13221_v25  ;;  %v13234_v2 = vld [vmem:[#allocation197_spill] sm:$0xff]  ;;  %v5341_v60 = vsel %vm1662_vm0, %v13240_v38, 0.0  ;;  %v13254_v38 = vld [vmem:[#allocation72_spill] sm:$0xff] }
0x1bc4   :  { %6810 = vmatprep.mubr.bf16.mxu1 %v6472_v26  ;;  %8980 = vrcp.f32 %v13222_v22  ;;  %v5335_v26 = vsel %vm1662_vm0, %v13234_v2, 0.0  ;;  %v13241_v25 = vld [vmem:[#allocation169_spill] sm:$0xff]  ;;  %v13242_v22 = vld [vmem:[#allocation188_spill] sm:$0xff] }
0x1bc5   :  { %6811 = vmatmul.mubr.bf16.gmra.mxu1 %v6471_v34  ;;  %8982 = vrcp.f32 %v13223_v16  ;;  %v13243_v16 = vld [vmem:[#allocation154_spill] sm:$0xff] }
0x1bc6   :  { %8984 = vrcp.f32 %v13233_v47 }
0x1bc7   :  { %5333 = vadd.xlane.f32.xlu0 %v5332_v21  ;;  %8986 = vrcp.f32 %v13235_v44 }
0x1bc8   :  { %v8965_v1 = vpop.eup %8964  ;;  %8988 = vrcp.f32 %v13238_v54  ;;  %v13253_v54 = vld [vmem:[#allocation138_spill] sm:$0xff] }
0x1bc9   :  { %v8967_v27 = vpop.eup %8966  ;;  %v3897_v34 = vmul.f32 %v8965_v1, %v13224_v15  ;;  %8990 = vrcp.f32 %v13239_v50 }
0x1bca   :  { %v8969_v53 = vpop.eup %8968  ;;  %v3898_v48 = vmul.f32 %v8967_v27, %v13225_v40  ;;  %8992 = vrcp.f32 %v13241_v25  ;;  %v13244_v40 = vld [vmem:[#allocation156_spill] sm:$0xff] }
0x1bcb   :  { %5339 = vadd.xlane.f32.xlu0 %v5338_v20  ;;  %v8971_v24 = vpop.eup %8970  ;;  %v5175_v6 = vmul.f32 %v8969_v53, %v13226_v19  ;;  %8994 = vrcp.f32 %v13242_v22  ;;  %v13245_v19 = vld [vmem:[#allocation28_spill] sm:$0xff]  ;;  %v13256_v22 = vld [vmem:[#allocation142_spill] sm:$0xff] }
0x1bcc   :  { %v8308_v61 = vpack.i.bf16 %v3898_v48, %v3897_v34  ;;  %v5176_v30 = vmul.f32 %v8971_v24, %v13227_v10  ;;  %8996 = vrcp.f32 %v11945_v35 }
0x1bcd   :  { %v8973_v51 = vpop.eup %8972  ;;  %8998 = vrcp.f32 %v13243_v16 }
0x1bce   :  { %v8975_v14 = vpop.eup %8974  ;;  %v8328_v5 = vpack.i.bf16 %v5176_v30, %v5175_v6  ;;  %v4615_v17 = vmul.f32 %v8973_v51, %v13228_v18  ;;  %9000 = vrcp.f32 %v11949_v41 }
0x1bcf   :  { %v8977_v39 = vpop.eup %8976  ;;  %v4616_v32 = vmul.f32 %v8975_v14, %v13229_v7  ;;  %9002 = vrcp.f32 %v13244_v40  ;;  %v13246_v14 = vld [vmem:[#allocation54_spill] sm:$0xff]  ;;  %v13247_v7 = vld [vmem:[#allocation47_spill] sm:$0xff] }
0x1bd0   :  { %v8979_v49 = vpop.eup %8978  ;;  %v5177_v63 = vmul.f32 %v8977_v39, %v13231_v0  ;;  %9004 = vrcp.f32 %v13253_v54 }
0x1bd1   :  { %v8981_v12 = vpop.eup %8980  ;;  %v8333_v36 = vpack.i.bf16 %v4616_v32, %v4615_v17  ;;  %v5178_v33 = vmul.f32 %v8979_v49, %v13232_v4  ;;  %v13248_v49 = vld [vmem:[#allocation46_spill] sm:$0xff]  ;;  %v13249_v4 = vld [vmem:[#allocation29_spill] sm:$0xff]  ;;  %9006 = vrcp.f32 %v13254_v38 }
0x1bd2   :  { %v8983_v13 = vpop.eup %8982  ;;  %v4617_v20 = vmul.f32 %v8981_v12, %v13236_v46 }
0x1bd3   :  { %v8348_v21 = vpack.i.bf16 %v5178_v33, %v5177_v63  ;;  %v4618_v56 = vmul.f32 %v8983_v13, %v13237_v55  ;;  %v8985_v24 = vpop.eup %8984  ;;  %v13250_v13 = vld [vmem:[#allocation55_spill] sm:$0xff] }
0x1bd4   :  { %v8987_v51 = vpop.eup %8986  ;;  %v5173_v6 = vmul.f32 %v8985_v24, %v13245_v19 }
0x1bd5   :  { %v8358_v27 = vpack.i.bf16 %v4618_v56, %v4617_v20  ;;  %v5174_v39 = vmul.f32 %v8987_v51, %v13246_v14  ;;  %v13252_v20 = vld [vmem:[#allocation180_spill] sm:$0xff]  ;;  %v13258_v14 = vld [vmem:[#allocation115_spill] sm:$0xff] }
0x1bd7   :  { %v8313_v17 = vpack.i.bf16 %v5174_v39, %v5173_v6 }
0x1be1   :  { %8309 = vrot.lane.b32.xlu0 %v8308_v61, %s9224_s0  ;;  %v8989_v61 = vpop.eup %8988 }
0x1be2   :  { %v8991_v10 = vpop.eup %8990  ;;  %v3337_v32 = vmul.f32 %v8989_v61, %v13247_v7  ;;  %v13257_v61 = vld [vmem:[#allocation144_spill] sm:$0xff] }
0x1be3   :  { %v3338_v45 = vmul.f32 %v8991_v10, %v13248_v49  ;;  %v13259_v49 = vld [vmem:[#allocation95_spill] sm:$0xff] }
0x1be5   :  { %8329 = vrot.lane.b32.xlu0 %v8328_v5, %s9224_s0  ;;  %v8993_v5 = vpop.eup %8992  ;;  %v8318_v63 = vpack.i.bf16 %v3338_v45, %v3337_v32 }
0x1be6   :  { %5896 = vadd.xlane.f32.xlu1 %v5895_v29  ;;  %v8995_v18 = vpop.eup %8994  ;;  %v4613_v33 = vmul.f32 %v8993_v5, %v13249_v4 }
0x1be7   :  { %v8997_v29 = vpop.eup %8996  ;;  %v4614_v47 = vmul.f32 %v8995_v18, %v13250_v13 }
0x1be8   :  { %v8999_v12 = vpop.eup %8998 }
0x1be9   :  { %8334 = vrot.lane.b32.xlu0 %v8333_v36, %s9224_s0  ;;  %v9001_v2 = vpop.eup %9000  ;;  %v4874_v55 = vmul.f32 %v8999_v12, %v13252_v20  ;;  %v8323_v40 = vpack.i.bf16 %v4614_v47, %v4613_v33  ;;  %v13260_v12 = vld [vmem:[#allocation17_spill] sm:$0xff] }
0x1bea   :  { %5336 = vadd.xlane.f32.xlu1 %v5335_v26  ;;  %v9003_v56 = vpop.eup %9002  ;;  %v3037_v16 = vmul.f32 %v9001_v2, %v13256_v22 }
0x1beb   :  { %v3038_v19 = vmul.f32 %v9003_v56, %v13257_v61 }
0x1bed   :  { %8349 = vrot.lane.b32.xlu0 %v8348_v21, %s9224_s0  ;;  %v12249_v57 = vpop.xlane.xlu1 %4782  ;;  %v13251_v21 = vld [vmem:[#allocation78_spill] sm:$0xff] }
0x1bee   :  { %5342 = vadd.xlane.f32.xlu1 %v5341_v60  ;;  %v4873_v46 = vmul.f32 %v8997_v29, %v13251_v21  ;;  %v9005_v29 = vpop.eup %9004 }
0x1bef   :  { %v12254_v1 = vpop.xlane.xlu0 %4779 }
0x1bf1   :  { %8359 = vrot.lane.b32.xlu0 %v8358_v27, %s9224_s0  ;;  %v12259_v53 = vpop.xlane.xlu1 %4222  ;;  %v13255_v27 = vld [vmem:[#allocation91_spill] sm:$0xff] }
0x1bf2   :  { %9008 = vrcp.f32 %v13255_v27  ;;  %v13263_v27 = vld [vmem:[#allocation60_spill] sm:$0xff] }
0x1bf3   :  { %v12262_v15 = vpop.xlane.xlu0 %5887 }
0x1bf5   :  { %v12265_v34 = vpop.xlane.xlu1 %5330 }
0x1bf7   :  { %v12268_v48 = vpop.xlane.xlu0 %5890 }
0x1bf9   :  { %v6173_v35 = vpop.xlane.xlu1 %6172 }
0x1bfb   :  { %v12271_v30 = vpop.xlane.xlu0 %4219 }
0x1bfd   :  { %v6167_v41 = vpop.xlane.xlu1 %6166 }
0x1bfe   :  { %9010 = vrcp.f32 %v6167_v41 }
0x1bff   :  { %v12276_v36 = vpop.xlane.xlu0 %5327  ;;  %8314 = vrot.lane.b32.xlu1 %v8313_v17, %s9224_s0  ;;  %9012 = vrcp.f32 %v13258_v14 }
0x1c01   :  { %v8295_v0 = vpop.permute.xlu1 %8294  ;;  %v8130_v17 = vpop.f32.mrf.mxu1 }
0x1c02   :  { %v8297_v26 = vunpack.i.h.bf16 %v8295_v0  ;;  %v8296_v44 = vunpack.i.l.bf16 %v8295_v0  ;;  %v9007_v0 = vpop.eup %9006 }
0x1c03   :  { %v6170_v50 = vpop.xlane.xlu0 %6169  ;;  %8319 = vrot.lane.b32.xlu1 %v8318_v63, %s9224_s0  ;;  %v6252_v41 = vpop.f32.mrf.mxu1 }
0x1c04   :  { %v6435_v60 = vsel %vm1662_vm0, %v4873_v46, %v8296_v44  ;;  %v6436_v25 = vsel %vm1662_vm0, %v4874_v55, %v8297_v26  ;;  %v9009_v4 = vpop.eup %9008  ;;  %v13261_v44 = vld [vmem:[#allocation147_spill] sm:$0xff]  ;;  %v13262_v46 = vld [vmem:[#allocation149_spill] sm:$0xff] }
0x1c05   :  { %v8300_v24 = vpop.permute.xlu1 %8299  ;;  %v6476_v51 = vpack.c.bf16 %v6436_v25, %v6435_v60  ;;  %v8131_v63 = vpop.f32.mrf.mxu1  ;;  %v3597_v21 = vmul.f32 %v9007_v0, %v13261_v44  ;;  %v3598_v20 = vmul.f32 %v9005_v29, %v13262_v46  ;;  %v5731_v22 = vmul.f32 %v9009_v4, %v13263_v27 }
0x1c06   :  { %v8302_v6 = vunpack.i.h.bf16 %v8300_v24  ;;  %v8301_v10 = vunpack.i.l.bf16 %v8300_v24 }
0x1c07   :  { %v6164_v39 = vpop.xlane.xlu0 %6163  ;;  %8324 = vrot.lane.b32.xlu1 %v8323_v40, %s9224_s0  ;;  %6818 = vmatprep.mubr.bf16.mxu1 %v6476_v51 }
0x1c08   :  { %v4048_v5 = vsel %vm1662_vm0, %v3038_v19, %v8302_v6  ;;  %v4047_v18 = vsel %vm1662_vm0, %v3037_v16, %v8301_v10  ;;  %9014 = vrcp.f32 %v6164_v39  ;;  %v13264_v16 = vld [vmem:[#allocation56_spill] sm:$0xff] }
0x1c09   :  { %v6469_v7 = vpack.c.bf16 %v4048_v5, %v4047_v18  ;;  %9016 = vrcp.f32 %v6170_v50  ;;  %v13265_v5 = vld [vmem:[#allocation64_spill] sm:$0xff] }
0x1c0a   :  { %9018 = vrcp.f32 %v6173_v35  ;;  %v6255_v35 = vpop.f32.mrf.mxu1 }
0x1c0b   :  { %v6182_v32 = vpop.xlane.xlu0 %6181  ;;  %9020 = vrcp.f32 %v13259_v49  ;;  %v9011_v33 = vpop.eup %9010 }
0x1c0c   :  { %9022 = vrcp.f32 %v13260_v12  ;;  %v9013_v47 = vpop.eup %9012  ;;  %v6292_v54 = vmul.f32 %v9011_v33, %v6255_v35  ;;  %v13269_v33 = vld [vmem:[#allocation96_spill] sm:$0xff] }
0x1c0d   :  { %v5732_v24 = vmul.f32 %v9013_v47, %v13264_v16  ;;  %9024 = vrcp.f32 %v11955_v42  ;;  %v13271_v47 = vld [vmem:[#allocation136_spill] sm:$0xff] }
0x1c0f   :  { %v6176_v45 = vpop.xlane.xlu0 %6175  ;;  %v8343_v6 = vpack.i.bf16 %v5732_v24, %v5731_v22 }
0x1c13   :  { %v8290_v13 = vpop.permute.xlu0 %8289 }
0x1c14   :  { %v8292_v2 = vunpack.i.h.bf16 %v8290_v13  ;;  %v8291_v26 = vunpack.i.l.bf16 %v8290_v13  ;;  %v13270_v13 = vld [vmem:[#allocation120_spill] sm:$0xff] }
0x1c15   :  { %v9015_v55 = vpop.eup %9014 }
0x1c16   :  { %v6291_v56 = vmul.f32 %v9015_v55, %v6252_v41  ;;  %v4055_v50 = vsel %vm1662_vm0, %v3597_v21, %v8291_v26  ;;  %v4056_v38 = vsel %vm1662_vm0, %v3598_v20, %v8292_v2  ;;  %v9017_v40 = vpop.eup %9016  ;;  %v13266_v41 = vld [vmem:[#allocation68_spill] sm:$0xff]  ;;  %v13272_v2 = vld [vmem:[#allocation79_spill] sm:$0xff] }
0x1c17   :  { %v6470_v60 = vpack.c.bf16 %v4056_v38, %v4055_v50  ;;  %v9019_v51 = vpop.eup %9018  ;;  %v6293_v19 = vmul.f32 %v9017_v40, %v8130_v17  ;;  %v13273_v21 = vld [vmem:[#allocation160_spill] sm:$0xff] }
0x1c18   :  { %v8338_v25 = vpack.i.bf16 %v6292_v54, %v6291_v56  ;;  %v9021_v61 = vpop.eup %9020  ;;  %v6294_v14 = vmul.f32 %v9019_v51, %v8131_v63  ;;  %v13268_v63 = vld [vmem:[#allocation134_spill] sm:$0xff] }
0x1c19   :  { %6899 = vmatprep.mubr.bf16.mxu0 %v6470_v60  ;;  %v9023_v10 = vpop.eup %9022  ;;  %v5733_v18 = vmul.f32 %v9021_v61, %v13265_v5  ;;  %v13275_v5 = vld [vmem:[#allocation38_spill] sm:$0xff] }
0x1c1a   :  { %8339 = vrot.lane.b32.xlu1 %v8338_v25, %s9224_s0  ;;  %6900 = vmatmul.mubr.bf16.gmra.mxu0 %v6469_v7  ;;  %v8353_v39 = vpack.i.bf16 %v6294_v14, %v6293_v19  ;;  %v5734_v49 = vmul.f32 %v9023_v10, %v13266_v41  ;;  %v13267_v7 = vld [vmem:[#allocation105_spill] sm:$0xff]  ;;  %v9025_v0 = vpop.eup %9024  ;;  %v13274_v14 = vld [vmem:[#allocation30_spill] sm:$0xff] }
0x1c1b   :  { %9026 = vrcp.f32 %v13267_v7  ;;  %v4313_v26 = vmul.f32 %v9025_v0, %v13272_v2  ;;  %v13277_v0 = vld [vmem:[#allocation42_spill] sm:$0xff] }
0x1c1c   :  { %v8363_v29 = vpack.i.bf16 %v5734_v49, %v5733_v18  ;;  %9028 = vrcp.f32 %v13268_v63 }
0x1c1d   :  { %9030 = vrcp.f32 %v13269_v33 }
0x1c1e   :  { %8344 = vrot.lane.b32.xlu1 %v8343_v6, %s9224_s0  ;;  %9032 = vrcp.f32 %v13270_v13 }
0x1c1f   :  { %9034 = vrcp.f32 %v13271_v47 }
0x1c20   :  { %9036 = vrcp.f32 %v6182_v32 }
0x1c22   :  { %8354 = vrot.lane.b32.xlu1 %v8353_v39, %s9224_s0 }
0x1c26   :  { %8364 = vrot.lane.b32.xlu1 %v8363_v29, %s9224_s0 }
0x1c28   :  { %v9027_v4 = vpop.eup %9026 }
0x1c29   :  { %v4314_v42 = vmul.f32 %v9027_v4, %v13273_v21  ;;  %v9029_v50 = vpop.eup %9028 }
0x1c2a   :  { %v9031_v32 = vpop.eup %9030 }
0x1c2b   :  { %v9033_v25 = vpop.eup %9032  ;;  %v5736_v63 = vmul.f32 %v9031_v32, %v13277_v0 }
0x1c2c   :  { %v5737_v39 = vmul.f32 %v9033_v25, %v13274_v14 }
0x1c36   :  { %v6185_v17 = vpop.xlane.xlu1 %6184 }
0x1c37   :  { %9038 = vrcp.f32 %v6185_v17  ;;  %v13276_v17 = vld [vmem:[#allocation34_spill] sm:$0xff] }
0x1c38   :  { %9040 = vrcp.f32 %v6176_v45  ;;  %v9035_v45 = vpop.eup %9034 }
0x1c39   :  { %v9037_v16 = vpop.eup %9036  ;;  %v5738_v18 = vmul.f32 %v9035_v45, %v13275_v5  ;;  %v13279_v45 = vld [vmem:[#allocation148_spill] sm:$0xff] }
0x1c3a   :  { %v6179_v12 = vpop.xlane.xlu1 %6178 }
0x1c3b   :  { %9042 = vrcp.f32 %v6179_v12  ;;  %v5735_v12 = vmul.f32 %v9029_v50, %v13276_v17  ;;  %v13278_v50 = vld [vmem:[#allocation146_spill] sm:$0xff] }
0x1c3c   :  { %9044 = vrcp.f32 %v11968_v3  ;;  %v13282_v17 = vld [vmem:[#allocation162_spill] sm:$0xff] }
0x1c3d   :  { %9046 = vrcp.f32 %v12063_v62  ;;  %v7576_v27 = vpop.f32.mrf.mxu0 }
0x1c3e   :  { %v8305_v44 = vpop.permute.xlu1 %8304  ;;  %9048 = vrcp.f32 %v12159_v43 }
0x1c3f   :  { %v8307_v46 = vunpack.i.h.bf16 %v8305_v44  ;;  %v8306_v20 = vunpack.i.l.bf16 %v8305_v44  ;;  %9050 = vrcp.f32 %v12163_v28  ;;  %v7577_v10 = vpop.f32.mrf.mxu0 }
0x1c40   :  { %9052 = vrcp.f32 %v12169_v23  ;;  %v12341_v23 = vld [vmem:[%s12506_s4] ss:$0 sm:$0xff]  ;;  %v7578_v21 = vadd.f32 %v7577_v10, %v7576_v27  ;;  %s9227_s4 = smov [#allocation10]  }
0x1c41   :  { %v6428_v55 = vsel %vm1662_vm0, %v4314_v42, %v8307_v46  ;;  %v6427_v35 = vsel %vm1662_vm0, %v4313_v26, %v8306_v20  ;;  %9054 = vrcp.f32 %v12186_v59  ;;  %v7579_v4 = vpop.f32.mrf.mxu0  ;;  %v8383_v59 = vpack.i.bf16 %v5738_v18, %v5737_v39  ;;  %v13281_v39 = vld [vmem:[#allocation184_spill] sm:$0xff]  ;;  %s6969_s17 = sshll.u32 %s9227_s4, 4  ;;  %s6970_s17 = int_to_ptr.vmem [resolvable:$true] %s6969_s17 }
0x1c42   :  { %v6475_v56 = vpack.c.bf16 %v6428_v55, %v6427_v35  ;;  %9056 = vrcp.f32 %v12249_v57  ;;  %v8378_v46 = vpack.i.bf16 %v5736_v63, %v5735_v12  ;;  %s9188_s18 = scalar_lea.vmem %s6970_s17, 2048  ;;  %p9193_p7 = scmp.lt.s32.totalorder %s6970_s17, %s6970_s17 }
0x1c43   :  { %9058 = vrcp.f32 %v12254_v1  ;;  %v7580_v20 = vpop.f32.mrf.mxu0  ;;  %p9189_p6 = scmp.ne.s32.totalorder %s6970_s17, %s9188_s18  ;;  %p9194_p8 = scmp.lt.s32.totalorder %s9188_s18, %s9188_s18 }
0x1c44   :  { %v12319_v54 = vpop.xlane.xlu0 %5893  ;;  %6819 = vmatmul.mubr.bf16.gmra.mxu1 %v6475_v56  ;;  %v9039_v40 = vpop.eup %9038  ;;  %9060 = vrcp.f32 %v12259_v53 }
0x1c45   :  { %v9041_v3 = vpop.eup %9040  ;;  %9062 = vrcp.f32 %v12271_v30  ;;  %v13280_v30 = vld [vmem:[#allocation182_spill] sm:$0xff]  ;;  %p9195_p9 = por %p9194_p8, %p9193_p7 }
0x1c47   :  { %p9196_p10 = pnand %p9195_p9, %p9189_p6 }
0x1c48   :  { %v12322_v38 = vpop.xlane.xlu0 %5899  ;;  %v9043_v6 = vpop.eup %9042 }
0x1c49   :  { %v8134_v60 = vpop.f32.mrf.mxu1  ;;  %v9045_v2 = vpop.eup %9044 }
0x1c4a   :  { %v6297_v61 = vmul.f32 %v9037_v16, %v8134_v60  ;;  %v9047_v44 = vpop.eup %9046  ;;  %v3599_v32 = vmul.f32 %v9045_v2, %v13278_v50  ;;  %v7581_v16 = vadd.f32 %v7580_v20, %v7579_v4  ;;  %v13283_v4 = vld [vmem:[#allocation164_spill] sm:$0xff]  ;;  %v13284_v20 = vld [vmem:[#allocation181_spill] sm:$0xff] }
0x1c4b   :  { %v6268_v22 = vpop.f32.mrf.mxu1  ;;  %v9049_v1 = vpop.eup %9048  ;;  %v3600_v27 = vmul.f32 %v9047_v44, %v13279_v45 }
0x1c4c   :  { %v12326_v24 = vpop.xlane.xlu0 %5902  ;;  %v6295_v41 = vmul.f32 %v9041_v3, %v6268_v22  ;;  %v9051_v22 = vpop.eup %9050  ;;  %v4878_v5 = vmul.f32 %v9049_v1, %v13281_v39 }
0x1c4d   :  { %v8135_v51 = vpop.f32.mrf.mxu1  ;;  %v4877_v14 = vmul.f32 %v9051_v22, %v13280_v30 }
0x1c4e   :  { %v6298_v19 = vmul.f32 %v9039_v40, %v8135_v51 }
0x1c4f   :  { %v6271_v62 = vpop.f32.mrf.mxu1 }
0x1c50   :  { %v8368_v43 = vpack.i.bf16 %v6298_v19, %v6297_v61  ;;  %v6296_v49 = vmul.f32 %v9043_v6, %v6271_v62  ;;  %v12332_v29 = vpop.xlane.xlu0 %5333  ;;  %v9053_v6 = vpop.eup %9052 }
0x1c51   :  { %v7512_v28 = vpop.f32.mrf.mxu1  ;;  %v9055_v18 = vpop.eup %9054 }
0x1c52   :  { %v8373_v7 = vpack.i.bf16 %v6296_v49, %v6295_v41  ;;  %8369 = vrot.lane.b32.xlu1 %v8368_v43, %s9224_s0  ;;  %v4317_v12 = vmul.f32 %v9055_v18, %v13282_v17 }
0x1c53   :  { %v7513_v33 = vpop.f32.mrf.mxu1 }
0x1c54   :  { %v7514_v13 = vadd.f32 %v7513_v33, %v7512_v28  ;;  %v12344_v47 = vpop.xlane.xlu0 %5339  ;;  %8374 = vrot.lane.b32.xlu0 %v8373_v7, %s9224_s0  ;;  %v9057_v7 = vpop.eup %9056  ;;  %v4318_v33 = vmul.f32 %v9053_v6, %v13283_v4 }
0x1c55   :  { %v7515_v26 = vpop.f32.mrf.mxu1 }
0x1c56   :  { %v6789_v42 = vadd.f32 %v7514_v13, %v12341_v23  ;;  %8384 = vrot.lane.b32.xlu1 %v8383_v59, %s9224_s0  ;;  %v9059_v13 = vpop.eup %9058 }
0x1c57   :  { %v7516_v55 = vpop.f32.mrf.mxu1 }
0x1c58   :  { %v6886_v57 = vadd.f32 %v7578_v21, %v6789_v42  ;;  %v7517_v35 = vadd.f32 %v7516_v55, %v7515_v26  ;;  %v8310_v56 = vpop.permute.xlu0 %8309  ;;  %8379 = vrot.lane.b32.xlu0 %v8378_v46, %s9224_s0  ;;  %v9061_v21 = vpop.eup %9060  ;;  %v4879_v55 = vmul.f32 %v9059_v13, %v13284_v20 }
0x1c59   :  { %v8312_v60 = vunpack.i.h.bf16 %v8310_v56  ;;  %v8311_v25 = vunpack.i.l.bf16 %v8310_v56  ;;  %v9063_v56 = vpop.eup %9062  ;;  %v7518_v30 = vpop.f32.mrf.mxu1 }
0x1c5a   :  { %6948 = vst [vmem:[#allocation10] sm:$0xff] %v6886_v57  ;;  %v6792_v40 = vadd.f32 %v7517_v35, %v12341_v23  ;;  %v13285_v57 = vld [vmem:[#allocation183_spill] sm:$0xff] }
0x1c5b   :  { %v4057_v53 = vsel %vm1662_vm0, %v3599_v32, %v8311_v25  ;;  %v4058_v51 = vsel %vm1662_vm0, %v3600_v27, %v8312_v60  ;;  %v4880_v35 = vmul.f32 %v9057_v7, %v13285_v57  ;;  %v13286_v25 = vld [vmem:[#allocation161_spill] sm:$0xff] }
0x1c5c   :  { %v6889_v3 = vadd.f32 %v7581_v16, %v6792_v40  ;;  %v8330_v61 = vpop.permute.xlu0 %8329  ;;  %v6474_v19 = vpack.c.bf16 %v4058_v51, %v4057_v53  ;;  %v4319_v45 = vmul.f32 %v9063_v56, %v13286_v25  ;;  %v13287_v16 = vld [vmem:[#allocation163_spill] sm:$0xff] }
0x1c5d   :  { %v8332_v10 = vunpack.i.h.bf16 %v8330_v61  ;;  %v8331_v62 = vunpack.i.l.bf16 %v8330_v61  ;;  %v4320_v40 = vmul.f32 %v9061_v21, %v13287_v16  ;;  %v13288_v53 = vld [vmem:[#allocation107_spill] sm:$0xff] }
0x1c5e   :  { %6949 = vst [vmem:[#allocation10 + $0x8] sm:$0xff] %v6889_v3  ;;  %6907 = vmatprep.mubr.bf16.mxu0 %v6474_v19  ;;  %9064 = vrcp.f32 %v13288_v53  ;;  %v13289_v19 = vld [vmem:[#allocation85_spill] sm:$0xff]  ;;  %v13295_v16 = vld [vmem:[#allocation75_spill] sm:$0xff] }
0x1c5f   :  { %v12361_v41 = vsel %vm1662_vm0, %v4877_v14, %v8331_v62  ;;  %v12364_v43 = vsel %vm1662_vm0, %v4878_v5, %v8332_v10  ;;  %9066 = vrcp.f32 %v12074_v52  ;;  %v13290_v10 = vld [vmem:[#allocation175_spill] sm:$0xff]  ;;  %v7519_v5 = vpop.f32.mrf.mxu1 }
0x1c60   :  { %v8335_v49 = vpop.permute.xlu0 %8334  ;;  %v6484_v28 = vpack.c.bf16 %v12364_v43, %v12361_v41  ;;  %9068 = vrcp.f32 %v13289_v19  ;;  %v13299_v41 = vld [vmem:[#allocation80_spill] sm:$0xff] }
0x1c61   :  { %v8337_v0 = vunpack.i.h.bf16 %v8335_v49  ;;  %v8336_v63 = vunpack.i.l.bf16 %v8335_v49  ;;  %9070 = vrcp.f32 %v12086_v9  ;;  %v13291_v49 = vld [vmem:[#allocation74_spill] sm:$0xff] }
0x1c62   :  { %9072 = vrcp.f32 %v13290_v10 }
0x1c63   :  { %v12371_v59 = vsel %vm1662_vm0, %v4317_v12, %v8336_v63  ;;  %v12374_v2 = vsel %vm1662_vm0, %v4318_v33, %v8337_v0  ;;  %9074 = vrcp.f32 %v12107_v58  ;;  %v13292_v0 = vld [vmem:[#allocation82_spill] sm:$0xff]  ;;  %v7521_v58 = vpop.f32.mrf.mxu1 }
0x1c64   :  { %v6483_v26 = vpack.c.bf16 %v12374_v2, %v12371_v59  ;;  %v8350_v44 = vpop.permute.xlu0 %8349  ;;  %9076 = vrcp.f32 %v12175_v37  ;;  %v13294_v37 = vld [vmem:[#allocation141_spill] sm:$0xff] }
0x1c65   :  { %v8352_v42 = vunpack.i.h.bf16 %v8350_v44  ;;  %v8351_v46 = vunpack.i.l.bf16 %v8350_v44  ;;  %9078 = vrcp.f32 %v12182_v8  ;;  %v13293_v44 = vld [vmem:[#allocation143_spill] sm:$0xff]  ;;  %v7520_v8 = vadd.f32 %v7519_v5, %v7518_v30 }
0x1c66   :  { %9080 = vrcp.f32 %v12178_v31  ;;  %v13296_v31 = vld [vmem:[#allocation83_spill] sm:$0xff] }
0x1c67   :  { %v12381_v50 = vsel %vm1662_vm0, %v4879_v55, %v8351_v46  ;;  %v12384_v32 = vsel %vm1662_vm0, %v4880_v35, %v8352_v42  ;;  %9082 = vrcp.f32 %v12192_v11  ;;  %v6797_v11 = vadd.f32 %v7520_v8, %v12341_v23 }
0x1c68   :  { %v8360_v1 = vpop.permute.xlu0 %8359  ;;  %v6488_v60 = vpack.c.bf16 %v12384_v32, %v12381_v50  ;;  %9084 = vrcp.f32 %v12262_v15 }
0x1c69   :  { %v8362_v27 = vunpack.i.h.bf16 %v8360_v1  ;;  %v8361_v22 = vunpack.i.l.bf16 %v8360_v1  ;;  %v7522_v1 = vpop.f32.mrf.mxu1  ;;  %9086 = vrcp.f32 %v12268_v48 }
0x1c6a   :  { %v7523_v30 = vadd.f32 %v7522_v1, %v7521_v58  ;;  %9088 = vrcp.f32 %v12265_v34 }
0x1c6b   :  { %v12392_v51 = vsel %vm1662_vm0, %v4319_v45, %v8361_v22  ;;  %v12395_v3 = vsel %vm1662_vm0, %v4320_v40, %v8362_v27  ;;  %v9065_v39 = vpop.eup %9064  ;;  %9090 = vrcp.f32 %v12276_v36 }
0x1c6c   :  { %v6487_v61 = vpack.c.bf16 %v12395_v3, %v12392_v51  ;;  %v9067_v52 = vpop.eup %9066  ;;  %v4876_v7 = vmul.f32 %v9065_v39, %v13291_v49  ;;  %v6800_v48 = vadd.f32 %v7523_v30, %v12341_v23  ;;  %v13304_v30 = vld [vmem:[#allocation76_spill] sm:$0xff]  ;;  %9092 = vrcp.f32 %v12319_v54 }
0x1c6d   :  { %v9069_v17 = vpop.eup %9068  ;;  %v4875_v63 = vmul.f32 %v9067_v52, %v13292_v0  ;;  %9094 = vrcp.f32 %v12322_v38 }
0x1c6e   :  { %v9071_v4 = vpop.eup %9070  ;;  %v3040_v21 = vmul.f32 %v9069_v17, %v13293_v44  ;;  %v13297_v44 = vld [vmem:[#allocation66_spill] sm:$0xff]  ;;  %9096 = vrcp.f32 %v12326_v24 }
0x1c6f   :  { %v12401_v6 = vpop.xlane.xlu1 %5896  ;;  %v9073_v20 = vpop.eup %9072  ;;  %v3039_v55 = vmul.f32 %v9071_v4, %v13294_v37  ;;  %v13305_v24 = vld [vmem:[#allocation170_spill] sm:$0xff] }
0x1c70   :  { %v9075_v56 = vpop.eup %9074  ;;  %v4316_v40 = vmul.f32 %v9073_v20, %v13295_v16  ;;  %9098 = vrcp.f32 %v12401_v6  ;;  %v13306_v6 = vld [vmem:[#allocation89_spill] sm:$0xff] }
0x1c71   :  { %v4315_v19 = vmul.f32 %v9075_v56, %v13296_v31  ;;  %9100 = vrcp.f32 %v12344_v47 }
0x1c73   :  { %v12405_v62 = vpop.xlane.xlu1 %5336 }
0x1c77   :  { %v12408_v14 = vpop.xlane.xlu1 %5342 }
0x1c78   :  { %9102 = vrcp.f32 %v12408_v14  ;;  %v13307_v14 = vld [vmem:[#allocation114_spill] sm:$0xff] }
0x1c79   :  { %9104 = vrcp.f32 %v12332_v29  ;;  %v13308_v29 = vld [vmem:[#allocation90_spill] sm:$0xff] }
0x1c7a   :  { %9106 = vrcp.f32 %v12405_v62 }
0x1c7b   :  { %v8315_v18 = vpop.permute.xlu1 %8314 }
0x1c7c   :  { %v8317_v12 = vunpack.i.h.bf16 %v8315_v18  ;;  %v8316_v9 = vunpack.i.l.bf16 %v8315_v18 }
0x1c7e   :  { %v6437_v33 = vsel %vm1662_vm0, %v4875_v63, %v8316_v9  ;;  %v6438_v13 = vsel %vm1662_vm0, %v4876_v7, %v8317_v12  ;;  %v9077_v9 = vpop.eup %9076 }
0x1c7f   :  { %v8320_v42 = vpop.permute.xlu1 %8319  ;;  %v6480_v46 = vpack.c.bf16 %v6438_v13, %v6437_v33  ;;  %v9079_v63 = vpop.eup %9078 }
0x1c80   :  { %v8322_v57 = vunpack.i.h.bf16 %v8320_v42  ;;  %v8321_v35 = vunpack.i.l.bf16 %v8320_v42  ;;  %v9081_v33 = vpop.eup %9080  ;;  %v13298_v42 = vld [vmem:[#allocation62_spill] sm:$0xff] }
0x1c81   :  { %6826 = vmatprep.mubr.bf16.mxu1 %v6480_v46  ;;  %v5994_v36 = vmul.f32 %v9079_v63, %v13298_v42  ;;  %v9083_v46 = vpop.eup %9082 }
0x1c82   :  { %v4050_v25 = vsel %vm1662_vm0, %v3040_v21, %v8322_v57  ;;  %v4049_v45 = vsel %vm1662_vm0, %v3039_v55, %v8321_v35  ;;  %v7582_v27 = vpop.f32.mrf.mxu0  ;;  %v5993_v21 = vmul.f32 %v9077_v9, %v13297_v44  ;;  %v9085_v35 = vpop.eup %9084  ;;  %v5433_v43 = vmul.f32 %v9083_v46, %v13299_v41 }
0x1c83   :  { %v6473_v22 = vpack.c.bf16 %v4050_v25, %v4049_v45  ;;  %v8325_v53 = vpop.permute.xlu1 %8324  ;;  %v9087_v25 = vpop.eup %9086 }
0x1c84   :  { %v8327_v10 = vunpack.i.h.bf16 %v8325_v53  ;;  %v8326_v39 = vunpack.i.l.bf16 %v8325_v53  ;;  %v7583_v52 = vpop.f32.mrf.mxu0 }
0x1c85   :  { %v7584_v5 = vadd.f32 %v7583_v52, %v7582_v27  ;;  %6908 = vmatmul.mubr.bf16.gmra.mxu0 %v6473_v22  ;;  %v13303_v52 = vld [vmem:[#allocation84_spill] sm:$0xff] }
0x1c86   :  { %v6430_v18 = vsel %vm1662_vm0, %v4316_v40, %v8327_v10  ;;  %v6429_v49 = vsel %vm1662_vm0, %v4315_v19, %v8326_v39  ;;  %v7585_v7 = vpop.f32.mrf.mxu0  ;;  %v9089_v40 = vpop.eup %9088  ;;  %v13301_v19 = vld [vmem:[#allocation167_spill] sm:$0xff] }
0x1c87   :  { %v6479_v17 = vpack.c.bf16 %v6430_v18, %v6429_v49  ;;  %v6894_v12 = vadd.f32 %v7584_v5, %v6797_v11  ;;  %v5995_v10 = vmul.f32 %v9085_v35, %v13301_v19  ;;  %v13302_v39 = vld [vmem:[#allocation67_spill] sm:$0xff]  ;;  %v9091_v2 = vpop.eup %9090  ;;  %v5436_v5 = vmul.f32 %v9089_v40, %v13304_v30 }
0x1c88   :  { %v7586_v15 = vpop.f32.mrf.mxu0  ;;  %v5996_v59 = vmul.f32 %v9087_v25, %v13302_v39  ;;  %v5435_v11 = vmul.f32 %v9091_v2, %v13303_v52  ;;  %v9093_v51 = vpop.eup %9092  ;;  %v13312_v25 = vld [vmem:[#allocation203_spill] sm:$0xff] }
0x1c89   :  { %6950 = vst [vmem:[#allocation10 + $0x10] sm:$0xff] %v6894_v12  ;;  %v7587_v0 = vadd.f32 %v7586_v15, %v7585_v7  ;;  %6827 = vmatmul.mubr.bf16.gmra.mxu1 %v6479_v17  ;;  %v9095_v3 = vpop.eup %9094  ;;  %v7524_v39 = vpop.f32.mrf.mxu1 }
0x1c8a   :  { %6834 = vmatprep.mubr.bf16.mxu1 %v6484_v28  ;;  %v13300_v28 = vld [vmem:[#allocation199_spill] sm:$0xff]  ;;  %v5999_v63 = vmul.f32 %v9095_v3, %v13305_v24 }
0x1c8b   :  { %v6897_v4 = vadd.f32 %v7587_v0, %v6800_v48  ;;  %v5434_v56 = vmul.f32 %v9081_v33, %v13300_v28  ;;  %v5997_v33 = vmul.f32 %v9093_v51, %v13307_v14  ;;  %v7525_v2 = vpop.f32.mrf.mxu1 }
0x1c8c   :  { %v8340_v58 = vpop.permute.xlu1 %8339 }
0x1c8d   :  { %6951 = vst [vmem:[#allocation10 + $0x18] sm:$0xff] %v6897_v4  ;;  %v8342_v13 = vunpack.i.h.bf16 %v8340_v58  ;;  %v8341_v34 = vunpack.i.l.bf16 %v8340_v58 }
0x1c8f   :  { %v6451_v20 = vsel %vm1662_vm0, %v5993_v21, %v8341_v34  ;;  %v6452_v37 = vsel %vm1662_vm0, %v5994_v36, %v8342_v13  ;;  %v13309_v36 = vld [vmem:[#allocation200_spill] sm:$0xff] }
0x1c90   :  { %v8345_v55 = vpop.permute.xlu1 %8344  ;;  %v6478_v57 = vpack.c.bf16 %v6452_v37, %v6451_v20  ;;  %v13310_v20 = vld [vmem:[#allocation202_spill] sm:$0xff] }
0x1c91   :  { %v8347_v8 = vunpack.i.h.bf16 %v8345_v55  ;;  %v8346_v1 = vunpack.i.l.bf16 %v8345_v55  ;;  %6835 = vmatmul.mubr.bf16.gmra.mxu1 %v6483_v26 }
0x1c92   :  { %6842 = vmatprep.mubr.bf16.mxu1 %v6488_v60  ;;  %6915 = vmatprep.mubr.bf16.mxu0 %v6478_v57 }
0x1c93   :  { %v6444_v45 = vsel %vm1662_vm0, %v5434_v56, %v8347_v8  ;;  %v6443_v27 = vsel %vm1662_vm0, %v5433_v43, %v8346_v1  ;;  %v13311_v56 = vld [vmem:[#allocation201_spill] sm:$0xff] }
0x1c94   :  { %v6477_v22 = vpack.c.bf16 %v6444_v45, %v6443_v27  ;;  %v8355_v16 = vpop.permute.xlu1 %8354 }
0x1c95   :  { %v8357_v53 = vunpack.i.h.bf16 %v8355_v16  ;;  %v8356_v31 = vunpack.i.l.bf16 %v8355_v16 }
0x1c96   :  { %6916 = vmatmul.mubr.bf16.gmra.mxu0 %v6477_v22 }
0x1c97   :  { %v6453_v26 = vsel %vm1662_vm0, %v5995_v10, %v8356_v31  ;;  %v6454_v50 = vsel %vm1662_vm0, %v5996_v59, %v8357_v53 }
0x1c98   :  { %v8365_v32 = vpop.permute.xlu1 %8364  ;;  %v6482_v60 = vpack.c.bf16 %v6454_v50, %v6453_v26  ;;  %v7527_v26 = vpop.f32.mrf.mxu1  ;;  %v7526_v50 = vadd.f32 %v7525_v2, %v7524_v39 }
0x1c99   :  { %v8367_v18 = vunpack.i.h.bf16 %v8365_v32  ;;  %v8366_v49 = vunpack.i.l.bf16 %v8365_v32  ;;  %6843 = vmatmul.mubr.bf16.gmra.mxu1 %v6487_v61  ;;  %v9097_v61 = vpop.eup %9096 }
0x1c9a   :  { %6923 = vmatprep.mubr.bf16.mxu0 %v6482_v60  ;;  %v9099_v15 = vpop.eup %9098  ;;  %v6000_v4 = vmul.f32 %v9097_v61, %v13306_v6  ;;  %v7528_v32 = vpop.f32.mrf.mxu1 }
0x1c9b   :  { %v6446_v7 = vsel %vm1662_vm0, %v5436_v5, %v8367_v18  ;;  %v6445_v17 = vsel %vm1662_vm0, %v5435_v11, %v8366_v49  ;;  %v9101_v9 = vpop.eup %9100  ;;  %v5998_v13 = vmul.f32 %v9099_v15, %v13308_v29  ;;  %v6805_v11 = vadd.f32 %v7526_v50, %v12341_v23 }
0x1c9c   :  { %v6481_v12 = vpack.c.bf16 %v6446_v7, %v6445_v17  ;;  %v9103_v48 = vpop.eup %9102  ;;  %v5439_v46 = vmul.f32 %v9101_v9, %v13309_v36  ;;  %v7529_v30 = vadd.f32 %v7528_v32, %v7527_v26  ;;  %v7530_v3 = vpop.f32.mrf.mxu1 }
0x1c9d   :  { %v9105_v47 = vpop.eup %9104  ;;  %v5440_v37 = vmul.f32 %v9103_v48, %v13310_v20 }
0x1c9e   :  { %6924 = vmatmul.mubr.bf16.gmra.mxu0 %v6481_v12  ;;  %v9107_v62 = vpop.eup %9106  ;;  %v5437_v8 = vmul.f32 %v9105_v47, %v13311_v56  ;;  %v6808_v17 = vadd.f32 %v7529_v30, %v12341_v23  ;;  %v7531_v61 = vpop.f32.mrf.mxu1 }
0x1c9f   :  { %v5438_v45 = vmul.f32 %v9107_v62, %v13312_v25 }
0x1ca0   :  { %v7533_v15 = vpop.f32.mrf.mxu1 }
0x1ca2   :  { %v7534_v9 = vpop.f32.mrf.mxu1 }
0x1cc4   :  { %v8370_v54 = vpop.permute.xlu1 %8369 }
0x1cc5   :  { %v8372_v38 = vunpack.i.h.bf16 %v8370_v54  ;;  %v8371_v0 = vunpack.i.l.bf16 %v8370_v54  ;;  %v7532_v54 = vadd.f32 %v7531_v61, %v7530_v3 }
0x1cc6   :  { %v8375_v58 = vpop.permute.xlu0 %8374 }
0x1cc7   :  { %v8377_v34 = vunpack.i.h.bf16 %v8375_v58  ;;  %v8376_v44 = vunpack.i.l.bf16 %v8375_v58  ;;  %v6457_v21 = vsel %vm1662_vm0, %v5999_v63, %v8371_v0  ;;  %v6458_v42 = vsel %vm1662_vm0, %v6000_v4, %v8372_v38 }
0x1cc8   :  { %v8385_v55 = vpop.permute.xlu1 %8384  ;;  %v6490_v57 = vpack.c.bf16 %v6458_v42, %v6457_v21  ;;  %v6813_v24 = vadd.f32 %v7532_v54, %v12341_v23  ;;  %v7535_v63 = vadd.f32 %v7534_v9, %v7533_v15 }
0x1cc9   :  { %v8387_v35 = vunpack.i.h.bf16 %v8385_v55  ;;  %v8386_v41 = vunpack.i.l.bf16 %v8385_v55  ;;  %v6455_v43 = vsel %vm1662_vm0, %v5997_v33, %v8376_v44  ;;  %v6456_v28 = vsel %vm1662_vm0, %v5998_v13, %v8377_v34 }
0x1cca   :  { %v8380_v1 = vpop.permute.xlu0 %8379  ;;  %6939 = vmatprep.mubr.bf16.mxu1 %v6490_v57  ;;  %v6486_v27 = vpack.c.bf16 %v6456_v28, %v6455_v43  ;;  %v6816_v33 = vadd.f32 %v7535_v63, %v12341_v23 }
0x1ccb   :  { %v6450_v22 = vsel %vm1662_vm0, %v5440_v37, %v8387_v35  ;;  %v6449_v16 = vsel %vm1662_vm0, %v5439_v46, %v8386_v41  ;;  %v8382_v40 = vunpack.i.h.bf16 %v8380_v1  ;;  %v8381_v53 = vunpack.i.l.bf16 %v8380_v1 }
0x1ccc   :  { %v6489_v31 = vpack.c.bf16 %v6450_v22, %v6449_v16  ;;  %6931 = vmatprep.mubr.bf16.mxu0 %v6486_v27 }
0x1ccd   :  { %v6447_v19 = vsel %vm1662_vm0, %v5437_v8, %v8381_v53  ;;  %v6448_v10 = vsel %vm1662_vm0, %v5438_v45, %v8382_v40 }
0x1cce   :  { %v6485_v59 = vpack.c.bf16 %v6448_v10, %v6447_v19  ;;  %6940 = vmatmul.mubr.bf16.vlgmr.msra.gmra.mxu1 %v6489_v31 }
0x1cd0   :  { %6932 = vmatmul.mubr.bf16.gmra.mxu0 %v6485_v59 }
0x1cda   :  { %v7588_v60 = vpop.f32.mrf.mxu0 }
0x1cdc   :  { %v7589_v52 = vpop.f32.mrf.mxu0 }
0x1cdd   :  { %v7590_v5 = vadd.f32 %v7589_v52, %v7588_v60 }
0x1cde   :  { %v7591_v18 = vpop.f32.mrf.mxu0 }
0x1cdf   :  { %v6902_v49 = vadd.f32 %v7590_v5, %v6805_v11 }
0x1ce0   :  { %v7592_v7 = vpop.f32.mrf.mxu0 }
0x1ce1   :  { %6952 = vst [vmem:[#allocation10 + $0x20] sm:$0xff] %v6902_v49  ;;  %v7593_v12 = vadd.f32 %v7592_v7, %v7591_v18 }
0x1ce3   :  { %v6905_v51 = vadd.f32 %v7593_v12, %v6808_v17 }
0x1ce5   :  { %6953 = vst [vmem:[#allocation10 + $0x28] sm:$0xff] %v6905_v51 }
0x1d04   :  { %v7536_v48 = vpop.f32.mrf.mxu1 }
0x1d06   :  { %v7537_v6 = vpop.f32.mrf.mxu1 }
0x1d07   :  { %v7538_v21 = vadd.f32 %v7537_v6, %v7536_v48 }
0x1d08   :  { %v7539_v29 = vpop.f32.mrf.mxu1 }
0x1d09   :  { %v6821_v20 = vadd.f32 %v7538_v21, %v12341_v23 }
0x1d0a   :  { %v7540_v34 = vpop.f32.mrf.mxu1 }
0x1d0b   :  { %v7541_v37 = vadd.f32 %v7540_v34, %v7539_v29 }
0x1d0d   :  { %v6824_v28 = vadd.f32 %v7541_v37, %v12341_v23 }
0x1d45   :  { %v7594_v38 = vpop.f32.mrf.mxu0 }
0x1d47   :  { %v7595_v0 = vpop.f32.mrf.mxu0 }
0x1d48   :  { %v7596_v4 = vadd.f32 %v7595_v0, %v7594_v38 }
0x1d49   :  { %v7597_v47 = vpop.f32.mrf.mxu0  ;;  %v7542_v44 = vpop.f32.mrf.mxu1 }
0x1d4a   :  { %v6910_v58 = vadd.f32 %v7596_v4, %v6813_v24 }
0x1d4b   :  { %v7598_v14 = vpop.f32.mrf.mxu0  ;;  %v7543_v42 = vpop.f32.mrf.mxu1 }
0x1d4c   :  { %6954 = vst [vmem:[#allocation10 + $0x30] sm:$0xff] %v6910_v58  ;;  %v7599_v13 = vadd.f32 %v7598_v14, %v7597_v47  ;;  %v7544_v56 = vadd.f32 %v7543_v42, %v7542_v44 }
0x1d4d   :  { %v7545_v57 = vpop.f32.mrf.mxu1 }
0x1d4e   :  { %v6913_v62 = vadd.f32 %v7599_v13, %v6816_v33  ;;  %v6829_v22 = vadd.f32 %v7544_v56, %v12341_v23 }
0x1d4f   :  { %v7546_v1 = vpop.f32.mrf.mxu1 }
0x1d50   :  { %6955 = vst [vmem:[#allocation10 + $0x38] sm:$0xff] %v6913_v62  ;;  %v7547_v16 = vadd.f32 %v7546_v1, %v7545_v57 }
0x1d51   :  { %v7548_v2 = vpop.f32.mrf.mxu1 }
0x1d52   :  { %v6832_v10 = vadd.f32 %v7547_v16, %v12341_v23 }
0x1d53   :  { %v7549_v26 = vpop.f32.mrf.mxu1 }
0x1d54   :  { %v7550_v49 = vadd.f32 %v7549_v26, %v7548_v2 }
0x1d55   :  { %v7551_v50 = vpop.f32.mrf.mxu1 }
0x1d56   :  { %v7600_v36 = vpop.f32.mrf.mxu0  ;;  %v6837_v9 = vadd.f32 %v7550_v49, %v12341_v23 }
0x1d57   :  { %v7552_v32 = vpop.f32.mrf.mxu1 }
0x1d58   :  { %v7601_v46 = vpop.f32.mrf.mxu0  ;;  %v7553_v54 = vadd.f32 %v7552_v32, %v7551_v50 }
0x1d59   :  { %v7602_v55 = vadd.f32 %v7601_v46, %v7600_v36  ;;  %v7554_v60 = vpop.f32.mrf.mxu1 }
0x1d5a   :  { %v7603_v35 = vpop.f32.mrf.mxu0  ;;  %v6840_v58 = vadd.f32 %v7553_v54, %v12341_v23 }
0x1d5b   :  { %v6918_v41 = vadd.f32 %v7602_v55, %v6821_v20  ;;  %v7555_v52 = vpop.f32.mrf.mxu1 }
0x1d5c   :  { %v7604_v43 = vpop.f32.mrf.mxu0  ;;  %v7556_v5 = vadd.f32 %v7555_v52, %v7554_v60 }
0x1d5d   :  { %6956 = vst [vmem:[#allocation10 + $0x40] sm:$0xff] %v6918_v41  ;;  %v7605_v8 = vadd.f32 %v7604_v43, %v7603_v35  ;;  %v7557_v11 = vpop.f32.mrf.mxu1 }
0x1d5e   :  { %v7606_v25 = vpop.f32.mrf.mxu0  ;;  %v6845_v12 = vadd.f32 %v7556_v5, %v12341_v23 }
0x1d5f   :  { %v6921_v45 = vadd.f32 %v7605_v8, %v6824_v28  ;;  %v7558_v30 = vpop.f32.mrf.mxu1 }
0x1d60   :  { %v7607_v27 = vpop.f32.mrf.mxu0  ;;  %v7559_v51 = vadd.f32 %v7558_v30, %v7557_v11 }
0x1d61   :  { %6957 = vst [vmem:[#allocation10 + $0x48] sm:$0xff] %v6921_v45  ;;  %v7608_v40 = vadd.f32 %v7607_v27, %v7606_v25 }
0x1d62   :  { %v7609_v53 = vpop.f32.mrf.mxu0  ;;  %v6848_v63 = vadd.f32 %v7559_v51, %v12341_v23 }
0x1d63   :  { %v6926_v31 = vadd.f32 %v7608_v40, %v6829_v22 }
0x1d64   :  { %v7610_v19 = vpop.f32.mrf.mxu0 }
0x1d65   :  { %6958 = vst [vmem:[#allocation10 + $0x50] sm:$0xff] %v6926_v31  ;;  %v7611_v39 = vadd.f32 %v7610_v19, %v7609_v53 }
0x1d67   :  { %v6929_v59 = vadd.f32 %v7611_v39, %v6832_v10 }
0x1d69   :  { %6959 = vst [vmem:[#allocation10 + $0x58] sm:$0xff] %v6929_v59 }
0x1d8e   :  { %v7618_v18 = vpop.f32.mrf.mxu1 }
0x1d90   :  { %v7612_v7 = vpop.f32.mrf.mxu0  ;;  %v7619_v17 = vpop.f32.mrf.mxu1 }
0x1d91   :  { %v7620_v3 = vadd.f32 %v7619_v17, %v7618_v18 }
0x1d92   :  { %v7613_v61 = vpop.f32.mrf.mxu0  ;;  %v7621_v15 = vpop.f32.mrf.mxu1 }
0x1d93   :  { %v6942_v48 = vadd.f32 %v7620_v3, %v6845_v12  ;;  %v7614_v38 = vadd.f32 %v7613_v61, %v7612_v7 }
0x1d94   :  { %v7615_v0 = vpop.f32.mrf.mxu0  ;;  %v7622_v24 = vpop.f32.mrf.mxu1 }
0x1d95   :  { %6962 = vst [vmem:[#allocation10 + $0x70] sm:$0xff] %v6942_v48  ;;  %v6934_v6 = vadd.f32 %v7614_v38, %v6837_v9  ;;  %v7623_v4 = vadd.f32 %v7622_v24, %v7621_v15 }
0x1d96   :  { %v7616_v47 = vpop.f32.mrf.mxu0 }
0x1d97   :  { %6960 = vst [vmem:[#allocation10 + $0x60] sm:$0xff] %v6934_v6  ;;  %v6945_v14 = vadd.f32 %v7623_v4, %v6848_v63  ;;  %v7617_v33 = vadd.f32 %v7616_v47, %v7615_v0 }
0x1d99   :  { %6963 = vst [vmem:[#allocation10 + $0x78] sm:$0xff] %v6945_v14  ;;  %v6937_v29 = vadd.f32 %v7617_v33, %v6840_v58 }
0x1d9b   :  { %6961 = vst [vmem:[#allocation10 + $0x68] sm:$0xff] %v6937_v29 }
0x1d9c   :  { %9199 = shalt.err (!%p9196_p10)
}
0x1d9d   :  { %6975 = dma.vmem_to_hbm [thread:$0]  %s6970_s17, 2048, %s12507_s5, [#allocation4], %s9220_s28, %s9220_s28, %s9221_s29  }
0x1d9e   :  { %9214 = dma.done.wait [#allocation4], 2048  }
0x1d9f   :  { %9215 = vsyncadd [#allocation4], 4294965248 }
0x1da0   :  { %6979 = vsyncpa [#allocation3], 1 }
0x1da1   :  { %6980 = vsyncpa [#allocation6], 1 }
0x1da2   :  { %6981 = vsyncpa [#allocation9], 1 }
0x1da3   :  { %6982 = vsyncpa [#allocation4], 1 }

</bundles_post_ra>
